<compile_context>
chip_gen: v5e
topology: v5e:2x2
jax: 0.10.0
libtpu: 0.0.40
codegen_flags: <defaults>
</compile_context>

<pallas_src>
import numpy as np
import jax
import jax.numpy as jnp
from jax.experimental import pallas as pl
from jax.experimental.pallas import tpu as pltpu

LOG2PI = float(np.log(2.0 * np.pi))
BN_EPS = 1e-5

# Feed bf16 operands to the MXU (f32 accumulation).  Weights are then stored
# as bf16 in params (halved HBM DMA, no in-kernel cast pass).  Default False to
# keep the exact f32 numerics of the PyTorch reference.
USE_BF16_MATMUL = False
BATCH_PAD = 16 if USE_BF16_MATMUL else 8     # pad batch (M) to the sublane tile


# ----------------------------- in-kernel helpers -----------------------------

def _mm(a, w_ref):
    """Matmul with f32 accumulation; casts the (small) activation if the weight
    was pre-stored in bf16 — never casts the weight in-kernel."""
    w = w_ref[...]
    if w.dtype != a.dtype:
        a = a.astype(w.dtype)
    return jnp.dot(a, w, preferred_element_type=jnp.float32)


def _bn_relu2(h, mask2, n_inv_top, n_inv_bot, g_ref, be_ref, bp):
    """Masked training-mode BatchNorm1d (biased var) + ReLU on a 2-branch stack.

    h:      [2*bp, F]  rows 0..bp = labelled branch, bp..2bp = unlabelled branch
    mask2:  [2*bp, 1]  0/1 rows defining each branch's batch statistics
    Each half is normalized with its OWN masked statistics (matching the
    PyTorch reference, which runs BN separately per branch)."""
    def half(hh, mm, n_inv):
        mean = jnp.sum(hh * mm, axis=0, keepdims=True) * n_inv
        d = hh - mean
        var = jnp.sum(d * d * mm, axis=0, keepdims=True) * n_inv
        return d * jax.lax.rsqrt(var + BN_EPS)

    xhat = jnp.concatenate(
        [half(h[:bp], mask2[:bp], n_inv_top),
         half(h[bp:], mask2[bp:], n_inv_bot)], axis=0)
    return jnp.maximum(xhat * g_ref[...] + be_ref[...], 0.0)


def _gauss_lp_sum(v, mu, logsig):
    """sum_features log N(v; mu, exp(logsig)) -> [rows, 1]."""
    zz = (v - mu) * jnp.exp(-logsig)
    return jnp.sum(-logsig - 0.5 * LOG2PI - 0.5 * zz * zz, axis=-1, keepdims=True)


# ------------------------------- fused kernel --------------------------------

def _m2_forward_kernel(
    # data
    x_ref, y_ref, eps_y_ref, eps_l_ref, eps_u_ref, labm_ref, unlm_ref,
    py_mu_ref, py_ls_ref,
    # regressor weights
    rw1, rb1, rg1, rbe1, rw2, rb2, rg2, rbe2, rw3, rb3,
    # encoder weights (layer1 split x/y rows, fused mu|log_sigma head)
    ew1x, ew1y, eb1, eg1, ebe1, ew2, eb2, eg2, ebe2, ew3, eb3,
    # decoder weights (layer1 split z/y rows, fused mu|log_sigma head)
    dw1z, dw1y, db1, dg1, dbe1, dw2, db2, dg2, dbe2, dw3, db3,
    # outputs: (1,1) scalars
    lsum_ref, lusum_ref, hsum_ref, logqsum_ref):

    bp = x_ref.shape[0]
    K = py_mu_ref.shape[1]

    lab = labm_ref[...]                                   # [bp,1]
    unl = unlm_ref[...]                                   # [bp,1]
    n_inv_l = 1.0 / jnp.maximum(jnp.sum(lab, axis=0, keepdims=True), 1.0)
    n_inv_u = 1.0 / jnp.maximum(jnp.sum(unl, axis=0, keepdims=True), 1.0)
    mask2 = jnp.concatenate([lab, unl], axis=0)           # [2bp,1] labelled first

    x1 = x_ref[...]                                       # [bp, D]
    x2 = jnp.concatenate([x1, x1], axis=0)                # [2bp, D]

    # ------------- regressor: dual BN branches batched along M --------------
    h1 = _mm(x1, rw1) + rb1[...]                          # shared layer-1 matmul
    h = jnp.concatenate([h1, h1], axis=0)                 # [2bp, 1024]
    h = _bn_relu2(h, mask2, n_inv_l, n_inv_u, rg1, rbe1, bp)
    h = _mm(h, rw2) + rb2[...]                            # 4 MiB weight pushed once
    h = _bn_relu2(h, mask2, n_inv_l, n_inv_u, rg2, rbe2, bp)
    r3 = _mm(h, rw3) + rb3[...]                           # [2bp, 2K] fused head
    r_mu, r_ls = r3[:, :K], r3[:, K:]
    mu_l, mu_u = r_mu[:bp], r_mu[bp:]
    ls_l, ls_u = r_ls[:bp], r_ls[bp:]

    # labelled branch: classification log q(y|x) summed over labelled rows
    logq = _gauss_lp_sum(y_ref[...], mu_l, ls_l)          # [bp,1]
    logqsum_ref[...] = jnp.sum(logq * lab, axis=0, keepdims=True)

    # unlabelled branch: sample y_hat and entropy of q(y|x) summed over rows
    y_hat = mu_u + jnp.exp(ls_u) * eps_y_ref[...]         # [bp, K]
    ent = jnp.sum(0.5 + 0.5 * LOG2PI + ls_u, axis=-1, keepdims=True)
    hsum_ref[...] = jnp.sum(ent * unl, axis=0, keepdims=True)

    # ------------- VAE labelled loss, both branches stacked -----------------
    y2 = jnp.concatenate([y_ref[...], y_hat], axis=0)     # true y | sampled y_hat
    eps2 = jnp.concatenate([eps_l_ref[...], eps_u_ref[...]], axis=0)

    # encoder
    h = _mm(x2, ew1x) + _mm(y2, ew1y) + eb1[...]
    h = _bn_relu2(h, mask2, n_inv_l, n_inv_u, eg1, ebe1, bp)
    h = _mm(h, ew2) + eb2[...]
    h = _bn_relu2(h, mask2, n_inv_l, n_inv_u, eg2, ebe2, bp)
    e3 = _mm(h, ew3) + eb3[...]                           # [2bp, 2*latent]
    L = e3.shape[1] // 2
    mu_e, ls_e = e3[:, :L], e3[:, L:]

    # reparameterized sample z = mu + exp(log_sigma) * eps
    z = mu_e + jnp.exp(ls_e) * eps2

    # decoder
    h = _mm(z, dw1z) + _mm(y2, dw1y) + db1[...]
    h = _bn_relu2(h, mask2, n_inv_l, n_inv_u, dg1, dbe1, bp)
    h = _mm(h, dw2) + db2[...]
    h = _bn_relu2(h, mask2, n_inv_l, n_inv_u, dg2, dbe2, bp)
    d3 = _mm(h, dw3) + db3[...]                           # [2bp, 2*D]
    D = d3.shape[1] // 2
    mu_d, ls_d = d3[:, :D], d3[:, D:]

    # fused diagonal-Gaussian log-prob reductions
    lp_x = _gauss_lp_sum(x2, mu_d, ls_d)                  # log p(x|y,z)
    lp_y = _gauss_lp_sum(y2, py_mu_ref[...], py_ls_ref[...])   # log p(y)
    lp_z = jnp.sum(-0.5 * LOG2PI - 0.5 * z * z, axis=-1, keepdims=True)  # log p(z)
    lq_z = _gauss_lp_sum(z, mu_e, ls_e)                   # log q(z|x,y)
    Lrows = -(lp_x + lp_y + lp_z - lq_z)                  # [2bp, 1]

    lsum_ref[...] = jnp.sum(Lrows[:bp] * lab, axis=0, keepdims=True)
    lusum_ref[...] = jnp.sum(Lrows[bp:] * unl, axis=0, keepdims=True)


# --------------------------------- M2 model -----------------------------------

def _init_linear_full(key, fan_in, fan_out):
    k1, k2 = jax.random.split(key)
    bound = 1.0 / np.sqrt(fan_in)
    w = jax.random.uniform(k1, (fan_in, fan_out), jnp.float32, -bound, bound)
    b = jax.random.uniform(k2, (1, fan_out), jnp.float32, -bound, bound)
    return w, b


def _bn_params(n):
    return jnp.ones((1, n), jnp.float32), jnp.zeros((1, n), jnp.float32)


def init_m2_params(key, latent_dim, input_dim, n_isoform):
    ks = jax.random.split(key, 9)

    ew1, eb1 = _init_linear_full(ks[0], input_dim + n_isoform, 256)
    ew2, eb2 = _init_linear_full(ks[1], 256, 128)
    ew3, eb3 = _init_linear_full(ks[2], 128, 2 * latent_dim)
    eg1, ebe1 = _bn_params(256)
    eg2, ebe2 = _bn_params(128)
    enc = dict(w1x=ew1[:input_dim], w1y=ew1[input_dim:], b1=eb1, g1=eg1, be1=ebe1,
               w2=ew2, b2=eb2, g2=eg2, be2=ebe2, w3=ew3, b3=eb3)

    dw1, db1 = _init_linear_full(ks[3], latent_dim + n_isoform, 128)
    dw2, db2 = _init_linear_full(ks[4], 128, 256)
    dw3, db3 = _init_linear_full(ks[5], 256, 2 * input_dim)
    dg1, dbe1 = _bn_params(128)
    dg2, dbe2 = _bn_params(256)
    dec = dict(w1z=dw1[:latent_dim], w1y=dw1[latent_dim:], b1=db1, g1=dg1, be1=dbe1,
               w2=dw2, b2=db2, g2=dg2, be2=dbe2, w3=dw3, b3=db3)

    rw1, rb1 = _init_linear_full(ks[6], input_dim, 1024)
    rw2, rb2 = _init_linear_full(ks[7], 1024, 1024)
    rw3, rb3 = _init_linear_full(ks[8], 1024, 2 * n_isoform)
    rg1, rbe1 = _bn_params(1024)
    rg2, rbe2 = _bn_params(1024)
    reg = dict(w1=rw1, b1=rb1, g1=rg1, be1=rbe1,
               w2=rw2, b2=rb2, g2=rg2, be2=rbe2, w3=rw3, b3=rb3)

    params = {"encoder": enc, "decoder": dec, "regressor": reg}
    if USE_BF16_MATMUL:
        # Pre-cast matmul weights to bf16 in HBM (halves DMA, removes in-kernel
        # cast pass); biases / BN affine params stay f32.
        for grp in params.values():
            for name in list(grp):
                if name.startswith("w"):
                    grp[name] = grp[name].astype(jnp.bfloat16)
    return params


@jax.jit
def m2_forward(params, x, y, py_mean, py_log_std, alpha, key):
    B, _ = x.shape
    n_iso = y.shape[1]
    latent = params["encoder"]["w3"].shape[1] // 2

    # Pad batch (M) to the sublane tile; padded rows are excluded from BN
    # statistics and from every loss reduction by the 0/1 masks.
    bp = ((B + BATCH_PAD - 1) // BATCH_PAD) * BATCH_PAD
    pad = bp - B
    x_p = jnp.pad(x.astype(jnp.float32), ((0, pad), (0, 0)))
    y_p = jnp.pad(y.astype(jnp.float32), ((0, pad), (0, 0)))

    valid = jnp.arange(bp) < B
    unlab = jnp.logical_and(jnp.sum(y_p, axis=1) == 0, valid)   # unlabelled rows
    lab = jnp.logical_and(jnp.logical_not(unlab), valid)        # labelled rows
    lab_mask = lab.astype(jnp.float32)[:, None]                 # [bp,1]
    unlab_mask = unlab.astype(jnp.float32)[:, None]
    n_lab = jnp.sum(lab_mask)
    n_unlab = jnp.sum(unlab_mask)

    py_mu = py_mean.reshape(1, n_iso).astype(jnp.float32)
    py_ls = py_log_std.reshape(1, n_iso).astype(jnp.float32)

    k_y, k_lz, k_uz = jax.random.split(key, 3)
    eps_y = jax.random.normal(k_y, (bp, n_iso), jnp.float32)
    eps_l = jax.random.normal(k_lz, (bp, latent), jnp.float32)
    eps_u = jax.random.normal(k_uz, (bp, latent), jnp.float32)

    enc, dec, reg = params["encoder"], params["decoder"], params["regressor"]

    l_sum, lu_sum, h_sum, logq_sum = pl.pallas_call(
        _m2_forward_kernel,
        out_shape=(jax.ShapeDtypeStruct((1, 1), jnp.float32),
                   jax.ShapeDtypeStruct((1, 1), jnp.float32),
                   jax.ShapeDtypeStruct((1, 1), jnp.float32),
                   jax.ShapeDtypeStruct((1, 1), jnp.float32)),
        compiler_params=pltpu.CompilerParams(vmem_limit_bytes=32 * 1024 * 1024),
    )(x_p, y_p, eps_y, eps_l, eps_u, lab_mask, unlab_mask, py_mu, py_ls,
      reg["w1"], reg["b1"], reg["g1"], reg["be1"],
      reg["w2"], reg["b2"], reg["g2"], reg["be2"], reg["w3"], reg["b3"],
      enc["w1x"], enc["w1y"], enc["b1"], enc["g1"], enc["be1"],
      enc["w2"], enc["b2"], enc["g2"], enc["be2"], enc["w3"], enc["b3"],
      dec["w1z"], dec["w1y"], dec["b1"], dec["g1"], dec["be1"],
      dec["w2"], dec["b2"], dec["g2"], dec["be2"], dec["w3"], dec["b3"])

    l_sum = l_sum[0, 0]
    lu_sum = lu_sum[0, 0]
    h_sum = h_sum[0, 0]
    logq_sum = logq_sum[0, 0]

    # Labelled ELBO term L (only if > 1 labelled row, as in the reference).
    l_term = jnp.where(n_lab > 1, l_sum, 0.0)
    # Unlabelled term U = -(-L(x, y_hat) + H) = L - H, summed over unlabelled rows.
    u_term = jnp.where(n_unlab > 1, lu_sum - h_sum, 0.0)
    J = l_term + u_term

    # Classification term: mean over labelled rows of -log q(y|x).
    clf = jnp.where(n_lab > 1, -logq_sum / jnp.maximum(n_lab, 1.0), 0.0)
    return J + alpha * clf


# ----------------------------------- driver -----------------------------------

if __name__ == "__main__":
    latent_dim, input_dim, n_isoform = 8, 32, 4
    batch = 8
    alpha = 0.1

    key = jax.random.PRNGKey(0)
    k_par, k_x, k_y, k_fwd = jax.random.split(key, 4)

    params = init_m2_params(k_par, latent_dim, input_dim, n_isoform)

    x = jax.random.normal(k_x, (batch, input_dim), jnp.float32)
    # first half unlabelled (all-zero y), second half labelled (nonzero y)
    y_lab_part = jnp.abs(jax.random.normal(k_y, (batch // 2, n_isoform))) + 0.1
    y = jnp.concatenate(
        [jnp.zeros((batch - batch // 2, n_isoform), jnp.float32), y_lab_part], axis=0)

    # stand-in for py_data['Mean'] / py_data['Standard_Deviation']
    py_mean = jnp.linspace(0.0, 1.0, n_isoform).astype(jnp.float32)
    py_std = jnp.linspace(0.5, 1.5, n_isoform).astype(jnp.float32)
    py_log_std = jnp.log(py_std)

    out = m2_forward(params, x, y, py_mean, py_log_std, alpha, k_fwd)
    out = jax.block_until_ready(out)
    assert out.shape == () and bool(jnp.isfinite(out))
    print("KERNEL_OK")
</pallas_src>

<mosaic_0001>
module attributes {stable_mosaic.version = 11 : i64} {
  func.func @_m2_forward_kernel(%arg0: memref<8x32xf32, #tpu.memory_space<vmem>>, %arg1: memref<8x4xf32, #tpu.memory_space<vmem>>, %arg2: memref<8x4xf32, #tpu.memory_space<vmem>>, %arg3: memref<8x8xf32, #tpu.memory_space<vmem>>, %arg4: memref<8x8xf32, #tpu.memory_space<vmem>>, %arg5: memref<8x1xf32, #tpu.memory_space<vmem>>, %arg6: memref<8x1xf32, #tpu.memory_space<vmem>>, %arg7: memref<1x4xf32, #tpu.memory_space<vmem>>, %arg8: memref<1x4xf32, #tpu.memory_space<vmem>>, %arg9: memref<32x1024xf32, #tpu.memory_space<vmem>>, %arg10: memref<1x1024xf32, #tpu.memory_space<vmem>>, %arg11: memref<1x1024xf32, #tpu.memory_space<vmem>>, %arg12: memref<1x1024xf32, #tpu.memory_space<vmem>>, %arg13: memref<1024x1024xf32, #tpu.memory_space<vmem>>, %arg14: memref<1x1024xf32, #tpu.memory_space<vmem>>, %arg15: memref<1x1024xf32, #tpu.memory_space<vmem>>, %arg16: memref<1x1024xf32, #tpu.memory_space<vmem>>, %arg17: memref<1024x8xf32, #tpu.memory_space<vmem>>, %arg18: memref<1x8xf32, #tpu.memory_space<vmem>>, %arg19: memref<32x256xf32, #tpu.memory_space<vmem>>, %arg20: memref<4x256xf32, #tpu.memory_space<vmem>>, %arg21: memref<1x256xf32, #tpu.memory_space<vmem>>, %arg22: memref<1x256xf32, #tpu.memory_space<vmem>>, %arg23: memref<1x256xf32, #tpu.memory_space<vmem>>, %arg24: memref<256x128xf32, #tpu.memory_space<vmem>>, %arg25: memref<1x128xf32, #tpu.memory_space<vmem>>, %arg26: memref<1x128xf32, #tpu.memory_space<vmem>>, %arg27: memref<1x128xf32, #tpu.memory_space<vmem>>, %arg28: memref<128x16xf32, #tpu.memory_space<vmem>>, %arg29: memref<1x16xf32, #tpu.memory_space<vmem>>, %arg30: memref<8x128xf32, #tpu.memory_space<vmem>>, %arg31: memref<4x128xf32, #tpu.memory_space<vmem>>, %arg32: memref<1x128xf32, #tpu.memory_space<vmem>>, %arg33: memref<1x128xf32, #tpu.memory_space<vmem>>, %arg34: memref<1x128xf32, #tpu.memory_space<vmem>>, %arg35: memref<128x256xf32, #tpu.memory_space<vmem>>, %arg36: memref<1x256xf32, #tpu.memory_space<vmem>>, %arg37: memref<1x256xf32, #tpu.memory_space<vmem>>, %arg38: memref<1x256xf32, #tpu.memory_space<vmem>>, %arg39: memref<256x64xf32, #tpu.memory_space<vmem>>, %arg40: memref<1x64xf32, #tpu.memory_space<vmem>>, %arg41: memref<1x1xf32, #tpu.memory_space<vmem>>, %arg42: memref<1x1xf32, #tpu.memory_space<vmem>>, %arg43: memref<1x1xf32, #tpu.memory_space<vmem>>, %arg44: memref<1x1xf32, #tpu.memory_space<vmem>>) attributes {dimension_semantics = [], scalar_prefetch = 0 : i64, scratch_operands = 0 : i64, tpu.core_type = #tpu.core_type<tc>} {
    %c0 = arith.constant 0 : index
    %c0_0 = arith.constant 0 : index
    %0 = vector.load %arg5[%c0, %c0_0] : memref<8x1xf32, #tpu.memory_space<vmem>>, vector<8x1xf32>
    %c0_1 = arith.constant 0 : index
    %c0_2 = arith.constant 0 : index
    %1 = vector.load %arg6[%c0_1, %c0_2] : memref<8x1xf32, #tpu.memory_space<vmem>>, vector<8x1xf32>
    %cst = arith.constant dense<0.000000e+00> : vector<1xf32>
    %2 = vector.multi_reduction <add>, %0, %cst [0] : vector<8x1xf32> to vector<1xf32>
    %3 = vector.shape_cast %2 : vector<1xf32> to vector<1x1xf32>
    %cst_3 = arith.constant 1.000000e+00 : f32
    %4 = vector.broadcast %cst_3 : f32 to vector<1x1xf32>
    %5 = arith.maximumf %3, %4 : vector<1x1xf32>
    %cst_4 = arith.constant 1.000000e+00 : f32
    %6 = vector.broadcast %cst_4 : f32 to vector<1x1xf32>
    %7 = arith.divf %6, %5 : vector<1x1xf32>
    %cst_5 = arith.constant dense<0.000000e+00> : vector<1xf32>
    %8 = vector.multi_reduction <add>, %1, %cst_5 [0] : vector<8x1xf32> to vector<1xf32>
    %9 = vector.shape_cast %8 : vector<1xf32> to vector<1x1xf32>
    %cst_6 = arith.constant 1.000000e+00 : f32
    %10 = vector.broadcast %cst_6 : f32 to vector<1x1xf32>
    %11 = arith.maximumf %9, %10 : vector<1x1xf32>
    %cst_7 = arith.constant 1.000000e+00 : f32
    %12 = vector.broadcast %cst_7 : f32 to vector<1x1xf32>
    %13 = arith.divf %12, %11 : vector<1x1xf32>
    %14 = tpu.concatenate %0, %1 in 0 : vector<8x1xf32>, vector<8x1xf32> -> vector<16x1xf32>
    %c0_8 = arith.constant 0 : index
    %c0_9 = arith.constant 0 : index
    %15 = vector.load %arg0[%c0_8, %c0_9] : memref<8x32xf32, #tpu.memory_space<vmem>>, vector<8x32xf32>
    %16 = tpu.concatenate %15, %15 in 0 : vector<8x32xf32>, vector<8x32xf32> -> vector<16x32xf32>
    %c0_10 = arith.constant 0 : index
    %c0_11 = arith.constant 0 : index
    %17 = vector.load %arg9[%c0_10, %c0_11] : memref<32x1024xf32, #tpu.memory_space<vmem>>, vector<32x1024xf32>
    %cst_12 = arith.constant dense<0.000000e+00> : vector<8x1024xf32>
    %18 = tpu.matmul %15, %17, %cst_12 {dimension_numbers = #tpu.dot_dimension_numbers<[1], [0], [0], [1], [0, 0, 1, 1], [], []>} : vector<8x32xf32>, vector<32x1024xf32>, vector<8x1024xf32> -> vector<8x1024xf32>
    %c0_13 = arith.constant 0 : index
    %c0_14 = arith.constant 0 : index
    %19 = vector.load %arg10[%c0_13, %c0_14] : memref<1x1024xf32, #tpu.memory_space<vmem>>, vector<1x1024xf32>
    %20 = vector.broadcast %19 : vector<1x1024xf32> to vector<8x1024xf32>
    %21 = arith.addf %18, %20 : vector<8x1024xf32>
    %22 = tpu.concatenate %21, %21 in 0 : vector<8x1024xf32>, vector<8x1024xf32> -> vector<16x1024xf32>
    %23 = vector.extract_strided_slice %22 {offsets = [0, 0], sizes = [8, 1024], strides = [1, 1]} : vector<16x1024xf32> to vector<8x1024xf32>
    %24 = vector.extract_strided_slice %14 {offsets = [0, 0], sizes = [8, 1], strides = [1, 1]} : vector<16x1xf32> to vector<8x1xf32>
    %25 = vector.broadcast %24 : vector<8x1xf32> to vector<8x1024xf32>
    %26 = arith.mulf %23, %25 : vector<8x1024xf32>
    %cst_15 = arith.constant dense<0.000000e+00> : vector<1024xf32>
    %27 = vector.multi_reduction <add>, %26, %cst_15 [0] : vector<8x1024xf32> to vector<1024xf32>
    %28 = vector.shape_cast %27 : vector<1024xf32> to vector<1x1024xf32>
    %29 = vector.broadcast %7 : vector<1x1xf32> to vector<1x1024xf32>
    %30 = arith.mulf %28, %29 : vector<1x1024xf32>
    %31 = vector.broadcast %30 : vector<1x1024xf32> to vector<8x1024xf32>
    %32 = arith.subf %23, %31 : vector<8x1024xf32>
    %33 = arith.mulf %32, %32 : vector<8x1024xf32>
    %34 = vector.broadcast %24 : vector<8x1xf32> to vector<8x1024xf32>
    %35 = arith.mulf %33, %34 : vector<8x1024xf32>
    %cst_16 = arith.constant dense<0.000000e+00> : vector<1024xf32>
    %36 = vector.multi_reduction <add>, %35, %cst_16 [0] : vector<8x1024xf32> to vector<1024xf32>
    %37 = vector.shape_cast %36 : vector<1024xf32> to vector<1x1024xf32>
    %38 = vector.broadcast %7 : vector<1x1xf32> to vector<1x1024xf32>
    %39 = arith.mulf %37, %38 : vector<1x1024xf32>
    %cst_17 = arith.constant 9.99999974E-6 : f32
    %40 = vector.broadcast %cst_17 : f32 to vector<1x1024xf32>
    %41 = arith.addf %39, %40 : vector<1x1024xf32>
    %42 = math.rsqrt %41 : vector<1x1024xf32>
    %43 = vector.broadcast %42 : vector<1x1024xf32> to vector<8x1024xf32>
    %44 = arith.mulf %32, %43 : vector<8x1024xf32>
    %45 = vector.extract_strided_slice %22 {offsets = [8, 0], sizes = [8, 1024], strides = [1, 1]} : vector<16x1024xf32> to vector<8x1024xf32>
    %46 = vector.extract_strided_slice %14 {offsets = [8, 0], sizes = [8, 1], strides = [1, 1]} : vector<16x1xf32> to vector<8x1xf32>
    %47 = vector.broadcast %46 : vector<8x1xf32> to vector<8x1024xf32>
    %48 = arith.mulf %45, %47 : vector<8x1024xf32>
    %cst_18 = arith.constant dense<0.000000e+00> : vector<1024xf32>
    %49 = vector.multi_reduction <add>, %48, %cst_18 [0] : vector<8x1024xf32> to vector<1024xf32>
    %50 = vector.shape_cast %49 : vector<1024xf32> to vector<1x1024xf32>
    %51 = vector.broadcast %13 : vector<1x1xf32> to vector<1x1024xf32>
    %52 = arith.mulf %50, %51 : vector<1x1024xf32>
    %53 = vector.broadcast %52 : vector<1x1024xf32> to vector<8x1024xf32>
    %54 = arith.subf %45, %53 : vector<8x1024xf32>
    %55 = arith.mulf %54, %54 : vector<8x1024xf32>
    %56 = vector.broadcast %46 : vector<8x1xf32> to vector<8x1024xf32>
    %57 = arith.mulf %55, %56 : vector<8x1024xf32>
    %cst_19 = arith.constant dense<0.000000e+00> : vector<1024xf32>
    %58 = vector.multi_reduction <add>, %57, %cst_19 [0] : vector<8x1024xf32> to vector<1024xf32>
    %59 = vector.shape_cast %58 : vector<1024xf32> to vector<1x1024xf32>
    %60 = vector.broadcast %13 : vector<1x1xf32> to vector<1x1024xf32>
    %61 = arith.mulf %59, %60 : vector<1x1024xf32>
    %cst_20 = arith.constant 9.99999974E-6 : f32
    %62 = vector.broadcast %cst_20 : f32 to vector<1x1024xf32>
    %63 = arith.addf %61, %62 : vector<1x1024xf32>
    %64 = math.rsqrt %63 : vector<1x1024xf32>
    %65 = vector.broadcast %64 : vector<1x1024xf32> to vector<8x1024xf32>
    %66 = arith.mulf %54, %65 : vector<8x1024xf32>
    %67 = tpu.concatenate %44, %66 in 0 : vector<8x1024xf32>, vector<8x1024xf32> -> vector<16x1024xf32>
    %c0_21 = arith.constant 0 : index
    %c0_22 = arith.constant 0 : index
    %68 = vector.load %arg11[%c0_21, %c0_22] : memref<1x1024xf32, #tpu.memory_space<vmem>>, vector<1x1024xf32>
    %69 = vector.broadcast %68 : vector<1x1024xf32> to vector<16x1024xf32>
    %70 = arith.mulf %67, %69 : vector<16x1024xf32>
    %c0_23 = arith.constant 0 : index
    %c0_24 = arith.constant 0 : index
    %71 = vector.load %arg12[%c0_23, %c0_24] : memref<1x1024xf32, #tpu.memory_space<vmem>>, vector<1x1024xf32>
    %72 = vector.broadcast %71 : vector<1x1024xf32> to vector<16x1024xf32>
    %73 = arith.addf %70, %72 : vector<16x1024xf32>
    %cst_25 = arith.constant 0.000000e+00 : f32
    %74 = vector.broadcast %cst_25 : f32 to vector<16x1024xf32>
    %75 = arith.maximumf %73, %74 : vector<16x1024xf32>
    %c0_26 = arith.constant 0 : index
    %c0_27 = arith.constant 0 : index
    %76 = vector.load %arg13[%c0_26, %c0_27] : memref<1024x1024xf32, #tpu.memory_space<vmem>>, vector<1024x1024xf32>
    %cst_28 = arith.constant dense<0.000000e+00> : vector<16x1024xf32>
    %77 = tpu.matmul %75, %76, %cst_28 {dimension_numbers = #tpu.dot_dimension_numbers<[1], [0], [0], [1], [0, 0, 1, 1], [], []>} : vector<16x1024xf32>, vector<1024x1024xf32>, vector<16x1024xf32> -> vector<16x1024xf32>
    %c0_29 = arith.constant 0 : index
    %c0_30 = arith.constant 0 : index
    %78 = vector.load %arg14[%c0_29, %c0_30] : memref<1x1024xf32, #tpu.memory_space<vmem>>, vector<1x1024xf32>
    %79 = vector.broadcast %78 : vector<1x1024xf32> to vector<16x1024xf32>
    %80 = arith.addf %77, %79 : vector<16x1024xf32>
    %81 = vector.extract_strided_slice %80 {offsets = [0, 0], sizes = [8, 1024], strides = [1, 1]} : vector<16x1024xf32> to vector<8x1024xf32>
    %82 = vector.extract_strided_slice %14 {offsets = [0, 0], sizes = [8, 1], strides = [1, 1]} : vector<16x1xf32> to vector<8x1xf32>
    %83 = vector.broadcast %82 : vector<8x1xf32> to vector<8x1024xf32>
    %84 = arith.mulf %81, %83 : vector<8x1024xf32>
    %cst_31 = arith.constant dense<0.000000e+00> : vector<1024xf32>
    %85 = vector.multi_reduction <add>, %84, %cst_31 [0] : vector<8x1024xf32> to vector<1024xf32>
    %86 = vector.shape_cast %85 : vector<1024xf32> to vector<1x1024xf32>
    %87 = vector.broadcast %7 : vector<1x1xf32> to vector<1x1024xf32>
    %88 = arith.mulf %86, %87 : vector<1x1024xf32>
    %89 = vector.broadcast %88 : vector<1x1024xf32> to vector<8x1024xf32>
    %90 = arith.subf %81, %89 : vector<8x1024xf32>
    %91 = arith.mulf %90, %90 : vector<8x1024xf32>
    %92 = vector.broadcast %82 : vector<8x1xf32> to vector<8x1024xf32>
    %93 = arith.mulf %91, %92 : vector<8x1024xf32>
    %cst_32 = arith.constant dense<0.000000e+00> : vector<1024xf32>
    %94 = vector.multi_reduction <add>, %93, %cst_32 [0] : vector<8x1024xf32> to vector<1024xf32>
    %95 = vector.shape_cast %94 : vector<1024xf32> to vector<1x1024xf32>
    %96 = vector.broadcast %7 : vector<1x1xf32> to vector<1x1024xf32>
    %97 = arith.mulf %95, %96 : vector<1x1024xf32>
    %cst_33 = arith.constant 9.99999974E-6 : f32
    %98 = vector.broadcast %cst_33 : f32 to vector<1x1024xf32>
    %99 = arith.addf %97, %98 : vector<1x1024xf32>
    %100 = math.rsqrt %99 : vector<1x1024xf32>
    %101 = vector.broadcast %100 : vector<1x1024xf32> to vector<8x1024xf32>
    %102 = arith.mulf %90, %101 : vector<8x1024xf32>
    %103 = vector.extract_strided_slice %80 {offsets = [8, 0], sizes = [8, 1024], strides = [1, 1]} : vector<16x1024xf32> to vector<8x1024xf32>
    %104 = vector.extract_strided_slice %14 {offsets = [8, 0], sizes = [8, 1], strides = [1, 1]} : vector<16x1xf32> to vector<8x1xf32>
    %105 = vector.broadcast %104 : vector<8x1xf32> to vector<8x1024xf32>
    %106 = arith.mulf %103, %105 : vector<8x1024xf32>
    %cst_34 = arith.constant dense<0.000000e+00> : vector<1024xf32>
    %107 = vector.multi_reduction <add>, %106, %cst_34 [0] : vector<8x1024xf32> to vector<1024xf32>
    %108 = vector.shape_cast %107 : vector<1024xf32> to vector<1x1024xf32>
    %109 = vector.broadcast %13 : vector<1x1xf32> to vector<1x1024xf32>
    %110 = arith.mulf %108, %109 : vector<1x1024xf32>
    %111 = vector.broadcast %110 : vector<1x1024xf32> to vector<8x1024xf32>
    %112 = arith.subf %103, %111 : vector<8x1024xf32>
    %113 = arith.mulf %112, %112 : vector<8x1024xf32>
    %114 = vector.broadcast %104 : vector<8x1xf32> to vector<8x1024xf32>
    %115 = arith.mulf %113, %114 : vector<8x1024xf32>
    %cst_35 = arith.constant dense<0.000000e+00> : vector<1024xf32>
    %116 = vector.multi_reduction <add>, %115, %cst_35 [0] : vector<8x1024xf32> to vector<1024xf32>
    %117 = vector.shape_cast %116 : vector<1024xf32> to vector<1x1024xf32>
    %118 = vector.broadcast %13 : vector<1x1xf32> to vector<1x1024xf32>
    %119 = arith.mulf %117, %118 : vector<1x1024xf32>
    %cst_36 = arith.constant 9.99999974E-6 : f32
    %120 = vector.broadcast %cst_36 : f32 to vector<1x1024xf32>
    %121 = arith.addf %119, %120 : vector<1x1024xf32>
    %122 = math.rsqrt %121 : vector<1x1024xf32>
    %123 = vector.broadcast %122 : vector<1x1024xf32> to vector<8x1024xf32>
    %124 = arith.mulf %112, %123 : vector<8x1024xf32>
    %125 = tpu.concatenate %102, %124 in 0 : vector<8x1024xf32>, vector<8x1024xf32> -> vector<16x1024xf32>
    %c0_37 = arith.constant 0 : index
    %c0_38 = arith.constant 0 : index
    %126 = vector.load %arg15[%c0_37, %c0_38] : memref<1x1024xf32, #tpu.memory_space<vmem>>, vector<1x1024xf32>
    %127 = vector.broadcast %126 : vector<1x1024xf32> to vector<16x1024xf32>
    %128 = arith.mulf %125, %127 : vector<16x1024xf32>
    %c0_39 = arith.constant 0 : index
    %c0_40 = arith.constant 0 : index
    %129 = vector.load %arg16[%c0_39, %c0_40] : memref<1x1024xf32, #tpu.memory_space<vmem>>, vector<1x1024xf32>
    %130 = vector.broadcast %129 : vector<1x1024xf32> to vector<16x1024xf32>
    %131 = arith.addf %128, %130 : vector<16x1024xf32>
    %cst_41 = arith.constant 0.000000e+00 : f32
    %132 = vector.broadcast %cst_41 : f32 to vector<16x1024xf32>
    %133 = arith.maximumf %131, %132 : vector<16x1024xf32>
    %c0_42 = arith.constant 0 : index
    %c0_43 = arith.constant 0 : index
    %134 = vector.load %arg17[%c0_42, %c0_43] : memref<1024x8xf32, #tpu.memory_space<vmem>>, vector<1024x8xf32>
    %cst_44 = arith.constant dense<0.000000e+00> : vector<16x8xf32>
    %135 = tpu.matmul %133, %134, %cst_44 {dimension_numbers = #tpu.dot_dimension_numbers<[1], [0], [0], [1], [0, 0, 1, 1], [], []>} : vector<16x1024xf32>, vector<1024x8xf32>, vector<16x8xf32> -> vector<16x8xf32>
    %c0_45 = arith.constant 0 : index
    %c0_46 = arith.constant 0 : index
    %136 = vector.load %arg18[%c0_45, %c0_46] : memref<1x8xf32, #tpu.memory_space<vmem>>, vector<1x8xf32>
    %137 = vector.broadcast %136 : vector<1x8xf32> to vector<16x8xf32>
    %138 = arith.addf %135, %137 : vector<16x8xf32>
    %139 = vector.extract_strided_slice %138 {offsets = [0, 0], sizes = [16, 4], strides = [1, 1]} : vector<16x8xf32> to vector<16x4xf32>
    %140 = vector.extract_strided_slice %138 {offsets = [0, 4], sizes = [16, 4], strides = [1, 1]} : vector<16x8xf32> to vector<16x4xf32>
    %141 = vector.extract_strided_slice %139 {offsets = [0, 0], sizes = [8, 4], strides = [1, 1]} : vector<16x4xf32> to vector<8x4xf32>
    %142 = vector.extract_strided_slice %139 {offsets = [8, 0], sizes = [8, 4], strides = [1, 1]} : vector<16x4xf32> to vector<8x4xf32>
    %143 = vector.extract_strided_slice %140 {offsets = [0, 0], sizes = [8, 4], strides = [1, 1]} : vector<16x4xf32> to vector<8x4xf32>
    %144 = vector.extract_strided_slice %140 {offsets = [8, 0], sizes = [8, 4], strides = [1, 1]} : vector<16x4xf32> to vector<8x4xf32>
    %c0_47 = arith.constant 0 : index
    %c0_48 = arith.constant 0 : index
    %145 = vector.load %arg1[%c0_47, %c0_48] : memref<8x4xf32, #tpu.memory_space<vmem>>, vector<8x4xf32>
    %146 = arith.subf %145, %141 : vector<8x4xf32>
    %cst_49 = arith.constant 0.000000e+00 : f32
    %147 = vector.broadcast %cst_49 : f32 to vector<8x4xf32>
    %148 = arith.subf %147, %143 : vector<8x4xf32>
    %149 = math.exp %148 : vector<8x4xf32>
    %150 = arith.mulf %146, %149 : vector<8x4xf32>
    %cst_50 = arith.constant 0.000000e+00 : f32
    %151 = vector.broadcast %cst_50 : f32 to vector<8x4xf32>
    %152 = arith.subf %151, %143 : vector<8x4xf32>
    %cst_51 = arith.constant 0.918938517 : f32
    %153 = vector.broadcast %cst_51 : f32 to vector<8x4xf32>
    %154 = arith.subf %152, %153 : vector<8x4xf32>
    %cst_52 = arith.constant 5.000000e-01 : f32
    %155 = vector.broadcast %cst_52 : f32 to vector<8x4xf32>
    %156 = arith.mulf %155, %150 : vector<8x4xf32>
    %157 = arith.mulf %156, %150 : vector<8x4xf32>
    %158 = arith.subf %154, %157 : vector<8x4xf32>
    %cst_53 = arith.constant dense<0.000000e+00> : vector<8xf32>
    %159 = vector.multi_reduction <add>, %158, %cst_53 [1] : vector<8x4xf32> to vector<8xf32>
    %160 = vector.shape_cast %159 : vector<8xf32> to vector<8x1xf32>
    %161 = arith.mulf %160, %0 : vector<8x1xf32>
    %cst_54 = arith.constant dense<0.000000e+00> : vector<1xf32>
    %162 = vector.multi_reduction <add>, %161, %cst_54 [0] : vector<8x1xf32> to vector<1xf32>
    %163 = vector.shape_cast %162 : vector<1xf32> to vector<1x1xf32>
    %c0_55 = arith.constant 0 : index
    %c0_56 = arith.constant 0 : index
    %164 = vector.load %arg44[%c0_55, %c0_56] : memref<1x1xf32, #tpu.memory_space<vmem>>, vector<1x1xf32>
    tpu.vector_store %arg44[%c0_55, %c0_56], %163 {strides = array<i32>} : memref<1x1xf32, #tpu.memory_space<vmem>>, vector<1x1xf32>,
    %165 = math.exp %144 : vector<8x4xf32>
    %c0_57 = arith.constant 0 : index
    %c0_58 = arith.constant 0 : index
    %166 = vector.load %arg2[%c0_57, %c0_58] : memref<8x4xf32, #tpu.memory_space<vmem>>, vector<8x4xf32>
    %167 = arith.mulf %165, %166 : vector<8x4xf32>
    %168 = arith.addf %142, %167 : vector<8x4xf32>
    %cst_59 = arith.constant 1.41893852 : f32
    %169 = vector.broadcast %cst_59 : f32 to vector<8x4xf32>
    %170 = arith.addf %169, %144 : vector<8x4xf32>
    %cst_60 = arith.constant dense<0.000000e+00> : vector<8xf32>
    %171 = vector.multi_reduction <add>, %170, %cst_60 [1] : vector<8x4xf32> to vector<8xf32>
    %172 = vector.shape_cast %171 : vector<8xf32> to vector<8x1xf32>
    %173 = arith.mulf %172, %1 : vector<8x1xf32>
    %cst_61 = arith.constant dense<0.000000e+00> : vector<1xf32>
    %174 = vector.multi_reduction <add>, %173, %cst_61 [0] : vector<8x1xf32> to vector<1xf32>
    %175 = vector.shape_cast %174 : vector<1xf32> to vector<1x1xf32>
    %c0_62 = arith.constant 0 : index
    %c0_63 = arith.constant 0 : index
    %176 = vector.load %arg43[%c0_62, %c0_63] : memref<1x1xf32, #tpu.memory_space<vmem>>, vector<1x1xf32>
    tpu.vector_store %arg43[%c0_62, %c0_63], %175 {strides = array<i32>} : memref<1x1xf32, #tpu.memory_space<vmem>>, vector<1x1xf32>,
    %c0_64 = arith.constant 0 : index
    %c0_65 = arith.constant 0 : index
    %177 = vector.load %arg1[%c0_64, %c0_65] : memref<8x4xf32, #tpu.memory_space<vmem>>, vector<8x4xf32>
    %178 = tpu.concatenate %177, %168 in 0 : vector<8x4xf32>, vector<8x4xf32> -> vector<16x4xf32>
    %c0_66 = arith.constant 0 : index
    %c0_67 = arith.constant 0 : index
    %179 = vector.load %arg3[%c0_66, %c0_67] : memref<8x8xf32, #tpu.memory_space<vmem>>, vector<8x8xf32>
    %c0_68 = arith.constant 0 : index
    %c0_69 = arith.constant 0 : index
    %180 = vector.load %arg4[%c0_68, %c0_69] : memref<8x8xf32, #tpu.memory_space<vmem>>, vector<8x8xf32>
    %181 = tpu.concatenate %179, %180 in 0 : vector<8x8xf32>, vector<8x8xf32> -> vector<16x8xf32>
    %c0_70 = arith.constant 0 : index
    %c0_71 = arith.constant 0 : index
    %182 = vector.load %arg19[%c0_70, %c0_71] : memref<32x256xf32, #tpu.memory_space<vmem>>, vector<32x256xf32>
    %cst_72 = arith.constant dense<0.000000e+00> : vector<16x256xf32>
    %183 = tpu.matmul %16, %182, %cst_72 {dimension_numbers = #tpu.dot_dimension_numbers<[1], [0], [0], [1], [0, 0, 1, 1], [], []>} : vector<16x32xf32>, vector<32x256xf32>, vector<16x256xf32> -> vector<16x256xf32>
    %c0_73 = arith.constant 0 : index
    %c0_74 = arith.constant 0 : index
    %184 = vector.load %arg20[%c0_73, %c0_74] : memref<4x256xf32, #tpu.memory_space<vmem>>, vector<4x256xf32>
    %cst_75 = arith.constant dense<0.000000e+00> : vector<16x256xf32>
    %185 = tpu.matmul %178, %184, %cst_75 {dimension_numbers = #tpu.dot_dimension_numbers<[1], [0], [0], [1], [0, 0, 1, 1], [], []>} : vector<16x4xf32>, vector<4x256xf32>, vector<16x256xf32> -> vector<16x256xf32>
    %186 = arith.addf %183, %185 : vector<16x256xf32>
    %c0_76 = arith.constant 0 : index
    %c0_77 = arith.constant 0 : index
    %187 = vector.load %arg21[%c0_76, %c0_77] : memref<1x256xf32, #tpu.memory_space<vmem>>, vector<1x256xf32>
    %188 = vector.broadcast %187 : vector<1x256xf32> to vector<16x256xf32>
    %189 = arith.addf %186, %188 : vector<16x256xf32>
    %190 = vector.extract_strided_slice %189 {offsets = [0, 0], sizes = [8, 256], strides = [1, 1]} : vector<16x256xf32> to vector<8x256xf32>
    %191 = vector.extract_strided_slice %14 {offsets = [0, 0], sizes = [8, 1], strides = [1, 1]} : vector<16x1xf32> to vector<8x1xf32>
    %192 = vector.broadcast %191 : vector<8x1xf32> to vector<8x256xf32>
    %193 = arith.mulf %190, %192 : vector<8x256xf32>
    %cst_78 = arith.constant dense<0.000000e+00> : vector<256xf32>
    %194 = vector.multi_reduction <add>, %193, %cst_78 [0] : vector<8x256xf32> to vector<256xf32>
    %195 = vector.shape_cast %194 : vector<256xf32> to vector<1x256xf32>
    %196 = vector.broadcast %7 : vector<1x1xf32> to vector<1x256xf32>
    %197 = arith.mulf %195, %196 : vector<1x256xf32>
    %198 = vector.broadcast %197 : vector<1x256xf32> to vector<8x256xf32>
    %199 = arith.subf %190, %198 : vector<8x256xf32>
    %200 = arith.mulf %199, %199 : vector<8x256xf32>
    %201 = vector.broadcast %191 : vector<8x1xf32> to vector<8x256xf32>
    %202 = arith.mulf %200, %201 : vector<8x256xf32>
    %cst_79 = arith.constant dense<0.000000e+00> : vector<256xf32>
    %203 = vector.multi_reduction <add>, %202, %cst_79 [0] : vector<8x256xf32> to vector<256xf32>
    %204 = vector.shape_cast %203 : vector<256xf32> to vector<1x256xf32>
    %205 = vector.broadcast %7 : vector<1x1xf32> to vector<1x256xf32>
    %206 = arith.mulf %204, %205 : vector<1x256xf32>
    %cst_80 = arith.constant 9.99999974E-6 : f32
    %207 = vector.broadcast %cst_80 : f32 to vector<1x256xf32>
    %208 = arith.addf %206, %207 : vector<1x256xf32>
    %209 = math.rsqrt %208 : vector<1x256xf32>
    %210 = vector.broadcast %209 : vector<1x256xf32> to vector<8x256xf32>
    %211 = arith.mulf %199, %210 : vector<8x256xf32>
    %212 = vector.extract_strided_slice %189 {offsets = [8, 0], sizes = [8, 256], strides = [1, 1]} : vector<16x256xf32> to vector<8x256xf32>
    %213 = vector.extract_strided_slice %14 {offsets = [8, 0], sizes = [8, 1], strides = [1, 1]} : vector<16x1xf32> to vector<8x1xf32>
    %214 = vector.broadcast %213 : vector<8x1xf32> to vector<8x256xf32>
    %215 = arith.mulf %212, %214 : vector<8x256xf32>
    %cst_81 = arith.constant dense<0.000000e+00> : vector<256xf32>
    %216 = vector.multi_reduction <add>, %215, %cst_81 [0] : vector<8x256xf32> to vector<256xf32>
    %217 = vector.shape_cast %216 : vector<256xf32> to vector<1x256xf32>
    %218 = vector.broadcast %13 : vector<1x1xf32> to vector<1x256xf32>
    %219 = arith.mulf %217, %218 : vector<1x256xf32>
    %220 = vector.broadcast %219 : vector<1x256xf32> to vector<8x256xf32>
    %221 = arith.subf %212, %220 : vector<8x256xf32>
    %222 = arith.mulf %221, %221 : vector<8x256xf32>
    %223 = vector.broadcast %213 : vector<8x1xf32> to vector<8x256xf32>
    %224 = arith.mulf %222, %223 : vector<8x256xf32>
    %cst_82 = arith.constant dense<0.000000e+00> : vector<256xf32>
    %225 = vector.multi_reduction <add>, %224, %cst_82 [0] : vector<8x256xf32> to vector<256xf32>
    %226 = vector.shape_cast %225 : vector<256xf32> to vector<1x256xf32>
    %227 = vector.broadcast %13 : vector<1x1xf32> to vector<1x256xf32>
    %228 = arith.mulf %226, %227 : vector<1x256xf32>
    %cst_83 = arith.constant 9.99999974E-6 : f32
    %229 = vector.broadcast %cst_83 : f32 to vector<1x256xf32>
    %230 = arith.addf %228, %229 : vector<1x256xf32>
    %231 = math.rsqrt %230 : vector<1x256xf32>
    %232 = vector.broadcast %231 : vector<1x256xf32> to vector<8x256xf32>
    %233 = arith.mulf %221, %232 : vector<8x256xf32>
    %234 = tpu.concatenate %211, %233 in 0 : vector<8x256xf32>, vector<8x256xf32> -> vector<16x256xf32>
    %c0_84 = arith.constant 0 : index
    %c0_85 = arith.constant 0 : index
    %235 = vector.load %arg22[%c0_84, %c0_85] : memref<1x256xf32, #tpu.memory_space<vmem>>, vector<1x256xf32>
    %236 = vector.broadcast %235 : vector<1x256xf32> to vector<16x256xf32>
    %237 = arith.mulf %234, %236 : vector<16x256xf32>
    %c0_86 = arith.constant 0 : index
    %c0_87 = arith.constant 0 : index
    %238 = vector.load %arg23[%c0_86, %c0_87] : memref<1x256xf32, #tpu.memory_space<vmem>>, vector<1x256xf32>
    %239 = vector.broadcast %238 : vector<1x256xf32> to vector<16x256xf32>
    %240 = arith.addf %237, %239 : vector<16x256xf32>
    %cst_88 = arith.constant 0.000000e+00 : f32
    %241 = vector.broadcast %cst_88 : f32 to vector<16x256xf32>
    %242 = arith.maximumf %240, %241 : vector<16x256xf32>
    %c0_89 = arith.constant 0 : index
    %c0_90 = arith.constant 0 : index
    %243 = vector.load %arg24[%c0_89, %c0_90] : memref<256x128xf32, #tpu.memory_space<vmem>>, vector<256x128xf32>
    %cst_91 = arith.constant dense<0.000000e+00> : vector<16x128xf32>
    %244 = tpu.matmul %242, %243, %cst_91 {dimension_numbers = #tpu.dot_dimension_numbers<[1], [0], [0], [1], [0, 0, 1, 1], [], []>} : vector<16x256xf32>, vector<256x128xf32>, vector<16x128xf32> -> vector<16x128xf32>
    %c0_92 = arith.constant 0 : index
    %c0_93 = arith.constant 0 : index
    %245 = vector.load %arg25[%c0_92, %c0_93] : memref<1x128xf32, #tpu.memory_space<vmem>>, vector<1x128xf32>
    %246 = vector.broadcast %245 : vector<1x128xf32> to vector<16x128xf32>
    %247 = arith.addf %244, %246 : vector<16x128xf32>
    %248 = vector.extract_strided_slice %247 {offsets = [0, 0], sizes = [8, 128], strides = [1, 1]} : vector<16x128xf32> to vector<8x128xf32>
    %249 = vector.extract_strided_slice %14 {offsets = [0, 0], sizes = [8, 1], strides = [1, 1]} : vector<16x1xf32> to vector<8x1xf32>
    %250 = vector.broadcast %249 : vector<8x1xf32> to vector<8x128xf32>
    %251 = arith.mulf %248, %250 : vector<8x128xf32>
    %cst_94 = arith.constant dense<0.000000e+00> : vector<128xf32>
    %252 = vector.multi_reduction <add>, %251, %cst_94 [0] : vector<8x128xf32> to vector<128xf32>
    %253 = vector.shape_cast %252 : vector<128xf32> to vector<1x128xf32>
    %254 = vector.broadcast %7 : vector<1x1xf32> to vector<1x128xf32>
    %255 = arith.mulf %253, %254 : vector<1x128xf32>
    %256 = vector.broadcast %255 : vector<1x128xf32> to vector<8x128xf32>
    %257 = arith.subf %248, %256 : vector<8x128xf32>
    %258 = arith.mulf %257, %257 : vector<8x128xf32>
    %259 = vector.broadcast %249 : vector<8x1xf32> to vector<8x128xf32>
    %260 = arith.mulf %258, %259 : vector<8x128xf32>
    %cst_95 = arith.constant dense<0.000000e+00> : vector<128xf32>
    %261 = vector.multi_reduction <add>, %260, %cst_95 [0] : vector<8x128xf32> to vector<128xf32>
    %262 = vector.shape_cast %261 : vector<128xf32> to vector<1x128xf32>
    %263 = vector.broadcast %7 : vector<1x1xf32> to vector<1x128xf32>
    %264 = arith.mulf %262, %263 : vector<1x128xf32>
    %cst_96 = arith.constant 9.99999974E-6 : f32
    %265 = vector.broadcast %cst_96 : f32 to vector<1x128xf32>
    %266 = arith.addf %264, %265 : vector<1x128xf32>
    %267 = math.rsqrt %266 : vector<1x128xf32>
    %268 = vector.broadcast %267 : vector<1x128xf32> to vector<8x128xf32>
    %269 = arith.mulf %257, %268 : vector<8x128xf32>
    %270 = vector.extract_strided_slice %247 {offsets = [8, 0], sizes = [8, 128], strides = [1, 1]} : vector<16x128xf32> to vector<8x128xf32>
    %271 = vector.extract_strided_slice %14 {offsets = [8, 0], sizes = [8, 1], strides = [1, 1]} : vector<16x1xf32> to vector<8x1xf32>
    %272 = vector.broadcast %271 : vector<8x1xf32> to vector<8x128xf32>
    %273 = arith.mulf %270, %272 : vector<8x128xf32>
    %cst_97 = arith.constant dense<0.000000e+00> : vector<128xf32>
    %274 = vector.multi_reduction <add>, %273, %cst_97 [0] : vector<8x128xf32> to vector<128xf32>
    %275 = vector.shape_cast %274 : vector<128xf32> to vector<1x128xf32>
    %276 = vector.broadcast %13 : vector<1x1xf32> to vector<1x128xf32>
    %277 = arith.mulf %275, %276 : vector<1x128xf32>
    %278 = vector.broadcast %277 : vector<1x128xf32> to vector<8x128xf32>
    %279 = arith.subf %270, %278 : vector<8x128xf32>
    %280 = arith.mulf %279, %279 : vector<8x128xf32>
    %281 = vector.broadcast %271 : vector<8x1xf32> to vector<8x128xf32>
    %282 = arith.mulf %280, %281 : vector<8x128xf32>
    %cst_98 = arith.constant dense<0.000000e+00> : vector<128xf32>
    %283 = vector.multi_reduction <add>, %282, %cst_98 [0] : vector<8x128xf32> to vector<128xf32>
    %284 = vector.shape_cast %283 : vector<128xf32> to vector<1x128xf32>
    %285 = vector.broadcast %13 : vector<1x1xf32> to vector<1x128xf32>
    %286 = arith.mulf %284, %285 : vector<1x128xf32>
    %cst_99 = arith.constant 9.99999974E-6 : f32
    %287 = vector.broadcast %cst_99 : f32 to vector<1x128xf32>
    %288 = arith.addf %286, %287 : vector<1x128xf32>
    %289 = math.rsqrt %288 : vector<1x128xf32>
    %290 = vector.broadcast %289 : vector<1x128xf32> to vector<8x128xf32>
    %291 = arith.mulf %279, %290 : vector<8x128xf32>
    %292 = tpu.concatenate %269, %291 in 0 : vector<8x128xf32>, vector<8x128xf32> -> vector<16x128xf32>
    %c0_100 = arith.constant 0 : index
    %c0_101 = arith.constant 0 : index
    %293 = vector.load %arg26[%c0_100, %c0_101] : memref<1x128xf32, #tpu.memory_space<vmem>>, vector<1x128xf32>
    %294 = vector.broadcast %293 : vector<1x128xf32> to vector<16x128xf32>
    %295 = arith.mulf %292, %294 : vector<16x128xf32>
    %c0_102 = arith.constant 0 : index
    %c0_103 = arith.constant 0 : index
    %296 = vector.load %arg27[%c0_102, %c0_103] : memref<1x128xf32, #tpu.memory_space<vmem>>, vector<1x128xf32>
    %297 = vector.broadcast %296 : vector<1x128xf32> to vector<16x128xf32>
    %298 = arith.addf %295, %297 : vector<16x128xf32>
    %cst_104 = arith.constant 0.000000e+00 : f32
    %299 = vector.broadcast %cst_104 : f32 to vector<16x128xf32>
    %300 = arith.maximumf %298, %299 : vector<16x128xf32>
    %c0_105 = arith.constant 0 : index
    %c0_106 = arith.constant 0 : index
    %301 = vector.load %arg28[%c0_105, %c0_106] : memref<128x16xf32, #tpu.memory_space<vmem>>, vector<128x16xf32>
    %cst_107 = arith.constant dense<0.000000e+00> : vector<16x16xf32>
    %302 = tpu.matmul %300, %301, %cst_107 {dimension_numbers = #tpu.dot_dimension_numbers<[1], [0], [0], [1], [0, 0, 1, 1], [], []>} : vector<16x128xf32>, vector<128x16xf32>, vector<16x16xf32> -> vector<16x16xf32>
    %c0_108 = arith.constant 0 : index
    %c0_109 = arith.constant 0 : index
    %303 = vector.load %arg29[%c0_108, %c0_109] : memref<1x16xf32, #tpu.memory_space<vmem>>, vector<1x16xf32>
    %304 = vector.broadcast %303 : vector<1x16xf32> to vector<16x16xf32>
    %305 = arith.addf %302, %304 : vector<16x16xf32>
    %306 = vector.extract_strided_slice %305 {offsets = [0, 0], sizes = [16, 8], strides = [1, 1]} : vector<16x16xf32> to vector<16x8xf32>
    %307 = vector.extract_strided_slice %305 {offsets = [0, 8], sizes = [16, 8], strides = [1, 1]} : vector<16x16xf32> to vector<16x8xf32>
    %308 = math.exp %307 : vector<16x8xf32>
    %309 = arith.mulf %308, %181 : vector<16x8xf32>
    %310 = arith.addf %306, %309 : vector<16x8xf32>
    %c0_110 = arith.constant 0 : index
    %c0_111 = arith.constant 0 : index
    %311 = vector.load %arg30[%c0_110, %c0_111] : memref<8x128xf32, #tpu.memory_space<vmem>>, vector<8x128xf32>
    %cst_112 = arith.constant dense<0.000000e+00> : vector<16x128xf32>
    %312 = tpu.matmul %310, %311, %cst_112 {dimension_numbers = #tpu.dot_dimension_numbers<[1], [0], [0], [1], [0, 0, 1, 1], [], []>} : vector<16x8xf32>, vector<8x128xf32>, vector<16x128xf32> -> vector<16x128xf32>
    %c0_113 = arith.constant 0 : index
    %c0_114 = arith.constant 0 : index
    %313 = vector.load %arg31[%c0_113, %c0_114] : memref<4x128xf32, #tpu.memory_space<vmem>>, vector<4x128xf32>
    %cst_115 = arith.constant dense<0.000000e+00> : vector<16x128xf32>
    %314 = tpu.matmul %178, %313, %cst_115 {dimension_numbers = #tpu.dot_dimension_numbers<[1], [0], [0], [1], [0, 0, 1, 1], [], []>} : vector<16x4xf32>, vector<4x128xf32>, vector<16x128xf32> -> vector<16x128xf32>
    %315 = arith.addf %312, %314 : vector<16x128xf32>
    %c0_116 = arith.constant 0 : index
    %c0_117 = arith.constant 0 : index
    %316 = vector.load %arg32[%c0_116, %c0_117] : memref<1x128xf32, #tpu.memory_space<vmem>>, vector<1x128xf32>
    %317 = vector.broadcast %316 : vector<1x128xf32> to vector<16x128xf32>
    %318 = arith.addf %315, %317 : vector<16x128xf32>
    %319 = vector.extract_strided_slice %318 {offsets = [0, 0], sizes = [8, 128], strides = [1, 1]} : vector<16x128xf32> to vector<8x128xf32>
    %320 = vector.extract_strided_slice %14 {offsets = [0, 0], sizes = [8, 1], strides = [1, 1]} : vector<16x1xf32> to vector<8x1xf32>
    %321 = vector.broadcast %320 : vector<8x1xf32> to vector<8x128xf32>
    %322 = arith.mulf %319, %321 : vector<8x128xf32>
    %cst_118 = arith.constant dense<0.000000e+00> : vector<128xf32>
    %323 = vector.multi_reduction <add>, %322, %cst_118 [0] : vector<8x128xf32> to vector<128xf32>
    %324 = vector.shape_cast %323 : vector<128xf32> to vector<1x128xf32>
    %325 = vector.broadcast %7 : vector<1x1xf32> to vector<1x128xf32>
    %326 = arith.mulf %324, %325 : vector<1x128xf32>
    %327 = vector.broadcast %326 : vector<1x128xf32> to vector<8x128xf32>
    %328 = arith.subf %319, %327 : vector<8x128xf32>
    %329 = arith.mulf %328, %328 : vector<8x128xf32>
    %330 = vector.broadcast %320 : vector<8x1xf32> to vector<8x128xf32>
    %331 = arith.mulf %329, %330 : vector<8x128xf32>
    %cst_119 = arith.constant dense<0.000000e+00> : vector<128xf32>
    %332 = vector.multi_reduction <add>, %331, %cst_119 [0] : vector<8x128xf32> to vector<128xf32>
    %333 = vector.shape_cast %332 : vector<128xf32> to vector<1x128xf32>
    %334 = vector.broadcast %7 : vector<1x1xf32> to vector<1x128xf32>
    %335 = arith.mulf %333, %334 : vector<1x128xf32>
    %cst_120 = arith.constant 9.99999974E-6 : f32
    %336 = vector.broadcast %cst_120 : f32 to vector<1x128xf32>
    %337 = arith.addf %335, %336 : vector<1x128xf32>
    %338 = math.rsqrt %337 : vector<1x128xf32>
    %339 = vector.broadcast %338 : vector<1x128xf32> to vector<8x128xf32>
    %340 = arith.mulf %328, %339 : vector<8x128xf32>
    %341 = vector.extract_strided_slice %318 {offsets = [8, 0], sizes = [8, 128], strides = [1, 1]} : vector<16x128xf32> to vector<8x128xf32>
    %342 = vector.extract_strided_slice %14 {offsets = [8, 0], sizes = [8, 1], strides = [1, 1]} : vector<16x1xf32> to vector<8x1xf32>
    %343 = vector.broadcast %342 : vector<8x1xf32> to vector<8x128xf32>
    %344 = arith.mulf %341, %343 : vector<8x128xf32>
    %cst_121 = arith.constant dense<0.000000e+00> : vector<128xf32>
    %345 = vector.multi_reduction <add>, %344, %cst_121 [0] : vector<8x128xf32> to vector<128xf32>
    %346 = vector.shape_cast %345 : vector<128xf32> to vector<1x128xf32>
    %347 = vector.broadcast %13 : vector<1x1xf32> to vector<1x128xf32>
    %348 = arith.mulf %346, %347 : vector<1x128xf32>
    %349 = vector.broadcast %348 : vector<1x128xf32> to vector<8x128xf32>
    %350 = arith.subf %341, %349 : vector<8x128xf32>
    %351 = arith.mulf %350, %350 : vector<8x128xf32>
    %352 = vector.broadcast %342 : vector<8x1xf32> to vector<8x128xf32>
    %353 = arith.mulf %351, %352 : vector<8x128xf32>
    %cst_122 = arith.constant dense<0.000000e+00> : vector<128xf32>
    %354 = vector.multi_reduction <add>, %353, %cst_122 [0] : vector<8x128xf32> to vector<128xf32>
    %355 = vector.shape_cast %354 : vector<128xf32> to vector<1x128xf32>
    %356 = vector.broadcast %13 : vector<1x1xf32> to vector<1x128xf32>
    %357 = arith.mulf %355, %356 : vector<1x128xf32>
    %cst_123 = arith.constant 9.99999974E-6 : f32
    %358 = vector.broadcast %cst_123 : f32 to vector<1x128xf32>
    %359 = arith.addf %357, %358 : vector<1x128xf32>
    %360 = math.rsqrt %359 : vector<1x128xf32>
    %361 = vector.broadcast %360 : vector<1x128xf32> to vector<8x128xf32>
    %362 = arith.mulf %350, %361 : vector<8x128xf32>
    %363 = tpu.concatenate %340, %362 in 0 : vector<8x128xf32>, vector<8x128xf32> -> vector<16x128xf32>
    %c0_124 = arith.constant 0 : index
    %c0_125 = arith.constant 0 : index
    %364 = vector.load %arg33[%c0_124, %c0_125] : memref<1x128xf32, #tpu.memory_space<vmem>>, vector<1x128xf32>
    %365 = vector.broadcast %364 : vector<1x128xf32> to vector<16x128xf32>
    %366 = arith.mulf %363, %365 : vector<16x128xf32>
    %c0_126 = arith.constant 0 : index
    %c0_127 = arith.constant 0 : index
    %367 = vector.load %arg34[%c0_126, %c0_127] : memref<1x128xf32, #tpu.memory_space<vmem>>, vector<1x128xf32>
    %368 = vector.broadcast %367 : vector<1x128xf32> to vector<16x128xf32>
    %369 = arith.addf %366, %368 : vector<16x128xf32>
    %cst_128 = arith.constant 0.000000e+00 : f32
    %370 = vector.broadcast %cst_128 : f32 to vector<16x128xf32>
    %371 = arith.maximumf %369, %370 : vector<16x128xf32>
    %c0_129 = arith.constant 0 : index
    %c0_130 = arith.constant 0 : index
    %372 = vector.load %arg35[%c0_129, %c0_130] : memref<128x256xf32, #tpu.memory_space<vmem>>, vector<128x256xf32>
    %cst_131 = arith.constant dense<0.000000e+00> : vector<16x256xf32>
    %373 = tpu.matmul %371, %372, %cst_131 {dimension_numbers = #tpu.dot_dimension_numbers<[1], [0], [0], [1], [0, 0, 1, 1], [], []>} : vector<16x128xf32>, vector<128x256xf32>, vector<16x256xf32> -> vector<16x256xf32>
    %c0_132 = arith.constant 0 : index
    %c0_133 = arith.constant 0 : index
    %374 = vector.load %arg36[%c0_132, %c0_133] : memref<1x256xf32, #tpu.memory_space<vmem>>, vector<1x256xf32>
    %375 = vector.broadcast %374 : vector<1x256xf32> to vector<16x256xf32>
    %376 = arith.addf %373, %375 : vector<16x256xf32>
    %377 = vector.extract_strided_slice %376 {offsets = [0, 0], sizes = [8, 256], strides = [1, 1]} : vector<16x256xf32> to vector<8x256xf32>
    %378 = vector.extract_strided_slice %14 {offsets = [0, 0], sizes = [8, 1], strides = [1, 1]} : vector<16x1xf32> to vector<8x1xf32>
    %379 = vector.broadcast %378 : vector<8x1xf32> to vector<8x256xf32>
    %380 = arith.mulf %377, %379 : vector<8x256xf32>
    %cst_134 = arith.constant dense<0.000000e+00> : vector<256xf32>
    %381 = vector.multi_reduction <add>, %380, %cst_134 [0] : vector<8x256xf32> to vector<256xf32>
    %382 = vector.shape_cast %381 : vector<256xf32> to vector<1x256xf32>
    %383 = vector.broadcast %7 : vector<1x1xf32> to vector<1x256xf32>
    %384 = arith.mulf %382, %383 : vector<1x256xf32>
    %385 = vector.broadcast %384 : vector<1x256xf32> to vector<8x256xf32>
    %386 = arith.subf %377, %385 : vector<8x256xf32>
    %387 = arith.mulf %386, %386 : vector<8x256xf32>
    %388 = vector.broadcast %378 : vector<8x1xf32> to vector<8x256xf32>
    %389 = arith.mulf %387, %388 : vector<8x256xf32>
    %cst_135 = arith.constant dense<0.000000e+00> : vector<256xf32>
    %390 = vector.multi_reduction <add>, %389, %cst_135 [0] : vector<8x256xf32> to vector<256xf32>
    %391 = vector.shape_cast %390 : vector<256xf32> to vector<1x256xf32>
    %392 = vector.broadcast %7 : vector<1x1xf32> to vector<1x256xf32>
    %393 = arith.mulf %391, %392 : vector<1x256xf32>
    %cst_136 = arith.constant 9.99999974E-6 : f32
    %394 = vector.broadcast %cst_136 : f32 to vector<1x256xf32>
    %395 = arith.addf %393, %394 : vector<1x256xf32>
    %396 = math.rsqrt %395 : vector<1x256xf32>
    %397 = vector.broadcast %396 : vector<1x256xf32> to vector<8x256xf32>
    %398 = arith.mulf %386, %397 : vector<8x256xf32>
    %399 = vector.extract_strided_slice %376 {offsets = [8, 0], sizes = [8, 256], strides = [1, 1]} : vector<16x256xf32> to vector<8x256xf32>
    %400 = vector.extract_strided_slice %14 {offsets = [8, 0], sizes = [8, 1], strides = [1, 1]} : vector<16x1xf32> to vector<8x1xf32>
    %401 = vector.broadcast %400 : vector<8x1xf32> to vector<8x256xf32>
    %402 = arith.mulf %399, %401 : vector<8x256xf32>
    %cst_137 = arith.constant dense<0.000000e+00> : vector<256xf32>
    %403 = vector.multi_reduction <add>, %402, %cst_137 [0] : vector<8x256xf32> to vector<256xf32>
    %404 = vector.shape_cast %403 : vector<256xf32> to vector<1x256xf32>
    %405 = vector.broadcast %13 : vector<1x1xf32> to vector<1x256xf32>
    %406 = arith.mulf %404, %405 : vector<1x256xf32>
    %407 = vector.broadcast %406 : vector<1x256xf32> to vector<8x256xf32>
    %408 = arith.subf %399, %407 : vector<8x256xf32>
    %409 = arith.mulf %408, %408 : vector<8x256xf32>
    %410 = vector.broadcast %400 : vector<8x1xf32> to vector<8x256xf32>
    %411 = arith.mulf %409, %410 : vector<8x256xf32>
    %cst_138 = arith.constant dense<0.000000e+00> : vector<256xf32>
    %412 = vector.multi_reduction <add>, %411, %cst_138 [0] : vector<8x256xf32> to vector<256xf32>
    %413 = vector.shape_cast %412 : vector<256xf32> to vector<1x256xf32>
    %414 = vector.broadcast %13 : vector<1x1xf32> to vector<1x256xf32>
    %415 = arith.mulf %413, %414 : vector<1x256xf32>
    %cst_139 = arith.constant 9.99999974E-6 : f32
    %416 = vector.broadcast %cst_139 : f32 to vector<1x256xf32>
    %417 = arith.addf %415, %416 : vector<1x256xf32>
    %418 = math.rsqrt %417 : vector<1x256xf32>
    %419 = vector.broadcast %418 : vector<1x256xf32> to vector<8x256xf32>
    %420 = arith.mulf %408, %419 : vector<8x256xf32>
    %421 = tpu.concatenate %398, %420 in 0 : vector<8x256xf32>, vector<8x256xf32> -> vector<16x256xf32>
    %c0_140 = arith.constant 0 : index
    %c0_141 = arith.constant 0 : index
    %422 = vector.load %arg37[%c0_140, %c0_141] : memref<1x256xf32, #tpu.memory_space<vmem>>, vector<1x256xf32>
    %423 = vector.broadcast %422 : vector<1x256xf32> to vector<16x256xf32>
    %424 = arith.mulf %421, %423 : vector<16x256xf32>
    %c0_142 = arith.constant 0 : index
    %c0_143 = arith.constant 0 : index
    %425 = vector.load %arg38[%c0_142, %c0_143] : memref<1x256xf32, #tpu.memory_space<vmem>>, vector<1x256xf32>
    %426 = vector.broadcast %425 : vector<1x256xf32> to vector<16x256xf32>
    %427 = arith.addf %424, %426 : vector<16x256xf32>
    %cst_144 = arith.constant 0.000000e+00 : f32
    %428 = vector.broadcast %cst_144 : f32 to vector<16x256xf32>
    %429 = arith.maximumf %427, %428 : vector<16x256xf32>
    %c0_145 = arith.constant 0 : index
    %c0_146 = arith.constant 0 : index
    %430 = vector.load %arg39[%c0_145, %c0_146] : memref<256x64xf32, #tpu.memory_space<vmem>>, vector<256x64xf32>
    %cst_147 = arith.constant dense<0.000000e+00> : vector<16x64xf32>
    %431 = tpu.matmul %429, %430, %cst_147 {dimension_numbers = #tpu.dot_dimension_numbers<[1], [0], [0], [1], [0, 0, 1, 1], [], []>} : vector<16x256xf32>, vector<256x64xf32>, vector<16x64xf32> -> vector<16x64xf32>
    %c0_148 = arith.constant 0 : index
    %c0_149 = arith.constant 0 : index
    %432 = vector.load %arg40[%c0_148, %c0_149] : memref<1x64xf32, #tpu.memory_space<vmem>>, vector<1x64xf32>
    %433 = vector.broadcast %432 : vector<1x64xf32> to vector<16x64xf32>
    %434 = arith.addf %431, %433 : vector<16x64xf32>
    %435 = vector.extract_strided_slice %434 {offsets = [0, 0], sizes = [16, 32], strides = [1, 1]} : vector<16x64xf32> to vector<16x32xf32>
    %436 = vector.extract_strided_slice %434 {offsets = [0, 32], sizes = [16, 32], strides = [1, 1]} : vector<16x64xf32> to vector<16x32xf32>
    %437 = arith.subf %16, %435 : vector<16x32xf32>
    %cst_150 = arith.constant 0.000000e+00 : f32
    %438 = vector.broadcast %cst_150 : f32 to vector<16x32xf32>
    %439 = arith.subf %438, %436 : vector<16x32xf32>
    %440 = math.exp %439 : vector<16x32xf32>
    %441 = arith.mulf %437, %440 : vector<16x32xf32>
    %cst_151 = arith.constant 0.000000e+00 : f32
    %442 = vector.broadcast %cst_151 : f32 to vector<16x32xf32>
    %443 = arith.subf %442, %436 : vector<16x32xf32>
    %cst_152 = arith.constant 0.918938517 : f32
    %444 = vector.broadcast %cst_152 : f32 to vector<16x32xf32>
    %445 = arith.subf %443, %444 : vector<16x32xf32>
    %cst_153 = arith.constant 5.000000e-01 : f32
    %446 = vector.broadcast %cst_153 : f32 to vector<16x32xf32>
    %447 = arith.mulf %446, %441 : vector<16x32xf32>
    %448 = arith.mulf %447, %441 : vector<16x32xf32>
    %449 = arith.subf %445, %448 : vector<16x32xf32>
    %cst_154 = arith.constant dense<0.000000e+00> : vector<16xf32>
    %450 = vector.multi_reduction <add>, %449, %cst_154 [1] : vector<16x32xf32> to vector<16xf32>
    %451 = vector.shape_cast %450 : vector<16xf32> to vector<16x1xf32>
    %c0_155 = arith.constant 0 : index
    %c0_156 = arith.constant 0 : index
    %452 = vector.load %arg7[%c0_155, %c0_156] : memref<1x4xf32, #tpu.memory_space<vmem>>, vector<1x4xf32>
    %c0_157 = arith.constant 0 : index
    %c0_158 = arith.constant 0 : index
    %453 = vector.load %arg8[%c0_157, %c0_158] : memref<1x4xf32, #tpu.memory_space<vmem>>, vector<1x4xf32>
    %454 = vector.broadcast %452 : vector<1x4xf32> to vector<16x4xf32>
    %455 = arith.subf %178, %454 : vector<16x4xf32>
    %cst_159 = arith.constant 0.000000e+00 : f32
    %456 = vector.broadcast %cst_159 : f32 to vector<1x4xf32>
    %457 = arith.subf %456, %453 : vector<1x4xf32>
    %458 = math.exp %457 : vector<1x4xf32>
    %459 = vector.broadcast %458 : vector<1x4xf32> to vector<16x4xf32>
    %460 = arith.mulf %455, %459 : vector<16x4xf32>
    %cst_160 = arith.constant 0.000000e+00 : f32
    %461 = vector.broadcast %cst_160 : f32 to vector<1x4xf32>
    %462 = arith.subf %461, %453 : vector<1x4xf32>
    %cst_161 = arith.constant 0.918938517 : f32
    %463 = vector.broadcast %cst_161 : f32 to vector<1x4xf32>
    %464 = arith.subf %462, %463 : vector<1x4xf32>
    %cst_162 = arith.constant 5.000000e-01 : f32
    %465 = vector.broadcast %cst_162 : f32 to vector<16x4xf32>
    %466 = arith.mulf %465, %460 : vector<16x4xf32>
    %467 = arith.mulf %466, %460 : vector<16x4xf32>
    %468 = vector.broadcast %464 : vector<1x4xf32> to vector<16x4xf32>
    %469 = arith.subf %468, %467 : vector<16x4xf32>
    %cst_163 = arith.constant dense<0.000000e+00> : vector<16xf32>
    %470 = vector.multi_reduction <add>, %469, %cst_163 [1] : vector<16x4xf32> to vector<16xf32>
    %471 = vector.shape_cast %470 : vector<16xf32> to vector<16x1xf32>
    %cst_164 = arith.constant 5.000000e-01 : f32
    %472 = vector.broadcast %cst_164 : f32 to vector<16x8xf32>
    %473 = arith.mulf %472, %310 : vector<16x8xf32>
    %474 = arith.mulf %473, %310 : vector<16x8xf32>
    %cst_165 = arith.constant -0.918938517 : f32
    %475 = vector.broadcast %cst_165 : f32 to vector<16x8xf32>
    %476 = arith.subf %475, %474 : vector<16x8xf32>
    %cst_166 = arith.constant dense<0.000000e+00> : vector<16xf32>
    %477 = vector.multi_reduction <add>, %476, %cst_166 [1] : vector<16x8xf32> to vector<16xf32>
    %478 = vector.shape_cast %477 : vector<16xf32> to vector<16x1xf32>
    %479 = arith.subf %310, %306 : vector<16x8xf32>
    %cst_167 = arith.constant 0.000000e+00 : f32
    %480 = vector.broadcast %cst_167 : f32 to vector<16x8xf32>
    %481 = arith.subf %480, %307 : vector<16x8xf32>
    %482 = math.exp %481 : vector<16x8xf32>
    %483 = arith.mulf %479, %482 : vector<16x8xf32>
    %cst_168 = arith.constant 0.000000e+00 : f32
    %484 = vector.broadcast %cst_168 : f32 to vector<16x8xf32>
    %485 = arith.subf %484, %307 : vector<16x8xf32>
    %cst_169 = arith.constant 0.918938517 : f32
    %486 = vector.broadcast %cst_169 : f32 to vector<16x8xf32>
    %487 = arith.subf %485, %486 : vector<16x8xf32>
    %cst_170 = arith.constant 5.000000e-01 : f32
    %488 = vector.broadcast %cst_170 : f32 to vector<16x8xf32>
    %489 = arith.mulf %488, %483 : vector<16x8xf32>
    %490 = arith.mulf %489, %483 : vector<16x8xf32>
    %491 = arith.subf %487, %490 : vector<16x8xf32>
    %cst_171 = arith.constant dense<0.000000e+00> : vector<16xf32>
    %492 = vector.multi_reduction <add>, %491, %cst_171 [1] : vector<16x8xf32> to vector<16xf32>
    %493 = vector.shape_cast %492 : vector<16xf32> to vector<16x1xf32>
    %494 = arith.addf %451, %471 : vector<16x1xf32>
    %495 = arith.addf %494, %478 : vector<16x1xf32>
    %496 = arith.subf %495, %493 : vector<16x1xf32>
    %cst_172 = arith.constant 0.000000e+00 : f32
    %497 = vector.broadcast %cst_172 : f32 to vector<16x1xf32>
    %498 = arith.subf %497, %496 : vector<16x1xf32>
    %499 = vector.extract_strided_slice %498 {offsets = [0, 0], sizes = [8, 1], strides = [1, 1]} : vector<16x1xf32> to vector<8x1xf32>
    %500 = arith.mulf %499, %0 : vector<8x1xf32>
    %cst_173 = arith.constant dense<0.000000e+00> : vector<1xf32>
    %501 = vector.multi_reduction <add>, %500, %cst_173 [0] : vector<8x1xf32> to vector<1xf32>
    %502 = vector.shape_cast %501 : vector<1xf32> to vector<1x1xf32>
    %c0_174 = arith.constant 0 : index
    %c0_175 = arith.constant 0 : index
    %503 = vector.load %arg41[%c0_174, %c0_175] : memref<1x1xf32, #tpu.memory_space<vmem>>, vector<1x1xf32>
    tpu.vector_store %arg41[%c0_174, %c0_175], %502 {strides = array<i32>} : memref<1x1xf32, #tpu.memory_space<vmem>>, vector<1x1xf32>,
    %504 = vector.extract_strided_slice %498 {offsets = [8, 0], sizes = [8, 1], strides = [1, 1]} : vector<16x1xf32> to vector<8x1xf32>
    %505 = arith.mulf %504, %1 : vector<8x1xf32>
    %cst_176 = arith.constant dense<0.000000e+00> : vector<1xf32>
    %506 = vector.multi_reduction <add>, %505, %cst_176 [0] : vector<8x1xf32> to vector<1xf32>
    %507 = vector.shape_cast %506 : vector<1xf32> to vector<1x1xf32>
    %c0_177 = arith.constant 0 : index
    %c0_178 = arith.constant 0 : index
    %508 = vector.load %arg42[%c0_177, %c0_178] : memref<1x1xf32, #tpu.memory_space<vmem>>, vector<1x1xf32>
    tpu.vector_store %arg42[%c0_177, %c0_178], %507 {strides = array<i32>} : memref<1x1xf32, #tpu.memory_space<vmem>>, vector<1x1xf32>,
    return
  }
}

</mosaic_0001>

<bundles_post_ra>
// kernel: m2_forward.3
= control target key start
LH: loop header
LB: loop body
LE: loop exit
PB: predicated region body
PF: predicated region fallthrough
CT: control target
= control target key end

     0   :  { %s7320_s6 = smov 1   ;;  %s7321_s10 = smov 2   ;;  %s9842_s0 = inlined_call_operand.smem [shape: u32[45], index: -1, kind: input, shape index: {}] }
   0x1   :  { %s7420_s5 = sld [smem:[%s9842_s0]]   ;;  %s7322_s14 = smov 3  }
   0x2   :  { %s7425_s9 = sld [smem:[%s9842_s0 + %s7320_s6]]   ;;  %s7323_s18 = smov 4  }
   0x3   :  { %s7430_s13 = sld [smem:[%s9842_s0 + %s7321_s10]]   ;;  %s7324_s22 = smov 5  }
   0x4   :  { %s7435_s17 = sld [smem:[%s9842_s0 + %s7322_s14]]   ;;  %s7325_s26 = smov 6  }
   0x5   :  { %s7440_s21 = sld [smem:[%s9842_s0 + %s7323_s18]]   ;;  %s7326_s30 = smov 7  }
   0x6   :  { %s7445_s25 = sld [smem:[%s9842_s0 + %s7324_s22]]   ;;  %s7327_s4 = smov 8  }
   0x7   :  { %9895 = sst [smem:[#allocation78_spill]] %s7420_s5  ;;  %s7328_s10 = smov 9  }
   0x8   :  { %9896 = sst [smem:[#allocation79_spill]] %s7425_s9  ;;  %s7329_s15 = smov 10  }
   0x9   :  { %9897 = sst [smem:[#allocation80_spill]] %s7430_s13  ;;  %s7330_s20 = smov 11  }
   0xa   :  { %9898 = sst [smem:[#allocation81_spill]] %s7435_s17  ;;  %s7332_s1 = smov 13  }
   0xb   :  { %9899 = sst [smem:[#allocation82_spill]] %s7440_s21  ;;  %s7333_s7 = smov 14  }
   0xc   :  { %9900 = sst [smem:[#allocation83_spill]] %s7445_s25  ;;  %s7335_s22 = smov 16  }
   0xd   :  { %s7450_s29 = sld [smem:[%s9842_s0 + %s7325_s26]]   ;;  %s7331_s26 = smov 12  }
   0xe   :  { %s7455_s3 = sld [smem:[%s9842_s0 + %s7326_s30]]   ;;  %s7336_s28 = smov 17  }
   0xf   :  { %s7460_s8 = sld [smem:[%s9842_s0 + %s7327_s4]]  }
  0x10   :  { %s7465_s14 = sld [smem:[%s9842_s0 + %s7328_s10]]  }
  0x11   :  { %s7470_s19 = sld [smem:[%s9842_s0 + %s7329_s15]]   ;;  %s7334_s15 = smov 15  }
  0x12   :  { %s7475_s24 = sld [smem:[%s9842_s0 + %s7330_s20]]  }
  0x13   :  { %9901 = sst [smem:[#allocation84_spill]] %s7450_s29 }
  0x14   :  { %s7480_s30 = sld [smem:[%s9842_s0 + %s7331_s26]]  }
  0x15   :  { %9902 = sst [smem:[#allocation85_spill]] %s7460_s8 }
  0x16   :  { %s7485_s6 = sld [smem:[%s9842_s0 + %s7332_s1]]  }
  0x17   :  { %9903 = sst [smem:[#allocation86_spill]] %s7470_s19 }
  0x18   :  { %s7490_s12 = sld [smem:[%s9842_s0 + %s7333_s7]]   ;;  %s7337_s7 = smov 18  }
  0x19   :  { %s7495_s20 = sld [smem:[%s9842_s0 + %s7334_s15]]   ;;  %s7338_s15 = smov 19  }
  0x1a   :  { %9904 = sst [smem:[#allocation87_spill]] %s7480_s30 }
  0x1b   :  { %s7500_s27 = sld [smem:[%s9842_s0 + %s7335_s22]]   ;;  %s7339_s22 = smov 20  }
  0x1c   :  { %s7505_s4 = sld [smem:[%s9842_s0 + %s7336_s28]]   ;;  %s7340_s28 = smov 21  }
  0x1d   :  { %s7510_s21 = sld [smem:[%s9842_s0 + %s7337_s7]]   ;;  %s7341_s7 = smov 22  }
  0x1e   :  { %9905 = sst [smem:[#allocation88_spill]] %s7490_s12 }
  0x1f   :  { %s7515_s17 = sld [smem:[%s9842_s0 + %s7338_s15]]   ;;  %s7342_s15 = smov 23  }
  0x20   :  { %s7520_s13 = sld [smem:[%s9842_s0 + %s7339_s22]]   ;;  %s7343_s22 = smov 24  }
  0x21   :  { %9906 = sst [smem:[#allocation89_spill]] %s7500_s27 }
  0x22   :  { %9907 = sst [smem:[#allocation90_spill]] %s7505_s4 }
  0x23   :  { %s7525_s9 = sld [smem:[%s9842_s0 + %s7340_s28]]   ;;  %s7344_s28 = smov 25  }
  0x24   :  { %s7530_s4 = sld [smem:[%s9842_s0 + %s7341_s7]]   ;;  %s7345_s7 = smov 26  }
  0x25   :  { %9908 = sst [smem:[#allocation91_spill]] %s7515_s17 }
  0x26   :  { %s7535_s29 = sld [smem:[%s9842_s0 + %s7342_s15]]   ;;  %s7346_s15 = smov 27  }
  0x27   :  { %s7540_s25 = sld [smem:[%s9842_s0 + %s7343_s22]]   ;;  %s7347_s22 = smov 28  }
  0x28   :  { %s7550_s17 = sld [smem:[%s9842_s0 + %s7345_s7]]   ;;  %s7349_s7 = smov 30  }
  0x29   :  { %9909 = sst [smem:[#allocation92_spill]] %s7525_s9 }
  0x2a   :  { %s7545_s9 = sld [smem:[%s9842_s0 + %s7344_s28]]   ;;  %s7348_s28 = smov 29  }
  0x2b   :  { %s7560_s27 = sld [smem:[%s9842_s0 + %s7347_s22]]   ;;  %s7351_s22 = smov 32  }
  0x2c   :  { %9910 = sst [smem:[#allocation93_spill]] %s7535_s29 }
  0x2d   :  { %s7555_s29 = sld [smem:[%s9842_s0 + %s7346_s15]]   ;;  %s7350_s15 = smov 31  }
  0x2e   :  { %s7570_s12 = sld [smem:[%s9842_s0 + %s7349_s7]]   ;;  %s7353_s7 = smov 34  }
  0x30   :  { %9911 = sst [smem:[#allocation94_spill]] %s7545_s9 }
  0x31   :  { %9913 = sst [smem:[#allocation96_spill]] %s7560_s27 }
  0x32   :  { %s7565_s9 = sld [smem:[%s9842_s0 + %s7348_s28]]   ;;  %s7352_s28 = smov 33  }
  0x33   :  { %9912 = sst [smem:[#allocation95_spill]] %s7555_s29 }
  0x34   :  { %9914 = sst [smem:[#allocation97_spill]] %s7570_s12 }
  0x35   :  { %s7575_s29 = sld [smem:[%s9842_s0 + %s7350_s15]]   ;;  %s7354_s15 = smov 35  }
  0x36   :  { %s7580_s27 = sld [smem:[%s9842_s0 + %s7351_s22]]   ;;  %s7355_s22 = smov 36  }
  0x37   :  { %s7585_s30 = sld [smem:[%s9842_s0 + %s7352_s28]]   ;;  %s7356_s28 = smov 37  }
  0x38   :  { %s7590_s12 = sld [smem:[%s9842_s0 + %s7353_s7]]   ;;  %s7357_s7 = smov 38  }
  0x39   :  { %s7595_s19 = sld [smem:[%s9842_s0 + %s7354_s15]]   ;;  %s7358_s15 = smov 39  }
  0x3a   :  { %s7605_s8 = sld [smem:[%s9842_s0 + %s7356_s28]]   ;;  %s7360_s28 = smov 41  }
  0x3b   :  { %s7615_s5 = sld [smem:[%s9842_s0 + %s7358_s15]]   ;;  %s7362_s15 = smov 43  }
  0x3c   :  { %9915 = sst [smem:[#allocation98_spill]] %s7580_s27 }
  0x3d   :  { %s7600_s27 = sld [smem:[%s9842_s0 + %s7355_s22]]   ;;  %s7359_s22 = smov 40  }
  0x3e   :  { %9916 = sst [smem:[#allocation99_spill]] %s7590_s12 }
  0x3f   :  { %s7610_s12 = sld [smem:[%s9842_s0 + %s7357_s7]]   ;;  %s7361_s7 = smov 42  }
  0x40   :  { %9918 = sst [smem:[#allocation101_spill]] %s7605_s8 }
  0x41   :  { %9920 = sst [smem:[#allocation103_spill]] %s7615_s5 }
  0x42   :  { %s7625_s8 = sld [smem:[%s9842_s0 + %s7360_s28]]  }
  0x43   :  { %9917 = sst [smem:[#allocation100_spill]] %s7600_s27 }
  0x44   :  { %s7620_s27 = sld [smem:[%s9842_s0 + %s7359_s22]]   ;;  %s7363_s22 = smov 44  }
  0x45   :  { %9919 = sst [smem:[#allocation102_spill]] %s7610_s12 }
  0x46   :  { %s7630_s12 = sld [smem:[%s9842_s0 + %s7361_s7]]  }
  0x47   :  { %s7635_s5 = sld [smem:[%s9842_s0 + %s7362_s15]]  }
  0x4a   :  { %9921 = sst [smem:[#allocation104_spill]] %s7620_s27 }
  0x4b   :  { %s7640_s27 = sld [smem:[%s9842_s0 + %s7363_s22]]  }
  0x4c   :  { %95 = vsyncpa [#allocation3], 0 }
  0x4d   :  { %96 = vsyncpa [#allocation6], 0 }
  0x4e   :  { %97 = vsyncpa [#allocation9], 0 }
  0x4f   :  { %98 = vsyncpa [#allocation12], 0 }
  0x50   :  { %99 = vsyncpa [#allocation15], 0 }
  0x51   :  { %100 = vsyncpa [#allocation18], 0 }
  0x52   :  { %101 = vsyncpa [#allocation21], 0 }
  0x53   :  { %102 = vsyncpa [#allocation24], 0 }
  0x54   :  { %103 = vsyncpa [#allocation27], 0 }
  0x55   :  { %104 = vsyncpa [#allocation30], 0 }
  0x56   :  { %105 = vsyncpa [#allocation33], 0 }
  0x57   :  { %106 = vsyncpa [#allocation36], 0 }
  0x58   :  { %107 = vsyncpa [#allocation39], 0 }
  0x59   :  { %108 = vsyncpa [#allocation42], 0 }
  0x5a   :  { %109 = vsyncpa [#allocation45], 0 }
  0x5b   :  { %110 = vsyncpa [#allocation48], 0 }
  0x5c   :  { %111 = vsyncpa [#allocation51], 0 }
  0x5d   :  { %112 = vsyncpa [#allocation4], 0 }
  0x5e   :  { %113 = vsyncpa [#allocation54], 0  ;;  %s143_s0 = sshll.u32 %s7455_s3, 4  ;;  %s144_s0 = int_to_ptr.hbm [resolvable:$true] %s143_s0 }
  0x5f   :  { %114 = vsyncpa [#allocation57], 0  ;;  %s7364_s28 = smov [#allocation5]   ;;  %s164_s2 = sshll.u32 %s7465_s14, 4  ;;  %s165_s2 = int_to_ptr.hbm [resolvable:$true] %s164_s2 }
  0x60   :  { %s145_s1 = sshll.u32 %s7364_s28, 4  ;;  %s6416_s7 = sshra.s32 %s144_s0, 4  ;;  %s146_s1 = int_to_ptr.vmem [resolvable:$true] %s145_s1  ;;  %s6417_s7 = int_to_ptr.hbm [resolvable:$true] %s6416_s7 }
  0x61   :  { %s6418_s10 = scalar_lea.hbm %s6417_s7, 1  ;;  %s6420_s11 = scalar_lea.hbm %s7455_s3, 1 }
  0x62   :  { %p6419_p0 = scmp.ne.s32.totalorder %s6417_s7, %s6418_s10  ;;  %p6421_p1 = scmp.lt.s32.totalorder %s6417_s7, %s7455_s3 }
  0x63   :  { %p6422_p2 = scmp.lt.s32.totalorder %s6420_s11, %s6418_s10 }
  0x65   :  { %p6423_p3 = por %p6422_p2, %p6421_p1 }
  0x67   :  { %p6424_p4 = pnand %p6423_p3, %p6419_p0 }
  0x69   :  { %6427 = shalt.err (!%p6424_p4)
}
  0x6a   :  { %148 = dma.hbm_to_vmem [thread:$0]  %s144_s0, 16, %s146_s1, [#allocation6]  }
  0x6b   :  { %s7365_s15 = smov [#allocation8]   ;;  %s6440_s18 = sshra.s32 %s165_s2, 4  ;;  %s6441_s18 = int_to_ptr.hbm [resolvable:$true] %s6440_s18 }
  0x6c   :  { %s166_s16 = sshll.u32 %s7365_s15, 4  ;;  %s6442_s22 = scalar_lea.hbm %s6441_s18, 256  ;;  %s167_s16 = int_to_ptr.vmem [resolvable:$true] %s166_s16 }
  0x6d   :  { %p6443_p5 = scmp.ne.s32.totalorder %s6441_s18, %s6442_s22  ;;  %s6444_s23 = scalar_lea.hbm %s7465_s14, 256 }
  0x6e   :  { %p6445_p6 = scmp.lt.s32.totalorder %s6441_s18, %s7465_s14  ;;  %p6446_p7 = scmp.lt.s32.totalorder %s6444_s23, %s6442_s22 }
  0x70   :  { %p6447_p8 = por %p6446_p7, %p6445_p6 }
  0x72   :  { %p6448_p9 = pnand %p6447_p8, %p6443_p5 }
  0x74   :  { %6451 = shalt.err (!%p6448_p9)
}
  0x75   :  { %s7366_s3 = smov 1024   ;;  %s7367_s26 = smov 64  }
  0x76   :  { %172 = dma.hbm_to_vmem [thread:$0]  %s165_s2, 4096, %s167_s16, [#allocation9], %s7366_s3, %s7366_s3, %s7367_s26  }
  0x77   :  { %s189_s0 = sshll.u32 %s7475_s24, 4  ;;  %s7368_s28 = smov [#allocation11]   ;;  %s190_s0 = int_to_ptr.hbm [resolvable:$true] %s189_s0 }
  0x78   :  { %s191_s1 = sshll.u32 %s7368_s28, 4  ;;  %s210_s14 = sshll.u32 %s7485_s6, 4  ;;  %s192_s1 = int_to_ptr.vmem [resolvable:$true] %s191_s1  ;;  %s211_s14 = int_to_ptr.hbm [resolvable:$true] %s210_s14 }
  0x79   :  { %s6464_s7 = sshra.s32 %s190_s0, 4  ;;  %s6468_s11 = scalar_lea.hbm %s7475_s24, 8  ;;  %s6465_s7 = int_to_ptr.hbm [resolvable:$true] %s6464_s7 }
  0x7a   :  { %s6466_s10 = scalar_lea.hbm %s6465_s7, 8  ;;  %p6469_p11 = scmp.lt.s32.totalorder %s6465_s7, %s7475_s24 }
  0x7b   :  { %p6467_p10 = scmp.ne.s32.totalorder %s6465_s7, %s6466_s10  ;;  %p6470_p12 = scmp.lt.s32.totalorder %s6468_s11, %s6466_s10 }
  0x7d   :  { %p6471_p13 = por %p6470_p12, %p6469_p11 }
  0x7f   :  { %p6472_p0 = pnand %p6471_p13, %p6467_p10 }
  0x81   :  { %6475 = shalt.err (!%p6472_p0)
}
  0x82   :  { %194 = dma.hbm_to_vmem [thread:$0]  %s190_s0, 128, %s192_s1, [#allocation12]  }
  0x83   :  { %s7369_s2 = smov [#allocation14]   ;;  %s235_s16 = sshll.u32 %s7495_s20, 4  ;;  %s236_s16 = int_to_ptr.hbm [resolvable:$true] %s235_s16 }
  0x84   :  { %s212_s15 = sshll.u32 %s7369_s2, 4  ;;  %s6488_s18 = sshra.s32 %s211_s14, 4  ;;  %s213_s15 = int_to_ptr.vmem [resolvable:$true] %s212_s15  ;;  %s6489_s18 = int_to_ptr.hbm [resolvable:$true] %s6488_s18 }
  0x85   :  { %s6490_s22 = scalar_lea.hbm %s6489_s18, 8192  ;;  %s6492_s23 = scalar_lea.hbm %s7485_s6, 8192 }
  0x86   :  { %p6491_p1 = scmp.ne.s32.totalorder %s6489_s18, %s6490_s22  ;;  %p6493_p2 = scmp.lt.s32.totalorder %s6489_s18, %s7485_s6 }
  0x87   :  { %p6494_p3 = scmp.lt.s32.totalorder %s6492_s23, %s6490_s22 }
  0x89   :  { %p6495_p4 = por %p6494_p3, %p6493_p2 }
  0x8b   :  { %p6496_p5 = pnand %p6495_p4, %p6491_p1 }
  0x8d   :  { %6499 = shalt.err (!%p6496_p5)
}
  0x8e   :  { %218 = dma.hbm_to_vmem [thread:$0]  %s211_s14, 131072, %s213_s15, [#allocation15], %s7366_s3, %s7366_s3, %s7367_s26  }
  0x8f   :  { %s259_s24 = sshll.u32 %s7510_s21, 4  ;;  %s7370_s0 = smov [#allocation17]   ;;  %s260_s24 = int_to_ptr.hbm [resolvable:$true] %s259_s24 }
  0x90   :  { %s237_s28 = sshll.u32 %s7370_s0, 4  ;;  %s6512_s1 = sshra.s32 %s236_s16, 4  ;;  %s238_s28 = int_to_ptr.vmem [resolvable:$true] %s237_s28  ;;  %s6513_s1 = int_to_ptr.hbm [resolvable:$true] %s6512_s1 }
  0x91   :  { %s6514_s7 = scalar_lea.hbm %s6513_s1, 8  ;;  %s6516_s6 = scalar_lea.hbm %s7495_s20, 8 }
  0x92   :  { %p6515_p6 = scmp.ne.s32.totalorder %s6513_s1, %s6514_s7  ;;  %p6517_p7 = scmp.lt.s32.totalorder %s6513_s1, %s7495_s20 }
  0x93   :  { %p6518_p8 = scmp.lt.s32.totalorder %s6516_s6, %s6514_s7 }
  0x95   :  { %p6519_p9 = por %p6518_p8, %p6517_p7 }
  0x97   :  { %p6520_p10 = pnand %p6519_p9, %p6515_p6 }
  0x99   :  { %6523 = shalt.err (!%p6520_p10)
}
  0x9a   :  { %240 = dma.hbm_to_vmem [thread:$0]  %s236_s16, 128, %s238_s28, [#allocation18]  }
  0x9b   :  { %s7371_s3 = smov [#allocation20]   ;;  %s283_s14 = sshll.u32 %s7520_s13, 4  ;;  %s284_s14 = int_to_ptr.hbm [resolvable:$true] %s283_s14 }
  0x9c   :  { %s261_s26 = sshll.u32 %s7371_s3, 4  ;;  %s6536_s10 = sshra.s32 %s260_s24, 4  ;;  %s262_s26 = int_to_ptr.vmem [resolvable:$true] %s261_s26  ;;  %s6537_s10 = int_to_ptr.hbm [resolvable:$true] %s6536_s10 }
  0x9d   :  { %s6538_s11 = scalar_lea.hbm %s6537_s10, 1  ;;  %s6540_s2 = scalar_lea.hbm %s7510_s21, 1 }
  0x9e   :  { %p6539_p11 = scmp.ne.s32.totalorder %s6537_s10, %s6538_s11  ;;  %p6541_p12 = scmp.lt.s32.totalorder %s6537_s10, %s7510_s21 }
  0x9f   :  { %p6542_p13 = scmp.lt.s32.totalorder %s6540_s2, %s6538_s11 }
  0xa1   :  { %p6543_p0 = por %p6542_p13, %p6541_p12 }
  0xa3   :  { %p6544_p1 = pnand %p6543_p0, %p6539_p11 }
  0xa5   :  { %6547 = shalt.err (!%p6544_p1)
}
  0xa6   :  { %264 = dma.hbm_to_vmem [thread:$0]  %s260_s24, 16, %s262_s26, [#allocation21]  }
  0xa7   :  { %s305_s20 = sshll.u32 %s7530_s4, 4  ;;  %s7372_s15 = smov [#allocation23]   ;;  %s306_s20 = int_to_ptr.hbm [resolvable:$true] %s305_s20 }
  0xa8   :  { %s285_s16 = sshll.u32 %s7372_s15, 4  ;;  %s6560_s18 = sshra.s32 %s284_s14, 4  ;;  %s286_s16 = int_to_ptr.vmem [resolvable:$true] %s285_s16  ;;  %s6561_s18 = int_to_ptr.hbm [resolvable:$true] %s6560_s18 }
  0xa9   :  { %s6562_s22 = scalar_lea.hbm %s6561_s18, 8  ;;  %s6564_s23 = scalar_lea.hbm %s7520_s13, 8 }
  0xaa   :  { %p6563_p2 = scmp.ne.s32.totalorder %s6561_s18, %s6562_s22  ;;  %p6565_p3 = scmp.lt.s32.totalorder %s6561_s18, %s7520_s13 }
  0xab   :  { %p6566_p4 = scmp.lt.s32.totalorder %s6564_s23, %s6562_s22 }
  0xad   :  { %p6567_p5 = por %p6566_p4, %p6565_p3 }
  0xaf   :  { %p6568_p6 = pnand %p6567_p5, %p6563_p2 }
  0xb1   :  { %6571 = shalt.err (!%p6568_p6)
}
  0xb2   :  { %288 = dma.hbm_to_vmem [thread:$0]  %s284_s14, 128, %s286_s16, [#allocation24]  }
  0xb3   :  { %s7373_s21 = smov [#allocation26]   ;;  %s326_s0 = sshll.u32 %s7540_s25, 4  ;;  %s7671_s0 = int_to_ptr.hbm [resolvable:$true] %s326_s0 }
  0xb4   :  { %s307_s24 = sshll.u32 %s7373_s21, 4  ;;  %s6584_s28 = sshra.s32 %s306_s20, 4  ;;  %s308_s24 = int_to_ptr.vmem [resolvable:$true] %s307_s24  ;;  %s6585_s28 = int_to_ptr.hbm [resolvable:$true] %s6584_s28 }
  0xb5   :  { %s6586_s1 = scalar_lea.hbm %s6585_s28, 2  ;;  %s6588_s7 = scalar_lea.hbm %s7530_s4, 2 }
  0xb6   :  { %p6587_p7 = scmp.ne.s32.totalorder %s6585_s28, %s6586_s1  ;;  %p6589_p8 = scmp.lt.s32.totalorder %s6585_s28, %s7530_s4 }
  0xb7   :  { %p6590_p9 = scmp.lt.s32.totalorder %s6588_s7, %s6586_s1 }
  0xb9   :  { %p6591_p10 = por %p6590_p9, %p6589_p8 }
  0xbb   :  { %p6592_p11 = pnand %p6591_p10, %p6587_p7 }
  0xbd   :  { %6595 = shalt.err (!%p6592_p11)
}
  0xbe   :  { %310 = dma.hbm_to_vmem [thread:$0]  %s306_s20, 32, %s308_s24, [#allocation27]  }
  0xbf   :  { %s7374_s13 = smov [#allocation29]   ;;  %s351_s3 = sshll.u32 %s7550_s17, 4  ;;  %s352_s3 = int_to_ptr.hbm [resolvable:$true] %s351_s3 }
  0xc0   :  { %s328_s6 = sshll.u32 %s7374_s13, 4  ;;  %s6608_s26 = sshra.s32 %s7671_s0, 4  ;;  %s329_s6 = int_to_ptr.vmem [resolvable:$true] %s328_s6  ;;  %s6609_s26 = int_to_ptr.hbm [resolvable:$true] %s6608_s26 }
  0xc1   :  { %s6610_s14 = scalar_lea.hbm %s6609_s26, 256  ;;  %s6612_s10 = scalar_lea.hbm %s7540_s25, 256 }
  0xc2   :  { %p6611_p12 = scmp.ne.s32.totalorder %s6609_s26, %s6610_s14  ;;  %p6613_p13 = scmp.lt.s32.totalorder %s6609_s26, %s7540_s25 }
  0xc3   :  { %p6614_p0 = scmp.lt.s32.totalorder %s6612_s10, %s6610_s14 }
  0xc5   :  { %p6615_p1 = por %p6614_p0, %p6613_p13 }
  0xc7   :  { %p6616_p2 = pnand %p6615_p1, %p6611_p12 }
  0xc9   :  { %6619 = shalt.err (!%p6616_p2)
}
  0xca   :  { %s7375_s4 = smov 128   ;;  %s7376_s11 = smov 8  }
  0xcb   :  { %334 = dma.hbm_to_vmem [thread:$0]  %s7671_s0, 4096, %s329_s6, [#allocation30], %s7375_s4, %s7375_s4, %s7376_s11  }
  0xcc   :  { %s7377_s2 = smov [#allocation32]   ;;  %s375_s15 = sshll.u32 %s7565_s9, 4  ;;  %s376_s15 = int_to_ptr.hbm [resolvable:$true] %s375_s15 }
  0xcd   :  { %s353_s20 = sshll.u32 %s7377_s2, 4  ;;  %s6632_s16 = sshra.s32 %s352_s3, 4  ;;  %s354_s20 = int_to_ptr.vmem [resolvable:$true] %s353_s20  ;;  %s6633_s16 = int_to_ptr.hbm [resolvable:$true] %s6632_s16 }
  0xce   :  { %s6634_s25 = scalar_lea.hbm %s6633_s16, 1  ;;  %s6636_s18 = scalar_lea.hbm %s7550_s17, 1 }
  0xcf   :  { %p6635_p3 = scmp.ne.s32.totalorder %s6633_s16, %s6634_s25  ;;  %p6637_p4 = scmp.lt.s32.totalorder %s6633_s16, %s7550_s17 }
  0xd0   :  { %p6638_p5 = scmp.lt.s32.totalorder %s6636_s18, %s6634_s25 }
  0xd2   :  { %p6639_p6 = por %p6638_p5, %p6637_p4 }
  0xd4   :  { %p6640_p7 = pnand %p6639_p6, %p6635_p3 }
  0xd6   :  { %6643 = shalt.err (!%p6640_p7)
}
  0xd7   :  { %356 = dma.hbm_to_vmem [thread:$0]  %s352_s3, 16, %s354_s20, [#allocation33]  }
  0xd8   :  { %s397_s22 = sshll.u32 %s7575_s29, 4  ;;  %s7378_s23 = smov [#allocation35]   ;;  %s398_s22 = int_to_ptr.hbm [resolvable:$true] %s397_s22 }
  0xd9   :  { %s377_s21 = sshll.u32 %s7378_s23, 4  ;;  %s6656_s24 = sshra.s32 %s376_s15, 4  ;;  %s378_s21 = int_to_ptr.vmem [resolvable:$true] %s377_s21  ;;  %s6657_s24 = int_to_ptr.hbm [resolvable:$true] %s6656_s24 }
  0xda   :  { %s6658_s0 = scalar_lea.hbm %s6657_s24, 1  ;;  %s6660_s28 = scalar_lea.hbm %s7565_s9, 1 }
  0xdb   :  { %p6659_p8 = scmp.ne.s32.totalorder %s6657_s24, %s6658_s0  ;;  %p6661_p9 = scmp.lt.s32.totalorder %s6657_s24, %s7565_s9 }
  0xdc   :  { %p6662_p10 = scmp.lt.s32.totalorder %s6660_s28, %s6658_s0 }
  0xde   :  { %p6663_p11 = por %p6662_p10, %p6661_p9 }
  0xe0   :  { %p6664_p12 = pnand %p6663_p11, %p6659_p8 }
  0xe2   :  { %6667 = shalt.err (!%p6664_p12)
}
  0xe3   :  { %380 = dma.hbm_to_vmem [thread:$0]  %s376_s15, 16, %s378_s21, [#allocation36]  }
  0xe4   :  { %s7379_s17 = smov [#allocation38]   ;;  %s419_s7 = sshll.u32 %s7585_s30, 4  ;;  %s420_s7 = int_to_ptr.hbm [resolvable:$true] %s419_s7 }
  0xe5   :  { %s399_s1 = sshll.u32 %s7379_s17, 4  ;;  %s6680_s13 = sshra.s32 %s398_s22, 4  ;;  %s400_s1 = int_to_ptr.vmem [resolvable:$true] %s399_s1  ;;  %s6681_s13 = int_to_ptr.hbm [resolvable:$true] %s6680_s13 }
  0xe6   :  { %s6682_s6 = scalar_lea.hbm %s6681_s13, 4  ;;  %s6684_s3 = scalar_lea.hbm %s7575_s29, 4 }
  0xe7   :  { %p6683_p13 = scmp.ne.s32.totalorder %s6681_s13, %s6682_s6  ;;  %p6685_p0 = scmp.lt.s32.totalorder %s6681_s13, %s7575_s29 }
  0xe8   :  { %p6686_p1 = scmp.lt.s32.totalorder %s6684_s3, %s6682_s6 }
  0xea   :  { %p6687_p2 = por %p6686_p1, %p6685_p0 }
  0xec   :  { %p6688_p3 = pnand %p6687_p2, %p6683_p13 }
  0xee   :  { %6691 = shalt.err (!%p6688_p3)
}
  0xef   :  { %402 = dma.hbm_to_vmem [thread:$0]  %s398_s22, 64, %s400_s1, [#allocation39]  }
  0xf0   :  { %s7380_s9 = smov [#allocation41]   ;;  %s440_s14 = sshll.u32 %s7595_s19, 4  ;;  %s441_s14 = int_to_ptr.hbm [resolvable:$true] %s440_s14 }
  0xf1   :  { %s421_s26 = sshll.u32 %s7380_s9, 4  ;;  %s6704_s10 = sshra.s32 %s420_s7, 4  ;;  %s422_s26 = int_to_ptr.vmem [resolvable:$true] %s421_s26  ;;  %s6705_s10 = int_to_ptr.hbm [resolvable:$true] %s6704_s10 }
  0xf2   :  { %s6706_s4 = scalar_lea.hbm %s6705_s10, 1  ;;  %s6708_s2 = scalar_lea.hbm %s7585_s30, 1 }
  0xf3   :  { %p6707_p4 = scmp.ne.s32.totalorder %s6705_s10, %s6706_s4  ;;  %p6709_p5 = scmp.lt.s32.totalorder %s6705_s10, %s7585_s30 }
  0xf4   :  { %p6710_p6 = scmp.lt.s32.totalorder %s6708_s2, %s6706_s4 }
  0xf6   :  { %p6711_p7 = por %p6710_p6, %p6709_p5 }
  0xf8   :  { %p6712_p8 = pnand %p6711_p7, %p6707_p4 }
  0xfa   :  { %6715 = shalt.err (!%p6712_p8)
}
  0xfb   :  { %424 = dma.hbm_to_vmem [thread:$0]  %s420_s7, 16, %s422_s26, [#allocation42]  }
  0xfc   :  { %s9922_s29 = sld [smem:[#allocation101_spill]]  ;;  %s7381_s20 = smov [#allocation44]  }
  0xfd   :  { %s442_s15 = sshll.u32 %s7381_s20, 4  ;;  %s6728_s25 = sshra.s32 %s441_s14, 4  ;;  %s443_s15 = int_to_ptr.vmem [resolvable:$true] %s442_s15  ;;  %s6729_s25 = int_to_ptr.hbm [resolvable:$true] %s6728_s25 }
  0xfe   :  { %s6730_s18 = scalar_lea.hbm %s6729_s25, 256  ;;  %s6732_s30 = scalar_lea.hbm %s7595_s19, 256 }
  0xff   :  { %p6731_p9 = scmp.ne.s32.totalorder %s6729_s25, %s6730_s18  ;;  %p6733_p10 = scmp.lt.s32.totalorder %s6729_s25, %s7595_s19 }
 0x100   :  { %p6734_p11 = scmp.lt.s32.totalorder %s6732_s30, %s6730_s18 }
 0x102   :  { %s465_s16 = sshll.u32 %s9922_s29, 4  ;;  %p6735_p12 = por %p6734_p11, %p6733_p10  ;;  %s7694_s16 = int_to_ptr.hbm [resolvable:$true] %s465_s16 }
 0x104   :  { %p6736_p13 = pnand %p6735_p12, %p6731_p9 }
 0x106   :  { %6739 = shalt.err (!%p6736_p13)
}
 0x107   :  { %s7382_s22 = smov 256   ;;  %s9923_s23 = sld [smem:[#allocation78_spill]] }
 0x108   :  { %s7383_s21 = smov 16   ;;  %s7384_s0 = smov [#allocation47]  }
 0x109   :  { %448 = dma.hbm_to_vmem [thread:$0]  %s441_s14, 4096, %s443_s15, [#allocation45], %s7382_s22, %s7382_s22, %s7383_s21  }
 0x10a   :  { %s467_s28 = sshll.u32 %s7384_s0, 4  ;;  %s6752_s19 = sshra.s32 %s7694_s16, 4  ;;  %s468_s28 = int_to_ptr.vmem [resolvable:$true] %s467_s28  ;;  %s6753_s19 = int_to_ptr.hbm [resolvable:$true] %s6752_s19 }
 0x10b   :  { %s6754_s17 = scalar_lea.hbm %s6753_s19, 2  ;;  %s6756_s1 = scalar_lea.hbm %s9922_s29, 2 }
 0x10c   :  { %p6755_p0 = scmp.ne.s32.totalorder %s6753_s19, %s6754_s17  ;;  %p6757_p1 = scmp.lt.s32.totalorder %s6753_s19, %s9922_s29 }
 0x10d   :  { %s120_s24 = sshll.u32 %s9923_s23, 4  ;;  %p6758_p2 = scmp.lt.s32.totalorder %s6756_s1, %s6754_s17  ;;  %s121_s24 = int_to_ptr.hbm [resolvable:$true] %s120_s24 }
 0x10f   :  { %p6759_p3 = por %p6758_p2, %p6757_p1 }
 0x111   :  { %p6760_p4 = pnand %p6759_p3, %p6755_p0 }
 0x113   :  { %6763 = shalt.err (!%p6760_p4)
}
 0x114   :  { %s9924_s7 = sld [smem:[#allocation85_spill]]  ;;  %s7385_s13 = smov [#allocation2]  }
 0x115   :  { %470 = dma.hbm_to_vmem [thread:$0]  %s7694_s16, 32, %s468_s28, [#allocation48]  }
 0x116   :  { %s122_s6 = sshll.u32 %s7385_s13, 4  ;;  %s6776_s9 = sshra.s32 %s121_s24, 4  ;;  %s123_s6 = int_to_ptr.vmem [resolvable:$true] %s122_s6  ;;  %s6777_s9 = int_to_ptr.hbm [resolvable:$true] %s6776_s9 }
 0x117   :  { %s6778_s26 = scalar_lea.hbm %s6777_s9, 8  ;;  %s6780_s14 = scalar_lea.hbm %s9923_s23, 8 }
 0x118   :  { %p6779_p5 = scmp.ne.s32.totalorder %s6777_s9, %s6778_s26  ;;  %p6781_p6 = scmp.lt.s32.totalorder %s6777_s9, %s9923_s23 }
 0x119   :  { %p6782_p7 = scmp.lt.s32.totalorder %s6780_s14, %s6778_s26 }
 0x11a   :  { %s154_s3 = sshll.u32 %s9924_s7, 4  ;;  %s155_s3 = int_to_ptr.hbm [resolvable:$true] %s154_s3 }
 0x11b   :  { %p6783_p8 = por %p6782_p7, %p6781_p6 }
 0x11d   :  { %p6784_p9 = pnand %p6783_p8, %p6779_p5 }
 0x11f   :  { %6787 = shalt.err (!%p6784_p9)
}
 0x120   :  { %125 = dma.hbm_to_vmem [thread:$0]  %s121_s24, 128, %s123_s6, [#allocation3]  }
 0x121   :  { %s9925_s10 = sld [smem:[#allocation86_spill]]  ;;  %s7386_s2 = smov [#allocation7]  }
 0x122   :  { %s156_s29 = sshll.u32 %s7386_s2, 4  ;;  %s6800_s20 = sshra.s32 %s155_s3, 4  ;;  %s157_s29 = int_to_ptr.vmem [resolvable:$true] %s156_s29  ;;  %s6801_s20 = int_to_ptr.hbm [resolvable:$true] %s6800_s20 }
 0x123   :  { %s6802_s15 = scalar_lea.hbm %s6801_s20, 1  ;;  %s6804_s16 = scalar_lea.hbm %s9924_s7, 1 }
 0x124   :  { %p6803_p10 = scmp.ne.s32.totalorder %s6801_s20, %s6802_s15  ;;  %p6805_p11 = scmp.lt.s32.totalorder %s6801_s20, %s9924_s7 }
 0x125   :  { %p6806_p12 = scmp.lt.s32.totalorder %s6804_s16, %s6802_s15 }
 0x127   :  { %s178_s4 = sshll.u32 %s9925_s10, 4  ;;  %p6807_p13 = por %p6806_p12, %p6805_p11  ;;  %s179_s4 = int_to_ptr.hbm [resolvable:$true] %s178_s4 }
 0x129   :  { %p6808_p0 = pnand %p6807_p13, %p6803_p10 }
 0x12b   :  { %6811 = shalt.err (!%p6808_p0)
}
 0x12c   :  { %159 = dma.hbm_to_vmem [thread:$0]  %s155_s3, 16, %s157_s29, [#allocation6]  }
 0x12d   :  { %s9926_s25 = sld [smem:[#allocation87_spill]]  ;;  %s7387_s18 = smov [#allocation10]  }
 0x12e   :  { %s180_s30 = sshll.u32 %s7387_s18, 4  ;;  %s6824_s24 = sshra.s32 %s179_s4, 4  ;;  %s181_s30 = int_to_ptr.vmem [resolvable:$true] %s180_s30  ;;  %s6825_s24 = int_to_ptr.hbm [resolvable:$true] %s6824_s24 }
 0x12f   :  { %s6826_s0 = scalar_lea.hbm %s6825_s24, 8  ;;  %s6828_s28 = scalar_lea.hbm %s9925_s10, 8 }
 0x130   :  { %p6827_p1 = scmp.ne.s32.totalorder %s6825_s24, %s6826_s0  ;;  %p6829_p2 = scmp.lt.s32.totalorder %s6825_s24, %s9925_s10 }
 0x131   :  { %p6830_p3 = scmp.lt.s32.totalorder %s6828_s28, %s6826_s0 }
 0x133   :  { %s200_s23 = sshll.u32 %s9926_s25, 4  ;;  %p6831_p4 = por %p6830_p3, %p6829_p2  ;;  %s201_s23 = int_to_ptr.hbm [resolvable:$true] %s200_s23 }
 0x135   :  { %p6832_p5 = pnand %p6831_p4, %p6827_p1 }
 0x137   :  { %6835 = shalt.err (!%p6832_p5)
}
 0x138   :  { %183 = dma.hbm_to_vmem [thread:$0]  %s179_s4, 128, %s181_s30, [#allocation9]  }
 0x139   :  { %s9927_s19 = sld [smem:[#allocation88_spill]]  ;;  %s7388_s1 = smov [#allocation13]  }
 0x13a   :  { %s202_s7 = sshll.u32 %s7388_s1, 4  ;;  %s6848_s13 = sshra.s32 %s201_s23, 4  ;;  %s203_s7 = int_to_ptr.vmem [resolvable:$true] %s202_s7  ;;  %s6849_s13 = int_to_ptr.hbm [resolvable:$true] %s6848_s13 }
 0x13b   :  { %s6850_s6 = scalar_lea.hbm %s6849_s13, 8  ;;  %s6852_s3 = scalar_lea.hbm %s9926_s25, 8 }
 0x13c   :  { %p6851_p6 = scmp.ne.s32.totalorder %s6849_s13, %s6850_s6  ;;  %p6853_p7 = scmp.lt.s32.totalorder %s6849_s13, %s9926_s25 }
 0x13d   :  { %p6854_p8 = scmp.lt.s32.totalorder %s6852_s3, %s6850_s6 }
 0x13f   :  { %s224_s17 = sshll.u32 %s9927_s19, 4  ;;  %p6855_p9 = por %p6854_p8, %p6853_p7  ;;  %s225_s17 = int_to_ptr.hbm [resolvable:$true] %s224_s17 }
 0x141   :  { %p6856_p10 = pnand %p6855_p9, %p6851_p6 }
 0x143   :  { %6859 = shalt.err (!%p6856_p10)
}
 0x144   :  { %205 = dma.hbm_to_vmem [thread:$0]  %s201_s23, 128, %s203_s7, [#allocation12]  }
 0x145   :  { %s9928_s9 = sld [smem:[#allocation89_spill]]  ;;  %s7389_s26 = smov [#allocation16]  }
 0x146   :  { %s226_s14 = sshll.u32 %s7389_s26, 4  ;;  %s6872_s4 = sshra.s32 %s225_s17, 4  ;;  %s227_s14 = int_to_ptr.vmem [resolvable:$true] %s226_s14  ;;  %s6873_s4 = int_to_ptr.hbm [resolvable:$true] %s6872_s4 }
 0x147   :  { %s6874_s2 = scalar_lea.hbm %s6873_s4, 8  ;;  %s6876_s29 = scalar_lea.hbm %s9927_s19, 8 }
 0x148   :  { %p6875_p11 = scmp.ne.s32.totalorder %s6873_s4, %s6874_s2  ;;  %p6877_p12 = scmp.lt.s32.totalorder %s6873_s4, %s9927_s19 }
 0x149   :  { %p6878_p13 = scmp.lt.s32.totalorder %s6876_s29, %s6874_s2 }
 0x14b   :  { %s246_s10 = sshll.u32 %s9928_s9, 4  ;;  %p6879_p0 = por %p6878_p13, %p6877_p12  ;;  %s247_s10 = int_to_ptr.hbm [resolvable:$true] %s246_s10 }
 0x14d   :  { %p6880_p1 = pnand %p6879_p0, %p6875_p11 }
 0x14f   :  { %6883 = shalt.err (!%p6880_p1)
}
 0x150   :  { %229 = dma.hbm_to_vmem [thread:$0]  %s225_s17, 128, %s227_s14, [#allocation15]  }
 0x151   :  { %s9929_s20 = sld [smem:[#allocation91_spill]]  ;;  %s7390_s16 = smov [#allocation19]  }
 0x152   :  { %s248_s25 = sshll.u32 %s7390_s16, 4  ;;  %s6896_s18 = sshra.s32 %s247_s10, 4  ;;  %s249_s25 = int_to_ptr.vmem [resolvable:$true] %s248_s25  ;;  %s6897_s18 = int_to_ptr.hbm [resolvable:$true] %s6896_s18 }
 0x153   :  { %s6898_s30 = scalar_lea.hbm %s6897_s18, 8  ;;  %s6900_s23 = scalar_lea.hbm %s9928_s9, 8 }
 0x154   :  { %p6899_p2 = scmp.ne.s32.totalorder %s6897_s18, %s6898_s30  ;;  %p6901_p3 = scmp.lt.s32.totalorder %s6897_s18, %s9928_s9 }
 0x155   :  { %p6902_p4 = scmp.lt.s32.totalorder %s6900_s23, %s6898_s30 }
 0x157   :  { %s269_s15 = sshll.u32 %s9929_s20, 4  ;;  %p6903_p5 = por %p6902_p4, %p6901_p3  ;;  %s7722_s15 = int_to_ptr.hbm [resolvable:$true] %s269_s15 }
 0x159   :  { %p6904_p6 = pnand %p6903_p5, %p6899_p2 }
 0x15b   :  { %6907 = shalt.err (!%p6904_p6)
}
 0x15c   :  { %251 = dma.hbm_to_vmem [thread:$0]  %s247_s10, 128, %s249_s25, [#allocation18]  }
 0x15d   :  { %s9930_s24 = sld [smem:[#allocation92_spill]]  ;;  %s7391_s0 = smov [#allocation22]  }
 0x15e   :  { %s271_s28 = sshll.u32 %s7391_s0, 4  ;;  %s6920_s17 = sshra.s32 %s7722_s15, 4  ;;  %s272_s28 = int_to_ptr.vmem [resolvable:$true] %s271_s28  ;;  %s6921_s17 = int_to_ptr.hbm [resolvable:$true] %s6920_s17 }
 0x15f   :  { %s6922_s1 = scalar_lea.hbm %s6921_s17, 64  ;;  %s6924_s7 = scalar_lea.hbm %s9929_s20, 64 }
 0x160   :  { %p6923_p7 = scmp.ne.s32.totalorder %s6921_s17, %s6922_s1  ;;  %p6925_p8 = scmp.lt.s32.totalorder %s6921_s17, %s9929_s20 }
 0x161   :  { %p6926_p9 = scmp.lt.s32.totalorder %s6924_s7, %s6922_s1 }
 0x163   :  { %s294_s19 = sshll.u32 %s9930_s24, 4  ;;  %p6927_p10 = por %p6926_p9, %p6925_p8  ;;  %s295_s19 = int_to_ptr.hbm [resolvable:$true] %s294_s19 }
 0x165   :  { %p6928_p11 = pnand %p6927_p10, %p6923_p7 }
 0x167   :  { %6931 = shalt.err (!%p6928_p11)
}
 0x168   :  { %s9931_s13 = sld [smem:[#allocation93_spill]]  ;;  %s7392_s3 = smov [#allocation25]  }
 0x169   :  { %277 = dma.hbm_to_vmem [thread:$0]  %s7722_s15, 1024, %s272_s28, [#allocation21], %s7382_s22, %s7382_s22, %s7383_s21  }
 0x16a   :  { %s296_s9 = sshll.u32 %s7392_s3, 4  ;;  %s6944_s26 = sshra.s32 %s295_s19, 4  ;;  %s297_s9 = int_to_ptr.vmem [resolvable:$true] %s296_s9  ;;  %s6945_s26 = int_to_ptr.hbm [resolvable:$true] %s6944_s26 }
 0x16b   :  { %s6946_s14 = scalar_lea.hbm %s6945_s26, 2  ;;  %s6948_s10 = scalar_lea.hbm %s9930_s24, 2 }
 0x16c   :  { %p6947_p12 = scmp.ne.s32.totalorder %s6945_s26, %s6946_s14  ;;  %p6949_p13 = scmp.lt.s32.totalorder %s6945_s26, %s9930_s24 }
 0x16d   :  { %p6950_p0 = scmp.lt.s32.totalorder %s6948_s10, %s6946_s14 }
 0x16e   :  { %s316_s6 = sshll.u32 %s9931_s13, 4  ;;  %s317_s6 = int_to_ptr.hbm [resolvable:$true] %s316_s6 }
 0x16f   :  { %p6951_p1 = por %p6950_p0, %p6949_p13 }
 0x171   :  { %p6952_p2 = pnand %p6951_p1, %p6947_p12 }
 0x173   :  { %6955 = shalt.err (!%p6952_p2)
}
 0x174   :  { %299 = dma.hbm_to_vmem [thread:$0]  %s295_s19, 32, %s297_s9, [#allocation24]  }
 0x175   :  { %s9932_s4 = sld [smem:[#allocation94_spill]]  ;;  %s7393_s22 = smov [#allocation28]  }
 0x176   :  { %s318_s21 = sshll.u32 %s7393_s22, 4  ;;  %s6968_s29 = sshra.s32 %s317_s6, 4  ;;  %s319_s21 = int_to_ptr.vmem [resolvable:$true] %s318_s21  ;;  %s6969_s29 = int_to_ptr.hbm [resolvable:$true] %s6968_s29 }
 0x177   :  { %s6970_s20 = scalar_lea.hbm %s6969_s29, 2  ;;  %s6972_s15 = scalar_lea.hbm %s9931_s13, 2 }
 0x178   :  { %p6971_p3 = scmp.ne.s32.totalorder %s6969_s29, %s6970_s20  ;;  %p6973_p4 = scmp.lt.s32.totalorder %s6969_s29, %s9931_s13 }
 0x179   :  { %p6974_p5 = scmp.lt.s32.totalorder %s6972_s15, %s6970_s20 }
 0x17b   :  { %s340_s2 = sshll.u32 %s9932_s4, 4  ;;  %p6975_p6 = por %p6974_p5, %p6973_p4  ;;  %s341_s2 = int_to_ptr.hbm [resolvable:$true] %s340_s2 }
 0x17d   :  { %p6976_p7 = pnand %p6975_p6, %p6971_p3 }
 0x17f   :  { %6979 = shalt.err (!%p6976_p7)
}
 0x180   :  { %321 = dma.hbm_to_vmem [thread:$0]  %s317_s6, 32, %s319_s21, [#allocation27]  }
 0x181   :  { %s9933_s16 = sld [smem:[#allocation95_spill]]  ;;  %s7394_s18 = smov [#allocation31]  }
 0x182   :  { %s342_s30 = sshll.u32 %s7394_s18, 4  ;;  %s6992_s23 = sshra.s32 %s341_s2, 4  ;;  %s343_s30 = int_to_ptr.vmem [resolvable:$true] %s342_s30  ;;  %s6993_s23 = int_to_ptr.hbm [resolvable:$true] %s6992_s23 }
 0x183   :  { %s6994_s24 = scalar_lea.hbm %s6993_s23, 1  ;;  %s6996_s0 = scalar_lea.hbm %s9932_s4, 1 }
 0x184   :  { %p6995_p8 = scmp.ne.s32.totalorder %s6993_s23, %s6994_s24  ;;  %p6997_p9 = scmp.lt.s32.totalorder %s6993_s23, %s9932_s4 }
 0x185   :  { %p6998_p10 = scmp.lt.s32.totalorder %s6996_s0, %s6994_s24 }
 0x187   :  { %s362_s25 = sshll.u32 %s9933_s16, 4  ;;  %p6999_p11 = por %p6998_p10, %p6997_p9  ;;  %s363_s25 = int_to_ptr.hbm [resolvable:$true] %s362_s25 }
 0x189   :  { %p7000_p12 = pnand %p6999_p11, %p6995_p8 }
 0x18b   :  { %7003 = shalt.err (!%p7000_p12)
}
 0x18c   :  { %345 = dma.hbm_to_vmem [thread:$0]  %s341_s2, 16, %s343_s30, [#allocation30]  }
 0x18d   :  { %s9934_s28 = sld [smem:[#allocation97_spill]]  ;;  %s7395_s19 = smov [#allocation34]  }
 0x18e   :  { %s364_s17 = sshll.u32 %s7395_s19, 4  ;;  %s7016_s7 = sshra.s32 %s363_s25, 4  ;;  %s365_s17 = int_to_ptr.vmem [resolvable:$true] %s364_s17  ;;  %s7017_s7 = int_to_ptr.hbm [resolvable:$true] %s7016_s7 }
 0x18f   :  { %s7018_s13 = scalar_lea.hbm %s7017_s7, 1  ;;  %s7020_s6 = scalar_lea.hbm %s9933_s16, 1 }
 0x190   :  { %p7019_p13 = scmp.ne.s32.totalorder %s7017_s7, %s7018_s13  ;;  %p7021_p0 = scmp.lt.s32.totalorder %s7017_s7, %s9933_s16 }
 0x191   :  { %p7022_p1 = scmp.lt.s32.totalorder %s7020_s6, %s7018_s13 }
 0x193   :  { %s386_s1 = sshll.u32 %s9934_s28, 4  ;;  %p7023_p2 = por %p7022_p1, %p7021_p0  ;;  %s387_s1 = int_to_ptr.hbm [resolvable:$true] %s386_s1 }
 0x195   :  { %p7024_p3 = pnand %p7023_p2, %p7019_p13 }
 0x197   :  { %7027 = shalt.err (!%p7024_p3)
}
 0x198   :  { %367 = dma.hbm_to_vmem [thread:$0]  %s363_s25, 16, %s365_s17, [#allocation33]  }
 0x199   :  { %s9935_s3 = sld [smem:[#allocation98_spill]]  ;;  %s7396_s26 = smov [#allocation37]  }
 0x19a   :  { %s388_s14 = sshll.u32 %s7396_s26, 4  ;;  %s7040_s10 = sshra.s32 %s387_s1, 4  ;;  %s389_s14 = int_to_ptr.vmem [resolvable:$true] %s388_s14  ;;  %s7041_s10 = int_to_ptr.hbm [resolvable:$true] %s7040_s10 }
 0x19b   :  { %s7042_s4 = scalar_lea.hbm %s7041_s10, 8  ;;  %s7044_s22 = scalar_lea.hbm %s9934_s28, 8 }
 0x19c   :  { %p7043_p4 = scmp.ne.s32.totalorder %s7041_s10, %s7042_s4  ;;  %p7045_p5 = scmp.lt.s32.totalorder %s7041_s10, %s9934_s28 }
 0x19d   :  { %p7046_p6 = scmp.lt.s32.totalorder %s7044_s22, %s7042_s4 }
 0x19f   :  { %s408_s9 = sshll.u32 %s9935_s3, 4  ;;  %p7047_p7 = por %p7046_p6, %p7045_p5  ;;  %s409_s9 = int_to_ptr.hbm [resolvable:$true] %s408_s9 }
 0x1a1   :  { %p7048_p8 = pnand %p7047_p7, %p7043_p4 }
 0x1a3   :  { %7051 = shalt.err (!%p7048_p8)
}
 0x1a4   :  { %391 = dma.hbm_to_vmem [thread:$0]  %s387_s1, 128, %s389_s14, [#allocation36]  }
 0x1a5   :  { %s9936_s21 = sld [smem:[#allocation99_spill]]  ;;  %s7397_s2 = smov [#allocation40]  }
 0x1a6   :  { %s410_s29 = sshll.u32 %s7397_s2, 4  ;;  %s7064_s15 = sshra.s32 %s409_s9, 4  ;;  %s411_s29 = int_to_ptr.vmem [resolvable:$true] %s410_s29  ;;  %s7065_s15 = int_to_ptr.hbm [resolvable:$true] %s7064_s15 }
 0x1a7   :  { %s7066_s16 = scalar_lea.hbm %s7065_s15, 1  ;;  %s7068_s25 = scalar_lea.hbm %s9935_s3, 1 }
 0x1a8   :  { %p7067_p9 = scmp.ne.s32.totalorder %s7065_s15, %s7066_s16  ;;  %p7069_p10 = scmp.lt.s32.totalorder %s7065_s15, %s9935_s3 }
 0x1a9   :  { %p7070_p11 = scmp.lt.s32.totalorder %s7068_s25, %s7066_s16 }
 0x1ab   :  { %s430_s20 = sshll.u32 %s9936_s21, 4  ;;  %p7071_p12 = por %p7070_p11, %p7069_p10  ;;  %s431_s20 = int_to_ptr.hbm [resolvable:$true] %s430_s20 }
 0x1ad   :  { %p7072_p13 = pnand %p7071_p12, %p7067_p9 }
 0x1af   :  { %7075 = shalt.err (!%p7072_p13)
}
 0x1b0   :  { %413 = dma.hbm_to_vmem [thread:$0]  %s409_s9, 16, %s411_s29, [#allocation39]  }
 0x1b1   :  { %s9937_s18 = sld [smem:[#allocation100_spill]]  ;;  %s7398_s23 = smov [#allocation43]  }
 0x1b2   :  { %s432_s24 = sshll.u32 %s7398_s23, 4  ;;  %s7088_s0 = sshra.s32 %s431_s20, 4  ;;  %s433_s24 = int_to_ptr.vmem [resolvable:$true] %s432_s24  ;;  %s7089_s0 = int_to_ptr.hbm [resolvable:$true] %s7088_s0 }
 0x1b3   :  { %s7090_s28 = scalar_lea.hbm %s7089_s0, 1  ;;  %s7092_s19 = scalar_lea.hbm %s9936_s21, 1 }
 0x1b4   :  { %p7091_p0 = scmp.ne.s32.totalorder %s7089_s0, %s7090_s28  ;;  %p7093_p1 = scmp.lt.s32.totalorder %s7089_s0, %s9936_s21 }
 0x1b5   :  { %p7094_p2 = scmp.lt.s32.totalorder %s7092_s19, %s7090_s28 }
 0x1b7   :  { %s454_s30 = sshll.u32 %s9937_s18, 4  ;;  %p7095_p3 = por %p7094_p2, %p7093_p1  ;;  %s455_s30 = int_to_ptr.hbm [resolvable:$true] %s454_s30 }
 0x1b9   :  { %p7096_p4 = pnand %p7095_p3, %p7091_p0 }
 0x1bb   :  { %7099 = shalt.err (!%p7096_p4)
}
 0x1bc   :  { %435 = dma.hbm_to_vmem [thread:$0]  %s431_s20, 16, %s433_s24, [#allocation42]  }
 0x1bd   :  { %s9938_s17 = sld [smem:[#allocation102_spill]]  ;;  %s7399_s1 = smov [#allocation46]  }
 0x1be   :  { %s456_s7 = sshll.u32 %s7399_s1, 4  ;;  %s7112_s6 = sshra.s32 %s455_s30, 4  ;;  %s457_s7 = int_to_ptr.vmem [resolvable:$true] %s456_s7  ;;  %s7113_s6 = int_to_ptr.hbm [resolvable:$true] %s7112_s6 }
 0x1bf   :  { %s7114_s3 = scalar_lea.hbm %s7113_s6, 2  ;;  %s7116_s9 = scalar_lea.hbm %s9937_s18, 2 }
 0x1c0   :  { %p7115_p5 = scmp.ne.s32.totalorder %s7113_s6, %s7114_s3  ;;  %p7117_p6 = scmp.lt.s32.totalorder %s7113_s6, %s9937_s18 }
 0x1c1   :  { %p7118_p7 = scmp.lt.s32.totalorder %s7116_s9, %s7114_s3 }
 0x1c3   :  { %s476_s13 = sshll.u32 %s9938_s17, 4  ;;  %p7119_p8 = por %p7118_p7, %p7117_p6  ;;  %s477_s13 = int_to_ptr.hbm [resolvable:$true] %s476_s13 }
 0x1c5   :  { %p7120_p9 = pnand %p7119_p8, %p7115_p5 }
 0x1c7   :  { %7123 = shalt.err (!%p7120_p9)
}
 0x1c8   :  { %459 = dma.hbm_to_vmem [thread:$0]  %s455_s30, 32, %s457_s7, [#allocation45]  }
 0x1c9   :  { %s9939_s26 = sld [smem:[#allocation104_spill]]  ;;  %s7400_s10 = smov [#allocation49]  }
 0x1ca   :  { %s478_s4 = sshll.u32 %s7400_s10, 4  ;;  %s7136_s22 = sshra.s32 %s477_s13, 4  ;;  %s479_s4 = int_to_ptr.vmem [resolvable:$true] %s478_s4  ;;  %s7137_s22 = int_to_ptr.hbm [resolvable:$true] %s7136_s22 }
 0x1cb   :  { %s7138_s21 = scalar_lea.hbm %s7137_s22, 2  ;;  %s7140_s2 = scalar_lea.hbm %s9938_s17, 2 }
 0x1cc   :  { %p7139_p10 = scmp.ne.s32.totalorder %s7137_s22, %s7138_s21  ;;  %p7141_p11 = scmp.lt.s32.totalorder %s7137_s22, %s9938_s17 }
 0x1cd   :  { %p7142_p12 = scmp.lt.s32.totalorder %s7140_s2, %s7138_s21 }
 0x1cf   :  { %s489_s14 = sshll.u32 %s9939_s26, 4  ;;  %p7143_p13 = por %p7142_p12, %p7141_p11  ;;  %s490_s14 = int_to_ptr.hbm [resolvable:$true] %s489_s14 }
 0x1d1   :  { %p7144_p0 = pnand %p7143_p13, %p7139_p10 }
 0x1d3   :  { %7147 = shalt.err (!%p7144_p0)
}
 0x1d4   :  { %481 = dma.hbm_to_vmem [thread:$0]  %s477_s13, 32, %s479_s4, [#allocation48]  }
 0x1d5   :  { %s7401_s29 = smov [#allocation50]   ;;  %s7160_s15 = sshra.s32 %s490_s14, 4  ;;  %s7161_s15 = int_to_ptr.hbm [resolvable:$true] %s7160_s15 }
 0x1d6   :  { %s491_s20 = sshll.u32 %s7401_s29, 4  ;;  %s7162_s16 = scalar_lea.hbm %s7161_s15, 1  ;;  %s492_s20 = int_to_ptr.vmem [resolvable:$true] %s491_s20 }
 0x1d7   :  { %p7163_p1 = scmp.ne.s32.totalorder %s7161_s15, %s7162_s16  ;;  %s7164_s25 = scalar_lea.hbm %s9939_s26, 1 }
 0x1d8   :  { %p7165_p2 = scmp.lt.s32.totalorder %s7161_s15, %s9939_s26  ;;  %p7166_p3 = scmp.lt.s32.totalorder %s7164_s25, %s7162_s16 }
 0x1da   :  { %p7167_p4 = por %p7166_p3, %p7165_p2 }
 0x1dc   :  { %p7168_p5 = pnand %p7167_p4, %p7163_p1 }
 0x1de   :  { %7171 = shalt.err (!%p7168_p5)
}
 0x1df   :  { %494 = dma.hbm_to_vmem [thread:$0]  %s490_s14, 16, %s492_s20, [#allocation51]  }
 0x1e0   :  { %7280 = dma.done.wait [#allocation3], 128  }
 0x1e1   :  { %7281 = vsyncadd [#allocation3], 4294967168 }
 0x1e2   :  { %7282 = dma.done.wait [#allocation6], 32  }
 0x1e3   :  { %7283 = vsyncadd [#allocation6], 4294967264 }
 0x1e4   :  { %7284 = dma.done.wait [#allocation9], 4224  }
 0x1e5   :  { %7285 = vsyncadd [#allocation9], 4294963072 }
 0x1e6   :  { %7286 = dma.done.wait [#allocation12], 256  }
 0x1e7   :  { %7287 = vsyncadd [#allocation12], 4294967040 }
 0x1e8   :  { %7288 = dma.done.wait [#allocation15], 131200  }
 0x1e9   :  { %7289 = vsyncadd [#allocation15], 4294836096 }
 0x1ea   :  { %7290 = dma.done.wait [#allocation18], 256  }
 0x1eb   :  { %7291 = vsyncadd [#allocation18], 4294967040 }
 0x1ec   :  { %7292 = dma.done.wait [#allocation21], 1040  }
 0x1ed   :  { %7293 = vsyncadd [#allocation21], 4294966256 }
 0x1ee   :  { %7294 = dma.done.wait [#allocation24], 160  }
 0x1ef   :  { %7295 = vsyncadd [#allocation24], 4294967136 }
 0x1f0   :  { %7296 = dma.done.wait [#allocation27], 64  }
 0x1f1   :  { %7297 = vsyncadd [#allocation27], 4294967232 }
 0x1f2   :  { %7298 = dma.done.wait [#allocation30], 4112  }
 0x1f3   :  { %7299 = vsyncadd [#allocation30], 4294963184 }
 0x1f4   :  { %7300 = dma.done.wait [#allocation33], 32  }
 0x1f5   :  { %7301 = vsyncadd [#allocation33], 4294967264 }
 0x1f6   :  { %7302 = dma.done.wait [#allocation36], 144  }
 0x1f7   :  { %7303 = vsyncadd [#allocation36], 4294967152 }
 0x1f8   :  { %7304 = dma.done.wait [#allocation39], 80  }
 0x1f9   :  { %7305 = vsyncadd [#allocation39], 4294967216 }
 0x1fa   :  { %7306 = dma.done.wait [#allocation42], 32  }
 0x1fb   :  { %7307 = vsyncadd [#allocation42], 4294967264 }
 0x1fc   :  { %7308 = dma.done.wait [#allocation45], 4128  }
 0x1fd   :  { %7309 = vsyncadd [#allocation45], 4294963168 }
 0x1fe   :  { %7310 = dma.done.wait [#allocation48], 64  }
 0x1ff   :  { %7311 = vsyncadd [#allocation48], 4294967232 }
 0x200   :  { %7312 = dma.done.wait [#allocation51], 16  }
 0x201   :  { %7313 = vsyncadd [#allocation51], 4294967280  ;;  %v7402_v0 = vmov 0   ;;  %v697_v1 = vld [vmem:[#allocation8 + $0xc0] sm:$0xff]  ;;  %v698_v2 = vld [vmem:[#allocation8 + $0xc8] sm:$0xff]  ;;  %s9940_s18 = sld [smem:[#allocation83_spill]] }
 0x202   :  { %6285 = vset.pattern.permute.xlu0 %v7402_v0  ;;  %6286 = vset.pattern.permute.xlu1 %v7402_v0  ;;  %v699_v3 = vld [vmem:[#allocation8 + $0xd0] sm:$0xff]  ;;  %v700_v4 = vld [vmem:[#allocation8 + $0xd8] sm:$0xff]  ;;  %v689_v5 = vld [vmem:[#allocation8 + $0x80] sm:$0xff]  ;;  %vm723_vm0 = vcmask 261120   ;;  %vm625_vm1 = vcmask 7168   ;;  %s9941_s30 = sld [smem:[#allocation84_spill]] }
 0x203   :  { %739 = vmatpush.msra.mxu0 %v697_v1  ;;  %759 = vmatpush.msra.mxu1 %v698_v2  ;;  %v690_v6 = vld [vmem:[#allocation8 + $0x88] sm:$0xff]  ;;  %v691_v7 = vld [vmem:[#allocation8 + $0x90] sm:$0xff]  ;;  %v692_v8 = vld [vmem:[#allocation8 + $0x98] sm:$0xff]  ;;  %s10000_s23 = sld [smem:[#allocation90_spill]]  ;;  %s7403_s28 = smov 4  }
 0x204   :  { %779 = vmatpush.msra.mxu2 %v699_v3  ;;  %799 = vmatpush.msra.mxu3 %v700_v4  ;;  %v681_v9 = vld [vmem:[#allocation8 + $0x40] sm:$0xff]  ;;  %v682_v10 = vld [vmem:[#allocation8 + $0x48] sm:$0xff]  ;;  %v683_v11 = vld [vmem:[#allocation8 + $0x50] sm:$0xff]  ;;  %s10021_s24 = sld [smem:[#allocation79_spill]]  ;;  %s7404_s19 = smov 124  }
 0x205   :  { %740 = vmatpush.msra.mxu0 %v689_v5  ;;  %760 = vmatpush.msra.mxu1 %v690_v6  ;;  %v684_v12 = vld [vmem:[#allocation8 + $0x58] sm:$0xff]  ;;  %v673_v13 = vld [vmem:[#allocation8] sm:$0xff]  ;;  %v674_v14 = vld [vmem:[#allocation8 + $0x8] sm:$0xff]  ;;  %s10022_s0 = sld [smem:[#allocation80_spill]]  ;;  %s7405_s13 = smov 120  }
 0x206   :  { %780 = vmatpush.msra.mxu2 %v691_v7  ;;  %800 = vmatpush.msra.mxu3 %v692_v8  ;;  %v675_v15 = vld [vmem:[#allocation8 + $0x10] sm:$0xff]  ;;  %v676_v16 = vld [vmem:[#allocation8 + $0x18] sm:$0xff]  ;;  %v701_v18 = vld [vmem:[#allocation8 + $0xe0] sm:$0xff]  ;;  %s10023_s17 = sld [smem:[#allocation96_spill]]  ;;  %s7406_s3 = smov 96  }
 0x207   :  { %741 = vmatpush.msra.mxu0 %v681_v9  ;;  %761 = vmatpush.msra.mxu1 %v682_v10  ;;  %v672_v17 = vld [vmem:[#allocation2] sm:$0xff]  ;;  %v702_v19 = vld [vmem:[#allocation8 + $0xe8] sm:$0xff]  ;;  %v693_v22 = vld [vmem:[#allocation8 + $0xa0] sm:$0xff]  ;;  %s10024_s1 = sld [smem:[#allocation81_spill]]  ;;  %s7407_s9 = smov 32  }
 0x208   :  { %781 = vmatpush.msra.mxu2 %v683_v11  ;;  %801 = vmatpush.msra.mxu3 %v684_v12  ;;  %v703_v20 = vld [vmem:[#allocation8 + $0xf0] sm:$0xff]  ;;  %v704_v21 = vld [vmem:[#allocation8 + $0xf8] sm:$0xff]  ;;  %v694_v23 = vld [vmem:[#allocation8 + $0xa8] sm:$0xff]  ;;  %s10025_s7 = sld [smem:[#allocation82_spill]]  ;;  %s6080_s14 = sshll.u32 %s7640_s27, 4  ;;  %s6081_s14 = int_to_ptr.hbm [resolvable:$true] %s6080_s14 }
 0x209   :  { %742 = vmatpush.msra.mxu0 %v673_v13  ;;  %762 = vmatpush.msra.mxu1 %v674_v14  ;;  %v695_v24 = vld [vmem:[#allocation8 + $0xb0] sm:$0xff]  ;;  %v696_v26 = vld [vmem:[#allocation8 + $0xb8] sm:$0xff]  ;;  %v685_v27 = vld [vmem:[#allocation8 + $0x60] sm:$0xff]  ;;  %s10026_s6 = sld [smem:[#allocation103_spill]]  ;;  %s7196_s10 = sshra.s32 %s6081_s14, 4  ;;  %s7197_s10 = int_to_ptr.hbm [resolvable:$true] %s7196_s10 }
 0x20a   :  { %782 = vmatpush.msra.mxu2 %v675_v15  ;;  %802 = vmatpush.msra.mxu3 %v676_v16  ;;  %v623_v25 = vld [vmem:[%s9940_s18] sm:$0xff]  ;;  %v688_v31 = vld [vmem:[#allocation8 + $0x78] sm:$0xff]  ;;  %v677_v34 = vld [vmem:[#allocation8 + $0x20] sm:$0xff]  ;;  %s7198_s4 = scalar_lea.hbm %s7197_s10, 1  ;;  %s7200_s22 = scalar_lea.hbm %s7640_s27, 1 }
 0x20b   :  { %6164 = vmatmul.msk.f32.vlgmr.msra.gmra.mxu0 %vm723_vm0, %v672_v17  ;;  %6165 = vmatmul.msk.f32.vlgmr.msra.gmra.mxu1 %vm723_vm0, %v672_v17  ;;  %v686_v28 = vld [vmem:[#allocation8 + $0x68] sm:$0xff]  ;;  %v626_v29 = vsel %vm625_vm1, %v623_v25, 0.0  ;;  %v687_v30 = vld [vmem:[#allocation8 + $0x70] sm:$0xff]  ;;  %v680_v42 = vld [vmem:[#allocation8 + $0x38] sm:$0xff]  ;;  %p7199_p6 = scmp.ne.s32.totalorder %s7197_s10, %s7198_s4  ;;  %p7201_p7 = scmp.lt.s32.totalorder %s7197_s10, %s7640_s27 }
 0x20c   :  { %6166 = vmatmul.msk.f32.vlgmr.msra.gmra.mxu2 %vm723_vm0, %v672_v17  ;;  %6167 = vmatmul.msk.f32.vlgmr.msra.gmra.mxu3 %vm723_vm0, %v672_v17  ;;  %v627_v32 = vrot.slane %v626_v29, 4  ;;  %v624_v33 = vld [vmem:[%s9941_s30] sm:$0xff]  ;;  %v1591_v8 = vld [vmem:[#allocation14 + $0x3c0] sm:$0xff]  ;;  %p7202_p8 = scmp.lt.s32.totalorder %s7200_s22, %s7198_s4 }
 0x20d   :  { %819 = vmatpush.msrb.mxu0 %v701_v18  ;;  %839 = vmatpush.msrb.mxu1 %v702_v19  ;;  %v649_v35 = vsel %vm625_vm1, %v624_v33, 0.0  ;;  %v678_v37 = vld [vmem:[#allocation8 + $0x28] sm:$0xff]  ;;  %v679_v40 = vld [vmem:[#allocation8 + $0x30] sm:$0xff]  ;;  %v1719_v9 = vld [vmem:[#allocation14 + $0x7c0] sm:$0xff] }
 0x20e   :  { %859 = vmatpush.msrb.mxu2 %v703_v20  ;;  %879 = vmatpush.msrb.mxu3 %v704_v21  ;;  %v628_v36 = vadd.f32 %v627_v32, %v626_v29  ;;  %v650_v38 = vrot.slane %v649_v35, 4  ;;  %v1583_v10 = vld [vmem:[#allocation14 + $0x380] sm:$0xff]  ;;  %v7775_v29 = vld [vmem:[#allocation10] sm:$0xff]  ;;  %p7203_p9 = por %p7202_p8, %p7201_p7 }
 0x20f   :  { %820 = vmatpush.msrb.mxu0 %v693_v22  ;;  %840 = vmatpush.msrb.mxu1 %v694_v23  ;;  %v1711_v11 = vld [vmem:[#allocation14 + $0x780] sm:$0xff] }
 0x210   :  { %860 = vmatpush.msrb.mxu2 %v695_v24  ;;  %880 = vmatpush.msrb.mxu3 %v696_v26  ;;  %v629_v39 = vrot.slane %v628_v36, 2  ;;  %v651_v41 = vadd.f32 %v650_v38, %v649_v35  ;;  %v1575_v12 = vld [vmem:[#allocation14 + $0x340] sm:$0xff]  ;;  %v707_v35 = vperm.slane %v7775_v29, 0  ;;  %p7204_p10 = pnand %p7203_p9, %p7199_p6 }
 0x211   :  { %821 = vmatpush.msrb.mxu0 %v685_v27  ;;  %841 = vmatpush.msrb.mxu1 %v686_v28  ;;  %v1703_v13 = vld [vmem:[#allocation14 + $0x740] sm:$0xff] }
 0x212   :  { %861 = vmatpush.msrb.mxu2 %v687_v30  ;;  %881 = vmatpush.msrb.mxu3 %v688_v31  ;;  %v630_v43 = vadd.f32 %v629_v39, %v628_v36  ;;  %v652_v44 = vrot.slane %v651_v41, 2  ;;  %v1567_v14 = vld [vmem:[#allocation14 + $0x300] sm:$0xff]  ;;  %v708_v36 = vperm.slane %v7775_v29, 1 }
 0x213   :  { %889 = vperm.xlu0 %6285, %v623_v25   ;;  %822 = vmatpush.msrb.mxu0 %v677_v34  ;;  %v1695_v15 = vld [vmem:[#allocation14 + $0x700] sm:$0xff] }
 0x214   :  { %842 = vmatpush.msrb.mxu1 %v678_v37  ;;  %862 = vmatpush.msrb.mxu2 %v679_v40  ;;  %v631_v45 = vrot.slane %v630_v43, 1  ;;  %v653_v46 = vadd.f32 %v652_v44, %v651_v41  ;;  %v1847_v16 = vld [vmem:[#allocation14 + $0xbc0] sm:$0xff] }
 0x215   :  { %882 = vmatpush.msrb.mxu3 %v680_v42  ;;  %6168 = vmatmul.msk.f32.vlgmr.msrb.gmra.mxu0 %vm723_vm0, %v672_v17  ;;  %v1559_v18 = vld [vmem:[#allocation14 + $0x2c0] sm:$0xff] }
 0x216   :  { %6169 = vmatmul.msk.f32.vlgmr.msrb.gmra.mxu1 %vm723_vm0, %v672_v17  ;;  %6170 = vmatmul.msk.f32.vlgmr.msrb.gmra.mxu2 %vm723_vm0, %v672_v17  ;;  %v632_v47 = vadd.f32 %v631_v45, %v630_v43  ;;  %v654_v48 = vrot.slane %v653_v46, 1  ;;  %v1687_v19 = vld [vmem:[#allocation14 + $0x6c0] sm:$0xff] }
 0x217   :  { %6171 = vmatmul.msk.f32.vlgmr.msrb.gmra.mxu3 %vm723_vm0, %v672_v17  ;;  %2513 = vmatpush.msra.mxu0 %v1591_v8  ;;  %v1975_v17 = vld [vmem:[#allocation14 + $0xfc0] sm:$0xff] }
 0x218   :  { %v633_v49 = vmax.f32 %v632_v47, 1.0  ;;  %v655_v50 = vadd.f32 %v654_v48, %v653_v46  ;;  %2536 = vmatpush.msra.mxu1 %v1719_v9  ;;  %2559 = vmatpush.msra.mxu2 %v1847_v16  ;;  %v1839_v20 = vld [vmem:[#allocation14 + $0xb80] sm:$0xff] }
 0x219   :  { %2514 = vmatpush.msra.mxu0 %v1583_v10  ;;  %2582 = vmatpush.msra.mxu3 %v1975_v17  ;;  %v1967_v21 = vld [vmem:[#allocation14 + $0xf80] sm:$0xff]  ;;  %v711_v10 = vperm.slane %v7775_v29, 4 }
 0x21a   :  { %6297 = vrcp.f32 %v633_v49  ;;  %v656_v51 = vmax.f32 %v655_v50, 1.0  ;;  %v643_v55 = vand.u32 2147483647, %v633_v49  ;;  %v645_v56 = vand.u32 2147483648, %v633_v49  ;;  %2537 = vmatpush.msra.mxu1 %v1711_v11  ;;  %2560 = vmatpush.msra.mxu2 %v1839_v20  ;;  %v1551_v22 = vld [vmem:[#allocation14 + $0x280] sm:$0xff] }
 0x21b   :  { %1139 = vperm.xlu0 %6285, %v624_v33   ;;  %vm639_vm2 = vweird.f32 %v633_v49  ;;  %2515 = vmatpush.msra.mxu0 %v1575_v12  ;;  %v1679_v23 = vld [vmem:[#allocation14 + $0x680] sm:$0xff] }
 0x21c   :  { %6299 = vrcp.f32 %v656_v51  ;;  %vm644_vm5 = vcmp.eq.f32.partialorder %v643_v55, 8.507059e+37  ;;  %v646_v61 = vor.u32 1.1754944e-38, %v645_v56  ;;  %vm662_vm6 = vweird.f32 %v656_v51  ;;  %2538 = vmatpush.msra.mxu1 %v1703_v13  ;;  %2583 = vmatpush.msra.mxu3 %v1967_v21  ;;  %v1831_v24 = vld [vmem:[#allocation14 + $0xb40] sm:$0xff] }
 0x21d   :  { %v668_v0 = vand.u32 2147483648, %v656_v51  ;;  %v666_v3 = vand.u32 2147483647, %v656_v51  ;;  %2516 = vmatpush.msra.mxu0 %v1567_v14  ;;  %v1959_v25 = vld [vmem:[#allocation14 + $0xf40] sm:$0xff]  ;;  %2561 = vmatpush.msra.mxu2 %v1831_v24 }
 0x21e   :  { %2539 = vmatpush.msra.mxu1 %v1695_v15  ;;  %2584 = vmatpush.msra.mxu3 %v1959_v25  ;;  %v1543_v26 = vld [vmem:[#allocation14 + $0x240] sm:$0xff] }
 0x21f   :  { %v669_v5 = vor.u32 1.1754944e-38, %v668_v0  ;;  %vm667_vm9 = vcmp.eq.f32.partialorder %v666_v3, 8.507059e+37  ;;  %2517 = vmatpush.msra.mxu0 %v1559_v18  ;;  %v1671_v27 = vld [vmem:[#allocation14 + $0x640] sm:$0xff] }
 0x220   :  { %v6298_v52 = vpop.eup %6297  ;;  %2540 = vmatpush.msra.mxu1 %v1687_v19  ;;  %v1823_v28 = vld [vmem:[#allocation14 + $0xb00] sm:$0xff] }
 0x221   :  { %v635_v53 = vmul.f32 %v6298_v52, %v633_v49  ;;  %vm640_vm3 = vweird.f32 %v6298_v52  ;;  %2518 = vmatpush.msra.mxu0 %v1551_v22  ;;  %v1951_v30 = vld [vmem:[#allocation14 + $0xf00] sm:$0xff]  ;;  %2562 = vmatpush.msra.mxu2 %v1823_v28 }
 0x222   :  { %v6300_v54 = vpop.eup %6299  ;;  %vm641_vm4 = vmor %vm639_vm2, %vm640_vm3  ;;  %2541 = vmatpush.msra.mxu1 %v1679_v23  ;;  %2585 = vmatpush.msra.mxu3 %v1951_v30  ;;  %v1535_v31 = vld [vmem:[#allocation14 + $0x200] sm:$0xff] }
 0x223   :  { %v636_v57 = vsub.f32 1.0, %v635_v53  ;;  %v658_v58 = vmul.f32 %v6300_v54, %v656_v51  ;;  %vm663_vm7 = vweird.f32 %v6300_v54  ;;  %2519 = vmatpush.msra.mxu0 %v1543_v26  ;;  %v1663_v32 = vld [vmem:[#allocation14 + $0x600] sm:$0xff] }
 0x224   :  { %vm664_vm8 = vmor %vm662_vm6, %vm663_vm7  ;;  %2542 = vmatpush.msra.mxu1 %v1671_v27  ;;  %v1815_v33 = vld [vmem:[#allocation14 + $0xac0] sm:$0xff] }
 0x225   :  { %v637_v59 = vmul.f32 %v6298_v52, %v636_v57  ;;  %v659_v60 = vsub.f32 1.0, %v658_v58  ;;  %2520 = vmatpush.msra.mxu0 %v1535_v31  ;;  %v1943_v34 = vld [vmem:[#allocation14 + $0xec0] sm:$0xff]  ;;  %2563 = vmatpush.msra.mxu2 %v1815_v33 }
 0x226   :  { %2543 = vmatpush.msra.mxu1 %v1663_v32  ;;  %2586 = vmatpush.msra.mxu3 %v1943_v34  ;;  %v1527_v37 = vld [vmem:[#allocation14 + $0x1c0] sm:$0xff] }
 0x227   :  { %v638_v62 = vadd.f32 %v6298_v52, %v637_v59  ;;  %v660_v63 = vmul.f32 %v6300_v54, %v659_v60  ;;  %v1655_v38 = vld [vmem:[#allocation14 + $0x5c0] sm:$0xff]  ;;  %2521 = vmatpush.msra.mxu0 %v1527_v37  ;;  %v709_v59 = vperm.slane %v7775_v29, 2  ;;  %v710_v60 = vperm.slane %v7775_v29, 3 }
 0x228   :  { %v1807_v39 = vld [vmem:[#allocation14 + $0xa80] sm:$0xff]  ;;  %2544 = vmatpush.msra.mxu1 %v1655_v38 }
 0x229   :  { %v642_v1 = vsel %vm641_vm4, %v6298_v52, %v638_v62  ;;  %v661_v2 = vadd.f32 %v6300_v54, %v660_v63  ;;  %v1935_v40 = vld [vmem:[#allocation14 + $0xe80] sm:$0xff]  ;;  %2564 = vmatpush.msra.mxu2 %v1807_v39 }
 0x22a   :  { %v647_v4 = vsel %vm644_vm5, %v646_v61, %v642_v1  ;;  %2587 = vmatpush.msra.mxu3 %v1935_v40  ;;  %v1519_v42 = vld [vmem:[#allocation14 + $0x180] sm:$0xff] }
 0x22b   :  { %950 = vperm.xlu1 %6286, %v647_v4   ;;  %v665_v6 = vsel %vm664_vm8, %v6300_v54, %v661_v2  ;;  %v1647_v43 = vld [vmem:[#allocation14 + $0x580] sm:$0xff]  ;;  %2522 = vmatpush.msra.mxu0 %v1519_v42 }
 0x22c   :  { %v670_v7 = vsel %vm667_vm9, %v669_v5, %v665_v6  ;;  %v1799_v44 = vld [vmem:[#allocation14 + $0xa40] sm:$0xff]  ;;  %2545 = vmatpush.msra.mxu1 %v1647_v43  ;;  %v712_v43 = vperm.slane %v7775_v29, 5 }
 0x22d   :  { %v1927_v47 = vld [vmem:[#allocation14 + $0xe40] sm:$0xff]  ;;  %2565 = vmatpush.msra.mxu2 %v1799_v44 }
 0x22e   :  { %2588 = vmatpush.msra.mxu3 %v1927_v47  ;;  %v1511_v50 = vld [vmem:[#allocation14 + $0x140] sm:$0xff] }
 0x22f   :  { %v1639_v51 = vld [vmem:[#allocation14 + $0x540] sm:$0xff]  ;;  %2523 = vmatpush.msra.mxu0 %v1511_v50 }
 0x230   :  { %v1791_v52 = vld [vmem:[#allocation14 + $0xa00] sm:$0xff]  ;;  %2546 = vmatpush.msra.mxu1 %v1639_v51 }
 0x231   :  { %v1919_v53 = vld [vmem:[#allocation14 + $0xe00] sm:$0xff]  ;;  %2566 = vmatpush.msra.mxu2 %v1791_v52 }
 0x232   :  { %2589 = vmatpush.msra.mxu3 %v1919_v53  ;;  %v1503_v56 = vld [vmem:[#allocation14 + $0x100] sm:$0xff] }
 0x233   :  { %1200 = vperm.xlu1 %6286, %v670_v7   ;;  %v1631_v57 = vld [vmem:[#allocation14 + $0x500] sm:$0xff]  ;;  %2524 = vmatpush.msra.mxu0 %v1503_v56 }
 0x234   :  { %v1783_v58 = vld [vmem:[#allocation14 + $0x9c0] sm:$0xff]  ;;  %2547 = vmatpush.msra.mxu1 %v1631_v57 }
 0x235   :  { %v1911_v61 = vld [vmem:[#allocation14 + $0xdc0] sm:$0xff]  ;;  %2567 = vmatpush.msra.mxu2 %v1783_v58 }
 0x236   :  { %2590 = vmatpush.msra.mxu3 %v1911_v61  ;;  %v1495_v0 = vld [vmem:[#allocation14 + $0xc0] sm:$0xff] }
 0x237   :  { %v1623_v1 = vld [vmem:[#allocation14 + $0x4c0] sm:$0xff]  ;;  %2525 = vmatpush.msra.mxu0 %v1495_v0 }
 0x238   :  { %v1775_v2 = vld [vmem:[#allocation14 + $0x980] sm:$0xff]  ;;  %2548 = vmatpush.msra.mxu1 %v1623_v1 }
 0x239   :  { %v1903_v3 = vld [vmem:[#allocation14 + $0xd80] sm:$0xff]  ;;  %2568 = vmatpush.msra.mxu2 %v1775_v2 }
 0x23a   :  { %v1487_v4 = vld [vmem:[#allocation14 + $0x80] sm:$0xff]  ;;  %2591 = vmatpush.msra.mxu3 %v1903_v3 }
 0x23b   :  { %v1615_v5 = vld [vmem:[#allocation14 + $0x480] sm:$0xff]  ;;  %2526 = vmatpush.msra.mxu0 %v1487_v4 }
 0x23c   :  { %v1767_v11 = vld [vmem:[#allocation14 + $0x940] sm:$0xff]  ;;  %2549 = vmatpush.msra.mxu1 %v1615_v5 }
 0x23d   :  { %v1895_v12 = vld [vmem:[#allocation14 + $0xd40] sm:$0xff]  ;;  %2569 = vmatpush.msra.mxu2 %v1767_v11 }
 0x23e   :  { %v1479_v13 = vld [vmem:[#allocation14 + $0x40] sm:$0xff]  ;;  %2592 = vmatpush.msra.mxu3 %v1895_v12 }
 0x23f   :  { %v1607_v16 = vld [vmem:[#allocation14 + $0x440] sm:$0xff]  ;;  %2527 = vmatpush.msra.mxu0 %v1479_v13  ;;  %v713_v13 = vperm.slane %v7775_v29, 6 }
 0x240   :  { %v1759_v17 = vld [vmem:[#allocation14 + $0x900] sm:$0xff]  ;;  %2550 = vmatpush.msra.mxu1 %v1607_v16  ;;  %v714_v16 = vperm.slane %v7775_v29, 7 }
 0x241   :  { %v1887_v21 = vld [vmem:[#allocation14 + $0xd00] sm:$0xff]  ;;  %2570 = vmatpush.msra.mxu2 %v1759_v17 }
 0x242   :  { %v1471_v22 = vld [vmem:[#allocation14] sm:$0xff]  ;;  %2593 = vmatpush.msra.mxu3 %v1887_v21 }
 0x243   :  { %v1599_v28 = vld [vmem:[#allocation14 + $0x400] sm:$0xff]  ;;  %2528 = vmatpush.msra.mxu0 %v1471_v22 }
 0x244   :  { %v1751_v30 = vld [vmem:[#allocation14 + $0x8c0] sm:$0xff]  ;;  %2551 = vmatpush.msra.mxu1 %v1599_v28 }
 0x245   :  { %v1879_v33 = vld [vmem:[#allocation14 + $0xcc0] sm:$0xff]  ;;  %2571 = vmatpush.msra.mxu2 %v1751_v30 }
 0x246   :  { %v2103_v38 = vld [vmem:[#allocation14 + $0x13c0] sm:$0xff]  ;;  %2594 = vmatpush.msra.mxu3 %v1879_v33 }
 0x247   :  { %v2231_v39 = vld [vmem:[#allocation14 + $0x17c0] sm:$0xff]  ;;  %2605 = vmatpush.msrb.mxu0 %v2103_v38 }
 0x248   :  { %v1743_v44 = vld [vmem:[#allocation14 + $0x880] sm:$0xff]  ;;  %2628 = vmatpush.msrb.mxu1 %v2231_v39 }
 0x249   :  { %v2095_v52 = vld [vmem:[#allocation14 + $0x1380] sm:$0xff]  ;;  %2572 = vmatpush.msra.mxu2 %v1743_v44 }
 0x24a   :  { %v2223_v53 = vld [vmem:[#allocation14 + $0x1780] sm:$0xff]  ;;  %2606 = vmatpush.msrb.mxu0 %v2095_v52 }
 0x24b   :  { %v1735_v57 = vld [vmem:[#allocation14 + $0x840] sm:$0xff]  ;;  %2629 = vmatpush.msrb.mxu1 %v2223_v53 }
 0x24c   :  { %v2215_v1 = vld [vmem:[#allocation14 + $0x1740] sm:$0xff]  ;;  %2573 = vmatpush.msra.mxu2 %v1735_v57 }
 0x24d   :  { %v1727_v2 = vld [vmem:[#allocation14 + $0x800] sm:$0xff]  ;;  %2630 = vmatpush.msrb.mxu1 %v2215_v1 }
 0x24e   :  { %v1855_v4 = vld [vmem:[#allocation14 + $0xc00] sm:$0xff]  ;;  %2574 = vmatpush.msra.mxu2 %v1727_v2 }
 0x24f   :  { %v2079_v5 = vld [vmem:[#allocation14 + $0x1300] sm:$0xff] }
 0x250   :  { %v2359_v17 = vld [vmem:[#allocation14 + $0x1bc0] sm:$0xff] }
 0x251   :  { %v2351_v30 = vld [vmem:[#allocation14 + $0x1b80] sm:$0xff]  ;;  %2651 = vmatpush.msrb.mxu2 %v2359_v17 }
 0x252   :  { %v2479_v29 = vld [vmem:[#allocation14 + $0x1f80] sm:$0xff] }
 0x253   :  { %v2063_v39 = vld [vmem:[#allocation14 + $0x1280] sm:$0xff]  ;;  %2652 = vmatpush.msrb.mxu2 %v2351_v30 }
 0x254   :  { %v2191_v44 = vld [vmem:[#allocation14 + $0x1680] sm:$0xff] }
 0x255   :  { %v2471_v53 = vld [vmem:[#allocation14 + $0x1f40] sm:$0xff] }
 0x256   :  { %v2463_v1 = vld [vmem:[#allocation14 + $0x1f00] sm:$0xff] }
 0x257   :  { %v2319_v30 = vld [vmem:[#allocation14 + $0x1a80] sm:$0xff] }
 0x285   :  { %v7779_v41 = vpop.permute.xlu0 %889 }
 0x288   :  { %v744_v45 = vpop.f32.mrf.mxu0  ;;  %v764_v46 = vpop.f32.mrf.mxu1 }
 0x289   :  { %v7781_v48 = vadd.f32 %v744_v45, %v707_v35  ;;  %v7783_v49 = vadd.f32 %v764_v46, %v708_v36  ;;  %v1871_v45 = vld [vmem:[#allocation14 + $0xc80] sm:$0xff] }
 0x28a   :  { %2595 = vmatpush.msra.mxu3 %v1871_v45  ;;  %v2343_v45 = vld [vmem:[#allocation14 + $0x1b40] sm:$0xff] }
 0x28b   :  { %v892_v54 = vmul.f32 %v7779_v41, %v7781_v48  ;;  %v893_v55 = vmul.f32 %v7779_v41, %v7783_v49  ;;  %2653 = vmatpush.msrb.mxu2 %v2343_v45  ;;  %v2159_v45 = vld [vmem:[#allocation14 + $0x1580] sm:$0xff] }
 0x28d   :  { %v900_v62 = vrot.slane %v892_v54, 4  ;;  %v906_v63 = vrot.slane %v893_v55, 4  ;;  %v7796_v20 = vpop.permute.xlu0 %1139 }
 0x28e   :  { %9942 = vst [vmem:[#allocation105_spill] sm:$0xff] %v7796_v20  ;;  %v7831_v33 = vmul.f32 %v7796_v20, %v7783_v49 }
 0x28f   :  { %v901_v6 = vadd.f32 %v900_v62, %v892_v54  ;;  %v907_v7 = vadd.f32 %v906_v63, %v893_v55  ;;  %v784_v8 = vpop.f32.mrf.mxu2  ;;  %v804_v9 = vpop.f32.mrf.mxu3 }
 0x290   :  { %v7792_v14 = vadd.f32 %v784_v8, %v709_v59  ;;  %v7794_v15 = vadd.f32 %v804_v9, %v710_v60  ;;  %v1863_v59 = vld [vmem:[#allocation14 + $0xc40] sm:$0xff] }
 0x291   :  { %v902_v18 = vrot.slane %v901_v6, 2  ;;  %v908_v19 = vrot.slane %v907_v7, 2  ;;  %v2087_v60 = vld [vmem:[#allocation14 + $0x1340] sm:$0xff]  ;;  %2596 = vmatpush.msra.mxu3 %v1863_v59 }
 0x292   :  { %v894_v23 = vmul.f32 %v7779_v41, %v7792_v14  ;;  %v1144_v24 = vmul.f32 %v7796_v20, %v7792_v14  ;;  %v895_v25 = vmul.f32 %v7779_v41, %v7794_v15  ;;  %v1145_v26 = vmul.f32 %v7796_v20, %v7794_v15  ;;  %v824_v27 = vpop.f32.mrf.mxu0  ;;  %2607 = vmatpush.msrb.mxu0 %v2087_v60  ;;  %v2183_v59 = vld [vmem:[#allocation14 + $0x1640] sm:$0xff] }
 0x293   :  { %v903_v31 = vadd.f32 %v902_v18, %v901_v6  ;;  %v7806_v32 = vadd.f32 %v824_v27, %v711_v10  ;;  %v909_v46 = vadd.f32 %v908_v19, %v907_v7  ;;  %v844_v51 = vpop.f32.mrf.mxu1  ;;  %v2207_v10 = vld [vmem:[#allocation14 + $0x1700] sm:$0xff]  ;;  %2597 = vmatpush.msra.mxu3 %v1855_v4 }
 0x294   :  { %v912_v34 = vrot.slane %v894_v23, 4  ;;  %v1162_v35 = vrot.slane %v1144_v24, 4  ;;  %v918_v36 = vrot.slane %v895_v25, 4  ;;  %v1168_v37 = vrot.slane %v1145_v26, 4  ;;  %v2487_v18 = vld [vmem:[#allocation14 + $0x1fc0] sm:$0xff]  ;;  %2608 = vmatpush.msrb.mxu0 %v2079_v5  ;;  %2631 = vmatpush.msrb.mxu1 %v2207_v10 }
 0x295   :  { %v896_v40 = vmul.f32 %v7779_v41, %v7806_v32  ;;  %v1146_v42 = vmul.f32 %v7796_v20, %v7806_v32  ;;  %v904_v58 = vrot.slane %v903_v31, 1  ;;  %v7813_v0 = vadd.f32 %v844_v51, %v712_v43  ;;  %v2199_v27 = vld [vmem:[#allocation14 + $0x16c0] sm:$0xff]  ;;  %2674 = vmatpush.msrb.mxu3 %v2487_v18 }
 0x296   :  { %v913_v47 = vadd.f32 %v912_v34, %v894_v23  ;;  %v1163_v50 = vadd.f32 %v1162_v35, %v1144_v24  ;;  %v919_v54 = vadd.f32 %v918_v36, %v895_v25  ;;  %v1169_v55 = vadd.f32 %v1168_v37, %v1145_v26  ;;  %v2071_v26 = vld [vmem:[#allocation14 + $0x12c0] sm:$0xff]  ;;  %2632 = vmatpush.msrb.mxu1 %v2199_v27 }
 0x297   :  { %v924_v56 = vrot.slane %v896_v40, 4  ;;  %v1174_v63 = vrot.slane %v1146_v42, 4  ;;  %v910_v3 = vrot.slane %v909_v46, 1  ;;  %v897_v9 = vmul.f32 %v7779_v41, %v7813_v0  ;;  %2609 = vmatpush.msrb.mxu0 %v2071_v26  ;;  %2675 = vmatpush.msrb.mxu3 %v2479_v29  ;;  %v2335_v60 = vld [vmem:[#allocation14 + $0x1b00] sm:$0xff] }
 0x298   :  { %v914_v61 = vrot.slane %v913_v47, 2  ;;  %v1164_v62 = vrot.slane %v1163_v50, 2  ;;  %v920_v6 = vrot.slane %v919_v54, 2  ;;  %v1170_v7 = vrot.slane %v1169_v55, 2  ;;  %2633 = vmatpush.msrb.mxu1 %v2191_v44  ;;  %2654 = vmatpush.msrb.mxu2 %v2335_v60  ;;  %v2167_v26 = vld [vmem:[#allocation14 + $0x15c0] sm:$0xff] }
 0x299   :  { %v925_v8 = vadd.f32 %v924_v56, %v896_v40  ;;  %v905_v11 = vadd.f32 %v904_v58, %v903_v31  ;;  %v1147_v12 = vmul.f32 %v7796_v20, %v7813_v0  ;;  %v7823_v22 = vadd.f32 %v1174_v63, %v1146_v42  ;;  %v864_v24 = vpop.f32.mrf.mxu2  ;;  %2610 = vmatpush.msrb.mxu0 %v2063_v39 }
 0x29a   :  { %v915_v19 = vadd.f32 %v914_v61, %v913_v47  ;;  %v7821_v21 = vadd.f32 %v1164_v62, %v1163_v50  ;;  %v930_v23 = vrot.slane %v897_v9, 4  ;;  %v884_v25 = vpop.f32.mrf.mxu3  ;;  %v911_v28 = vadd.f32 %v910_v3, %v909_v46  ;;  %2676 = vmatpush.msrb.mxu3 %v2471_v53  ;;  %2634 = vmatpush.msrb.mxu1 %v2183_v59 }
 0x29b   :  { %v7827_v31 = vmul.f32 %v7796_v20, %v7781_v48  ;;  %v7833_v34 = vadd.f32 %v920_v6, %v919_v54  ;;  %v7835_v35 = vadd.f32 %v1170_v7, %v1169_v55  ;;  %v926_v36 = vrot.slane %v925_v8, 2  ;;  %v2055_v54 = vld [vmem:[#allocation14 + $0x1240] sm:$0xff] }
 0x29c   :  { %v931_v37 = vadd.f32 %v930_v23, %v897_v9  ;;  %v1180_v40 = vrot.slane %v1147_v12, 4  ;;  %v7839_v42 = vadd.f32 %v864_v24, %v713_v13  ;;  %v7841_v43 = vadd.f32 %v884_v25, %v714_v16  ;;  %2611 = vmatpush.msrb.mxu0 %v2055_v54  ;;  %v2047_v7 = vld [vmem:[#allocation14 + $0x1200] sm:$0xff]  ;;  %2677 = vmatpush.msrb.mxu3 %v2463_v1 }
 0x29d   :  { %v7837_v38 = vpop.permute.xlu1 %950  ;;  %v916_v47 = vrot.slane %v915_v19, 1  ;;  %v1166_v50 = vrot.slane %v7821_v21, 1  ;;  %v1176_v51 = vrot.slane %v7823_v22, 2  ;;  %v922_v61 = vrot.slane %v7833_v34, 1  ;;  %v2175_v9 = vld [vmem:[#allocation14 + $0x1600] sm:$0xff] }
 0x29e   :  { %9943 = vst [vmem:[#allocation106_spill] sm:$0xff] %v7837_v38  ;;  %v953_v46 = vmul.f32 %v7837_v38, %v905_v11  ;;  %v932_v52 = vrot.slane %v931_v37, 2  ;;  %v898_v55 = vmul.f32 %v7779_v41, %v7839_v42  ;;  %v1148_v56 = vmul.f32 %v7796_v20, %v7839_v42  ;;  %v2455_v13 = vld [vmem:[#allocation14 + $0x1ec0] sm:$0xff]  ;;  %2612 = vmatpush.msrb.mxu0 %v2047_v7 }
 0x29f   :  { %v899_v57 = vmul.f32 %v7779_v41, %v7841_v43  ;;  %v1149_v58 = vmul.f32 %v7796_v20, %v7841_v43  ;;  %v1172_v62 = vrot.slane %v7835_v35, 1  ;;  %v7856_v63 = vadd.f32 %v926_v36, %v925_v8  ;;  %v2327_v8 = vld [vmem:[#allocation14 + $0x1ac0] sm:$0xff]  ;;  %2635 = vmatpush.msrb.mxu1 %v2175_v9  ;;  %2678 = vmatpush.msrb.mxu3 %v2455_v13 }
 0x2a0   :  { %v7859_v2 = vsub.f32 %v7781_v48, %v953_v46  ;;  %v1181_v3 = vadd.f32 %v1180_v40, %v1147_v12  ;;  %v936_v4 = vrot.slane %v898_v55, 4  ;;  %v1186_v5 = vrot.slane %v1148_v56, 4  ;;  %v2039_v25 = vld [vmem:[#allocation14 + $0x11c0] sm:$0xff]  ;;  %2655 = vmatpush.msrb.mxu2 %v2327_v8 }
 0x2a1   :  { %v942_v6 = vrot.slane %v899_v57, 4  ;;  %v917_v10 = vadd.f32 %v916_v47, %v915_v19  ;;  %v1192_v11 = vrot.slane %v1149_v58, 4  ;;  %v954_v17 = vmul.f32 %v7837_v38, %v911_v28  ;;  %v2031_v40 = vld [vmem:[#allocation14 + $0x1180] sm:$0xff]  ;;  %2613 = vmatpush.msrb.mxu0 %v2039_v25  ;;  %2636 = vmatpush.msrb.mxu1 %v2167_v26 }
 0x2a2   :  { %v969_v16 = vmul.f32 %v7859_v2, %v7859_v2  ;;  %v1177_v12 = vadd.f32 %v1176_v51, %v7823_v22  ;;  %v933_v18 = vadd.f32 %v932_v52, %v931_v37  ;;  %v937_v23 = vadd.f32 %v936_v4, %v898_v55  ;;  %v2311_v46 = vld [vmem:[#allocation14 + $0x1a40] sm:$0xff]  ;;  %2656 = vmatpush.msrb.mxu2 %v2319_v30 }
 0x2a3   :  { %v1187_v24 = vadd.f32 %v1186_v5, %v1148_v56  ;;  %v7866_v19 = vadd.f32 %v1166_v50, %v7821_v21  ;;  %v943_v27 = vadd.f32 %v942_v6, %v899_v57  ;;  %v1150_v36 = vrot.slane %v7827_v31, 4  ;;  %v2447_v21 = vld [vmem:[#allocation14 + $0x1e80] sm:$0xff]  ;;  %2614 = vmatpush.msrb.mxu0 %v2031_v40  ;;  %2637 = vmatpush.msrb.mxu1 %v2159_v45 }
 0x2a4   :  { %v977_v29 = vmul.f32 %v969_v16, %v7779_v41  ;;  %v923_v28 = vadd.f32 %v922_v61, %v7833_v34  ;;  %v7872_v22 = vadd.f32 %v1172_v62, %v7835_v35  ;;  %v928_v37 = vrot.slane %v7856_v63, 1  ;;  %v2439_v54 = vld [vmem:[#allocation14 + $0x1e40] sm:$0xff]  ;;  %2679 = vmatpush.msrb.mxu3 %v2447_v21  ;;  %2657 = vmatpush.msrb.mxu2 %v2311_v46 }
 0x2a5   :  { %v1182_v39 = vrot.slane %v1181_v3, 2  ;;  %v1193_v44 = vadd.f32 %v1192_v11, %v1149_v58  ;;  %v7876_v50 = vsub.f32 %v7783_v49, %v954_v17  ;;  %v955_v34 = vmul.f32 %v7837_v38, %v917_v10  ;;  %v2023_v55 = vld [vmem:[#allocation14 + $0x1140] sm:$0xff] }
 0x2a6   :  { %v985_v47 = vrot.slane %v977_v29, 4  ;;  %v1178_v35 = vrot.slane %v1177_v12, 1  ;;  %v934_v51 = vrot.slane %v933_v18, 1  ;;  %v938_v52 = vrot.slane %v937_v23, 2  ;;  %v2151_v57 = vld [vmem:[#allocation14 + $0x1540] sm:$0xff]  ;;  %2680 = vmatpush.msrb.mxu3 %v2439_v54  ;;  %2615 = vmatpush.msrb.mxu0 %v2023_v55 }
 0x2a7   :  { %v1188_v53 = vrot.slane %v1187_v24, 2  ;;  %v944_v56 = vrot.slane %v943_v27, 2  ;;  %v970_v59 = vmul.f32 %v7876_v50, %v7876_v50  ;;  %v7882_v60 = vsub.f32 %v7792_v14, %v955_v34  ;;  %v2303_v1 = vld [vmem:[#allocation14 + $0x1a00] sm:$0xff]  ;;  %2638 = vmatpush.msrb.mxu1 %v2151_v57 }
 0x2a8   :  { %v986_v58 = vadd.f32 %v985_v47, %v977_v29  ;;  %v7885_v61 = vadd.f32 %v928_v37, %v7856_v63  ;;  %v7887_v62 = vadd.f32 %v1182_v39, %v1181_v3  ;;  %v2431_v4 = vld [vmem:[#allocation14 + $0x1e00] sm:$0xff]  ;;  %v956_v5 = vmul.f32 %v7837_v38, %v923_v28  ;;  %v7904_v29 = vpop.permute.xlu1 %1200  ;;  %2658 = vmatpush.msrb.mxu2 %v2303_v1 }
 0x2a9   :  { %v1156_v6 = vrot.slane %v7831_v33, 4  ;;  %v1194_v7 = vrot.slane %v1193_v44, 2  ;;  %v2015_v9 = vld [vmem:[#allocation14 + $0x1100] sm:$0xff]  ;;  %v978_v8 = vmul.f32 %v970_v59, %v7779_v41  ;;  %v971_v63 = vmul.f32 %v7882_v60, %v7882_v60  ;;  %9944 = vst [vmem:[#allocation107_spill] sm:$0xff] %v7904_v29  ;;  %2681 = vmatpush.msrb.mxu3 %v2431_v4 }
 0x2aa   :  { %v2143_v10 = vld [vmem:[#allocation14 + $0x1500] sm:$0xff]  ;;  %v987_v11 = vrot.slane %v986_v58, 2  ;;  %v7894_v3 = vadd.f32 %v1178_v35, %v1177_v12  ;;  %v7896_v13 = vadd.f32 %v934_v51, %v933_v18  ;;  %v7898_v16 = vadd.f32 %v938_v52, %v937_v23  ;;  %2616 = vmatpush.msrb.mxu0 %v2015_v9 }
 0x2ab   :  { %v7900_v17 = vadd.f32 %v1188_v53, %v1187_v24  ;;  %v2295_v25 = vld [vmem:[#allocation14 + $0x19c0] sm:$0xff]  ;;  %v7902_v30 = vadd.f32 %v944_v56, %v943_v27  ;;  %v991_v12 = vrot.slane %v978_v8, 4  ;;  %v979_v18 = vmul.f32 %v971_v63, %v7779_v41  ;;  %2639 = vmatpush.msrb.mxu1 %v2143_v10  ;;  %v7925_v63 = vld [vmem:[#allocation11] sm:$0xff] }
 0x2ac   :  { %v2423_v26 = vld [vmem:[#allocation14 + $0x1dc0] sm:$0xff]  ;;  %v988_v39 = vadd.f32 %v987_v11, %v986_v58  ;;  %v7909_v40 = vsub.f32 %v7794_v15, %v956_v5  ;;  %v1151_v27 = vadd.f32 %v1150_v36, %v7827_v31  ;;  %v1157_v45 = vadd.f32 %v1156_v6, %v7831_v33  ;;  %2659 = vmatpush.msrb.mxu2 %v2295_v25 }
 0x2ad   :  { %v2007_v28 = vld [vmem:[#allocation14 + $0x10c0] sm:$0xff]  ;;  %v7915_v46 = vadd.f32 %v1194_v7, %v1193_v44  ;;  %2682 = vmatpush.msrb.mxu3 %v2423_v26  ;;  %v992_v51 = vadd.f32 %v991_v12, %v978_v8  ;;  %v997_v52 = vrot.slane %v979_v18, 4  ;;  %v1205_v33 = vmul.f32 %v7904_v29, %v7866_v19 }
 0x2ae   :  { %v2135_v37 = vld [vmem:[#allocation14 + $0x14c0] sm:$0xff]  ;;  %v989_v35 = vrot.slane %v988_v39, 1  ;;  %2617 = vmatpush.msrb.mxu0 %v2007_v28  ;;  %v972_v55 = vmul.f32 %v7909_v40, %v7909_v40  ;;  %v1152_v56 = vrot.slane %v1151_v27, 2  ;;  %v1158_v31 = vrot.slane %v1157_v45, 2 }
 0x2af   :  { %v2287_v24 = vld [vmem:[#allocation14 + $0x1980] sm:$0xff]  ;;  %2640 = vmatpush.msrb.mxu1 %v2135_v37  ;;  %v940_v36 = vrot.slane %v7898_v16, 1  ;;  %v993_v59 = vrot.slane %v992_v51, 2  ;;  %v998_v1 = vadd.f32 %v997_v52, %v979_v18  ;;  %v7928_v28 = vsub.f32 %v7792_v14, %v1205_v33 }
 0x2b0   :  { %v2415_v21 = vld [vmem:[#allocation14 + $0x1d80] sm:$0xff]  ;;  %2660 = vmatpush.msrb.mxu2 %v2287_v24  ;;  %v990_v58 = vadd.f32 %v989_v35, %v988_v39  ;;  %v980_v7 = vmul.f32 %v972_v55, %v7779_v41  ;;  %v1153_v9 = vadd.f32 %v1152_v56, %v1151_v27  ;;  %v1159_v10 = vadd.f32 %v1158_v31, %v1157_v45  ;;  %v7933_v45 = vld [vmem:[#allocation13] sm:$0xff] }
 0x2b1   :  { %v1999_v47 = vld [vmem:[#allocation14 + $0x1080] sm:$0xff]  ;;  %2683 = vmatpush.msrb.mxu3 %v2415_v21  ;;  %v994_v25 = vadd.f32 %v993_v59, %v992_v51  ;;  %v999_v26 = vrot.slane %v998_v1, 2  ;;  %v946_v37 = vrot.slane %v7902_v30, 1  ;;  %v1206_v14 = vmul.f32 %v7904_v29, %v7872_v22 }
 0x2b2   :  { %v2127_v34 = vld [vmem:[#allocation14 + $0x1480] sm:$0xff]  ;;  %2618 = vmatpush.msrb.mxu0 %v1999_v47  ;;  %v1033_v8 = vmul.f32 %v990_v58, %v7837_v38  ;;  %v1003_v18 = vrot.slane %v980_v7, 4  ;;  %v1154_v24 = vrot.slane %v1153_v9, 1  ;;  %v1160_v21 = vrot.slane %v1159_v10, 1 }
 0x2b3   :  { %v2279_v53 = vld [vmem:[#allocation14 + $0x1940] sm:$0xff]  ;;  %2641 = vmatpush.msrb.mxu1 %v2127_v34  ;;  %v995_v47 = vrot.slane %v994_v25, 1  ;;  %v1000_v34 = vadd.f32 %v999_v26, %v998_v1  ;;  %v1389_v35 = vperm.slane %v7925_v63, 0  ;;  %v7942_v31 = vadd.f32 %v940_v36, %v7898_v16 }
 0x2b4   :  { %v2407_v54 = vld [vmem:[#allocation14 + $0x1d40] sm:$0xff]  ;;  %2661 = vmatpush.msrb.mxu2 %v2279_v53  ;;  %v7931_v27 = vadd.f32 1e-05, %v1033_v8  ;;  %v1004_v51 = vadd.f32 %v1003_v18, %v980_v7  ;;  %v1155_v52 = vadd.f32 %v1154_v24, %v1153_v9  ;;  %v1221_v53 = vmul.f32 %v7928_v28, %v7928_v28 }
 0x2b5   :  { %v1991_v44 = vld [vmem:[#allocation14 + $0x1040] sm:$0xff]  ;;  %2684 = vmatpush.msrb.mxu3 %v2407_v54  ;;  %v996_v54 = vadd.f32 %v995_v47, %v994_v25  ;;  %v1001_v55 = vrot.slane %v1000_v34, 1  ;;  %v1161_v56 = vadd.f32 %v1160_v21, %v1159_v10  ;;  %v1423_v22 = vperm.slane %v7933_v45, 0 }
 0x2b6   :  { %v2119_v57 = vld [vmem:[#allocation14 + $0x1440] sm:$0xff]  ;;  %2619 = vmatpush.msrb.mxu0 %v1991_v44  ;;  %6301 = vrsqrt.f32 %v7931_v27  ;;  %v1203_v58 = vmul.f32 %v7904_v29, %v1155_v52  ;;  %v1390_v1 = vperm.slane %v7925_v63, 1  ;;  %v1229_v10 = vmul.f32 %v1221_v53, %v7796_v20 }
 0x2b7   :  { %v2271_v5 = vld [vmem:[#allocation14 + $0x1900] sm:$0xff]  ;;  %2642 = vmatpush.msrb.mxu1 %v2119_v57  ;;  %v1005_v57 = vrot.slane %v1004_v51, 2  ;;  %v1034_v59 = vmul.f32 %v996_v54, %v7837_v38  ;;  %v1424_v8 = vperm.slane %v7933_v45, 1  ;;  %vm1055_vm10 = vweird.f32 %v7931_v27 }
 0x2b8   :  { %v2399_v6 = vld [vmem:[#allocation14 + $0x1d00] sm:$0xff]  ;;  %2662 = vmatpush.msrb.mxu2 %v2271_v5  ;;  %v1002_v5 = vadd.f32 %v1001_v55, %v1000_v34  ;;  %v7950_v36 = vsub.f32 %v7781_v48, %v1203_v58  ;;  %v1247_v24 = vrot.slane %v1229_v10, 4  ;;  %v957_v34 = vmul.f32 %v7837_v38, %v7885_v61 }
 0x2b9   :  { %v1983_v19 = vld [vmem:[#allocation14 + $0x1000] sm:$0xff]  ;;  %2685 = vmatpush.msrb.mxu3 %v2399_v6  ;;  %v1204_v6 = vmul.f32 %v7904_v29, %v1161_v56  ;;  %v1006_v16 = vadd.f32 %v1005_v57, %v1004_v51 }
 0x2ba   :  { %v2111_v11 = vld [vmem:[#allocation14 + $0x1400] sm:$0xff]  ;;  %2620 = vmatpush.msrb.mxu0 %v1983_v19  ;;  %v7954_v19 = vsub.f32 %v7794_v15, %v1206_v14  ;;  %v1035_v25 = vmul.f32 %v1002_v5, %v7837_v38  ;;  %v1219_v18 = vmul.f32 %v7950_v36, %v7950_v36  ;;  %v1248_v55 = vadd.f32 %v1247_v24, %v1229_v10 }
 0x2bb   :  { %v2263_v39 = vld [vmem:[#allocation14 + $0x18c0] sm:$0xff]  ;;  %2643 = vmatpush.msrb.mxu1 %v2111_v11  ;;  %v7956_v11 = vadd.f32 1e-05, %v1034_v59  ;;  %v7961_v26 = vsub.f32 %v7783_v49, %v1204_v6  ;;  %v1007_v48 = vrot.slane %v1006_v16, 1  ;;  %v7983_v59 = vsub.f32 %v7806_v32, %v957_v34 }
 0x2bc   :  { %v2391_v12 = vld [vmem:[#allocation14 + $0x1cc0] sm:$0xff]  ;;  %2663 = vmatpush.msrb.mxu2 %v2263_v39  ;;  %v1222_v15 = vmul.f32 %v7954_v19, %v7954_v19  ;;  %v6302_v21 = vpop.eup %6301  ;;  %v7968_v47 = vadd.f32 1e-05, %v1035_v25  ;;  %v1227_v53 = vmul.f32 %v1219_v18, %v7796_v20  ;;  %v1249_v58 = vrot.slane %v1248_v55, 2 }
 0x2bd   :  { %2686 = vmatpush.msrb.mxu3 %v2391_v12  ;;  %v2255_v33 = vld [vmem:[#allocation14 + $0x1880] sm:$0xff]  ;;  %6303 = vrsqrt.f32 %v7956_v11  ;;  %v1220_v49 = vmul.f32 %v7961_v26, %v7961_v26  ;;  %v1050_v14 = vmul.f32 %v6302_v21, %v7931_v27  ;;  %v1008_v52 = vadd.f32 %v1007_v48, %v1006_v16 }
 0x2be   :  { %v2383_v44 = vld [vmem:[#allocation14 + $0x1c80] sm:$0xff]  ;;  %2664 = vmatpush.msrb.mxu2 %v2255_v33  ;;  %6305 = vrsqrt.f32 %v7968_v47  ;;  %v1230_v61 = vmul.f32 %v1222_v15, %v7796_v20  ;;  %v958_v5 = vmul.f32 %v7837_v38, %v7896_v13  ;;  %vm1056_vm11 = vweird.f32 %v6302_v21 }
 0x2bf   :  { %2687 = vmatpush.msrb.mxu3 %v2383_v44  ;;  %v2247_v7 = vld [vmem:[#allocation14 + $0x1840] sm:$0xff]  ;;  %v1228_v54 = vmul.f32 %v1220_v49, %v7796_v20  ;;  %v1051_v56 = vmul.f32 %v6302_v21, %v1050_v14  ;;  %v1036_v33 = vmul.f32 %v1008_v52, %v7837_v38  ;;  %v1235_v44 = vrot.slane %v1227_v53, 4  ;;  %vm1057_vm15 = vmor %vm1055_vm10, %vm1056_vm11 }
 0x2c0   :  { %v2375_v9 = vld [vmem:[#allocation14 + $0x1c40] sm:$0xff]  ;;  %2665 = vmatpush.msrb.mxu2 %v2247_v7  ;;  %vm1065_vm12 = vweird.f32 %v7956_v11  ;;  %v973_v13 = vmul.f32 %v7983_v59, %v7983_v59  ;;  %v7996_v14 = vsub.f32 %v7813_v0, %v958_v5  ;;  %vm1075_vm14 = vweird.f32 %v7968_v47 }
 0x2c1   :  { %2688 = vmatpush.msrb.mxu3 %v2375_v9  ;;  %v2239_v39 = vld [vmem:[#allocation14 + $0x1800] sm:$0xff]  ;;  %v1241_v57 = vrot.slane %v1228_v54, 4  ;;  %v1052_v6 = vmul.f32 0.5, %v1051_v56  ;;  %v7988_v9 = vadd.f32 1e-05, %v1036_v33  ;;  %v1236_v16 = vadd.f32 %v1235_v44, %v1227_v53 }
 0x2c2   :  { %v2367_v12 = vld [vmem:[#allocation14 + $0x1c00] sm:$0xff]  ;;  %2666 = vmatpush.msrb.mxu2 %v2239_v39  ;;  %v1250_v39 = vadd.f32 %v1249_v58, %v1248_v55  ;;  %v981_v5 = vmul.f32 %v973_v13, %v7779_v41 }
 0x2c3   :  { %2689 = vmatpush.msrb.mxu3 %v2367_v12  ;;  %v6304_v10 = vpop.eup %6303  ;;  %v1242_v25 = vadd.f32 %v1241_v57, %v1228_v54  ;;  %v1253_v12 = vrot.slane %v1230_v61, 4  ;;  %v1053_v48 = vsub.f32 1.5, %v1052_v6  ;;  %6307 = vrsqrt.f32 %v7988_v9 }
 0x2c4   :  { %v1060_v18 = vmul.f32 %v6304_v10, %v7956_v11  ;;  %v6306_v24 = vpop.eup %6305  ;;  %v1237_v15 = vrot.slane %v1236_v16, 2  ;;  %v1251_v34 = vrot.slane %v1250_v39, 1  ;;  %vm1066_vm13 = vweird.f32 %v6304_v10 }
 0x2c5   :  { %v1243_v49 = vrot.slane %v1242_v25, 2  ;;  %v1054_v52 = vmul.f32 %v6302_v21, %v1053_v48  ;;  %v1070_v54 = vmul.f32 %v6306_v24, %v7968_v47  ;;  %v1254_v44 = vadd.f32 %v1253_v12, %v1230_v61  ;;  %vm1067_vm3 = vmor %vm1065_vm12, %vm1066_vm13 }
 0x2c6   :  { %v1061_v53 = vmul.f32 %v6304_v10, %v1060_v18  ;;  %v1238_v55 = vadd.f32 %v1237_v15, %v1236_v16  ;;  %v1252_v33 = vadd.f32 %v1251_v34, %v1250_v39  ;;  %vm1076_vm2 = vweird.f32 %v6306_v24 }
 0x2c7   :  { %v1244_v56 = vadd.f32 %v1243_v49, %v1242_v25  ;;  %v1058_v57 = vsel %vm1057_vm15, %v6302_v21, %v1054_v52  ;;  %v1071_v6 = vmul.f32 %v6306_v24, %v1070_v54  ;;  %v1255_v16 = vrot.slane %v1254_v44, 2  ;;  %vm1077_vm4 = vmor %vm1075_vm14, %vm1076_vm2 }
 0x2c8   :  { %v1062_v58 = vmul.f32 0.5, %v1061_v53  ;;  %v1129_v48 = vmul.f32 %v1058_v57, %v7859_v2  ;;  %v1239_v18 = vrot.slane %v1238_v55, 1  ;;  %v1285_v23 = vmul.f32 %v1252_v33, %v7904_v29 }
 0x2c9   :  { %v1245_v4 = vrot.slane %v1244_v56, 1  ;;  %v8006_v7 = vpop.eup %6307  ;;  %v1072_v27 = vmul.f32 0.5, %v1071_v6  ;;  %v1009_v39 = vrot.slane %v981_v5, 4  ;;  %v1256_v53 = vadd.f32 %v1255_v16, %v1254_v44 }
 0x2ca   :  { %v1063_v51 = vsub.f32 1.5, %v1062_v58  ;;  %v1405_v61 = vmul.f32 %v1389_v35, %v1129_v48  ;;  %v1080_v21 = vmul.f32 %v8006_v7, %v7988_v9  ;;  %v1240_v25 = vadd.f32 %v1239_v18, %v1238_v55 }
 0x2cb   :  { %v1073_v2 = vsub.f32 1.5, %v1072_v27  ;;  %v1246_v13 = vadd.f32 %v1245_v4, %v1244_v56  ;;  %v8012_v15 = vadd.f32 1e-05, %v1285_v23  ;;  %v1592_v56 = vld [vmem:[#allocation14 + $0x3c8] sm:$0xff]  ;;  %vm1086_vm5 = vweird.f32 %v8006_v7 }
 0x2cc   :  { %v1064_v12 = vmul.f32 %v6304_v10, %v1063_v51  ;;  %v1439_v49 = vadd.f32 %v1423_v22, %v1405_v61  ;;  %v1081_v34 = vmul.f32 %v8006_v7, %v1080_v21  ;;  %v1283_v52 = vmul.f32 %v1240_v25, %v7904_v29  ;;  %v1576_v27 = vld [vmem:[#allocation14 + $0x348] sm:$0xff] }
 0x2cd   :  { %v1074_v55 = vmul.f32 %v6306_v24, %v1073_v2  ;;  %v1284_v51 = vmul.f32 %v1246_v13, %v7904_v29  ;;  %6309 = vrsqrt.f32 %v8012_v15  ;;  %v1257_v44 = vrot.slane %v1256_v53, 1  ;;  %v1720_v13 = vld [vmem:[#allocation14 + $0x7c8] sm:$0xff] }
 0x2ce   :  { %v1068_v54 = vsel %vm1067_vm3, %v6304_v10, %v1064_v12  ;;  %v8023_v23 = vmax.f32 %v1439_v49, 0.0  ;;  %v1082_v11 = vmul.f32 0.5, %v1081_v34  ;;  %v8029_v33 = vadd.f32 1e-05, %v1283_v52  ;;  %v1568_v34 = vld [vmem:[#allocation14 + $0x308] sm:$0xff] }
 0x2cf   :  { %v1130_v4 = vmul.f32 %v1068_v54, %v7876_v50  ;;  %v1078_v57 = vsel %vm1077_vm4, %v6306_v24, %v1074_v55  ;;  %v8032_v10 = vadd.f32 1e-05, %v1284_v51  ;;  %v1584_v50 = vld [vmem:[#allocation14 + $0x388] sm:$0xff]  ;;  %v947_v47 = vadd.f32 %v946_v37, %v7902_v30 }
 0x2d0   :  { %2529 = vmatmul.f32.vlgmr.msra.gmra.mxu0 %v8023_v23  ;;  %v1131_v6 = vmul.f32 %v1078_v57, %v7882_v60  ;;  %v1083_v48 = vsub.f32 1.5, %v1082_v11  ;;  %6311 = vrsqrt.f32 %v8029_v33  ;;  %vm1085_vm6 = vweird.f32 %v7988_v9 }
 0x2d1   :  { %v1406_v58 = vmul.f32 %v1390_v1, %v1130_v4  ;;  %2697 = vmatpush.msra.mxu0 %v1592_v56  ;;  %6313 = vrsqrt.f32 %v8032_v10  ;;  %v1258_v24 = vadd.f32 %v1257_v44, %v1256_v53  ;;  %v9945_v16 = vperm.slane %v7925_v63, 2  ;;  %vm1087_vm7 = vmor %vm1085_vm6, %vm1086_vm5  ;;  %v1712_v4 = vld [vmem:[#allocation14 + $0x788] sm:$0xff] }
 0x2d2   :  { %v1084_v61 = vmul.f32 %v8006_v7, %v1083_v48  ;;  %v1010_v21 = vadd.f32 %v1009_v39, %v981_v5  ;;  %v1392_v30 = vperm.slane %v7925_v63, 3  ;;  %v1426_v37 = vperm.slane %v7933_v45, 3 }
 0x2d3   :  { %v1440_v18 = vadd.f32 %v1424_v8, %v1406_v58  ;;  %v1407_v60 = vmul.f32 %v9945_v16, %v1131_v6  ;;  %v8049_v25 = vpop.eup %6309  ;;  %2698 = vmatpush.msra.mxu0 %v1584_v50  ;;  %v1286_v9 = vmul.f32 %v1258_v24, %v7904_v29  ;;  %v974_v12 = vmul.f32 %v7996_v14, %v7996_v14  ;;  %v1560_v6 = vld [vmem:[#allocation14 + $0x2c8] sm:$0xff] }
 0x2d4   :  { %v9946_v5 = vperm.slane %v7933_v45, 2  ;;  %v1088_v49 = vsel %vm1087_vm7, %v8006_v7, %v1084_v61  ;;  %v1320_v52 = vmul.f32 %v8049_v25, %v8012_v15  ;;  %vm1325_vm8 = vweird.f32 %v8012_v15  ;;  %v1848_v7 = vld [vmem:[#allocation14 + $0xbc8] sm:$0xff] }
 0x2d5   :  { %v8058_v2 = vmax.f32 %v1440_v18, 0.0  ;;  %2699 = vmatpush.msra.mxu0 %v1576_v27  ;;  %v1132_v53 = vmul.f32 %v1088_v49, %v7909_v40  ;;  %v8067_v54 = vadd.f32 1e-05, %v1286_v9  ;;  %v1011_v55 = vrot.slane %v1010_v21, 2  ;;  %v1704_v24 = vld [vmem:[#allocation14 + $0x748] sm:$0xff] }
 0x2d6   :  { %v1441_v39 = vadd.f32 %v9946_v5, %v1407_v60  ;;  %v8069_v51 = vpop.eup %6311  ;;  %v1321_v11 = vmul.f32 %v8049_v25, %v1320_v52  ;;  %v982_v57 = vmul.f32 %v974_v12, %v7779_v41  ;;  %v959_v40 = vmul.f32 %v7837_v38, %v7942_v31  ;;  %v1840_v18 = vld [vmem:[#allocation14 + $0xb88] sm:$0xff] }
 0x2d7   :  { %2552 = vmatmul.f32.vlgmr.msra.gmra.mxu1 %v8058_v2  ;;  %v8078_v44 = vpop.eup %6313  ;;  %v1408_v58 = vmul.f32 %v1392_v30, %v1132_v53  ;;  %2700 = vmatpush.msra.mxu0 %v1568_v34  ;;  %v1300_v50 = vmul.f32 %v8069_v51, %v8029_v33  ;;  %6315 = vrsqrt.f32 %v8067_v54  ;;  %v960_v48 = vmul.f32 %v7837_v38, %v947_v47  ;;  %v1552_v47 = vld [vmem:[#allocation14 + $0x288] sm:$0xff] }
 0x2d8   :  { %v8072_v56 = vmax.f32 %v1441_v39, 0.0  ;;  %2720 = vmatpush.msra.mxu1 %v1720_v13  ;;  %vm1305_vm9 = vweird.f32 %v8029_v33  ;;  %v1310_v31 = vmul.f32 %v8078_v44, %v8032_v10  ;;  %vm1315_vm10 = vweird.f32 %v8032_v10  ;;  %v1696_v9 = vld [vmem:[#allocation14 + $0x708] sm:$0xff] }
 0x2d9   :  { %v1322_v27 = vmul.f32 0.5, %v1321_v11  ;;  %v1442_v16 = vadd.f32 %v1426_v37, %v1408_v58  ;;  %v1301_v60 = vmul.f32 %v8069_v51, %v1300_v50  ;;  %vm1326_vm11 = vweird.f32 %v8049_v25  ;;  %2701 = vmatpush.msra.mxu0 %v1560_v6  ;;  %v1976_v34 = vld [vmem:[#allocation14 + $0xfc8] sm:$0xff] }
 0x2da   :  { %2575 = vmatmul.f32.vlgmr.msra.gmra.mxu2 %v8072_v56  ;;  %2721 = vmatpush.msra.mxu1 %v1712_v4  ;;  %v1012_v61 = vadd.f32 %v1011_v55, %v1010_v21  ;;  %v1311_v12 = vmul.f32 %v8078_v44, %v1310_v31  ;;  %v1015_v5 = vrot.slane %v982_v57, 4  ;;  %v8097_v39 = vsub.f32 %v7839_v42, %v959_v40  ;;  %v1832_v53 = vld [vmem:[#allocation14 + $0xb48] sm:$0xff]  ;;  %vm1327_vm14 = vmor %vm1325_vm8, %vm1326_vm11 }
 0x2db   :  { %2743 = vmatpush.msra.mxu2 %v1848_v7  ;;  %v1323_v13 = vsub.f32 1.5, %v1322_v27  ;;  %v8099_v49 = vmax.f32 %v1442_v16, 0.0  ;;  %v1302_v52 = vmul.f32 0.5, %v1301_v60  ;;  %v8102_v7 = vsub.f32 %v7841_v43, %v960_v48  ;;  %v1688_v55 = vld [vmem:[#allocation14 + $0x6c8] sm:$0xff]  ;;  %2702 = vmatpush.msra.mxu0 %v1552_v47 }
 0x2dc   :  { %2722 = vmatpush.msra.mxu1 %v1704_v24  ;;  %v1013_v4 = vrot.slane %v1012_v61, 1  ;;  %vm1306_vm12 = vweird.f32 %v8069_v51  ;;  %v1312_v21 = vmul.f32 0.5, %v1311_v12  ;;  %v1544_v11 = vld [vmem:[#allocation14 + $0x248] sm:$0xff]  ;;  %v1016_v58 = vadd.f32 %v1015_v5, %v982_v57 }
 0x2dd   :  { %2744 = vmatpush.msra.mxu2 %v1840_v18  ;;  %v1324_v40 = vmul.f32 %v8049_v25, %v1323_v13  ;;  %v8106_v50 = vpop.eup %6315  ;;  %2598 = vmatmul.f32.vlgmr.msra.gmra.mxu3 %v8099_v49  ;;  %v1303_v6 = vsub.f32 1.5, %v1302_v52  ;;  %vm1316_vm13 = vweird.f32 %v8078_v44  ;;  %v1968_v24 = vld [vmem:[#allocation14 + $0xf88] sm:$0xff]  ;;  %v975_v18 = vmul.f32 %v8097_v39, %v8097_v39  ;;  %vm8128_vm15 = vmor %vm1305_vm9, %vm1306_vm12 }
 0x2de   :  { %2723 = vmatpush.msra.mxu1 %v1696_v9  ;;  %v1824_v48 = vld [vmem:[#allocation14 + $0xb08] sm:$0xff]  ;;  %v1014_v31 = vadd.f32 %v1013_v4, %v1012_v61  ;;  %2766 = vmatpush.msra.mxu3 %v1976_v34  ;;  %v1313_v57 = vsub.f32 1.5, %v1312_v21  ;;  %v1330_v60 = vmul.f32 %v8106_v50, %v8067_v54  ;;  %v976_v9 = vmul.f32 %v8102_v7, %v8102_v7  ;;  %vm1317_vm3 = vmor %vm1315_vm10, %vm1316_vm13 }
 0x2df   :  { %v1680_v27 = vld [vmem:[#allocation14 + $0x688] sm:$0xff]  ;;  %2745 = vmatpush.msra.mxu2 %v1832_v53  ;;  %v1328_v16 = vsel %vm1327_vm14, %v8049_v25, %v1324_v40  ;;  %v1304_v15 = vmul.f32 %v8069_v51, %v1303_v6  ;;  %2703 = vmatpush.msra.mxu0 %v1544_v11  ;;  %v1017_v34 = vrot.slane %v1016_v58, 2  ;;  %vm1336_vm2 = vweird.f32 %v8106_v50 }
 0x2e0   :  { %v1536_v47 = vld [vmem:[#allocation14 + $0x208] sm:$0xff]  ;;  %2724 = vmatpush.msra.mxu1 %v1688_v55  ;;  %v1381_v12 = vmul.f32 %v1328_v16, %v7928_v28  ;;  %v1037_v5 = vmul.f32 %v1014_v31, %v7837_v38  ;;  %v1314_v52 = vmul.f32 %v8078_v44, %v1313_v57  ;;  %2767 = vmatpush.msra.mxu3 %v1968_v24  ;;  %v9949_v55 = vperm.slane %v7925_v63, 2 }
 0x2e1   :  { %v1960_v61 = vld [vmem:[#allocation14 + $0xf48] sm:$0xff]  ;;  %2746 = vmatpush.msra.mxu2 %v1824_v48  ;;  %v1331_v4 = vmul.f32 %v8106_v50, %v1330_v60  ;;  %v1207_v28 = vmul.f32 %v7904_v29, %v7894_v3  ;;  %v1308_v33 = vsel %vm8128_vm15, %v8069_v51, %v1304_v15  ;;  %2704 = vmatpush.msra.mxu0 %v1536_v47  ;;  %v9950_v57 = vperm.slane %v7933_v45, 2 }
 0x2e2   :  { %v1816_v13 = vld [vmem:[#allocation14 + $0xac8] sm:$0xff]  ;;  %2725 = vmatpush.msra.mxu1 %v1680_v27  ;;  %v1415_v11 = vmul.f32 %v9949_v55, %v1381_v12  ;;  %v8146_v40 = vadd.f32 1e-05, %v1037_v5  ;;  %v1018_v6 = vadd.f32 %v1017_v34, %v1016_v58  ;;  %v1379_v3 = vmul.f32 %v1308_v33, %v7950_v36  ;;  %2768 = vmatpush.msra.mxu3 %v1960_v61 }
 0x2e3   :  { %v1672_v53 = vld [vmem:[#allocation14 + $0x648] sm:$0xff]  ;;  %v1318_v24 = vsel %vm1317_vm3, %v8078_v44, %v1314_v52  ;;  %v1332_v51 = vmul.f32 0.5, %v1331_v4  ;;  %2747 = vmatpush.msra.mxu2 %v1816_v13  ;;  %v983_v10 = vmul.f32 %v975_v18, %v7779_v41  ;;  %vm1335_vm4 = vweird.f32 %v8067_v54 }
 0x2e4   :  { %v1952_v21 = vld [vmem:[#allocation14 + $0xf08] sm:$0xff]  ;;  %v1380_v31 = vmul.f32 %v1318_v24, %v7961_v26  ;;  %2726 = vmatpush.msra.mxu1 %v1672_v53  ;;  %v1449_v27 = vadd.f32 %v9950_v57, %v1415_v11  ;;  %6317 = vrsqrt.f32 %v8146_v40  ;;  %v1413_v36 = vmul.f32 %v1389_v35, %v1379_v3  ;;  %vm8164_vm5 = vmor %vm1335_vm4, %vm1336_vm2 }
 0x2e5   :  { %v1664_v48 = vld [vmem:[#allocation14 + $0x608] sm:$0xff]  ;;  %2769 = vmatpush.msra.mxu3 %v1952_v21  ;;  %v1333_v44 = vsub.f32 1.5, %v1332_v51  ;;  %v1019_v58 = vrot.slane %v1018_v6, 1  ;;  %v1021_v60 = vrot.slane %v983_v10, 4  ;;  %v984_v54 = vmul.f32 %v976_v9, %v7779_v41 }
 0x2e6   :  { %v1944_v16 = vld [vmem:[#allocation14 + $0xec8] sm:$0xff]  ;;  %v1414_v18 = vmul.f32 %v1390_v1, %v1380_v31  ;;  %v8160_v26 = vmax.f32 %v1449_v27, 0.0  ;;  %2727 = vmatpush.msra.mxu1 %v1664_v48  ;;  %v8170_v35 = vsub.f32 %v7806_v32, %v1207_v28  ;;  %v1447_v15 = vadd.f32 %v1423_v22, %v1413_v36 }
 0x2e7   :  { %v1334_v61 = vmul.f32 %v8106_v50, %v1333_v44  ;;  %2770 = vmatpush.msra.mxu3 %v1944_v16  ;;  %v1020_v1 = vadd.f32 %v1019_v58, %v1018_v6  ;;  %v1528_v12 = vld [vmem:[#allocation14 + $0x1c8] sm:$0xff]  ;;  %v1022_v34 = vadd.f32 %v1021_v60, %v983_v10  ;;  %v9954_v25 = vrot.slane %v7887_v62, 1 }
 0x2e8   :  { %9951 = vst [vmem:[#allocation108_spill] sm:$0xff] %v8160_v26  ;;  %v1656_v13 = vld [vmem:[#allocation14 + $0x5c8] sm:$0xff]  ;;  %v1196_v9 = vrot.slane %v7915_v46, 1  ;;  %v1448_v32 = vadd.f32 %v1424_v8, %v1414_v18  ;;  %2578 = vmatmul.f32.gmra.mxu2 %v8160_v26  ;;  %2705 = vmatpush.msra.mxu0 %v1528_v12  ;;  %v1027_v28 = vrot.slane %v984_v54, 4  ;;  %v8182_v33 = vmax.f32 %v1447_v15, 0.0 }
 0x2e9   :  { %v1808_v5 = vld [vmem:[#allocation14 + $0xa88] sm:$0xff]  ;;  %v1185_v52 = vadd.f32 %v9954_v25, %v7887_v62  ;;  %v1338_v21 = vsel %vm8164_vm5, %v8106_v50, %v1334_v61  ;;  %v1038_v62 = vmul.f32 %v1020_v1, %v7837_v38  ;;  %2728 = vmatpush.msra.mxu1 %v1656_v13  ;;  %v1023_v11 = vrot.slane %v1022_v34, 2 }
 0x2ea   :  { %v1936_v22 = vld [vmem:[#allocation14 + $0xe88] sm:$0xff]  ;;  %2748 = vmatpush.msra.mxu2 %v1808_v5  ;;  %v8188_v8 = vpop.eup %6317  ;;  %v8190_v6 = vmax.f32 %v1448_v32, 0.0  ;;  %v1382_v3 = vmul.f32 %v1338_v21, %v7954_v19  ;;  %v1028_v48 = vadd.f32 %v1027_v28, %v984_v54  ;;  %v1223_v50 = vmul.f32 %v8170_v35, %v8170_v35  ;;  %2532 = vmatmul.f32.gmra.mxu0 %v8182_v33 }
 0x2eb   :  { %v1520_v53 = vld [vmem:[#allocation14 + $0x188] sm:$0xff]  ;;  %2771 = vmatpush.msra.mxu3 %v1936_v22  ;;  %v9955_v10 = vrot.slane %v7900_v17, 1  ;;  %v1090_v57 = vmul.f32 %v8188_v8, %v8146_v40  ;;  %v8201_v27 = vadd.f32 1e-05, %v1038_v62  ;;  %v1024_v36 = vadd.f32 %v1023_v11, %v1022_v34 }
 0x2ec   :  { %v1648_v4 = vld [vmem:[#allocation14 + $0x588] sm:$0xff]  ;;  %2706 = vmatpush.msra.mxu0 %v1520_v53  ;;  %v1197_v44 = vadd.f32 %v1196_v9, %v7915_v46  ;;  %2555 = vmatmul.f32.gmra.mxu1 %v8190_v6  ;;  %v1416_v58 = vmul.f32 %v1392_v30, %v1382_v3  ;;  %v1029_v60 = vrot.slane %v1028_v48, 2  ;;  %vm1096_vm6 = vweird.f32 %v8188_v8 }
 0x2ed   :  { %v1800_v55 = vld [vmem:[#allocation14 + $0xa48] sm:$0xff]  ;;  %v1191_v31 = vadd.f32 %v9955_v10, %v7900_v17  ;;  %2729 = vmatpush.msra.mxu1 %v1648_v4  ;;  %v1091_v18 = vmul.f32 %v8188_v8, %v1090_v57  ;;  %6319 = vrsqrt.f32 %v8201_v27  ;;  %v1025_v47 = vrot.slane %v1024_v36, 1 }
 0x2ee   :  { %v1928_v24 = vld [vmem:[#allocation14 + $0xe48] sm:$0xff]  ;;  %2749 = vmatpush.msra.mxu2 %v1800_v55  ;;  %v1450_v54 = vadd.f32 %v1426_v37, %v1416_v58  ;;  %v1030_v46 = vadd.f32 %v1029_v60, %v1028_v48  ;;  %v1231_v30 = vmul.f32 %v1223_v50, %v7796_v20  ;;  %v1208_v1 = vmul.f32 %v7904_v29, %v1185_v52 }
 0x2ef   :  { %v1512_v51 = vld [vmem:[#allocation14 + $0x148] sm:$0xff]  ;;  %2772 = vmatpush.msra.mxu3 %v1928_v24  ;;  %v1092_v15 = vmul.f32 0.5, %v1091_v18  ;;  %v1026_v61 = vadd.f32 %v1025_v47, %v1024_v36  ;;  %v1209_v12 = vmul.f32 %v7904_v29, %v1191_v31  ;;  %v1210_v37 = vmul.f32 %v7904_v29, %v1197_v44 }
 0x2f0   :  { %v1640_v19 = vld [vmem:[#allocation14 + $0x548] sm:$0xff]  ;;  %2707 = vmatpush.msra.mxu0 %v1512_v51  ;;  %v8215_v13 = vmax.f32 %v1450_v54, 0.0  ;;  %v1031_v5 = vrot.slane %v1030_v46, 1  ;;  %v1259_v34 = vrot.slane %v1231_v30, 4  ;;  %v8220_v32 = vsub.f32 %v7813_v0, %v1208_v1 }
 0x2f1   :  { %v1792_v16 = vld [vmem:[#allocation14 + $0xa08] sm:$0xff]  ;;  %2730 = vmatpush.msra.mxu1 %v1640_v19  ;;  %v1093_v25 = vsub.f32 1.5, %v1092_v15  ;;  %v1039_v9 = vmul.f32 %v1026_v61, %v7837_v38  ;;  %v8223_v22 = vsub.f32 %v7839_v42, %v1209_v12  ;;  %vm1095_vm7 = vweird.f32 %v8146_v40 }
 0x2f2   :  { %v1920_v17 = vld [vmem:[#allocation14 + $0xe08] sm:$0xff]  ;;  %2750 = vmatpush.msra.mxu2 %v1792_v16  ;;  %9956 = vst [vmem:[#allocation109_spill] sm:$0xff] %v8215_v13  ;;  %2601 = vmatmul.f32.gmra.mxu3 %v8215_v13  ;;  %v1032_v52 = vadd.f32 %v1031_v5, %v1030_v46  ;;  %v1260_v21 = vadd.f32 %v1259_v34, %v1231_v30  ;;  %vm1097_vm8 = vmor %vm1095_vm7, %vm1096_vm6  ;;  %v1427_v31 = vperm.slane %v7933_v45, 4  ;;  %v1394_v15 = vperm.slane %v7925_v63, 5 }
 0x2f3   :  { %2773 = vmatpush.msra.mxu3 %v1920_v17  ;;  %v1504_v53 = vld [vmem:[#allocation14 + $0x108] sm:$0xff]  ;;  %v8228_v62 = vsub.f32 %v7841_v43, %v1210_v37  ;;  %v6320_v55 = vpop.eup %6319  ;;  %v1094_v11 = vmul.f32 %v8188_v8, %v1093_v25  ;;  %v8231_v0 = vadd.f32 1e-05, %v1039_v9  ;;  %v1224_v3 = vmul.f32 %v8220_v32, %v8220_v32 }
 0x2f4   :  { %v1632_v4 = vld [vmem:[#allocation14 + $0x508] sm:$0xff]  ;;  %2708 = vmatpush.msra.mxu0 %v1504_v53  ;;  %v1225_v24 = vmul.f32 %v8223_v22, %v8223_v22  ;;  %v1393_v43 = vperm.slane %v7925_v63, 4  ;;  %v1100_v51 = vmul.f32 %v6320_v55, %v8201_v27  ;;  %v1040_v48 = vmul.f32 %v1032_v52, %v7837_v38 }
 0x2f5   :  { %v1784_v28 = vld [vmem:[#allocation14 + $0x9c8] sm:$0xff]  ;;  %2731 = vmatpush.msra.mxu1 %v1632_v4  ;;  %v1261_v50 = vrot.slane %v1260_v21, 2  ;;  %v1098_v10 = vsel %vm1097_vm8, %v8188_v8, %v1094_v11  ;;  %6321 = vrsqrt.f32 %v8231_v0  ;;  %v1232_v57 = vmul.f32 %v1224_v3, %v7796_v20 }
 0x2f6   :  { %v1912_v42 = vld [vmem:[#allocation14 + $0xdc8] sm:$0xff]  ;;  %2751 = vmatpush.msra.mxu2 %v1784_v28  ;;  %v1133_v40 = vmul.f32 %v1098_v10, %v7983_v59  ;;  %v1101_v19 = vmul.f32 %v6320_v55, %v1100_v51  ;;  %v8249_v16 = vadd.f32 1e-05, %v1040_v48  ;;  %v1233_v58 = vmul.f32 %v1225_v24, %v7796_v20 }
 0x2f7   :  { %2774 = vmatpush.msra.mxu3 %v1912_v42  ;;  %v1262_v36 = vadd.f32 %v1261_v50, %v1260_v21  ;;  %v1265_v44 = vrot.slane %v1232_v57, 4  ;;  %v1226_v17 = vmul.f32 %v8228_v62, %v8228_v62  ;;  %vm1106_vm9 = vweird.f32 %v6320_v55 }
 0x2f8   :  { %v1409_v8 = vmul.f32 %v1393_v43, %v1133_v40  ;;  %v1102_v60 = vmul.f32 0.5, %v1101_v19  ;;  %6323 = vrsqrt.f32 %v8249_v16  ;;  %v1271_v54 = vrot.slane %v1233_v58, 4 }
 0x2f9   :  { %v1263_v18 = vrot.slane %v1262_v36, 1  ;;  %v1266_v47 = vadd.f32 %v1265_v44, %v1232_v57  ;;  %v1234_v59 = vmul.f32 %v1226_v17, %v7796_v20  ;;  %vm1105_vm10 = vweird.f32 %v8201_v27  ;;  %v1624_v44 = vld [vmem:[#allocation14 + $0x4c8] sm:$0xff] }
 0x2fa   :  { %v1443_v46 = vadd.f32 %v1427_v31, %v1409_v8  ;;  %v1103_v30 = vsub.f32 1.5, %v1102_v60  ;;  %v1272_v5 = vadd.f32 %v1271_v54, %v1233_v58  ;;  %vm1107_vm11 = vmor %vm1105_vm10, %vm1106_vm9  ;;  %v1428_v27 = vperm.slane %v7933_v45, 5  ;;  %v1776_v58 = vld [vmem:[#allocation14 + $0x988] sm:$0xff]  ;;  %2732 = vmatpush.msra.mxu1 %v1624_v44 }
 0x2fb   :  { %v8261_v61 = vpop.eup %6321  ;;  %v1264_v1 = vadd.f32 %v1263_v18, %v1262_v36  ;;  %v1267_v12 = vrot.slane %v1266_v47, 2  ;;  %v1277_v34 = vrot.slane %v1234_v59, 4  ;;  %v1496_v36 = vld [vmem:[#allocation14 + $0xc8] sm:$0xff]  ;;  %vm1115_vm13 = vweird.f32 %v8231_v0  ;;  %2752 = vmatpush.msra.mxu2 %v1776_v58 }
 0x2fc   :  { %v8263_v37 = vmax.f32 %v1443_v46, 0.0  ;;  %v1104_v25 = vmul.f32 %v6320_v55, %v1103_v30  ;;  %v1110_v9 = vmul.f32 %v8261_v61, %v8231_v0  ;;  %v1273_v4 = vrot.slane %v1272_v5, 2  ;;  %2709 = vmatpush.msra.mxu0 %v1496_v36  ;;  %v1488_v54 = vld [vmem:[#allocation14 + $0x88] sm:$0xff] }
 0x2fd   :  { %v1287_v52 = vmul.f32 %v1264_v1, %v7904_v29  ;;  %v1268_v53 = vadd.f32 %v1267_v12, %v1266_v47  ;;  %v1278_v28 = vadd.f32 %v1277_v34, %v1234_v59  ;;  %vm1116_vm12 = vweird.f32 %v8261_v61  ;;  %v1904_v47 = vld [vmem:[#allocation14 + $0xd88] sm:$0xff] }
 0x2fe   :  { %9957 = vst [vmem:[#allocation110_spill] sm:$0xff] %v8263_v37  ;;  %v8269_v21 = vpop.eup %6323  ;;  %2621 = vmatmul.f32.vlgmr.msrb.gmra.mxu0 %v8263_v37  ;;  %v1108_v11 = vsel %vm1107_vm11, %v6320_v55, %v1104_v25  ;;  %v1111_v42 = vmul.f32 %v8261_v61, %v1110_v9  ;;  %v1274_v10 = vadd.f32 %v1273_v4, %v1272_v5  ;;  %v1616_v59 = vld [vmem:[#allocation14 + $0x488] sm:$0xff]  ;;  %vm8295_vm14 = vmor %vm1115_vm13, %vm1116_vm12  ;;  %vm1125_vm2 = vweird.f32 %v8249_v16 }
 0x2ff   :  { %v1134_v3 = vmul.f32 %v1108_v11, %v7996_v14  ;;  %v1120_v24 = vmul.f32 %v8269_v21, %v8249_v16  ;;  %v8277_v51 = vadd.f32 1e-05, %v1287_v52  ;;  %v1269_v50 = vrot.slane %v1268_v53, 1  ;;  %2775 = vmatpush.msra.mxu3 %v1904_v47  ;;  %v1768_v1 = vld [vmem:[#allocation14 + $0x948] sm:$0xff]  ;;  %2710 = vmatpush.msra.mxu0 %v1488_v54 }
 0x300   :  { %v1112_v48 = vmul.f32 0.5, %v1111_v42  ;;  %v1279_v57 = vrot.slane %v1278_v28, 2  ;;  %v1275_v17 = vrot.slane %v1274_v10, 1  ;;  %v1896_v12 = vld [vmem:[#allocation14 + $0xd48] sm:$0xff]  ;;  %vm1126_vm15 = vweird.f32 %v8269_v21  ;;  %2733 = vmatpush.msra.mxu1 %v1616_v59  ;;  %2753 = vmatpush.msra.mxu2 %v1768_v1 }
 0x301   :  { %v1410_v40 = vmul.f32 %v1394_v15, %v1134_v3  ;;  %v1121_v55 = vmul.f32 %v8269_v21, %v1120_v24  ;;  %6325 = vrsqrt.f32 %v8277_v51  ;;  %v1270_v19 = vadd.f32 %v1269_v50, %v1268_v53  ;;  %v1480_v5 = vld [vmem:[#allocation14 + $0x48] sm:$0xff]  ;;  %2776 = vmatpush.msra.mxu3 %v1896_v12  ;;  %vm1127_vm3 = vmor %vm1125_vm2, %vm1126_vm15 }
 0x302   :  { %v1113_v14 = vsub.f32 1.5, %v1112_v48  ;;  %v1280_v8 = vadd.f32 %v1279_v57, %v1278_v28  ;;  %v1276_v34 = vadd.f32 %v1275_v17, %v1274_v10  ;;  %v1395_v53 = vperm.slane %v7925_v63, 6  ;;  %v1608_v28 = vld [vmem:[#allocation14 + $0x448] sm:$0xff]  ;;  %2711 = vmatpush.msra.mxu0 %v1480_v5 }
 0x303   :  { %v1444_v60 = vadd.f32 %v1428_v27, %v1410_v40  ;;  %v1122_v18 = vmul.f32 0.5, %v1121_v55  ;;  %v1288_v30 = vmul.f32 %v1270_v19, %v7904_v29  ;;  %v1760_v11 = vld [vmem:[#allocation14 + $0x908] sm:$0xff]  ;;  %v1429_v57 = vperm.slane %v7933_v45, 6  ;;  %2734 = vmatpush.msra.mxu1 %v1608_v28 }
 0x304   :  { %v1114_v46 = vmul.f32 %v8261_v61, %v1113_v14  ;;  %v1281_v25 = vrot.slane %v1280_v8, 1  ;;  %v1888_v0 = vld [vmem:[#allocation14 + $0xd08] sm:$0xff]  ;;  %v1289_v24 = vmul.f32 %v1276_v34, %v7904_v29  ;;  %v1396_v19 = vperm.slane %v7925_v63, 7  ;;  %2754 = vmatpush.msra.mxu2 %v1760_v11 }
 0x305   :  { %v8289_v9 = vmax.f32 %v1444_v60, 0.0  ;;  %v1123_v4 = vsub.f32 1.5, %v1122_v18  ;;  %v8304_v3 = vadd.f32 1e-05, %v1288_v30  ;;  %v1600_v55 = vld [vmem:[#allocation14 + $0x408] sm:$0xff]  ;;  %2777 = vmatpush.msra.mxu3 %v1888_v0  ;;  %v1430_v47 = vperm.slane %v7933_v45, 7 }
 0x306   :  { %v1118_v42 = vsel %vm8295_vm14, %v8261_v61, %v1114_v46  ;;  %v1282_v48 = vadd.f32 %v1281_v25, %v1280_v8  ;;  %v1472_v61 = vld [vmem:[#allocation14 + $0x8] sm:$0xff]  ;;  %v8323_v17 = vadd.f32 1e-05, %v1289_v24  ;;  %2735 = vmatpush.msra.mxu1 %v1600_v55  ;;  %vm1345_vm5 = vweird.f32 %v8277_v51 }
 0x307   :  { %9958 = vst [vmem:[#allocation111_spill] sm:$0xff] %v8289_v9  ;;  %v8307_v50 = vpop.eup %6325  ;;  %2644 = vmatmul.f32.vlgmr.msrb.gmra.mxu1 %v8289_v9  ;;  %v1135_v10 = vmul.f32 %v1118_v42, %v8097_v39  ;;  %v1124_v40 = vmul.f32 %v8269_v21, %v1123_v4  ;;  %v1752_v14 = vld [vmem:[#allocation14 + $0x8c8] sm:$0xff]  ;;  %6327 = vrsqrt.f32 %v8304_v3  ;;  %2712 = vmatpush.msra.mxu0 %v1472_v61  ;;  %vm1355_vm8 = vweird.f32 %v8304_v3 }
 0x308   :  { %v1340_v36 = vmul.f32 %v8307_v50, %v8277_v51  ;;  %v1880_v39 = vld [vmem:[#allocation14 + $0xcc8] sm:$0xff]  ;;  %v1290_v8 = vmul.f32 %v1282_v48, %v7904_v29  ;;  %2755 = vmatpush.msra.mxu2 %v1752_v14  ;;  %6329 = vrsqrt.f32 %v8323_v17  ;;  %vm1346_vm4 = vweird.f32 %v8307_v50 }
 0x309   :  { %v2104_v44 = vld [vmem:[#allocation14 + $0x13c8] sm:$0xff]  ;;  %v1411_v16 = vmul.f32 %v1395_v53, %v1135_v10  ;;  %v1128_v58 = vsel %vm1127_vm3, %v8269_v21, %v1124_v40  ;;  %2778 = vmatpush.msra.mxu3 %v1880_v39  ;;  %vm1347_vm6 = vmor %vm1345_vm5, %vm1346_vm4  ;;  %vm1365_vm11 = vweird.f32 %v8323_v17 }
 0x30a   :  { %v2232_v60 = vld [vmem:[#allocation14 + $0x17c8] sm:$0xff]  ;;  %v1136_v18 = vmul.f32 %v1128_v58, %v8102_v7  ;;  %v1341_v54 = vmul.f32 %v8307_v50, %v1340_v36  ;;  %v8332_v1 = vadd.f32 1e-05, %v1290_v8  ;;  %2789 = vmatpush.msrb.mxu0 %v2104_v44 }
 0x30b   :  { %v1744_v59 = vld [vmem:[#allocation14 + $0x888] sm:$0xff]  ;;  %v1445_v21 = vadd.f32 %v1429_v57, %v1411_v16  ;;  %2812 = vmatpush.msrb.mxu1 %v2232_v60 }
 0x30c   :  { %v1872_v46 = vld [vmem:[#allocation14 + $0xc88] sm:$0xff]  ;;  %v1412_v5 = vmul.f32 %v1396_v19, %v1136_v18  ;;  %v1342_v34 = vmul.f32 0.5, %v1341_v54  ;;  %2756 = vmatpush.msra.mxu2 %v1744_v59  ;;  %6331 = vrsqrt.f32 %v8332_v1  ;;  %vm1375_vm14 = vweird.f32 %v8332_v1 }
 0x30d   :  { %v2096_v30 = vld [vmem:[#allocation14 + $0x1388] sm:$0xff]  ;;  %v8336_v52 = vmax.f32 %v1445_v21, 0.0  ;;  %2779 = vmatpush.msra.mxu3 %v1872_v46  ;;  %v8339_v11 = vpop.eup %6327 }
 0x30e   :  { %v2224_v12 = vld [vmem:[#allocation14 + $0x1788] sm:$0xff]  ;;  %2790 = vmatpush.msrb.mxu0 %v2096_v30  ;;  %v1446_v42 = vadd.f32 %v1430_v47, %v1412_v5  ;;  %v1343_v0 = vsub.f32 1.5, %v1342_v34  ;;  %v1350_v10 = vmul.f32 %v8339_v11, %v8304_v3  ;;  %v8351_v39 = vpop.eup %6329  ;;  %vm1356_vm7 = vweird.f32 %v8339_v11 }
 0x30f   :  { %v1736_v7 = vld [vmem:[#allocation14 + $0x848] sm:$0xff]  ;;  %9961 = vst [vmem:[#allocation112_spill] sm:$0xff] %v8336_v52  ;;  %2813 = vmatpush.msrb.mxu1 %v2224_v12  ;;  %2667 = vmatmul.f32.vlgmr.msrb.gmra.mxu2 %v8336_v52  ;;  %v1360_v51 = vmul.f32 %v8351_v39, %v8323_v17  ;;  %vm1357_vm9 = vmor %vm1355_vm8, %vm1356_vm7  ;;  %vm1366_vm10 = vweird.f32 %v8351_v39 }
 0x310   :  { %v1864_v25 = vld [vmem:[#allocation14 + $0xc48] sm:$0xff]  ;;  %2757 = vmatpush.msra.mxu2 %v1736_v7  ;;  %v8347_v61 = vmax.f32 %v1446_v42, 0.0  ;;  %v1344_v55 = vmul.f32 %v8307_v50, %v1343_v0  ;;  %v1351_v44 = vmul.f32 %v8339_v11, %v1350_v10  ;;  %vm1367_vm13 = vmor %vm1365_vm11, %vm1366_vm10 }
 0x311   :  { %v2088_v4 = vld [vmem:[#allocation14 + $0x1348] sm:$0xff]  ;;  %2780 = vmatpush.msra.mxu3 %v1864_v25  ;;  %v1361_v12 = vmul.f32 %v8351_v39, %v1360_v51 }
 0x312   :  { %v2216_v28 = vld [vmem:[#allocation14 + $0x1748] sm:$0xff]  ;;  %9962 = vst [vmem:[#allocation113_spill] sm:$0xff] %v8347_v61  ;;  %2791 = vmatpush.msrb.mxu0 %v2088_v4  ;;  %2690 = vmatmul.f32.vlgmr.msrb.gmra.mxu3 %v8347_v61  ;;  %v1348_v8 = vsel %vm1347_vm6, %v8307_v50, %v1344_v55  ;;  %v8360_v54 = vpop.eup %6331  ;;  %v1352_v46 = vmul.f32 0.5, %v1351_v44 }
 0x313   :  { %v1728_v24 = vld [vmem:[#allocation14 + $0x808] sm:$0xff]  ;;  %2814 = vmatpush.msrb.mxu1 %v2216_v28  ;;  %v1383_v59 = vmul.f32 %v1348_v8, %v8170_v35  ;;  %v1370_v50 = vmul.f32 %v8360_v54, %v8332_v1  ;;  %v1362_v28 = vmul.f32 0.5, %v1361_v12  ;;  %vm1376_vm12 = vweird.f32 %v8360_v54 }
 0x314   :  { %v1856_v48 = vld [vmem:[#allocation14 + $0xc08] sm:$0xff]  ;;  %2758 = vmatpush.msra.mxu2 %v1728_v24  ;;  %v1353_v25 = vsub.f32 1.5, %v1352_v46  ;;  %vm1377_vm15 = vmor %vm1375_vm14, %vm1376_vm12 }
 0x315   :  { %v2080_v40 = vld [vmem:[#allocation14 + $0x1308] sm:$0xff]  ;;  %2781 = vmatpush.msra.mxu3 %v1856_v48  ;;  %v1417_v34 = vmul.f32 %v1393_v43, %v1383_v59  ;;  %v1371_v42 = vmul.f32 %v8360_v54, %v1370_v50  ;;  %v1363_v55 = vsub.f32 1.5, %v1362_v28 }
 0x316   :  { %v2208_v14 = vld [vmem:[#allocation14 + $0x1708] sm:$0xff]  ;;  %2792 = vmatpush.msrb.mxu0 %v2080_v40  ;;  %v1354_v10 = vmul.f32 %v8339_v11, %v1353_v25 }
 0x317   :  { %v2360_v36 = vld [vmem:[#allocation14 + $0x1bc8] sm:$0xff]  ;;  %2815 = vmatpush.msrb.mxu1 %v2208_v14  ;;  %v1451_v48 = vadd.f32 %v1427_v31, %v1417_v34  ;;  %v1372_v14 = vmul.f32 0.5, %v1371_v42  ;;  %v1364_v8 = vmul.f32 %v8351_v39, %v1363_v55 }
 0x318   :  { %v2488_v16 = vld [vmem:[#allocation14 + $0x1fc8] sm:$0xff]  ;;  %2835 = vmatpush.msrb.mxu2 %v2360_v36  ;;  %v1358_v31 = vsel %vm1357_vm9, %v8339_v11, %v1354_v10 }
 0x319   :  { %v2072_v58 = vld [vmem:[#allocation14 + $0x12c8] sm:$0xff]  ;;  %2858 = vmatpush.msrb.mxu3 %v2488_v16  ;;  %v8377_v44 = vmax.f32 %v1451_v48, 0.0  ;;  %v1373_v51 = vsub.f32 1.5, %v1372_v14  ;;  %v1368_v59 = vsel %vm1367_vm13, %v8351_v39, %v1364_v8 }
 0x31a   :  { %v2200_v60 = vld [vmem:[#allocation14 + $0x16c8] sm:$0xff]  ;;  %2793 = vmatpush.msrb.mxu0 %v2072_v58  ;;  %v1384_v58 = vmul.f32 %v1358_v31, %v8220_v32  ;;  %v1385_v12 = vmul.f32 %v1368_v59, %v8223_v22 }
 0x31b   :  { %v2352_v18 = vld [vmem:[#allocation14 + $0x1b88] sm:$0xff]  ;;  %2816 = vmatpush.msrb.mxu1 %v2200_v60  ;;  %9963 = vst [vmem:[#allocation114_spill] sm:$0xff] %v8377_v44  ;;  %2624 = vmatmul.f32.gmra.mxu0 %v8377_v44  ;;  %v1374_v46 = vmul.f32 %v8360_v54, %v1373_v51  ;;  %v1593_v51 = vld [vmem:[#allocation14 + $0x3d0] sm:$0xff] }
 0x31c   :  { %v2480_v30 = vld [vmem:[#allocation14 + $0x1f88] sm:$0xff]  ;;  %2836 = vmatpush.msrb.mxu2 %v2352_v18  ;;  %v1418_v32 = vmul.f32 %v1394_v15, %v1384_v58  ;;  %v1419_v34 = vmul.f32 %v1395_v53, %v1385_v12 }
 0x31d   :  { %v2064_v21 = vld [vmem:[#allocation14 + $0x1288] sm:$0xff]  ;;  %2859 = vmatpush.msrb.mxu3 %v2480_v30  ;;  %v1378_v39 = vsel %vm1377_vm15, %v8360_v54, %v1374_v46 }
 0x31e   :  { %v2192_v7 = vld [vmem:[#allocation14 + $0x1688] sm:$0xff]  ;;  %2794 = vmatpush.msrb.mxu0 %v2064_v21  ;;  %v1452_v15 = vadd.f32 %v1428_v27, %v1418_v32  ;;  %v1386_v22 = vmul.f32 %v1378_v39, %v8228_v62  ;;  %v1453_v27 = vadd.f32 %v1429_v57, %v1419_v34  ;;  %v1713_v32 = vld [vmem:[#allocation14 + $0x790] sm:$0xff] }
 0x31f   :  { %v2344_v5 = vld [vmem:[#allocation14 + $0x1b48] sm:$0xff]  ;;  %2817 = vmatpush.msrb.mxu1 %v2192_v7  ;;  %v1849_v39 = vld [vmem:[#allocation14 + $0xbd0] sm:$0xff] }
 0x320   :  { %v2472_v35 = vld [vmem:[#allocation14 + $0x1f48] sm:$0xff]  ;;  %2837 = vmatpush.msrb.mxu2 %v2344_v5  ;;  %v1420_v54 = vmul.f32 %v1396_v19, %v1386_v22  ;;  %v8408_v42 = vmax.f32 %v1453_v27, 0.0  ;;  %v1689_v34 = vld [vmem:[#allocation14 + $0x6d0] sm:$0xff] }
 0x321   :  { %v2056_v4 = vld [vmem:[#allocation14 + $0x1248] sm:$0xff]  ;;  %2860 = vmatpush.msrb.mxu3 %v2472_v35  ;;  %v8401_v35 = vmax.f32 %v1452_v15, 0.0  ;;  %v1697_v15 = vld [vmem:[#allocation14 + $0x710] sm:$0xff] }
 0x322   :  { %v2184_v0 = vld [vmem:[#allocation14 + $0x1648] sm:$0xff]  ;;  %2795 = vmatpush.msrb.mxu0 %v2056_v4  ;;  %9965 = vst [vmem:[#allocation116_spill] sm:$0xff] %v8408_v42  ;;  %2670 = vmatmul.f32.gmra.mxu2 %v8408_v42  ;;  %v1969_v22 = vld [vmem:[#allocation14 + $0xf90] sm:$0xff] }
 0x323   :  { %v2336_v24 = vld [vmem:[#allocation14 + $0x1b08] sm:$0xff]  ;;  %2818 = vmatpush.msrb.mxu1 %v2184_v0  ;;  %9964 = vst [vmem:[#allocation115_spill] sm:$0xff] %v8401_v35  ;;  %v1454_v0 = vadd.f32 %v1430_v47, %v1420_v54  ;;  %2713 = vmatmul.f32.vlgmr.msra.gmra.mxu0 %v8023_v23  ;;  %v1681_v27 = vld [vmem:[#allocation14 + $0x690] sm:$0xff] }
 0x324   :  { %v2464_v43 = vld [vmem:[#allocation14 + $0x1f08] sm:$0xff]  ;;  %2838 = vmatpush.msrb.mxu2 %v2336_v24  ;;  %2647 = vmatmul.f32.gmra.mxu1 %v8401_v35  ;;  %v1833_v54 = vld [vmem:[#allocation14 + $0xb50] sm:$0xff] }
 0x325   :  { %v2048_v40 = vld [vmem:[#allocation14 + $0x1208] sm:$0xff]  ;;  %2861 = vmatpush.msrb.mxu3 %v2464_v43  ;;  %v8414_v19 = vmax.f32 %v1454_v0, 0.0  ;;  %v1825_v0 = vld [vmem:[#allocation14 + $0xb10] sm:$0xff] }
 0x326   :  { %v2176_v36 = vld [vmem:[#allocation14 + $0x1608] sm:$0xff]  ;;  %2796 = vmatpush.msrb.mxu0 %v2048_v40 }
 0x327   :  { %v2328_v3 = vld [vmem:[#allocation14 + $0x1ac8] sm:$0xff]  ;;  %2819 = vmatpush.msrb.mxu1 %v2176_v36  ;;  %9966 = vst [vmem:[#allocation117_spill] sm:$0xff] %v8414_v19  ;;  %2693 = vmatmul.f32.gmra.mxu3 %v8414_v19 }
 0x328   :  { %v2456_v16 = vld [vmem:[#allocation14 + $0x1ec8] sm:$0xff]  ;;  %2839 = vmatpush.msrb.mxu2 %v2328_v3 }
 0x329   :  { %v2040_v60 = vld [vmem:[#allocation14 + $0x11c8] sm:$0xff]  ;;  %2862 = vmatpush.msrb.mxu3 %v2456_v16 }
 0x32a   :  { %v2168_v18 = vld [vmem:[#allocation14 + $0x15c8] sm:$0xff]  ;;  %2797 = vmatpush.msrb.mxu0 %v2040_v60  ;;  %2759 = vmatmul.f32.vlgmr.msra.gmra.mxu2 %v8072_v56  ;;  %v1721_v60 = vld [vmem:[#allocation14 + $0x7d0] sm:$0xff] }
 0x32b   :  { %v2320_v17 = vld [vmem:[#allocation14 + $0x1a88] sm:$0xff]  ;;  %2820 = vmatpush.msrb.mxu1 %v2168_v18  ;;  %2716 = vmatmul.f32.gmra.mxu0 %v8182_v33 }
 0x32c   :  { %v2448_v11 = vld [vmem:[#allocation14 + $0x1e88] sm:$0xff]  ;;  %2840 = vmatpush.msrb.mxu2 %v2320_v17  ;;  %2736 = vmatmul.f32.vlgmr.msra.gmra.mxu1 %v8058_v2 }
 0x32d   :  { %v2032_v30 = vld [vmem:[#allocation14 + $0x1188] sm:$0xff]  ;;  %2863 = vmatpush.msrb.mxu3 %v2448_v11  ;;  %v1585_v11 = vld [vmem:[#allocation14 + $0x390] sm:$0xff] }
 0x32e   :  { %v2160_v21 = vld [vmem:[#allocation14 + $0x1588] sm:$0xff]  ;;  %2798 = vmatpush.msrb.mxu0 %v2032_v30  ;;  %v1577_v30 = vld [vmem:[#allocation14 + $0x350] sm:$0xff] }
 0x32f   :  { %v2312_v50 = vld [vmem:[#allocation14 + $0x1a48] sm:$0xff]  ;;  %2821 = vmatpush.msrb.mxu1 %v2160_v21  ;;  %2782 = vmatmul.f32.vlgmr.msra.gmra.mxu3 %v8099_v49  ;;  %v1705_v21 = vld [vmem:[#allocation14 + $0x750] sm:$0xff] }
 0x330   :  { %v2440_v7 = vld [vmem:[#allocation14 + $0x1e48] sm:$0xff]  ;;  %2841 = vmatpush.msrb.mxu2 %v2312_v50 }
 0x331   :  { %v2024_v1 = vld [vmem:[#allocation14 + $0x1148] sm:$0xff]  ;;  %2864 = vmatpush.msrb.mxu3 %v2440_v7  ;;  %v1569_v7 = vld [vmem:[#allocation14 + $0x310] sm:$0xff] }
 0x332   :  { %v2152_v5 = vld [vmem:[#allocation14 + $0x1548] sm:$0xff]  ;;  %2799 = vmatpush.msrb.mxu0 %v2024_v1  ;;  %2762 = vmatmul.f32.gmra.mxu2 %v8160_v26  ;;  %v1977_v1 = vld [vmem:[#allocation14 + $0xfd0] sm:$0xff] }
 0x333   :  { %v2304_v25 = vld [vmem:[#allocation14 + $0x1a08] sm:$0xff]  ;;  %2822 = vmatpush.msrb.mxu1 %v2152_v5  ;;  %v1561_v5 = vld [vmem:[#allocation14 + $0x2d0] sm:$0xff] }
 0x334   :  { %v2432_v4 = vld [vmem:[#allocation14 + $0x1e08] sm:$0xff]  ;;  %2842 = vmatpush.msrb.mxu2 %v2304_v25  ;;  %2739 = vmatmul.f32.gmra.mxu1 %v8190_v6  ;;  %v1841_v25 = vld [vmem:[#allocation14 + $0xb90] sm:$0xff] }
 0x335   :  { %v2016_v28 = vld [vmem:[#allocation14 + $0x1108] sm:$0xff]  ;;  %2865 = vmatpush.msrb.mxu3 %v2432_v4  ;;  %v1553_v4 = vld [vmem:[#allocation14 + $0x290] sm:$0xff] }
 0x336   :  { %v2144_v53 = vld [vmem:[#allocation14 + $0x1508] sm:$0xff]  ;;  %2800 = vmatpush.msrb.mxu0 %v2016_v28  ;;  %v1961_v28 = vld [vmem:[#allocation14 + $0xf50] sm:$0xff] }
 0x337   :  { %v2424_v62 = vld [vmem:[#allocation14 + $0x1dc8] sm:$0xff]  ;;  %2823 = vmatpush.msrb.mxu1 %v2144_v53  ;;  %2785 = vmatmul.f32.gmra.mxu3 %v8215_v13  ;;  %v1545_v53 = vld [vmem:[#allocation14 + $0x250] sm:$0xff] }
 0x338   :  { %v2296_v57 = vld [vmem:[#allocation14 + $0x19c8] sm:$0xff]  ;;  %2866 = vmatpush.msrb.mxu3 %v2424_v62  ;;  %v1673_v62 = vld [vmem:[#allocation14 + $0x650] sm:$0xff] }
 0x339   :  { %v2008_v24 = vld [vmem:[#allocation14 + $0x10c8] sm:$0xff]  ;;  %2843 = vmatpush.msrb.mxu2 %v2296_v57  ;;  %v1953_v57 = vld [vmem:[#allocation14 + $0xf10] sm:$0xff] }
 0x33a   :  { %v2136_v63 = vld [vmem:[#allocation14 + $0x14c8] sm:$0xff]  ;;  %2801 = vmatpush.msrb.mxu0 %v2008_v24  ;;  %v1537_v24 = vld [vmem:[#allocation14 + $0x210] sm:$0xff] }
 0x33b   :  { %v2288_v48 = vld [vmem:[#allocation14 + $0x1988] sm:$0xff]  ;;  %2824 = vmatpush.msrb.mxu1 %v2136_v63  ;;  %v1665_v63 = vld [vmem:[#allocation14 + $0x610] sm:$0xff] }
 0x33c   :  { %v2416_v10 = vld [vmem:[#allocation14 + $0x1d88] sm:$0xff]  ;;  %2844 = vmatpush.msrb.mxu2 %v2288_v48  ;;  %v1817_v48 = vld [vmem:[#allocation14 + $0xad0] sm:$0xff] }
 0x33d   :  { %v2000_v43 = vld [vmem:[#allocation14 + $0x1088] sm:$0xff]  ;;  %2867 = vmatpush.msrb.mxu3 %v2416_v10  ;;  %v1945_v10 = vld [vmem:[#allocation14 + $0xed0] sm:$0xff] }
 0x33e   :  { %v2128_v45 = vld [vmem:[#allocation14 + $0x1488] sm:$0xff]  ;;  %2802 = vmatpush.msrb.mxu0 %v2000_v43  ;;  %v1529_v43 = vld [vmem:[#allocation14 + $0x1d0] sm:$0xff] }
 0x33f   :  { %v2280_v47 = vld [vmem:[#allocation14 + $0x1948] sm:$0xff]  ;;  %2825 = vmatpush.msrb.mxu1 %v2128_v45  ;;  %v1657_v45 = vld [vmem:[#allocation14 + $0x5d0] sm:$0xff] }
 0x340   :  { %v2408_v40 = vld [vmem:[#allocation14 + $0x1d48] sm:$0xff]  ;;  %2845 = vmatpush.msrb.mxu2 %v2280_v47  ;;  %v1809_v47 = vld [vmem:[#allocation14 + $0xa90] sm:$0xff] }
 0x341   :  { %v1992_v55 = vld [vmem:[#allocation14 + $0x1048] sm:$0xff]  ;;  %2868 = vmatpush.msrb.mxu3 %v2408_v40  ;;  %v1937_v40 = vld [vmem:[#allocation14 + $0xe90] sm:$0xff] }
 0x342   :  { %v2120_v14 = vld [vmem:[#allocation14 + $0x1448] sm:$0xff]  ;;  %2803 = vmatpush.msrb.mxu0 %v1992_v55  ;;  %v1521_v55 = vld [vmem:[#allocation14 + $0x190] sm:$0xff] }
 0x343   :  { %v2400_v36 = vld [vmem:[#allocation14 + $0x1d08] sm:$0xff]  ;;  %2826 = vmatpush.msrb.mxu1 %v2120_v14  ;;  %v1649_v14 = vld [vmem:[#allocation14 + $0x590] sm:$0xff] }
 0x344   :  { %v2272_v31 = vld [vmem:[#allocation14 + $0x1908] sm:$0xff]  ;;  %2869 = vmatpush.msrb.mxu3 %v2400_v36  ;;  %v1801_v36 = vld [vmem:[#allocation14 + $0xa50] sm:$0xff] }
 0x345   :  { %v1984_v3 = vld [vmem:[#allocation14 + $0x1008] sm:$0xff]  ;;  %2846 = vmatpush.msrb.mxu2 %v2272_v31  ;;  %v1929_v31 = vld [vmem:[#allocation14 + $0xe50] sm:$0xff] }
 0x346   :  { %v2112_v16 = vld [vmem:[#allocation14 + $0x1408] sm:$0xff]  ;;  %2804 = vmatpush.msrb.mxu0 %v1984_v3  ;;  %v1513_v3 = vld [vmem:[#allocation14 + $0x150] sm:$0xff] }
 0x347   :  { %v2264_v58 = vld [vmem:[#allocation14 + $0x18c8] sm:$0xff]  ;;  %2827 = vmatpush.msrb.mxu1 %v2112_v16  ;;  %2805 = vmatmul.f32.vlgmr.msrb.gmra.mxu0 %v8263_v37  ;;  %v1641_v16 = vld [vmem:[#allocation14 + $0x550] sm:$0xff] }
 0x348   :  { %v2392_v8 = vld [vmem:[#allocation14 + $0x1cc8] sm:$0xff]  ;;  %2847 = vmatpush.msrb.mxu2 %v2264_v58  ;;  %2881 = vmatpush.msra.mxu0 %v1593_v51  ;;  %v1793_v58 = vld [vmem:[#allocation14 + $0xa10] sm:$0xff] }
 0x349   :  { %v2256_v18 = vld [vmem:[#allocation14 + $0x1888] sm:$0xff]  ;;  %2870 = vmatpush.msrb.mxu3 %v2392_v8  ;;  %2904 = vmatpush.msra.mxu1 %v1721_v60  ;;  %v1921_v8 = vld [vmem:[#allocation14 + $0xe10] sm:$0xff] }
 0x34a   :  { %v2384_v17 = vld [vmem:[#allocation14 + $0x1c88] sm:$0xff]  ;;  %2848 = vmatpush.msrb.mxu2 %v2256_v18  ;;  %2882 = vmatpush.msra.mxu0 %v1585_v11  ;;  %v1505_v51 = vld [vmem:[#allocation14 + $0x110] sm:$0xff] }
 0x34b   :  { %v2376_v59 = vld [vmem:[#allocation14 + $0x1c48] sm:$0xff]  ;;  %2871 = vmatpush.msrb.mxu3 %v2384_v17  ;;  %2905 = vmatpush.msra.mxu1 %v1713_v32  ;;  %v1633_v60 = vld [vmem:[#allocation14 + $0x510] sm:$0xff] }
 0x34c   :  { %v2248_v46 = vld [vmem:[#allocation14 + $0x1848] sm:$0xff]  ;;  %2883 = vmatpush.msra.mxu0 %v1577_v30  ;;  %2828 = vmatmul.f32.vlgmr.msrb.gmra.mxu1 %v8289_v9  ;;  %v1785_v18 = vld [vmem:[#allocation14 + $0x9d0] sm:$0xff] }
 0x34d   :  { %2872 = vmatpush.msrb.mxu3 %v2376_v59  ;;  %v2240_v12 = vld [vmem:[#allocation14 + $0x1808] sm:$0xff]  ;;  %2849 = vmatpush.msrb.mxu2 %v2248_v46  ;;  %v1913_v17 = vld [vmem:[#allocation14 + $0xdd0] sm:$0xff] }
 0x34e   :  { %v2368_v50 = vld [vmem:[#allocation14 + $0x1c08] sm:$0xff]  ;;  %2906 = vmatpush.msra.mxu1 %v1705_v21  ;;  %2884 = vmatpush.msra.mxu0 %v1569_v7  ;;  %v1497_v11 = vld [vmem:[#allocation14 + $0xd0] sm:$0xff] }
 0x34f   :  { %2850 = vmatpush.msrb.mxu2 %v2240_v12  ;;  %2873 = vmatpush.msrb.mxu3 %v2368_v50  ;;  %v1625_v32 = vld [vmem:[#allocation14 + $0x4d0] sm:$0xff]  ;;  %v2028_v29 = vld [vmem:[#allocation14 + $0x1168] sm:$0xff] }
 0x350   :  { %2907 = vmatpush.msra.mxu1 %v1697_v15  ;;  %2808 = vmatmul.f32.gmra.mxu0 %v8377_v44  ;;  %v1777_v59 = vld [vmem:[#allocation14 + $0x990] sm:$0xff]  ;;  %v2156_v20 = vld [vmem:[#allocation14 + $0x1568] sm:$0xff] }
 0x351   :  { %2927 = vmatpush.msra.mxu2 %v1849_v39  ;;  %2950 = vmatpush.msra.mxu3 %v1977_v1  ;;  %v1905_v46 = vld [vmem:[#allocation14 + $0xd90] sm:$0xff] }
 0x352   :  { %2885 = vmatpush.msra.mxu0 %v1561_v5  ;;  %2908 = vmatpush.msra.mxu1 %v1689_v34  ;;  %v1489_v30 = vld [vmem:[#allocation14 + $0x90] sm:$0xff] }
 0x353   :  { %2851 = vmatmul.f32.vlgmr.msrb.gmra.mxu2 %v8336_v52  ;;  %2951 = vmatpush.msra.mxu3 %v1969_v22  ;;  %v1617_v21 = vld [vmem:[#allocation14 + $0x490] sm:$0xff] }
 0x354   :  { %2928 = vmatpush.msra.mxu2 %v1841_v25  ;;  %2886 = vmatpush.msra.mxu0 %v1553_v4  ;;  %v1769_v12 = vld [vmem:[#allocation14 + $0x950] sm:$0xff] }
 0x355   :  { %2874 = vmatmul.f32.vlgmr.msrb.gmra.mxu3 %v8347_v61  ;;  %2909 = vmatpush.msra.mxu1 %v1681_v27  ;;  %v1897_v50 = vld [vmem:[#allocation14 + $0xd50] sm:$0xff] }
 0x356   :  { %2929 = vmatpush.msra.mxu2 %v1833_v54  ;;  %2952 = vmatpush.msra.mxu3 %v1961_v28  ;;  %v1481_v7 = vld [vmem:[#allocation14 + $0x50] sm:$0xff] }
 0x357   :  { %2887 = vmatpush.msra.mxu0 %v1545_v53  ;;  %2910 = vmatpush.msra.mxu1 %v1673_v62  ;;  %v1609_v15 = vld [vmem:[#allocation14 + $0x450] sm:$0xff] }
 0x358   :  { %2831 = vmatmul.f32.gmra.mxu1 %v8401_v35  ;;  %2930 = vmatpush.msra.mxu2 %v1825_v0  ;;  %v1761_v39 = vld [vmem:[#allocation14 + $0x910] sm:$0xff] }
 0x359   :  { %2953 = vmatpush.msra.mxu3 %v1953_v57  ;;  %2888 = vmatpush.msra.mxu0 %v1537_v24  ;;  %v1889_v1 = vld [vmem:[#allocation14 + $0xd10] sm:$0xff] }
 0x35a   :  { %2911 = vmatpush.msra.mxu1 %v1665_v63  ;;  %2931 = vmatpush.msra.mxu2 %v1817_v48  ;;  %v1473_v5 = vld [vmem:[#allocation14 + $0x10] sm:$0xff] }
 0x35b   :  { %2854 = vmatmul.f32.gmra.mxu2 %v8408_v42  ;;  %2954 = vmatpush.msra.mxu3 %v1945_v10  ;;  %v1601_v34 = vld [vmem:[#allocation14 + $0x410] sm:$0xff] }
 0x35c   :  { %2889 = vmatpush.msra.mxu0 %v1529_v43  ;;  %2912 = vmatpush.msra.mxu1 %v1657_v45  ;;  %v1753_v22 = vld [vmem:[#allocation14 + $0x8d0] sm:$0xff] }
 0x35d   :  { %2877 = vmatmul.f32.gmra.mxu3 %v8414_v19  ;;  %2932 = vmatpush.msra.mxu2 %v1809_v47  ;;  %v1881_v25 = vld [vmem:[#allocation14 + $0xcd0] sm:$0xff] }
 0x35e   :  { %2955 = vmatpush.msra.mxu3 %v1937_v40  ;;  %2890 = vmatpush.msra.mxu0 %v1521_v55  ;;  %v2105_v4 = vld [vmem:[#allocation14 + $0x13d0] sm:$0xff] }
 0x35f   :  { %2913 = vmatpush.msra.mxu1 %v1649_v14  ;;  %2933 = vmatpush.msra.mxu2 %v1801_v36  ;;  %v2233_v27 = vld [vmem:[#allocation14 + $0x17d0] sm:$0xff] }
 0x360   :  { %2956 = vmatpush.msra.mxu3 %v1929_v31  ;;  %2891 = vmatpush.msra.mxu0 %v1513_v3  ;;  %v1745_v54 = vld [vmem:[#allocation14 + $0x890] sm:$0xff] }
 0x361   :  { %2914 = vmatpush.msra.mxu1 %v1641_v16  ;;  %2934 = vmatpush.msra.mxu2 %v1793_v58  ;;  %v1873_v28 = vld [vmem:[#allocation14 + $0xc90] sm:$0xff] }
 0x362   :  { %2957 = vmatpush.msra.mxu3 %v1921_v8  ;;  %2892 = vmatpush.msra.mxu0 %v1505_v51  ;;  %v2097_v53 = vld [vmem:[#allocation14 + $0x1390] sm:$0xff] }
 0x363   :  { %2915 = vmatpush.msra.mxu1 %v1633_v60  ;;  %2935 = vmatpush.msra.mxu2 %v1785_v18  ;;  %v2225_v62 = vld [vmem:[#allocation14 + $0x1790] sm:$0xff] }
 0x364   :  { %2958 = vmatpush.msra.mxu3 %v1913_v17  ;;  %2893 = vmatpush.msra.mxu0 %v1497_v11  ;;  %v1737_v0 = vld [vmem:[#allocation14 + $0x850] sm:$0xff] }
 0x365   :  { %2916 = vmatpush.msra.mxu1 %v1625_v32  ;;  %2936 = vmatpush.msra.mxu2 %v1777_v59  ;;  %v1865_v57 = vld [vmem:[#allocation14 + $0xc50] sm:$0xff] }
 0x366   :  { %2959 = vmatpush.msra.mxu3 %v1905_v46  ;;  %2894 = vmatpush.msra.mxu0 %v1489_v30  ;;  %v2089_v24 = vld [vmem:[#allocation14 + $0x1350] sm:$0xff] }
 0x367   :  { %2917 = vmatpush.msra.mxu1 %v1617_v21  ;;  %2937 = vmatpush.msra.mxu2 %v1769_v12  ;;  %v2217_v63 = vld [vmem:[#allocation14 + $0x1750] sm:$0xff] }
 0x368   :  { %2960 = vmatpush.msra.mxu3 %v1897_v50  ;;  %2895 = vmatpush.msra.mxu0 %v1481_v7  ;;  %v1729_v48 = vld [vmem:[#allocation14 + $0x810] sm:$0xff] }
 0x369   :  { %2918 = vmatpush.msra.mxu1 %v1609_v15  ;;  %2938 = vmatpush.msra.mxu2 %v1761_v39  ;;  %v1857_v10 = vld [vmem:[#allocation14 + $0xc10] sm:$0xff] }
 0x36a   :  { %2961 = vmatpush.msra.mxu3 %v1889_v1  ;;  %2896 = vmatpush.msra.mxu0 %v1473_v5  ;;  %v2081_v43 = vld [vmem:[#allocation14 + $0x1310] sm:$0xff] }
 0x36b   :  { %2919 = vmatpush.msra.mxu1 %v1601_v34  ;;  %2939 = vmatpush.msra.mxu2 %v1753_v22  ;;  %v2209_v45 = vld [vmem:[#allocation14 + $0x1710] sm:$0xff] }
 0x36c   :  { %2962 = vmatpush.msra.mxu3 %v1881_v25  ;;  %2897 = vmatmul.f32.vlgmr.msra.gmra.mxu0 %v8023_v23  ;;  %v2361_v47 = vld [vmem:[#allocation14 + $0x1bd0] sm:$0xff] }
 0x36d   :  { %2920 = vmatmul.f32.vlgmr.msra.gmra.mxu1 %v8058_v2  ;;  %2973 = vmatpush.msrb.mxu0 %v2105_v4  ;;  %v2489_v40 = vld [vmem:[#allocation14 + $0x1fd0] sm:$0xff] }
 0x36e   :  { %2996 = vmatpush.msrb.mxu1 %v2233_v27  ;;  %2940 = vmatpush.msra.mxu2 %v1745_v54  ;;  %v2073_v55 = vld [vmem:[#allocation14 + $0x12d0] sm:$0xff] }
 0x36f   :  { %2963 = vmatpush.msra.mxu3 %v1873_v28  ;;  %2974 = vmatpush.msrb.mxu0 %v2097_v53  ;;  %v2201_v14 = vld [vmem:[#allocation14 + $0x16d0] sm:$0xff] }
 0x370   :  { %2997 = vmatpush.msrb.mxu1 %v2225_v62  ;;  %2941 = vmatpush.msra.mxu2 %v1737_v0  ;;  %v2353_v36 = vld [vmem:[#allocation14 + $0x1b90] sm:$0xff] }
 0x371   :  { %2964 = vmatpush.msra.mxu3 %v1865_v57  ;;  %2975 = vmatpush.msrb.mxu0 %v2089_v24  ;;  %v2481_v31 = vld [vmem:[#allocation14 + $0x1f90] sm:$0xff] }
 0x372   :  { %2998 = vmatpush.msrb.mxu1 %v2217_v63  ;;  %2942 = vmatpush.msra.mxu2 %v1729_v48  ;;  %v2065_v3 = vld [vmem:[#allocation14 + $0x1290] sm:$0xff] }
 0x373   :  { %2965 = vmatpush.msra.mxu3 %v1857_v10  ;;  %2943 = vmatmul.f32.vlgmr.msra.gmra.mxu2 %v8072_v56  ;;  %v2193_v16 = vld [vmem:[#allocation14 + $0x1690] sm:$0xff] }
 0x374   :  { %2966 = vmatmul.f32.vlgmr.msra.gmra.mxu3 %v8099_v49  ;;  %2976 = vmatpush.msrb.mxu0 %v2081_v43  ;;  %v2345_v58 = vld [vmem:[#allocation14 + $0x1b50] sm:$0xff] }
 0x375   :  { %2999 = vmatpush.msrb.mxu1 %v2209_v45  ;;  %3019 = vmatpush.msrb.mxu2 %v2361_v47  ;;  %v2473_v8 = vld [vmem:[#allocation14 + $0x1f50] sm:$0xff] }
 0x376   :  { %3042 = vmatpush.msrb.mxu3 %v2489_v40  ;;  %2900 = vmatmul.f32.gmra.mxu0 %v8182_v33  ;;  %v2057_v51 = vld [vmem:[#allocation14 + $0x1250] sm:$0xff] }
 0x377   :  { %2923 = vmatmul.f32.gmra.mxu1 %v8190_v6  ;;  %2977 = vmatpush.msrb.mxu0 %v2073_v55  ;;  %v2185_v60 = vld [vmem:[#allocation14 + $0x1650] sm:$0xff] }
 0x378   :  { %3000 = vmatpush.msrb.mxu1 %v2201_v14  ;;  %3020 = vmatpush.msrb.mxu2 %v2353_v36  ;;  %v2337_v18 = vld [vmem:[#allocation14 + $0x1b10] sm:$0xff] }
 0x379   :  { %3043 = vmatpush.msrb.mxu3 %v2481_v31  ;;  %2978 = vmatpush.msrb.mxu0 %v2065_v3  ;;  %v2465_v17 = vld [vmem:[#allocation14 + $0x1f10] sm:$0xff]  ;;  %v1594_v3 = vld [vmem:[#allocation14 + $0x3d8] sm:$0xff] }
 0x37a   :  { %3001 = vmatpush.msrb.mxu1 %v2193_v16  ;;  %3021 = vmatpush.msrb.mxu2 %v2345_v58  ;;  %v2049_v11 = vld [vmem:[#allocation14 + $0x1210] sm:$0xff]  ;;  %v1722_v16 = vld [vmem:[#allocation14 + $0x7d8] sm:$0xff] }
 0x37b   :  { %3044 = vmatpush.msrb.mxu3 %v2473_v8  ;;  %2979 = vmatpush.msrb.mxu0 %v2057_v51  ;;  %v2177_v32 = vld [vmem:[#allocation14 + $0x1610] sm:$0xff]  ;;  %v1586_v51 = vld [vmem:[#allocation14 + $0x398] sm:$0xff] }
 0x37c   :  { %3002 = vmatpush.msrb.mxu1 %v2185_v60  ;;  %3022 = vmatpush.msrb.mxu2 %v2337_v18  ;;  %v2329_v59 = vld [vmem:[#allocation14 + $0x1ad0] sm:$0xff]  ;;  %v1714_v60 = vld [vmem:[#allocation14 + $0x798] sm:$0xff] }
 0x37d   :  { %3045 = vmatpush.msrb.mxu3 %v2465_v17  ;;  %2946 = vmatmul.f32.gmra.mxu2 %v8160_v26  ;;  %v2457_v46 = vld [vmem:[#allocation14 + $0x1ed0] sm:$0xff] }
 0x37e   :  { %v2041_v30 = vld [vmem:[#allocation14 + $0x11d0] sm:$0xff]  ;;  %2969 = vmatmul.f32.gmra.mxu3 %v8215_v13  ;;  %2980 = vmatpush.msrb.mxu0 %v2049_v11  ;;  %v1578_v11 = vld [vmem:[#allocation14 + $0x358] sm:$0xff] }
 0x37f   :  { %v2169_v21 = vld [vmem:[#allocation14 + $0x15d0] sm:$0xff]  ;;  %3003 = vmatpush.msrb.mxu1 %v2177_v32  ;;  %3023 = vmatpush.msrb.mxu2 %v2329_v59  ;;  %v1706_v32 = vld [vmem:[#allocation14 + $0x758] sm:$0xff] }
 0x380   :  { %v2321_v12 = vld [vmem:[#allocation14 + $0x1a90] sm:$0xff]  ;;  %3046 = vmatpush.msrb.mxu3 %v2457_v46  ;;  %2981 = vmatpush.msrb.mxu0 %v2041_v30  ;;  %v1570_v30 = vld [vmem:[#allocation14 + $0x318] sm:$0xff] }
 0x381   :  { %v2449_v50 = vld [vmem:[#allocation14 + $0x1e90] sm:$0xff]  ;;  %3004 = vmatpush.msrb.mxu1 %v2169_v21  ;;  %3024 = vmatpush.msrb.mxu2 %v2321_v12  ;;  %v1698_v21 = vld [vmem:[#allocation14 + $0x718] sm:$0xff] }
 0x382   :  { %v2033_v7 = vld [vmem:[#allocation14 + $0x1190] sm:$0xff]  ;;  %3047 = vmatpush.msrb.mxu3 %v2449_v50  ;;  %v1850_v12 = vld [vmem:[#allocation14 + $0xbd8] sm:$0xff] }
 0x383   :  { %v2161_v15 = vld [vmem:[#allocation14 + $0x1590] sm:$0xff]  ;;  %2982 = vmatpush.msrb.mxu0 %v2033_v7  ;;  %v1978_v50 = vld [vmem:[#allocation14 + $0xfd8] sm:$0xff] }
 0x384   :  { %v2313_v39 = vld [vmem:[#allocation14 + $0x1a50] sm:$0xff]  ;;  %3005 = vmatpush.msrb.mxu1 %v2161_v15  ;;  %v1562_v7 = vld [vmem:[#allocation14 + $0x2d8] sm:$0xff] }
 0x385   :  { %v2441_v1 = vld [vmem:[#allocation14 + $0x1e50] sm:$0xff]  ;;  %3025 = vmatpush.msrb.mxu2 %v2313_v39  ;;  %v1690_v15 = vld [vmem:[#allocation14 + $0x6d8] sm:$0xff] }
 0x386   :  { %v2025_v5 = vld [vmem:[#allocation14 + $0x1150] sm:$0xff]  ;;  %3048 = vmatpush.msrb.mxu3 %v2441_v1  ;;  %v1842_v39 = vld [vmem:[#allocation14 + $0xb98] sm:$0xff] }
 0x387   :  { %v2153_v34 = vld [vmem:[#allocation14 + $0x1550] sm:$0xff]  ;;  %2983 = vmatpush.msrb.mxu0 %v2025_v5  ;;  %v1970_v1 = vld [vmem:[#allocation14 + $0xf98] sm:$0xff] }
 0x388   :  { %v2305_v22 = vld [vmem:[#allocation14 + $0x1a10] sm:$0xff]  ;;  %3006 = vmatpush.msrb.mxu1 %v2153_v34  ;;  %v1554_v5 = vld [vmem:[#allocation14 + $0x298] sm:$0xff] }
 0x389   :  { %v2433_v25 = vld [vmem:[#allocation14 + $0x1e10] sm:$0xff]  ;;  %3026 = vmatpush.msrb.mxu2 %v2305_v22  ;;  %v1682_v34 = vld [vmem:[#allocation14 + $0x698] sm:$0xff] }
 0x38a   :  { %v2017_v4 = vld [vmem:[#allocation14 + $0x1110] sm:$0xff]  ;;  %3049 = vmatpush.msrb.mxu3 %v2433_v25  ;;  %v1834_v22 = vld [vmem:[#allocation14 + $0xb58] sm:$0xff] }
 0x38b   :  { %v2145_v27 = vld [vmem:[#allocation14 + $0x1510] sm:$0xff]  ;;  %2984 = vmatpush.msrb.mxu0 %v2017_v4  ;;  %v1962_v25 = vld [vmem:[#allocation14 + $0xf58] sm:$0xff] }
 0x38c   :  { %v2297_v54 = vld [vmem:[#allocation14 + $0x19d0] sm:$0xff]  ;;  %3007 = vmatpush.msrb.mxu1 %v2145_v27  ;;  %v1546_v4 = vld [vmem:[#allocation14 + $0x258] sm:$0xff] }
 0x38d   :  { %v2425_v28 = vld [vmem:[#allocation14 + $0x1dd0] sm:$0xff]  ;;  %3027 = vmatpush.msrb.mxu2 %v2297_v54  ;;  %v1674_v27 = vld [vmem:[#allocation14 + $0x658] sm:$0xff] }
 0x38e   :  { %v2009_v53 = vld [vmem:[#allocation14 + $0x10d0] sm:$0xff]  ;;  %3050 = vmatpush.msrb.mxu3 %v2425_v28  ;;  %v1826_v54 = vld [vmem:[#allocation14 + $0xb18] sm:$0xff] }
 0x38f   :  { %v2137_v62 = vld [vmem:[#allocation14 + $0x14d0] sm:$0xff]  ;;  %2985 = vmatpush.msrb.mxu0 %v2009_v53  ;;  %v1954_v28 = vld [vmem:[#allocation14 + $0xf18] sm:$0xff] }
 0x390   :  { %v2289_v0 = vld [vmem:[#allocation14 + $0x1990] sm:$0xff]  ;;  %3008 = vmatpush.msrb.mxu1 %v2137_v62  ;;  %v1538_v53 = vld [vmem:[#allocation14 + $0x218] sm:$0xff] }
 0x391   :  { %v2417_v57 = vld [vmem:[#allocation14 + $0x1d90] sm:$0xff]  ;;  %3028 = vmatpush.msrb.mxu2 %v2289_v0  ;;  %v1666_v62 = vld [vmem:[#allocation14 + $0x618] sm:$0xff] }
 0x392   :  { %v2001_v24 = vld [vmem:[#allocation14 + $0x1090] sm:$0xff]  ;;  %3051 = vmatpush.msrb.mxu3 %v2417_v57  ;;  %v1818_v0 = vld [vmem:[#allocation14 + $0xad8] sm:$0xff] }
 0x393   :  { %v2129_v63 = vld [vmem:[#allocation14 + $0x1490] sm:$0xff]  ;;  %2986 = vmatpush.msrb.mxu0 %v2001_v24  ;;  %v1946_v57 = vld [vmem:[#allocation14 + $0xed8] sm:$0xff] }
 0x394   :  { %v2281_v48 = vld [vmem:[#allocation14 + $0x1950] sm:$0xff]  ;;  %3009 = vmatpush.msrb.mxu1 %v2129_v63  ;;  %v1530_v24 = vld [vmem:[#allocation14 + $0x1d8] sm:$0xff] }
 0x395   :  { %v2409_v10 = vld [vmem:[#allocation14 + $0x1d50] sm:$0xff]  ;;  %3029 = vmatpush.msrb.mxu2 %v2281_v48  ;;  %v1658_v63 = vld [vmem:[#allocation14 + $0x5d8] sm:$0xff] }
 0x396   :  { %v1993_v43 = vld [vmem:[#allocation14 + $0x1050] sm:$0xff]  ;;  %3052 = vmatpush.msrb.mxu3 %v2409_v10  ;;  %v1810_v48 = vld [vmem:[#allocation14 + $0xa98] sm:$0xff] }
 0x397   :  { %v2121_v45 = vld [vmem:[#allocation14 + $0x1450] sm:$0xff]  ;;  %2987 = vmatpush.msrb.mxu0 %v1993_v43  ;;  %v1938_v10 = vld [vmem:[#allocation14 + $0xe98] sm:$0xff] }
 0x398   :  { %v2273_v47 = vld [vmem:[#allocation14 + $0x1910] sm:$0xff]  ;;  %3010 = vmatpush.msrb.mxu1 %v2121_v45  ;;  %v1522_v43 = vld [vmem:[#allocation14 + $0x198] sm:$0xff] }
 0x399   :  { %v2401_v40 = vld [vmem:[#allocation14 + $0x1d10] sm:$0xff]  ;;  %3030 = vmatpush.msrb.mxu2 %v2273_v47  ;;  %v1650_v45 = vld [vmem:[#allocation14 + $0x598] sm:$0xff] }
 0x39a   :  { %v1985_v55 = vld [vmem:[#allocation14 + $0x1010] sm:$0xff]  ;;  %3053 = vmatpush.msrb.mxu3 %v2401_v40  ;;  %v1802_v47 = vld [vmem:[#allocation14 + $0xa58] sm:$0xff] }
 0x39b   :  { %v2113_v14 = vld [vmem:[#allocation14 + $0x1410] sm:$0xff]  ;;  %2988 = vmatpush.msrb.mxu0 %v1985_v55  ;;  %v1930_v40 = vld [vmem:[#allocation14 + $0xe58] sm:$0xff] }
 0x39c   :  { %v2265_v36 = vld [vmem:[#allocation14 + $0x18d0] sm:$0xff]  ;;  %3011 = vmatpush.msrb.mxu1 %v2113_v14  ;;  %2989 = vmatmul.f32.vlgmr.msrb.gmra.mxu0 %v8263_v37  ;;  %v1514_v55 = vld [vmem:[#allocation14 + $0x158] sm:$0xff] }
 0x39d   :  { %v2393_v31 = vld [vmem:[#allocation14 + $0x1cd0] sm:$0xff]  ;;  %3031 = vmatpush.msrb.mxu2 %v2265_v36  ;;  %3012 = vmatmul.f32.vlgmr.msrb.gmra.mxu1 %v8289_v9  ;;  %v1642_v14 = vld [vmem:[#allocation14 + $0x558] sm:$0xff] }
 0x39e   :  { %v2257_v58 = vld [vmem:[#allocation14 + $0x1890] sm:$0xff]  ;;  %3054 = vmatpush.msrb.mxu3 %v2393_v31  ;;  %3065 = vmatpush.msra.mxu0 %v1594_v3  ;;  %v1794_v36 = vld [vmem:[#allocation14 + $0xa18] sm:$0xff] }
 0x39f   :  { %v2385_v8 = vld [vmem:[#allocation14 + $0x1c90] sm:$0xff]  ;;  %3088 = vmatpush.msra.mxu1 %v1722_v16  ;;  %3032 = vmatpush.msrb.mxu2 %v2257_v58  ;;  %v1922_v31 = vld [vmem:[#allocation14 + $0xe18] sm:$0xff] }
 0x3a0   :  { %v2249_v18 = vld [vmem:[#allocation14 + $0x1850] sm:$0xff]  ;;  %3055 = vmatpush.msrb.mxu3 %v2385_v8  ;;  %3066 = vmatpush.msra.mxu0 %v1586_v51  ;;  %v1506_v3 = vld [vmem:[#allocation14 + $0x118] sm:$0xff] }
 0x3a1   :  { %v2377_v17 = vld [vmem:[#allocation14 + $0x1c50] sm:$0xff]  ;;  %3089 = vmatpush.msra.mxu1 %v1714_v60  ;;  %3033 = vmatpush.msrb.mxu2 %v2249_v18  ;;  %v1634_v16 = vld [vmem:[#allocation14 + $0x518] sm:$0xff] }
 0x3a2   :  { %v2241_v59 = vld [vmem:[#allocation14 + $0x1810] sm:$0xff]  ;;  %3056 = vmatpush.msrb.mxu3 %v2377_v17  ;;  %3067 = vmatpush.msra.mxu0 %v1578_v11  ;;  %v1786_v58 = vld [vmem:[#allocation14 + $0x9d8] sm:$0xff] }
 0x3a3   :  { %v2369_v46 = vld [vmem:[#allocation14 + $0x1c10] sm:$0xff]  ;;  %3090 = vmatpush.msra.mxu1 %v1706_v32  ;;  %3034 = vmatpush.msrb.mxu2 %v2241_v59  ;;  %v1914_v8 = vld [vmem:[#allocation14 + $0xdd8] sm:$0xff] }
 0x3a4   :  { %3057 = vmatpush.msrb.mxu3 %v2369_v46  ;;  %3035 = vmatmul.f32.vlgmr.msrb.gmra.mxu2 %v8336_v52  ;;  %v1498_v51 = vld [vmem:[#allocation14 + $0xd8] sm:$0xff] }
 0x3a5   :  { %3058 = vmatmul.f32.vlgmr.msrb.gmra.mxu3 %v8347_v61  ;;  %3068 = vmatpush.msra.mxu0 %v1570_v30  ;;  %v1626_v60 = vld [vmem:[#allocation14 + $0x4d8] sm:$0xff] }
 0x3a6   :  { %3091 = vmatpush.msra.mxu1 %v1698_v21  ;;  %3111 = vmatpush.msra.mxu2 %v1850_v12  ;;  %v1778_v18 = vld [vmem:[#allocation14 + $0x998] sm:$0xff] }
 0x3a7   :  { %3134 = vmatpush.msra.mxu3 %v1978_v50  ;;  %2992 = vmatmul.f32.gmra.mxu0 %v8377_v44  ;;  %v1906_v17 = vld [vmem:[#allocation14 + $0xd98] sm:$0xff] }
 0x3a8   :  { %3015 = vmatmul.f32.gmra.mxu1 %v8401_v35  ;;  %3069 = vmatpush.msra.mxu0 %v1562_v7  ;;  %v1490_v11 = vld [vmem:[#allocation14 + $0x98] sm:$0xff] }
 0x3a9   :  { %3092 = vmatpush.msra.mxu1 %v1690_v15  ;;  %3112 = vmatpush.msra.mxu2 %v1842_v39  ;;  %v1618_v32 = vld [vmem:[#allocation14 + $0x498] sm:$0xff] }
 0x3aa   :  { %3135 = vmatpush.msra.mxu3 %v1970_v1  ;;  %3070 = vmatpush.msra.mxu0 %v1554_v5  ;;  %v1770_v59 = vld [vmem:[#allocation14 + $0x958] sm:$0xff] }
 0x3ab   :  { %3093 = vmatpush.msra.mxu1 %v1682_v34  ;;  %3113 = vmatpush.msra.mxu2 %v1834_v22  ;;  %v1898_v46 = vld [vmem:[#allocation14 + $0xd58] sm:$0xff] }
 0x3ac   :  { %3136 = vmatpush.msra.mxu3 %v1962_v25  ;;  %3071 = vmatpush.msra.mxu0 %v1546_v4  ;;  %v1482_v30 = vld [vmem:[#allocation14 + $0x58] sm:$0xff] }
 0x3ad   :  { %3094 = vmatpush.msra.mxu1 %v1674_v27  ;;  %3114 = vmatpush.msra.mxu2 %v1826_v54  ;;  %v1610_v21 = vld [vmem:[#allocation14 + $0x458] sm:$0xff] }
 0x3ae   :  { %3137 = vmatpush.msra.mxu3 %v1954_v28  ;;  %3038 = vmatmul.f32.gmra.mxu2 %v8408_v42  ;;  %v1762_v12 = vld [vmem:[#allocation14 + $0x918] sm:$0xff] }
 0x3af   :  { %3061 = vmatmul.f32.gmra.mxu3 %v8414_v19  ;;  %3072 = vmatpush.msra.mxu0 %v1538_v53  ;;  %v1890_v50 = vld [vmem:[#allocation14 + $0xd18] sm:$0xff] }
 0x3b0   :  { %3095 = vmatpush.msra.mxu1 %v1666_v62  ;;  %3115 = vmatpush.msra.mxu2 %v1818_v0  ;;  %v1474_v7 = vld [vmem:[#allocation14 + $0x18] sm:$0xff] }
 0x3b1   :  { %3138 = vmatpush.msra.mxu3 %v1946_v57  ;;  %3073 = vmatpush.msra.mxu0 %v1530_v24  ;;  %v1602_v15 = vld [vmem:[#allocation14 + $0x418] sm:$0xff] }
 0x3b2   :  { %3096 = vmatpush.msra.mxu1 %v1658_v63  ;;  %3116 = vmatpush.msra.mxu2 %v1810_v48  ;;  %v1754_v39 = vld [vmem:[#allocation14 + $0x8d8] sm:$0xff] }
 0x3b3   :  { %3139 = vmatpush.msra.mxu3 %v1938_v10  ;;  %3074 = vmatpush.msra.mxu0 %v1522_v43  ;;  %v1882_v1 = vld [vmem:[#allocation14 + $0xcd8] sm:$0xff] }
 0x3b4   :  { %3097 = vmatpush.msra.mxu1 %v1650_v45  ;;  %3117 = vmatpush.msra.mxu2 %v1802_v47  ;;  %v2106_v5 = vld [vmem:[#allocation14 + $0x13d8] sm:$0xff] }
 0x3b5   :  { %3140 = vmatpush.msra.mxu3 %v1930_v40  ;;  %3075 = vmatpush.msra.mxu0 %v1514_v55  ;;  %v2234_v34 = vld [vmem:[#allocation14 + $0x17d8] sm:$0xff] }
 0x3b6   :  { %3098 = vmatpush.msra.mxu1 %v1642_v14  ;;  %3118 = vmatpush.msra.mxu2 %v1794_v36  ;;  %v1746_v22 = vld [vmem:[#allocation14 + $0x898] sm:$0xff] }
 0x3b7   :  { %3141 = vmatpush.msra.mxu3 %v1922_v31  ;;  %3076 = vmatpush.msra.mxu0 %v1506_v3  ;;  %v1874_v25 = vld [vmem:[#allocation14 + $0xc98] sm:$0xff] }
 0x3b8   :  { %3099 = vmatpush.msra.mxu1 %v1634_v16  ;;  %3119 = vmatpush.msra.mxu2 %v1786_v58  ;;  %v2098_v4 = vld [vmem:[#allocation14 + $0x1398] sm:$0xff] }
 0x3b9   :  { %3142 = vmatpush.msra.mxu3 %v1914_v8  ;;  %3077 = vmatpush.msra.mxu0 %v1498_v51  ;;  %v2226_v27 = vld [vmem:[#allocation14 + $0x1798] sm:$0xff] }
 0x3ba   :  { %3100 = vmatpush.msra.mxu1 %v1626_v60  ;;  %3120 = vmatpush.msra.mxu2 %v1778_v18  ;;  %v1738_v54 = vld [vmem:[#allocation14 + $0x858] sm:$0xff] }
 0x3bb   :  { %3143 = vmatpush.msra.mxu3 %v1906_v17  ;;  %3078 = vmatpush.msra.mxu0 %v1490_v11  ;;  %v1866_v28 = vld [vmem:[#allocation14 + $0xc58] sm:$0xff] }
 0x3bc   :  { %3101 = vmatpush.msra.mxu1 %v1618_v32  ;;  %3121 = vmatpush.msra.mxu2 %v1770_v59  ;;  %v2090_v53 = vld [vmem:[#allocation14 + $0x1358] sm:$0xff] }
 0x3bd   :  { %3144 = vmatpush.msra.mxu3 %v1898_v46  ;;  %3079 = vmatpush.msra.mxu0 %v1482_v30  ;;  %v2218_v62 = vld [vmem:[#allocation14 + $0x1758] sm:$0xff] }
 0x3be   :  { %3102 = vmatpush.msra.mxu1 %v1610_v21  ;;  %3122 = vmatpush.msra.mxu2 %v1762_v12  ;;  %v1730_v0 = vld [vmem:[#allocation14 + $0x818] sm:$0xff] }
 0x3bf   :  { %3145 = vmatpush.msra.mxu3 %v1890_v50  ;;  %3080 = vmatpush.msra.mxu0 %v1474_v7  ;;  %v1858_v57 = vld [vmem:[#allocation14 + $0xc18] sm:$0xff] }
 0x3c0   :  { %3103 = vmatpush.msra.mxu1 %v1602_v15  ;;  %3123 = vmatpush.msra.mxu2 %v1754_v39  ;;  %v2082_v24 = vld [vmem:[#allocation14 + $0x1318] sm:$0xff] }
 0x3c1   :  { %3146 = vmatpush.msra.mxu3 %v1882_v1  ;;  %3081 = vmatmul.f32.vlgmr.msra.gmra.mxu0 %v8023_v23  ;;  %v2210_v63 = vld [vmem:[#allocation14 + $0x1718] sm:$0xff] }
 0x3c2   :  { %3104 = vmatmul.f32.vlgmr.msra.gmra.mxu1 %v8058_v2  ;;  %3157 = vmatpush.msrb.mxu0 %v2106_v5  ;;  %v2362_v48 = vld [vmem:[#allocation14 + $0x1bd8] sm:$0xff] }
 0x3c3   :  { %3180 = vmatpush.msrb.mxu1 %v2234_v34  ;;  %3124 = vmatpush.msra.mxu2 %v1746_v22  ;;  %v2490_v10 = vld [vmem:[#allocation14 + $0x1fd8] sm:$0xff] }
 0x3c4   :  { %3147 = vmatpush.msra.mxu3 %v1874_v25  ;;  %3158 = vmatpush.msrb.mxu0 %v2098_v4  ;;  %v2074_v43 = vld [vmem:[#allocation14 + $0x12d8] sm:$0xff] }
 0x3c5   :  { %3181 = vmatpush.msrb.mxu1 %v2226_v27  ;;  %3125 = vmatpush.msra.mxu2 %v1738_v54  ;;  %v2202_v45 = vld [vmem:[#allocation14 + $0x16d8] sm:$0xff] }
 0x3c6   :  { %3148 = vmatpush.msra.mxu3 %v1866_v28  ;;  %3159 = vmatpush.msrb.mxu0 %v2090_v53  ;;  %v2354_v47 = vld [vmem:[#allocation14 + $0x1b98] sm:$0xff] }
 0x3c7   :  { %3182 = vmatpush.msrb.mxu1 %v2218_v62  ;;  %3126 = vmatpush.msra.mxu2 %v1730_v0  ;;  %v2482_v40 = vld [vmem:[#allocation14 + $0x1f98] sm:$0xff] }
 0x3c8   :  { %3149 = vmatpush.msra.mxu3 %v1858_v57  ;;  %3127 = vmatmul.f32.vlgmr.msra.gmra.mxu2 %v8072_v56  ;;  %v2066_v55 = vld [vmem:[#allocation14 + $0x1298] sm:$0xff] }
 0x3c9   :  { %3150 = vmatmul.f32.vlgmr.msra.gmra.mxu3 %v8099_v49  ;;  %3160 = vmatpush.msrb.mxu0 %v2082_v24  ;;  %v2194_v14 = vld [vmem:[#allocation14 + $0x1698] sm:$0xff] }
 0x3ca   :  { %3183 = vmatpush.msrb.mxu1 %v2210_v63  ;;  %3203 = vmatpush.msrb.mxu2 %v2362_v48  ;;  %v2346_v36 = vld [vmem:[#allocation14 + $0x1b58] sm:$0xff] }
 0x3cb   :  { %3226 = vmatpush.msrb.mxu3 %v2490_v10  ;;  %3084 = vmatmul.f32.gmra.mxu0 %v8182_v33  ;;  %v2474_v31 = vld [vmem:[#allocation14 + $0x1f58] sm:$0xff] }
 0x3cc   :  { %3107 = vmatmul.f32.gmra.mxu1 %v8190_v6  ;;  %3161 = vmatpush.msrb.mxu0 %v2074_v43  ;;  %v2058_v3 = vld [vmem:[#allocation14 + $0x1258] sm:$0xff] }
 0x3cd   :  { %3184 = vmatpush.msrb.mxu1 %v2202_v45  ;;  %3204 = vmatpush.msrb.mxu2 %v2354_v47  ;;  %v2186_v16 = vld [vmem:[#allocation14 + $0x1658] sm:$0xff] }
 0x3ce   :  { %3227 = vmatpush.msrb.mxu3 %v2482_v40  ;;  %3162 = vmatpush.msrb.mxu0 %v2066_v55  ;;  %v2338_v58 = vld [vmem:[#allocation14 + $0x1b18] sm:$0xff]  ;;  %v1595_v55 = vld [vmem:[#allocation14 + $0x3e0] sm:$0xff] }
 0x3cf   :  { %3185 = vmatpush.msrb.mxu1 %v2194_v14  ;;  %3205 = vmatpush.msrb.mxu2 %v2346_v36  ;;  %v2466_v8 = vld [vmem:[#allocation14 + $0x1f18] sm:$0xff]  ;;  %v1723_v14 = vld [vmem:[#allocation14 + $0x7e0] sm:$0xff] }
 0x3d0   :  { %3228 = vmatpush.msrb.mxu3 %v2474_v31  ;;  %3163 = vmatpush.msrb.mxu0 %v2058_v3  ;;  %v2050_v51 = vld [vmem:[#allocation14 + $0x1218] sm:$0xff]  ;;  %v1587_v3 = vld [vmem:[#allocation14 + $0x3a0] sm:$0xff] }
 0x3d1   :  { %3186 = vmatpush.msrb.mxu1 %v2186_v16  ;;  %3206 = vmatpush.msrb.mxu2 %v2338_v58  ;;  %v2178_v60 = vld [vmem:[#allocation14 + $0x1618] sm:$0xff]  ;;  %v1715_v16 = vld [vmem:[#allocation14 + $0x7a0] sm:$0xff] }
 0x3d2   :  { %v2330_v18 = vld [vmem:[#allocation14 + $0x1ad8] sm:$0xff]  ;;  %3229 = vmatpush.msrb.mxu3 %v2466_v8  ;;  %3130 = vmatmul.f32.gmra.mxu2 %v8160_v26 }
 0x3d3   :  { %v2458_v17 = vld [vmem:[#allocation14 + $0x1ed8] sm:$0xff]  ;;  %3153 = vmatmul.f32.gmra.mxu3 %v8215_v13  ;;  %3164 = vmatpush.msrb.mxu0 %v2050_v51  ;;  %v1579_v51 = vld [vmem:[#allocation14 + $0x360] sm:$0xff] }
 0x3d4   :  { %v2042_v11 = vld [vmem:[#allocation14 + $0x11d8] sm:$0xff]  ;;  %3187 = vmatpush.msrb.mxu1 %v2178_v60  ;;  %3207 = vmatpush.msrb.mxu2 %v2330_v18  ;;  %v1707_v60 = vld [vmem:[#allocation14 + $0x760] sm:$0xff] }
 0x3d5   :  { %v2170_v32 = vld [vmem:[#allocation14 + $0x15d8] sm:$0xff]  ;;  %3230 = vmatpush.msrb.mxu3 %v2458_v17  ;;  %3165 = vmatpush.msrb.mxu0 %v2042_v11  ;;  %v1571_v11 = vld [vmem:[#allocation14 + $0x320] sm:$0xff] }
 0x3d6   :  { %v2322_v59 = vld [vmem:[#allocation14 + $0x1a98] sm:$0xff]  ;;  %3188 = vmatpush.msrb.mxu1 %v2170_v32  ;;  %v1699_v32 = vld [vmem:[#allocation14 + $0x720] sm:$0xff] }
 0x3d7   :  { %v2450_v46 = vld [vmem:[#allocation14 + $0x1e98] sm:$0xff]  ;;  %3208 = vmatpush.msrb.mxu2 %v2322_v59  ;;  %v1851_v59 = vld [vmem:[#allocation14 + $0xbe0] sm:$0xff] }
 0x3d8   :  { %v2034_v30 = vld [vmem:[#allocation14 + $0x1198] sm:$0xff]  ;;  %3231 = vmatpush.msrb.mxu3 %v2450_v46  ;;  %v1979_v46 = vld [vmem:[#allocation14 + $0xfe0] sm:$0xff] }
 0x3d9   :  { %v2162_v21 = vld [vmem:[#allocation14 + $0x1598] sm:$0xff]  ;;  %3166 = vmatpush.msrb.mxu0 %v2034_v30  ;;  %v1563_v30 = vld [vmem:[#allocation14 + $0x2e0] sm:$0xff] }
 0x3da   :  { %v2314_v12 = vld [vmem:[#allocation14 + $0x1a58] sm:$0xff]  ;;  %3189 = vmatpush.msrb.mxu1 %v2162_v21  ;;  %v1691_v21 = vld [vmem:[#allocation14 + $0x6e0] sm:$0xff] }
 0x3db   :  { %v2442_v50 = vld [vmem:[#allocation14 + $0x1e58] sm:$0xff]  ;;  %3209 = vmatpush.msrb.mxu2 %v2314_v12  ;;  %v1843_v12 = vld [vmem:[#allocation14 + $0xba0] sm:$0xff] }
 0x3dc   :  { %v2026_v7 = vld [vmem:[#allocation14 + $0x1158] sm:$0xff]  ;;  %3232 = vmatpush.msrb.mxu3 %v2442_v50  ;;  %v1971_v50 = vld [vmem:[#allocation14 + $0xfa0] sm:$0xff] }
 0x3dd   :  { %v2154_v15 = vld [vmem:[#allocation14 + $0x1558] sm:$0xff]  ;;  %3167 = vmatpush.msrb.mxu0 %v2026_v7  ;;  %v1555_v7 = vld [vmem:[#allocation14 + $0x2a0] sm:$0xff] }
 0x3de   :  { %v2306_v39 = vld [vmem:[#allocation14 + $0x1a18] sm:$0xff]  ;;  %3190 = vmatpush.msrb.mxu1 %v2154_v15  ;;  %v1683_v15 = vld [vmem:[#allocation14 + $0x6a0] sm:$0xff] }
 0x3df   :  { %v2434_v1 = vld [vmem:[#allocation14 + $0x1e18] sm:$0xff]  ;;  %3210 = vmatpush.msrb.mxu2 %v2306_v39  ;;  %v1835_v39 = vld [vmem:[#allocation14 + $0xb60] sm:$0xff] }
 0x3e0   :  { %v2018_v5 = vld [vmem:[#allocation14 + $0x1118] sm:$0xff]  ;;  %3233 = vmatpush.msrb.mxu3 %v2434_v1  ;;  %v1963_v1 = vld [vmem:[#allocation14 + $0xf60] sm:$0xff] }
 0x3e1   :  { %v2146_v34 = vld [vmem:[#allocation14 + $0x1518] sm:$0xff]  ;;  %3168 = vmatpush.msrb.mxu0 %v2018_v5  ;;  %v1547_v5 = vld [vmem:[#allocation14 + $0x260] sm:$0xff] }
 0x3e2   :  { %v2298_v22 = vld [vmem:[#allocation14 + $0x19d8] sm:$0xff]  ;;  %3191 = vmatpush.msrb.mxu1 %v2146_v34  ;;  %v1675_v34 = vld [vmem:[#allocation14 + $0x660] sm:$0xff] }
 0x3e3   :  { %v2426_v25 = vld [vmem:[#allocation14 + $0x1dd8] sm:$0xff]  ;;  %3211 = vmatpush.msrb.mxu2 %v2298_v22  ;;  %v1827_v22 = vld [vmem:[#allocation14 + $0xb20] sm:$0xff] }
 0x3e4   :  { %v2010_v4 = vld [vmem:[#allocation14 + $0x10d8] sm:$0xff]  ;;  %3234 = vmatpush.msrb.mxu3 %v2426_v25  ;;  %v1955_v25 = vld [vmem:[#allocation14 + $0xf20] sm:$0xff] }
 0x3e5   :  { %v2138_v27 = vld [vmem:[#allocation14 + $0x14d8] sm:$0xff]  ;;  %3169 = vmatpush.msrb.mxu0 %v2010_v4  ;;  %v1539_v4 = vld [vmem:[#allocation14 + $0x220] sm:$0xff] }
 0x3e6   :  { %v2290_v54 = vld [vmem:[#allocation14 + $0x1998] sm:$0xff]  ;;  %3192 = vmatpush.msrb.mxu1 %v2138_v27  ;;  %v1667_v27 = vld [vmem:[#allocation14 + $0x620] sm:$0xff] }
 0x3e7   :  { %v2418_v28 = vld [vmem:[#allocation14 + $0x1d98] sm:$0xff]  ;;  %3212 = vmatpush.msrb.mxu2 %v2290_v54  ;;  %v1819_v54 = vld [vmem:[#allocation14 + $0xae0] sm:$0xff] }
 0x3e8   :  { %v2002_v53 = vld [vmem:[#allocation14 + $0x1098] sm:$0xff]  ;;  %3235 = vmatpush.msrb.mxu3 %v2418_v28  ;;  %v1947_v28 = vld [vmem:[#allocation14 + $0xee0] sm:$0xff] }
 0x3e9   :  { %v2130_v62 = vld [vmem:[#allocation14 + $0x1498] sm:$0xff]  ;;  %3170 = vmatpush.msrb.mxu0 %v2002_v53  ;;  %v1531_v53 = vld [vmem:[#allocation14 + $0x1e0] sm:$0xff] }
 0x3ea   :  { %v2282_v0 = vld [vmem:[#allocation14 + $0x1958] sm:$0xff]  ;;  %3193 = vmatpush.msrb.mxu1 %v2130_v62  ;;  %v1659_v62 = vld [vmem:[#allocation14 + $0x5e0] sm:$0xff] }
 0x3eb   :  { %v2410_v57 = vld [vmem:[#allocation14 + $0x1d58] sm:$0xff]  ;;  %3213 = vmatpush.msrb.mxu2 %v2282_v0  ;;  %v1811_v0 = vld [vmem:[#allocation14 + $0xaa0] sm:$0xff] }
 0x3ec   :  { %v1994_v24 = vld [vmem:[#allocation14 + $0x1058] sm:$0xff]  ;;  %3236 = vmatpush.msrb.mxu3 %v2410_v57  ;;  %v1939_v57 = vld [vmem:[#allocation14 + $0xea0] sm:$0xff] }
 0x3ed   :  { %v2122_v63 = vld [vmem:[#allocation14 + $0x1458] sm:$0xff]  ;;  %3171 = vmatpush.msrb.mxu0 %v1994_v24  ;;  %v1523_v24 = vld [vmem:[#allocation14 + $0x1a0] sm:$0xff] }
 0x3ee   :  { %v2274_v48 = vld [vmem:[#allocation14 + $0x1918] sm:$0xff]  ;;  %3194 = vmatpush.msrb.mxu1 %v2122_v63  ;;  %v1651_v63 = vld [vmem:[#allocation14 + $0x5a0] sm:$0xff] }
 0x3ef   :  { %v2402_v10 = vld [vmem:[#allocation14 + $0x1d18] sm:$0xff]  ;;  %3214 = vmatpush.msrb.mxu2 %v2274_v48  ;;  %v1803_v48 = vld [vmem:[#allocation14 + $0xa60] sm:$0xff] }
 0x3f0   :  { %v1986_v43 = vld [vmem:[#allocation14 + $0x1018] sm:$0xff]  ;;  %3237 = vmatpush.msrb.mxu3 %v2402_v10  ;;  %v1931_v10 = vld [vmem:[#allocation14 + $0xe60] sm:$0xff] }
 0x3f1   :  { %v2114_v45 = vld [vmem:[#allocation14 + $0x1418] sm:$0xff]  ;;  %3172 = vmatpush.msrb.mxu0 %v1986_v43  ;;  %v1515_v43 = vld [vmem:[#allocation14 + $0x160] sm:$0xff] }
 0x3f2   :  { %v2266_v47 = vld [vmem:[#allocation14 + $0x18d8] sm:$0xff]  ;;  %3195 = vmatpush.msrb.mxu1 %v2114_v45  ;;  %3173 = vmatmul.f32.vlgmr.msrb.gmra.mxu0 %v8263_v37  ;;  %v1643_v45 = vld [vmem:[#allocation14 + $0x560] sm:$0xff] }
 0x3f3   :  { %v2394_v40 = vld [vmem:[#allocation14 + $0x1cd8] sm:$0xff]  ;;  %3215 = vmatpush.msrb.mxu2 %v2266_v47  ;;  %3196 = vmatmul.f32.vlgmr.msrb.gmra.mxu1 %v8289_v9  ;;  %v1795_v47 = vld [vmem:[#allocation14 + $0xa20] sm:$0xff] }
 0x3f4   :  { %v2258_v36 = vld [vmem:[#allocation14 + $0x1898] sm:$0xff]  ;;  %3238 = vmatpush.msrb.mxu3 %v2394_v40  ;;  %3249 = vmatpush.msra.mxu0 %v1595_v55  ;;  %v1923_v40 = vld [vmem:[#allocation14 + $0xe20] sm:$0xff] }
 0x3f5   :  { %v2386_v31 = vld [vmem:[#allocation14 + $0x1c98] sm:$0xff]  ;;  %3272 = vmatpush.msra.mxu1 %v1723_v14  ;;  %3216 = vmatpush.msrb.mxu2 %v2258_v36  ;;  %v1507_v55 = vld [vmem:[#allocation14 + $0x120] sm:$0xff] }
 0x3f6   :  { %v2250_v58 = vld [vmem:[#allocation14 + $0x1858] sm:$0xff]  ;;  %3239 = vmatpush.msrb.mxu3 %v2386_v31  ;;  %3250 = vmatpush.msra.mxu0 %v1587_v3  ;;  %v1635_v14 = vld [vmem:[#allocation14 + $0x520] sm:$0xff] }
 0x3f7   :  { %v2378_v8 = vld [vmem:[#allocation14 + $0x1c58] sm:$0xff]  ;;  %3273 = vmatpush.msra.mxu1 %v1715_v16  ;;  %3217 = vmatpush.msrb.mxu2 %v2250_v58  ;;  %v1787_v36 = vld [vmem:[#allocation14 + $0x9e0] sm:$0xff] }
 0x3f8   :  { %v2242_v18 = vld [vmem:[#allocation14 + $0x1818] sm:$0xff]  ;;  %3240 = vmatpush.msrb.mxu3 %v2378_v8  ;;  %3251 = vmatpush.msra.mxu0 %v1579_v51  ;;  %v1915_v31 = vld [vmem:[#allocation14 + $0xde0] sm:$0xff] }
 0x3f9   :  { %v2370_v17 = vld [vmem:[#allocation14 + $0x1c18] sm:$0xff]  ;;  %3274 = vmatpush.msra.mxu1 %v1707_v60  ;;  %3218 = vmatpush.msrb.mxu2 %v2242_v18  ;;  %v1499_v3 = vld [vmem:[#allocation14 + $0xe0] sm:$0xff] }
 0x3fa   :  { %3241 = vmatpush.msrb.mxu3 %v2370_v17  ;;  %3219 = vmatmul.f32.vlgmr.msrb.gmra.mxu2 %v8336_v52  ;;  %v1627_v16 = vld [vmem:[#allocation14 + $0x4e0] sm:$0xff] }
 0x3fb   :  { %3242 = vmatmul.f32.vlgmr.msrb.gmra.mxu3 %v8347_v61  ;;  %3252 = vmatpush.msra.mxu0 %v1571_v11  ;;  %v1779_v58 = vld [vmem:[#allocation14 + $0x9a0] sm:$0xff] }
 0x3fc   :  { %3275 = vmatpush.msra.mxu1 %v1699_v32  ;;  %3295 = vmatpush.msra.mxu2 %v1851_v59  ;;  %v1907_v8 = vld [vmem:[#allocation14 + $0xda0] sm:$0xff] }
 0x3fd   :  { %3318 = vmatpush.msra.mxu3 %v1979_v46  ;;  %3176 = vmatmul.f32.gmra.mxu0 %v8377_v44  ;;  %v1491_v51 = vld [vmem:[#allocation14 + $0xa0] sm:$0xff] }
 0x3fe   :  { %3199 = vmatmul.f32.gmra.mxu1 %v8401_v35  ;;  %3253 = vmatpush.msra.mxu0 %v1563_v30  ;;  %v1619_v60 = vld [vmem:[#allocation14 + $0x4a0] sm:$0xff] }
 0x3ff   :  { %3276 = vmatpush.msra.mxu1 %v1691_v21  ;;  %3296 = vmatpush.msra.mxu2 %v1843_v12  ;;  %v1771_v18 = vld [vmem:[#allocation14 + $0x960] sm:$0xff] }
 0x400   :  { %3319 = vmatpush.msra.mxu3 %v1971_v50  ;;  %3254 = vmatpush.msra.mxu0 %v1555_v7  ;;  %v1899_v17 = vld [vmem:[#allocation14 + $0xd60] sm:$0xff] }
 0x401   :  { %3277 = vmatpush.msra.mxu1 %v1683_v15  ;;  %3297 = vmatpush.msra.mxu2 %v1835_v39  ;;  %v1483_v11 = vld [vmem:[#allocation14 + $0x60] sm:$0xff] }
 0x402   :  { %3320 = vmatpush.msra.mxu3 %v1963_v1  ;;  %3255 = vmatpush.msra.mxu0 %v1547_v5  ;;  %v1611_v32 = vld [vmem:[#allocation14 + $0x460] sm:$0xff] }
 0x403   :  { %3278 = vmatpush.msra.mxu1 %v1675_v34  ;;  %3298 = vmatpush.msra.mxu2 %v1827_v22  ;;  %v1763_v59 = vld [vmem:[#allocation14 + $0x920] sm:$0xff] }
 0x404   :  { %3321 = vmatpush.msra.mxu3 %v1955_v25  ;;  %3222 = vmatmul.f32.gmra.mxu2 %v8408_v42  ;;  %v1891_v46 = vld [vmem:[#allocation14 + $0xd20] sm:$0xff] }
 0x405   :  { %3245 = vmatmul.f32.gmra.mxu3 %v8414_v19  ;;  %3256 = vmatpush.msra.mxu0 %v1539_v4  ;;  %v1475_v30 = vld [vmem:[#allocation14 + $0x20] sm:$0xff] }
 0x406   :  { %3279 = vmatpush.msra.mxu1 %v1667_v27  ;;  %3299 = vmatpush.msra.mxu2 %v1819_v54  ;;  %v1603_v21 = vld [vmem:[#allocation14 + $0x420] sm:$0xff] }
 0x407   :  { %3322 = vmatpush.msra.mxu3 %v1947_v28  ;;  %3257 = vmatpush.msra.mxu0 %v1531_v53  ;;  %v1755_v12 = vld [vmem:[#allocation14 + $0x8e0] sm:$0xff] }
 0x408   :  { %3280 = vmatpush.msra.mxu1 %v1659_v62  ;;  %3300 = vmatpush.msra.mxu2 %v1811_v0  ;;  %v1883_v50 = vld [vmem:[#allocation14 + $0xce0] sm:$0xff] }
 0x409   :  { %3323 = vmatpush.msra.mxu3 %v1939_v57  ;;  %3258 = vmatpush.msra.mxu0 %v1523_v24  ;;  %v2107_v7 = vld [vmem:[#allocation14 + $0x13e0] sm:$0xff] }
 0x40a   :  { %3281 = vmatpush.msra.mxu1 %v1651_v63  ;;  %3301 = vmatpush.msra.mxu2 %v1803_v48  ;;  %v2235_v15 = vld [vmem:[#allocation14 + $0x17e0] sm:$0xff] }
 0x40b   :  { %3324 = vmatpush.msra.mxu3 %v1931_v10  ;;  %3259 = vmatpush.msra.mxu0 %v1515_v43  ;;  %v1747_v39 = vld [vmem:[#allocation14 + $0x8a0] sm:$0xff] }
 0x40c   :  { %3282 = vmatpush.msra.mxu1 %v1643_v45  ;;  %3302 = vmatpush.msra.mxu2 %v1795_v47  ;;  %v1875_v1 = vld [vmem:[#allocation14 + $0xca0] sm:$0xff] }
 0x40d   :  { %3325 = vmatpush.msra.mxu3 %v1923_v40  ;;  %3260 = vmatpush.msra.mxu0 %v1507_v55  ;;  %v2099_v5 = vld [vmem:[#allocation14 + $0x13a0] sm:$0xff] }
 0x40e   :  { %3283 = vmatpush.msra.mxu1 %v1635_v14  ;;  %3303 = vmatpush.msra.mxu2 %v1787_v36  ;;  %v2227_v34 = vld [vmem:[#allocation14 + $0x17a0] sm:$0xff] }
 0x40f   :  { %3326 = vmatpush.msra.mxu3 %v1915_v31  ;;  %3261 = vmatpush.msra.mxu0 %v1499_v3  ;;  %v1739_v22 = vld [vmem:[#allocation14 + $0x860] sm:$0xff]  ;;  %v8470_v31 = vpop.f32.mrf.mxu0 }
 0x410   :  { %3284 = vmatpush.msra.mxu1 %v1627_v16  ;;  %3304 = vmatpush.msra.mxu2 %v1779_v58  ;;  %v1867_v25 = vld [vmem:[#allocation14 + $0xc60] sm:$0xff] }
 0x411   :  { %3327 = vmatpush.msra.mxu3 %v1907_v8  ;;  %3262 = vmatpush.msra.mxu0 %v1491_v51  ;;  %v2091_v4 = vld [vmem:[#allocation14 + $0x1360] sm:$0xff] }
 0x412   :  { %3285 = vmatpush.msra.mxu1 %v1619_v60  ;;  %3305 = vmatpush.msra.mxu2 %v1771_v18  ;;  %v2219_v27 = vld [vmem:[#allocation14 + $0x1760] sm:$0xff] }
 0x413   :  { %3328 = vmatpush.msra.mxu3 %v1899_v17  ;;  %3263 = vmatpush.msra.mxu0 %v1483_v11  ;;  %v1731_v54 = vld [vmem:[#allocation14 + $0x820] sm:$0xff] }
 0x414   :  { %3286 = vmatpush.msra.mxu1 %v1611_v32  ;;  %3306 = vmatpush.msra.mxu2 %v1763_v59  ;;  %v1859_v28 = vld [vmem:[#allocation14 + $0xc20] sm:$0xff]  ;;  %v8474_v59 = vpop.f32.mrf.mxu1 }
 0x415   :  { %3329 = vmatpush.msra.mxu3 %v1891_v46  ;;  %3264 = vmatpush.msra.mxu0 %v1475_v30  ;;  %v2083_v53 = vld [vmem:[#allocation14 + $0x1320] sm:$0xff]  ;;  %v8476_v46 = vpop.f32.mrf.mxu2 }
 0x416   :  { %3287 = vmatpush.msra.mxu1 %v1603_v21  ;;  %3307 = vmatpush.msra.mxu2 %v1755_v12  ;;  %v2211_v62 = vld [vmem:[#allocation14 + $0x1720] sm:$0xff] }
 0x417   :  { %3330 = vmatpush.msra.mxu3 %v1883_v50  ;;  %3265 = vmatmul.f32.vlgmr.msra.gmra.mxu0 %v8023_v23  ;;  %v2363_v0 = vld [vmem:[#allocation14 + $0x1be0] sm:$0xff] }
 0x418   :  { %3288 = vmatmul.f32.vlgmr.msra.gmra.mxu1 %v8058_v2  ;;  %3341 = vmatpush.msrb.mxu0 %v2107_v7  ;;  %v2491_v57 = vld [vmem:[#allocation14 + $0x1fe0] sm:$0xff] }
 0x419   :  { %3364 = vmatpush.msrb.mxu1 %v2235_v15  ;;  %3308 = vmatpush.msra.mxu2 %v1747_v39  ;;  %v2075_v24 = vld [vmem:[#allocation14 + $0x12e0] sm:$0xff] }
 0x41a   :  { %3331 = vmatpush.msra.mxu3 %v1875_v1  ;;  %3342 = vmatpush.msrb.mxu0 %v2099_v5  ;;  %v2203_v63 = vld [vmem:[#allocation14 + $0x16e0] sm:$0xff]  ;;  %v8478_v5 = vpop.f32.mrf.mxu0 }
 0x41b   :  { %3365 = vmatpush.msrb.mxu1 %v2227_v34  ;;  %3309 = vmatpush.msra.mxu2 %v1739_v22  ;;  %v2355_v48 = vld [vmem:[#allocation14 + $0x1ba0] sm:$0xff] }
 0x41c   :  { %3332 = vmatpush.msra.mxu3 %v1867_v25  ;;  %3343 = vmatpush.msrb.mxu0 %v2091_v4  ;;  %v2483_v10 = vld [vmem:[#allocation14 + $0x1fa0] sm:$0xff] }
 0x41d   :  { %3366 = vmatpush.msrb.mxu1 %v2219_v27  ;;  %3310 = vmatpush.msra.mxu2 %v1731_v54  ;;  %v2067_v43 = vld [vmem:[#allocation14 + $0x12a0] sm:$0xff]  ;;  %v8480_v27 = vpop.f32.mrf.mxu3 }
 0x41e   :  { %3333 = vmatpush.msra.mxu3 %v1859_v28  ;;  %3311 = vmatmul.f32.vlgmr.msra.gmra.mxu2 %v8072_v56  ;;  %v2195_v45 = vld [vmem:[#allocation14 + $0x16a0] sm:$0xff] }
 0x41f   :  { %3334 = vmatmul.f32.vlgmr.msra.gmra.mxu3 %v8099_v49  ;;  %3344 = vmatpush.msrb.mxu0 %v2083_v53  ;;  %v2347_v47 = vld [vmem:[#allocation14 + $0x1b60] sm:$0xff] }
 0x420   :  { %3367 = vmatpush.msrb.mxu1 %v2211_v62  ;;  %3387 = vmatpush.msrb.mxu2 %v2363_v0  ;;  %v2475_v40 = vld [vmem:[#allocation14 + $0x1f60] sm:$0xff] }
 0x421   :  { %3410 = vmatpush.msrb.mxu3 %v2491_v57  ;;  %3268 = vmatmul.f32.gmra.mxu0 %v8182_v33  ;;  %v2059_v55 = vld [vmem:[#allocation14 + $0x1260] sm:$0xff] }
 0x422   :  { %3291 = vmatmul.f32.gmra.mxu1 %v8190_v6  ;;  %3345 = vmatpush.msrb.mxu0 %v2075_v24  ;;  %v2187_v14 = vld [vmem:[#allocation14 + $0x1660] sm:$0xff] }
 0x423   :  { %3368 = vmatpush.msrb.mxu1 %v2203_v63  ;;  %3388 = vmatpush.msrb.mxu2 %v2355_v48  ;;  %v2339_v36 = vld [vmem:[#allocation14 + $0x1b20] sm:$0xff]  ;;  %v8482_v48 = vpop.f32.mrf.mxu1 }
 0x424   :  { %3411 = vmatpush.msrb.mxu3 %v2483_v10  ;;  %3346 = vmatpush.msrb.mxu0 %v2067_v43  ;;  %v2467_v3 = vld [vmem:[#allocation14 + $0x1f20] sm:$0xff]  ;;  %v8484_v10 = vpop.f32.mrf.mxu2 }
 0x425   :  { %3369 = vmatpush.msrb.mxu1 %v2195_v45  ;;  %3389 = vmatpush.msrb.mxu2 %v2347_v47  ;;  %v2051_v16 = vld [vmem:[#allocation14 + $0x1220] sm:$0xff] }
 0x426   :  { %3412 = vmatpush.msrb.mxu3 %v2475_v40  ;;  %3347 = vmatpush.msrb.mxu0 %v2059_v55  ;;  %v2179_v58 = vld [vmem:[#allocation14 + $0x1620] sm:$0xff] }
 0x427   :  { %3370 = vmatpush.msrb.mxu1 %v2187_v14  ;;  %3390 = vmatpush.msrb.mxu2 %v2339_v36  ;;  %v2331_v8 = vld [vmem:[#allocation14 + $0x1ae0] sm:$0xff] }
 0x428   :  { %3413 = vmatpush.msrb.mxu3 %v2467_v3  ;;  %3314 = vmatmul.f32.gmra.mxu2 %v8160_v26  ;;  %v2459_v51 = vld [vmem:[#allocation14 + $0x1ee0] sm:$0xff]  ;;  %v8486_v3 = vpop.f32.mrf.mxu0 }
 0x429   :  { %v2043_v60 = vld [vmem:[#allocation14 + $0x11e0] sm:$0xff]  ;;  %3337 = vmatmul.f32.gmra.mxu3 %v8215_v13  ;;  %3348 = vmatpush.msrb.mxu0 %v2051_v16  ;;  %v1596_v16 = vld [vmem:[#allocation14 + $0x3e8] sm:$0xff] }
 0x42a   :  { %v2171_v18 = vld [vmem:[#allocation14 + $0x15e0] sm:$0xff]  ;;  %3371 = vmatpush.msrb.mxu1 %v2179_v58  ;;  %3391 = vmatpush.msrb.mxu2 %v2331_v8  ;;  %v1724_v58 = vld [vmem:[#allocation14 + $0x7e8] sm:$0xff] }
 0x42b   :  { %v2323_v17 = vld [vmem:[#allocation14 + $0x1aa0] sm:$0xff]  ;;  %3414 = vmatpush.msrb.mxu3 %v2459_v51  ;;  %3349 = vmatpush.msrb.mxu0 %v2043_v60  ;;  %v8488_v51 = vpop.f32.mrf.mxu3 }
 0x42c   :  { %v2451_v11 = vld [vmem:[#allocation14 + $0x1ea0] sm:$0xff]  ;;  %3372 = vmatpush.msrb.mxu1 %v2171_v18  ;;  %3392 = vmatpush.msrb.mxu2 %v2323_v17  ;;  %v1588_v18 = vld [vmem:[#allocation14 + $0x3a8] sm:$0xff] }
 0x42d   :  { %v2035_v32 = vld [vmem:[#allocation14 + $0x11a0] sm:$0xff]  ;;  %3415 = vmatpush.msrb.mxu3 %v2451_v11  ;;  %v1716_v17 = vld [vmem:[#allocation14 + $0x7a8] sm:$0xff] }
 0x42e   :  { %v2163_v30 = vld [vmem:[#allocation14 + $0x15a0] sm:$0xff]  ;;  %3350 = vmatpush.msrb.mxu0 %v2035_v32 }
 0x42f   :  { %v2315_v21 = vld [vmem:[#allocation14 + $0x1a60] sm:$0xff]  ;;  %3373 = vmatpush.msrb.mxu1 %v2163_v30  ;;  %v1580_v30 = vld [vmem:[#allocation14 + $0x368] sm:$0xff] }
 0x430   :  { %v2443_v12 = vld [vmem:[#allocation14 + $0x1e60] sm:$0xff]  ;;  %3393 = vmatpush.msrb.mxu2 %v2315_v21  ;;  %v1708_v21 = vld [vmem:[#allocation14 + $0x768] sm:$0xff] }
 0x431   :  { %v2027_v50 = vld [vmem:[#allocation14 + $0x1160] sm:$0xff]  ;;  %3416 = vmatpush.msrb.mxu3 %v2443_v12 }
 0x432   :  { %v2155_v7 = vld [vmem:[#allocation14 + $0x1560] sm:$0xff]  ;;  %3351 = vmatpush.msrb.mxu0 %v2027_v50  ;;  %v8492_v50 = vpop.f32.mrf.mxu1 }
 0x433   :  { %v2307_v15 = vld [vmem:[#allocation14 + $0x1a20] sm:$0xff]  ;;  %3374 = vmatpush.msrb.mxu1 %v2155_v7  ;;  %v8494_v7 = vpop.f32.mrf.mxu2 }
 0x434   :  { %v2435_v39 = vld [vmem:[#allocation14 + $0x1e20] sm:$0xff]  ;;  %3394 = vmatpush.msrb.mxu2 %v2307_v15 }
 0x435   :  { %v2019_v1 = vld [vmem:[#allocation14 + $0x1120] sm:$0xff]  ;;  %3417 = vmatpush.msrb.mxu3 %v2435_v39  ;;  %v1572_v39 = vld [vmem:[#allocation14 + $0x328] sm:$0xff] }
 0x436   :  { %v2147_v34 = vld [vmem:[#allocation14 + $0x1520] sm:$0xff]  ;;  %3352 = vmatpush.msrb.mxu0 %v2019_v1  ;;  %v1700_v1 = vld [vmem:[#allocation14 + $0x728] sm:$0xff] }
 0x437   :  { %v2299_v22 = vld [vmem:[#allocation14 + $0x19e0] sm:$0xff]  ;;  %3375 = vmatpush.msrb.mxu1 %v2147_v34  ;;  %v1852_v34 = vld [vmem:[#allocation14 + $0xbe8] sm:$0xff] }
 0x438   :  { %v2427_v25 = vld [vmem:[#allocation14 + $0x1de0] sm:$0xff]  ;;  %3395 = vmatpush.msrb.mxu2 %v2299_v22  ;;  %v1980_v22 = vld [vmem:[#allocation14 + $0xfe8] sm:$0xff] }
 0x439   :  { %v2011_v4 = vld [vmem:[#allocation14 + $0x10e0] sm:$0xff]  ;;  %3418 = vmatpush.msrb.mxu3 %v2427_v25  ;;  %v8497_v25 = vpop.f32.mrf.mxu0 }
 0x43a   :  { %v2139_v54 = vld [vmem:[#allocation14 + $0x14e0] sm:$0xff]  ;;  %3353 = vmatpush.msrb.mxu0 %v2011_v4  ;;  %v1564_v4 = vld [vmem:[#allocation14 + $0x2e8] sm:$0xff] }
 0x43b   :  { %v2291_v28 = vld [vmem:[#allocation14 + $0x19a0] sm:$0xff]  ;;  %3376 = vmatpush.msrb.mxu1 %v2139_v54  ;;  %v1692_v54 = vld [vmem:[#allocation14 + $0x6e8] sm:$0xff] }
 0x43c   :  { %v2419_v53 = vld [vmem:[#allocation14 + $0x1da0] sm:$0xff]  ;;  %3396 = vmatpush.msrb.mxu2 %v2291_v28  ;;  %v1844_v28 = vld [vmem:[#allocation14 + $0xba8] sm:$0xff] }
 0x43d   :  { %v2003_v62 = vld [vmem:[#allocation14 + $0x10a0] sm:$0xff]  ;;  %3419 = vmatpush.msrb.mxu3 %v2419_v53  ;;  %v8500_v53 = vpop.f32.mrf.mxu3 }
 0x43e   :  { %v2131_v0 = vld [vmem:[#allocation14 + $0x14a0] sm:$0xff]  ;;  %3354 = vmatpush.msrb.mxu0 %v2003_v62  ;;  %v1972_v62 = vld [vmem:[#allocation14 + $0xfa8] sm:$0xff] }
 0x43f   :  { %v2283_v57 = vld [vmem:[#allocation14 + $0x1960] sm:$0xff]  ;;  %3377 = vmatpush.msrb.mxu1 %v2131_v0  ;;  %v1556_v0 = vld [vmem:[#allocation14 + $0x2a8] sm:$0xff] }
 0x440   :  { %v2411_v24 = vld [vmem:[#allocation14 + $0x1d60] sm:$0xff]  ;;  %3397 = vmatpush.msrb.mxu2 %v2283_v57  ;;  %v1684_v57 = vld [vmem:[#allocation14 + $0x6a8] sm:$0xff] }
 0x441   :  { %v1995_v63 = vld [vmem:[#allocation14 + $0x1060] sm:$0xff]  ;;  %3420 = vmatpush.msrb.mxu3 %v2411_v24  ;;  %v1836_v24 = vld [vmem:[#allocation14 + $0xb68] sm:$0xff] }
 0x442   :  { %v2123_v43 = vld [vmem:[#allocation14 + $0x1460] sm:$0xff]  ;;  %3355 = vmatpush.msrb.mxu0 %v1995_v63  ;;  %v1964_v63 = vld [vmem:[#allocation14 + $0xf68] sm:$0xff] }
 0x443   :  { %v2275_v45 = vld [vmem:[#allocation14 + $0x1920] sm:$0xff]  ;;  %3378 = vmatpush.msrb.mxu1 %v2123_v43  ;;  %v1548_v43 = vld [vmem:[#allocation14 + $0x268] sm:$0xff] }
 0x444   :  { %v2403_v47 = vld [vmem:[#allocation14 + $0x1d20] sm:$0xff]  ;;  %3398 = vmatpush.msrb.mxu2 %v2275_v45  ;;  %v1676_v45 = vld [vmem:[#allocation14 + $0x668] sm:$0xff] }
 0x445   :  { %v1987_v40 = vld [vmem:[#allocation14 + $0x1020] sm:$0xff]  ;;  %3421 = vmatpush.msrb.mxu3 %v2403_v47  ;;  %v1828_v47 = vld [vmem:[#allocation14 + $0xb28] sm:$0xff] }
 0x446   :  { %v2115_v55 = vld [vmem:[#allocation14 + $0x1420] sm:$0xff]  ;;  %3356 = vmatpush.msrb.mxu0 %v1987_v40  ;;  %v8504_v40 = vpop.f32.mrf.mxu1 }
 0x447   :  { %v2267_v14 = vld [vmem:[#allocation14 + $0x18e0] sm:$0xff]  ;;  %3379 = vmatpush.msrb.mxu1 %v2115_v55  ;;  %3357 = vmatmul.f32.vlgmr.msrb.gmra.mxu0 %v8263_v37  ;;  %v8506_v55 = vpop.f32.mrf.mxu2 }
 0x448   :  { %v2395_v36 = vld [vmem:[#allocation14 + $0x1ce0] sm:$0xff]  ;;  %3399 = vmatpush.msrb.mxu2 %v2267_v14  ;;  %3380 = vmatmul.f32.vlgmr.msrb.gmra.mxu1 %v8289_v9  ;;  %v1956_v14 = vld [vmem:[#allocation14 + $0xf28] sm:$0xff] }
 0x449   :  { %v2259_v8 = vld [vmem:[#allocation14 + $0x18a0] sm:$0xff]  ;;  %3422 = vmatpush.msrb.mxu3 %v2395_v36  ;;  %3433 = vmatpush.msra.mxu0 %v1596_v16  ;;  %v1540_v36 = vld [vmem:[#allocation14 + $0x228] sm:$0xff] }
 0x44a   :  { %v2387_v60 = vld [vmem:[#allocation14 + $0x1ca0] sm:$0xff]  ;;  %3456 = vmatpush.msra.mxu1 %v1724_v58  ;;  %3400 = vmatpush.msrb.mxu2 %v2259_v8  ;;  %v1668_v16 = vld [vmem:[#allocation14 + $0x628] sm:$0xff] }
 0x44b   :  { %v2251_v11 = vld [vmem:[#allocation14 + $0x1860] sm:$0xff]  ;;  %3423 = vmatpush.msrb.mxu3 %v2387_v60  ;;  %3434 = vmatpush.msra.mxu0 %v1588_v18  ;;  %v1820_v58 = vld [vmem:[#allocation14 + $0xae8] sm:$0xff]  ;;  %v8509_v18 = vpop.f32.mrf.mxu0 }
 0x44c   :  { %v2379_v32 = vld [vmem:[#allocation14 + $0x1c60] sm:$0xff]  ;;  %3457 = vmatpush.msra.mxu1 %v1716_v17  ;;  %3401 = vmatpush.msrb.mxu2 %v2251_v11  ;;  %v1948_v8 = vld [vmem:[#allocation14 + $0xee8] sm:$0xff] }
 0x44d   :  { %v2243_v12 = vld [vmem:[#allocation14 + $0x1820] sm:$0xff]  ;;  %3424 = vmatpush.msrb.mxu3 %v2379_v32  ;;  %3435 = vmatpush.msra.mxu0 %v1580_v30  ;;  %v1532_v60 = vld [vmem:[#allocation14 + $0x1e8] sm:$0xff] }
 0x44e   :  { %v2371_v15 = vld [vmem:[#allocation14 + $0x1c20] sm:$0xff]  ;;  %3458 = vmatpush.msra.mxu1 %v1708_v21  ;;  %3402 = vmatpush.msrb.mxu2 %v2243_v12  ;;  %v1660_v17 = vld [vmem:[#allocation14 + $0x5e8] sm:$0xff]  ;;  %v8512_v21 = vpop.f32.mrf.mxu3 }
 0x44f   :  { %3425 = vmatpush.msrb.mxu3 %v2371_v15  ;;  %3403 = vmatmul.f32.vlgmr.msrb.gmra.mxu2 %v8336_v52  ;;  %v1812_v11 = vld [vmem:[#allocation14 + $0xaa8] sm:$0xff]  ;;  %9967 = vst [vmem:[#allocation118_spill] sm:$0xff] %v8512_v21 }
 0x450   :  { %3426 = vmatmul.f32.vlgmr.msrb.gmra.mxu3 %v8347_v61  ;;  %3436 = vmatpush.msra.mxu0 %v1572_v39  ;;  %v1940_v32 = vld [vmem:[#allocation14 + $0xea8] sm:$0xff] }
 0x451   :  { %3459 = vmatpush.msra.mxu1 %v1700_v1  ;;  %3479 = vmatpush.msra.mxu2 %v1852_v34  ;;  %v1524_v30 = vld [vmem:[#allocation14 + $0x1a8] sm:$0xff] }
 0x452   :  { %3502 = vmatpush.msra.mxu3 %v1980_v22  ;;  %3360 = vmatmul.f32.gmra.mxu0 %v8377_v44  ;;  %v1652_v12 = vld [vmem:[#allocation14 + $0x5a8] sm:$0xff] }
 0x453   :  { %3383 = vmatmul.f32.gmra.mxu1 %v8401_v35  ;;  %3437 = vmatpush.msra.mxu0 %v1564_v4  ;;  %v1804_v15 = vld [vmem:[#allocation14 + $0xa68] sm:$0xff] }
 0x454   :  { %3460 = vmatpush.msra.mxu1 %v1692_v54  ;;  %3480 = vmatpush.msra.mxu2 %v1844_v28  ;;  %v1932_v39 = vld [vmem:[#allocation14 + $0xe68] sm:$0xff]  ;;  %v8514_v28 = vpop.f32.mrf.mxu1 }
 0x455   :  { %3503 = vmatpush.msra.mxu3 %v1972_v62  ;;  %3438 = vmatpush.msra.mxu0 %v1556_v0  ;;  %v1516_v1 = vld [vmem:[#allocation14 + $0x168] sm:$0xff]  ;;  %v8516_v62 = vpop.f32.mrf.mxu2 }
 0x456   :  { %3461 = vmatpush.msra.mxu1 %v1684_v57  ;;  %3481 = vmatpush.msra.mxu2 %v1836_v24  ;;  %v1644_v34 = vld [vmem:[#allocation14 + $0x568] sm:$0xff] }
 0x457   :  { %3504 = vmatpush.msra.mxu3 %v1964_v63  ;;  %3439 = vmatpush.msra.mxu0 %v1548_v43  ;;  %v1796_v22 = vld [vmem:[#allocation14 + $0xa28] sm:$0xff] }
 0x458   :  { %3462 = vmatpush.msra.mxu1 %v1676_v45  ;;  %3482 = vmatpush.msra.mxu2 %v1828_v47  ;;  %v1924_v4 = vld [vmem:[#allocation14 + $0xe28] sm:$0xff] }
 0x459   :  { %3505 = vmatpush.msra.mxu3 %v1956_v14  ;;  %3406 = vmatmul.f32.gmra.mxu2 %v8408_v42  ;;  %v1508_v54 = vld [vmem:[#allocation14 + $0x128] sm:$0xff] }
 0x45a   :  { %3429 = vmatmul.f32.gmra.mxu3 %v8414_v19  ;;  %3440 = vmatpush.msra.mxu0 %v1540_v36  ;;  %v1636_v0 = vld [vmem:[#allocation14 + $0x528] sm:$0xff]  ;;  %v8518_v36 = vpop.f32.mrf.mxu0 }
 0x45b   :  { %3463 = vmatpush.msra.mxu1 %v1668_v16  ;;  %3483 = vmatpush.msra.mxu2 %v1820_v58  ;;  %v1788_v57 = vld [vmem:[#allocation14 + $0x9e8] sm:$0xff] }
 0x45c   :  { %3506 = vmatpush.msra.mxu3 %v1948_v8  ;;  %3441 = vmatpush.msra.mxu0 %v1532_v60  ;;  %v1916_v24 = vld [vmem:[#allocation14 + $0xde8] sm:$0xff] }
 0x45d   :  { %3464 = vmatpush.msra.mxu1 %v1660_v17  ;;  %3484 = vmatpush.msra.mxu2 %v1812_v11  ;;  %v1500_v63 = vld [vmem:[#allocation14 + $0xe8] sm:$0xff]  ;;  %v8520_v17 = vpop.f32.mrf.mxu3 }
 0x45e   :  { %3507 = vmatpush.msra.mxu3 %v1940_v32  ;;  %3442 = vmatpush.msra.mxu0 %v1524_v30  ;;  %v1628_v43 = vld [vmem:[#allocation14 + $0x4e8] sm:$0xff] }
 0x45f   :  { %3465 = vmatpush.msra.mxu1 %v1652_v12  ;;  %3485 = vmatpush.msra.mxu2 %v1804_v15  ;;  %v1780_v45 = vld [vmem:[#allocation14 + $0x9a8] sm:$0xff] }
 0x460   :  { %3508 = vmatpush.msra.mxu3 %v1932_v39  ;;  %3443 = vmatpush.msra.mxu0 %v1516_v1  ;;  %v1908_v47 = vld [vmem:[#allocation14 + $0xda8] sm:$0xff] }
 0x461   :  { %3466 = vmatpush.msra.mxu1 %v1644_v34  ;;  %3486 = vmatpush.msra.mxu2 %v1796_v22  ;;  %v1492_v14 = vld [vmem:[#allocation14 + $0xa8] sm:$0xff]  ;;  %v8522_v34 = vpop.f32.mrf.mxu1  ;;  %v8524_v22 = vpop.f32.mrf.mxu2 }
 0x462   :  { %3509 = vmatpush.msra.mxu3 %v1924_v4  ;;  %3444 = vmatpush.msra.mxu0 %v1508_v54  ;;  %v1620_v16 = vld [vmem:[#allocation14 + $0x4a8] sm:$0xff] }
 0x463   :  { %3467 = vmatpush.msra.mxu1 %v1636_v0  ;;  %3487 = vmatpush.msra.mxu2 %v1788_v57  ;;  %v1772_v58 = vld [vmem:[#allocation14 + $0x968] sm:$0xff]  ;;  %v8526_v57 = vpop.f32.mrf.mxu0 }
 0x464   :  { %3510 = vmatpush.msra.mxu3 %v1916_v24  ;;  %3445 = vmatpush.msra.mxu0 %v1500_v63  ;;  %v1900_v8 = vld [vmem:[#allocation14 + $0xd68] sm:$0xff] }
 0x465   :  { %3468 = vmatpush.msra.mxu1 %v1628_v43  ;;  %3488 = vmatpush.msra.mxu2 %v1780_v45  ;;  %v1484_v60 = vld [vmem:[#allocation14 + $0x68] sm:$0xff] }
 0x466   :  { %3511 = vmatpush.msra.mxu3 %v1908_v47  ;;  %3446 = vmatpush.msra.mxu0 %v1492_v14  ;;  %v1612_v11 = vld [vmem:[#allocation14 + $0x468] sm:$0xff] }
 0x467   :  { %v1764_v32 = vld [vmem:[#allocation14 + $0x928] sm:$0xff]  ;;  %3469 = vmatpush.msra.mxu1 %v1620_v16  ;;  %3489 = vmatpush.msra.mxu2 %v1772_v58 }
 0x468   :  { %v1892_v30 = vld [vmem:[#allocation14 + $0xd28] sm:$0xff]  ;;  %3512 = vmatpush.msra.mxu3 %v1900_v8  ;;  %3447 = vmatpush.msra.mxu0 %v1484_v60  ;;  %v8530_v8 = vpop.f32.mrf.mxu3 }
 0x469   :  { %v1476_v12 = vld [vmem:[#allocation14 + $0x28] sm:$0xff]  ;;  %3470 = vmatpush.msra.mxu1 %v1612_v11  ;;  %3490 = vmatpush.msra.mxu2 %v1764_v32  ;;  %v8532_v32 = vpop.f32.mrf.mxu1 }
 0x46a   :  { %v1604_v15 = vld [vmem:[#allocation14 + $0x428] sm:$0xff]  ;;  %3513 = vmatpush.msra.mxu3 %v1892_v30  ;;  %3448 = vmatpush.msra.mxu0 %v1476_v12  ;;  %v8534_v30 = vpop.f32.mrf.mxu2 }
 0x46b   :  { %v1756_v39 = vld [vmem:[#allocation14 + $0x8e8] sm:$0xff]  ;;  %3471 = vmatpush.msra.mxu1 %v1604_v15  ;;  %3449 = vmatmul.f32.vlgmr.msra.gmra.mxu0 %v8023_v23 }
 0x46c   :  { %v1884_v1 = vld [vmem:[#allocation14 + $0xce8] sm:$0xff]  ;;  %3491 = vmatpush.msra.mxu2 %v1756_v39  ;;  %3472 = vmatmul.f32.vlgmr.msra.gmra.mxu1 %v8058_v2 }
 0x46d   :  { %v2108_v4 = vld [vmem:[#allocation14 + $0x13e8] sm:$0xff]  ;;  %3514 = vmatpush.msra.mxu3 %v1884_v1 }
 0x46e   :  { %v2236_v54 = vld [vmem:[#allocation14 + $0x17e8] sm:$0xff]  ;;  %3525 = vmatpush.msrb.mxu0 %v2108_v4 }
 0x46f   :  { %v1748_v0 = vld [vmem:[#allocation14 + $0x8a8] sm:$0xff]  ;;  %3548 = vmatpush.msrb.mxu1 %v2236_v54 }
 0x470   :  { %v1876_v24 = vld [vmem:[#allocation14 + $0xca8] sm:$0xff]  ;;  %3492 = vmatpush.msra.mxu2 %v1748_v0  ;;  %v8538_v0 = vpop.f32.mrf.mxu0 }
 0x471   :  { %v2100_v63 = vld [vmem:[#allocation14 + $0x13a8] sm:$0xff]  ;;  %3515 = vmatpush.msra.mxu3 %v1876_v24 }
 0x472   :  { %v2228_v43 = vld [vmem:[#allocation14 + $0x17a8] sm:$0xff]  ;;  %3526 = vmatpush.msrb.mxu0 %v2100_v63 }
 0x473   :  { %v1740_v45 = vld [vmem:[#allocation14 + $0x868] sm:$0xff]  ;;  %3549 = vmatpush.msrb.mxu1 %v2228_v43  ;;  %3452 = vmatmul.f32.gmra.mxu0 %v8182_v33 }
 0x474   :  { %v1868_v47 = vld [vmem:[#allocation14 + $0xc68] sm:$0xff]  ;;  %3493 = vmatpush.msra.mxu2 %v1740_v45  ;;  %3475 = vmatmul.f32.gmra.mxu1 %v8190_v6 }
 0x475   :  { %v2092_v14 = vld [vmem:[#allocation14 + $0x1368] sm:$0xff]  ;;  %3516 = vmatpush.msra.mxu3 %v1868_v47  ;;  %v8542_v47 = vpop.f32.mrf.mxu3 }
 0x476   :  { %v2220_v16 = vld [vmem:[#allocation14 + $0x1768] sm:$0xff]  ;;  %3527 = vmatpush.msrb.mxu0 %v2092_v14 }
 0x477   :  { %v1732_v58 = vld [vmem:[#allocation14 + $0x828] sm:$0xff]  ;;  %3550 = vmatpush.msrb.mxu1 %v2220_v16 }
 0x478   :  { %v1860_v60 = vld [vmem:[#allocation14 + $0xc28] sm:$0xff]  ;;  %3494 = vmatpush.msra.mxu2 %v1732_v58 }
 0x479   :  { %v2084_v11 = vld [vmem:[#allocation14 + $0x1328] sm:$0xff]  ;;  %3517 = vmatpush.msra.mxu3 %v1860_v60  ;;  %3495 = vmatmul.f32.vlgmr.msra.gmra.mxu2 %v8072_v56 }
 0x47a   :  { %v2212_v12 = vld [vmem:[#allocation14 + $0x1728] sm:$0xff]  ;;  %3518 = vmatmul.f32.vlgmr.msra.gmra.mxu3 %v8099_v49  ;;  %3528 = vmatpush.msrb.mxu0 %v2084_v11 }
 0x47b   :  { %v2364_v15 = vld [vmem:[#allocation14 + $0x1be8] sm:$0xff]  ;;  %3551 = vmatpush.msrb.mxu1 %v2212_v12 }
 0x47c   :  { %v2492_v39 = vld [vmem:[#allocation14 + $0x1fe8] sm:$0xff]  ;;  %3571 = vmatpush.msrb.mxu2 %v2364_v15  ;;  %v8544_v15 = vpop.f32.mrf.mxu1 }
 0x47d   :  { %v2076_v1 = vld [vmem:[#allocation14 + $0x12e8] sm:$0xff]  ;;  %3594 = vmatpush.msrb.mxu3 %v2492_v39  ;;  %9968 = vst [vmem:[#allocation119_spill] sm:$0xff] %v8544_v15  ;;  %v8546_v39 = vpop.f32.mrf.mxu2  ;;  %v8552_v38 = vpop.f32.mrf.mxu3 }
 0x47e   :  { %v2204_v4 = vld [vmem:[#allocation14 + $0x16e8] sm:$0xff]  ;;  %3529 = vmatpush.msrb.mxu0 %v2076_v1  ;;  %9969 = vst [vmem:[#allocation120_spill] sm:$0xff] %v8546_v39 }
 0x47f   :  { %v2356_v54 = vld [vmem:[#allocation14 + $0x1ba8] sm:$0xff]  ;;  %3552 = vmatpush.msrb.mxu1 %v2204_v4  ;;  %9970 = vst [vmem:[#allocation121_spill] sm:$0xff] %v8552_v38 }
 0x480   :  { %v2484_v24 = vld [vmem:[#allocation14 + $0x1fa8] sm:$0xff]  ;;  %3572 = vmatpush.msrb.mxu2 %v2356_v54 }
 0x481   :  { %v2068_v63 = vld [vmem:[#allocation14 + $0x12a8] sm:$0xff]  ;;  %3595 = vmatpush.msrb.mxu3 %v2484_v24  ;;  %3498 = vmatmul.f32.gmra.mxu2 %v8160_v26 }
 0x482   :  { %v2196_v43 = vld [vmem:[#allocation14 + $0x16a8] sm:$0xff]  ;;  %3530 = vmatpush.msrb.mxu0 %v2068_v63  ;;  %v8549_v63 = vpop.f32.mrf.mxu0  ;;  %3521 = vmatmul.f32.gmra.mxu3 %v8215_v13 }
 0x483   :  { %v2348_v45 = vld [vmem:[#allocation14 + $0x1b68] sm:$0xff]  ;;  %3553 = vmatpush.msrb.mxu1 %v2196_v43 }
 0x484   :  { %v2476_v14 = vld [vmem:[#allocation14 + $0x1f68] sm:$0xff]  ;;  %3573 = vmatpush.msrb.mxu2 %v2348_v45  ;;  %v8554_v13 = vpop.f32.mrf.mxu1 }
 0x485   :  { %v2060_v16 = vld [vmem:[#allocation14 + $0x1268] sm:$0xff]  ;;  %3596 = vmatpush.msrb.mxu3 %v2476_v14  ;;  %v8560_v26 = vpop.f32.mrf.mxu3 }
 0x486   :  { %v2188_v58 = vld [vmem:[#allocation14 + $0x1668] sm:$0xff]  ;;  %3531 = vmatpush.msrb.mxu0 %v2060_v16 }
 0x487   :  { %v2340_v60 = vld [vmem:[#allocation14 + $0x1b28] sm:$0xff]  ;;  %3554 = vmatpush.msrb.mxu1 %v2188_v58 }
 0x488   :  { %v2468_v11 = vld [vmem:[#allocation14 + $0x1f28] sm:$0xff]  ;;  %3574 = vmatpush.msrb.mxu2 %v2340_v60 }
 0x489   :  { %v2052_v12 = vld [vmem:[#allocation14 + $0x1228] sm:$0xff]  ;;  %3597 = vmatpush.msrb.mxu3 %v2468_v11 }
 0x48a   :  { %v2180_v1 = vld [vmem:[#allocation14 + $0x1628] sm:$0xff]  ;;  %3532 = vmatpush.msrb.mxu0 %v2052_v12  ;;  %v8558_v39 = vpop.f32.mrf.mxu0 }
 0x48b   :  { %v2332_v4 = vld [vmem:[#allocation14 + $0x1ae8] sm:$0xff]  ;;  %3555 = vmatpush.msrb.mxu1 %v2180_v1 }
 0x48c   :  { %v2460_v54 = vld [vmem:[#allocation14 + $0x1ee8] sm:$0xff]  ;;  %3575 = vmatpush.msrb.mxu2 %v2332_v4 }
 0x48d   :  { %v2044_v24 = vld [vmem:[#allocation14 + $0x11e8] sm:$0xff]  ;;  %3598 = vmatpush.msrb.mxu3 %v2460_v54  ;;  %v8556_v54 = vpop.f32.mrf.mxu2  ;;  %v8570_v21 = vpop.f32.mrf.mxu3 }
 0x48e   :  { %v2172_v43 = vld [vmem:[#allocation14 + $0x15e8] sm:$0xff]  ;;  %3533 = vmatpush.msrb.mxu0 %v2044_v24  ;;  %9971 = vst [vmem:[#allocation122_spill] sm:$0xff] %v8570_v21 }
 0x48f   :  { %v2324_v45 = vld [vmem:[#allocation14 + $0x1aa8] sm:$0xff]  ;;  %3556 = vmatpush.msrb.mxu1 %v2172_v43 }
 0x490   :  { %v2452_v14 = vld [vmem:[#allocation14 + $0x1ea8] sm:$0xff]  ;;  %3576 = vmatpush.msrb.mxu2 %v2324_v45 }
 0x491   :  { %v2036_v16 = vld [vmem:[#allocation14 + $0x11a8] sm:$0xff]  ;;  %3599 = vmatpush.msrb.mxu3 %v2452_v14 }
 0x492   :  { %v2164_v58 = vld [vmem:[#allocation14 + $0x15a8] sm:$0xff]  ;;  %3534 = vmatpush.msrb.mxu0 %v2036_v16 }
 0x493   :  { %v2316_v60 = vld [vmem:[#allocation14 + $0x1a68] sm:$0xff]  ;;  %3557 = vmatpush.msrb.mxu1 %v2164_v58 }
 0x494   :  { %v2444_v11 = vld [vmem:[#allocation14 + $0x1e68] sm:$0xff]  ;;  %3577 = vmatpush.msrb.mxu2 %v2316_v60  ;;  %3535 = vmatpush.msrb.mxu0 %v2028_v29 }
 0x495   :  { %v2308_v12 = vld [vmem:[#allocation14 + $0x1a28] sm:$0xff]  ;;  %3600 = vmatpush.msrb.mxu3 %v2444_v11  ;;  %3558 = vmatpush.msrb.mxu1 %v2156_v20  ;;  %v8564_v15 = vpop.f32.mrf.mxu2 }
 0x496   :  { %v2436_v1 = vld [vmem:[#allocation14 + $0x1e28] sm:$0xff]  ;;  %3578 = vmatpush.msrb.mxu2 %v2308_v12 }
 0x497   :  { %v2020_v4 = vld [vmem:[#allocation14 + $0x1128] sm:$0xff]  ;;  %3601 = vmatpush.msrb.mxu3 %v2436_v1 }
 0x498   :  { %v2148_v24 = vld [vmem:[#allocation14 + $0x1528] sm:$0xff]  ;;  %3536 = vmatpush.msrb.mxu0 %v2020_v4 }
 0x499   :  { %v2300_v43 = vld [vmem:[#allocation14 + $0x19e8] sm:$0xff]  ;;  %3559 = vmatpush.msrb.mxu1 %v2148_v24 }
 0x49a   :  { %v2428_v45 = vld [vmem:[#allocation14 + $0x1de8] sm:$0xff]  ;;  %3579 = vmatpush.msrb.mxu2 %v2300_v43 }
 0x49b   :  { %v2012_v38 = vld [vmem:[#allocation14 + $0x10e8] sm:$0xff]  ;;  %3602 = vmatpush.msrb.mxu3 %v2428_v45 }
 0x49c   :  { %v2140_v14 = vld [vmem:[#allocation14 + $0x14e8] sm:$0xff]  ;;  %3537 = vmatpush.msrb.mxu0 %v2012_v38 }
 0x49d   :  { %v2292_v16 = vld [vmem:[#allocation14 + $0x19a8] sm:$0xff]  ;;  %3560 = vmatpush.msrb.mxu1 %v2140_v14 }
 0x49e   :  { %v2420_v58 = vld [vmem:[#allocation14 + $0x1da8] sm:$0xff]  ;;  %3580 = vmatpush.msrb.mxu2 %v2292_v16  ;;  %v8562_v16 = vpop.f32.mrf.mxu1 }
 0x49f   :  { %v2004_v60 = vld [vmem:[#allocation14 + $0x10a8] sm:$0xff]  ;;  %3603 = vmatpush.msrb.mxu3 %v2420_v58  ;;  %v1597_v58 = vld [vmem:[#allocation14 + $0x3f0] sm:$0xff] }
 0x4a0   :  { %v2132_v11 = vld [vmem:[#allocation14 + $0x14a8] sm:$0xff]  ;;  %3538 = vmatpush.msrb.mxu0 %v2004_v60  ;;  %v1725_v60 = vld [vmem:[#allocation14 + $0x7f0] sm:$0xff] }
 0x4a1   :  { %v2284_v29 = vld [vmem:[#allocation14 + $0x1968] sm:$0xff]  ;;  %3561 = vmatpush.msrb.mxu1 %v2132_v11 }
 0x4a2   :  { %v2412_v20 = vld [vmem:[#allocation14 + $0x1d68] sm:$0xff]  ;;  %3581 = vmatpush.msrb.mxu2 %v2284_v29  ;;  %v8566_v29 = vpop.f32.mrf.mxu0 }
 0x4a3   :  { %v1996_v12 = vld [vmem:[#allocation14 + $0x1068] sm:$0xff]  ;;  %3604 = vmatpush.msrb.mxu3 %v2412_v20 }
 0x4a4   :  { %v2124_v1 = vld [vmem:[#allocation14 + $0x1468] sm:$0xff]  ;;  %3539 = vmatpush.msrb.mxu0 %v1996_v12  ;;  %v1589_v12 = vld [vmem:[#allocation14 + $0x3b0] sm:$0xff] }
 0x4a5   :  { %v2276_v4 = vld [vmem:[#allocation14 + $0x1928] sm:$0xff]  ;;  %3562 = vmatpush.msrb.mxu1 %v2124_v1  ;;  %v1717_v1 = vld [vmem:[#allocation14 + $0x7b0] sm:$0xff] }
 0x4a6   :  { %v2404_v24 = vld [vmem:[#allocation14 + $0x1d28] sm:$0xff]  ;;  %3582 = vmatpush.msrb.mxu2 %v2276_v4 }
 0x4a7   :  { %v1988_v43 = vld [vmem:[#allocation14 + $0x1028] sm:$0xff]  ;;  %3605 = vmatpush.msrb.mxu3 %v2404_v24 }
 0x4a8   :  { %v2116_v45 = vld [vmem:[#allocation14 + $0x1428] sm:$0xff]  ;;  %3540 = vmatpush.msrb.mxu0 %v1988_v43  ;;  %v1581_v43 = vld [vmem:[#allocation14 + $0x370] sm:$0xff] }
 0x4a9   :  { %v2268_v38 = vld [vmem:[#allocation14 + $0x18e8] sm:$0xff]  ;;  %3563 = vmatpush.msrb.mxu1 %v2116_v45  ;;  %3541 = vmatmul.f32.vlgmr.msrb.gmra.mxu0 %v8263_v37  ;;  %v1709_v45 = vld [vmem:[#allocation14 + $0x770] sm:$0xff] }
 0x4aa   :  { %v2396_v14 = vld [vmem:[#allocation14 + $0x1ce8] sm:$0xff]  ;;  %3583 = vmatpush.msrb.mxu2 %v2268_v38  ;;  %3564 = vmatmul.f32.vlgmr.msrb.gmra.mxu1 %v8289_v9  ;;  %v1573_v37 = vld [vmem:[#allocation14 + $0x330] sm:$0xff]  ;;  %v8572_v9 = vld [vmem:[#allocation16] sm:$0xff]  ;;  %v8581_v21 = vpop.f32.mrf.mxu0 }
 0x4ab   :  { %v2260_v11 = vld [vmem:[#allocation14 + $0x18a8] sm:$0xff]  ;;  %3606 = vmatpush.msrb.mxu3 %v2396_v14  ;;  %3617 = vmatpush.msra.mxu0 %v1597_v58  ;;  %v8574_v58 = vpop.f32.mrf.mxu1  ;;  %9972 = vst [vmem:[#allocation123_spill] sm:$0xff] %v8581_v21 }
 0x4ac   :  { %v2388_v20 = vld [vmem:[#allocation14 + $0x1ca8] sm:$0xff]  ;;  %3640 = vmatpush.msra.mxu1 %v1725_v60  ;;  %3584 = vmatpush.msrb.mxu2 %v2260_v11  ;;  %v8576_v60 = vpop.f32.mrf.mxu2  ;;  %v1701_v11 = vld [vmem:[#allocation14 + $0x730] sm:$0xff] }
 0x4ad   :  { %v2252_v4 = vld [vmem:[#allocation14 + $0x1868] sm:$0xff]  ;;  %3607 = vmatpush.msrb.mxu3 %v2388_v20  ;;  %3618 = vmatpush.msra.mxu0 %v1589_v12  ;;  %v1853_v20 = vld [vmem:[#allocation14 + $0xbf0] sm:$0xff] }
 0x4ae   :  { %v2380_v24 = vld [vmem:[#allocation14 + $0x1c68] sm:$0xff]  ;;  %3641 = vmatpush.msra.mxu1 %v1717_v1  ;;  %3585 = vmatpush.msrb.mxu2 %v2252_v4  ;;  %v1981_v12 = vld [vmem:[#allocation14 + $0xff0] sm:$0xff]  ;;  %v9889_v4 = vperm.slane %v8572_v9, 0 }
 0x4af   :  { %v2244_v38 = vld [vmem:[#allocation14 + $0x1828] sm:$0xff]  ;;  %3608 = vmatpush.msrb.mxu3 %v2380_v24  ;;  %3619 = vmatpush.msra.mxu0 %v1581_v43  ;;  %v1565_v1 = vld [vmem:[#allocation14 + $0x2f0] sm:$0xff] }
 0x4b0   :  { %v2372_v14 = vld [vmem:[#allocation14 + $0x1c28] sm:$0xff]  ;;  %3642 = vmatpush.msra.mxu1 %v1709_v45  ;;  %3586 = vmatpush.msrb.mxu2 %v2244_v38  ;;  %v1693_v24 = vld [vmem:[#allocation14 + $0x6f0] sm:$0xff] }
 0x4b1   :  { %3609 = vmatpush.msrb.mxu3 %v2372_v14  ;;  %3587 = vmatmul.f32.vlgmr.msrb.gmra.mxu2 %v8336_v52  ;;  %v1845_v43 = vld [vmem:[#allocation14 + $0xbb0] sm:$0xff]  ;;  %v2531_v52 = vadd.f32 %v8470_v31, %v9889_v4 }
 0x4b2   :  { %3610 = vmatmul.f32.vlgmr.msrb.gmra.mxu3 %v8347_v61  ;;  %3620 = vmatpush.msra.mxu0 %v1573_v37  ;;  %v1973_v45 = vld [vmem:[#allocation14 + $0xfb0] sm:$0xff]  ;;  %v8585_v37 = vpop.f32.mrf.mxu3 }
 0x4b3   :  { %3643 = vmatpush.msra.mxu1 %v1701_v11  ;;  %3663 = vmatpush.msra.mxu2 %v1853_v20  ;;  %v1557_v38 = vld [vmem:[#allocation14 + $0x2b0] sm:$0xff]  ;;  %9973 = vst [vmem:[#allocation124_spill] sm:$0xff] %v8585_v37  ;;  %v8590_v21 = vpop.f32.mrf.mxu1  ;;  %v2554_v31 = vadd.f32 %v8474_v59, %v2531_v52  ;;  %v9894_v52 = vperm.slane %v8572_v9, 1 }
 0x4b4   :  { %3686 = vmatpush.msra.mxu3 %v1981_v12  ;;  %3544 = vmatmul.f32.gmra.mxu0 %v8377_v44  ;;  %v1685_v14 = vld [vmem:[#allocation14 + $0x6b0] sm:$0xff] }
 0x4b5   :  { %3567 = vmatmul.f32.gmra.mxu1 %v8401_v35  ;;  %3621 = vmatpush.msra.mxu0 %v1565_v1  ;;  %v1837_v61 = vld [vmem:[#allocation14 + $0xb70] sm:$0xff] }
 0x4b6   :  { %3644 = vmatpush.msra.mxu1 %v1693_v24  ;;  %3664 = vmatpush.msra.mxu2 %v1845_v43  ;;  %v1965_v11 = vld [vmem:[#allocation14 + $0xf70] sm:$0xff]  ;;  %v8592_v24 = vpop.f32.mrf.mxu2 }
 0x4b7   :  { %v1549_v20 = vld [vmem:[#allocation14 + $0x270] sm:$0xff]  ;;  %3687 = vmatpush.msra.mxu3 %v1973_v45  ;;  %3622 = vmatpush.msra.mxu0 %v1557_v38  ;;  %9974 = vst [vmem:[#allocation125_spill] sm:$0xff] %v8592_v24 }
 0x4b8   :  { %v1677_v12 = vld [vmem:[#allocation14 + $0x670] sm:$0xff]  ;;  %3645 = vmatpush.msra.mxu1 %v1685_v14  ;;  %3665 = vmatpush.msra.mxu2 %v1837_v61  ;;  %v8596_v61 = vpop.f32.mrf.mxu0 }
 0x4b9   :  { %v1829_v44 = vld [vmem:[#allocation14 + $0xb30] sm:$0xff]  ;;  %3688 = vmatpush.msra.mxu3 %v1965_v11  ;;  %3623 = vmatpush.msra.mxu0 %v1549_v20  ;;  %v2577_v20 = vadd.f32 %v8476_v46, %v2554_v31 }
 0x4ba   :  { %v1957_v35 = vld [vmem:[#allocation14 + $0xf30] sm:$0xff]  ;;  %3646 = vmatpush.msra.mxu1 %v1677_v12  ;;  %3666 = vmatpush.msra.mxu2 %v1829_v44 }
 0x4bb   :  { %v1541_v1 = vld [vmem:[#allocation14 + $0x230] sm:$0xff]  ;;  %3689 = vmatpush.msra.mxu3 %v1957_v35  ;;  %3590 = vmatmul.f32.gmra.mxu2 %v8408_v42 }
 0x4bc   :  { %v1669_v43 = vld [vmem:[#allocation14 + $0x630] sm:$0xff]  ;;  %3613 = vmatmul.f32.gmra.mxu3 %v8414_v19  ;;  %3624 = vmatpush.msra.mxu0 %v1541_v1  ;;  %v8601_v19 = vpop.f32.mrf.mxu3 }
 0x4bd   :  { %v1821_v37 = vld [vmem:[#allocation14 + $0xaf0] sm:$0xff]  ;;  %3647 = vmatpush.msra.mxu1 %v1669_v43  ;;  %9975 = vst [vmem:[#allocation126_spill] sm:$0xff] %v8601_v19 }
 0x4be   :  { %v1949_v45 = vld [vmem:[#allocation14 + $0xef0] sm:$0xff]  ;;  %3667 = vmatpush.msra.mxu2 %v1821_v37  ;;  %v2600_v37 = vadd.f32 %v8480_v27, %v2577_v20 }
 0x4bf   :  { %v1533_v38 = vld [vmem:[#allocation14 + $0x1f0] sm:$0xff]  ;;  %3690 = vmatpush.msra.mxu3 %v1949_v45  ;;  %v2715_v45 = vadd.f32 %v8509_v18, %v9894_v52 }
 0x4c0   :  { %v1661_v14 = vld [vmem:[#allocation14 + $0x5f0] sm:$0xff]  ;;  %3625 = vmatpush.msra.mxu0 %v1533_v38  ;;  %v8607_v38 = vpop.f32.mrf.mxu1  ;;  %v2623_v52 = vadd.f32 %v8486_v3, %v2600_v37 }
 0x4c1   :  { %v1813_v11 = vld [vmem:[#allocation14 + $0xab0] sm:$0xff]  ;;  %3648 = vmatpush.msra.mxu1 %v1661_v14  ;;  %v8609_v14 = vpop.f32.mrf.mxu2  ;;  %v2738_v19 = vadd.f32 %v8514_v28, %v2715_v45 }
 0x4c2   :  { %v1941_v44 = vld [vmem:[#allocation14 + $0xeb0] sm:$0xff]  ;;  %3668 = vmatpush.msra.mxu2 %v1813_v11  ;;  %v2646_v45 = vadd.f32 %v8492_v50, %v2623_v52 }
 0x4c3   :  { %v1525_v12 = vld [vmem:[#allocation14 + $0x1b0] sm:$0xff]  ;;  %3691 = vmatpush.msra.mxu3 %v1941_v44 }
 0x4c4   :  { %v1653_v35 = vld [vmem:[#allocation14 + $0x5b0] sm:$0xff]  ;;  %3626 = vmatpush.msra.mxu0 %v1525_v12 }
 0x4c5   :  { %v1805_v59 = vld [vmem:[#allocation14 + $0xa70] sm:$0xff]  ;;  %3649 = vmatpush.msra.mxu1 %v1653_v35 }
 0x4c6   :  { %v1933_v4 = vld [vmem:[#allocation14 + $0xe70] sm:$0xff]  ;;  %3669 = vmatpush.msra.mxu2 %v1805_v59  ;;  %v9976_v59 = vperm.slane %v8572_v9, 0 }
 0x4c7   :  { %v1517_v42 = vld [vmem:[#allocation14 + $0x170] sm:$0xff]  ;;  %3692 = vmatpush.msra.mxu3 %v1933_v4 }
 0x4c8   :  { %v1645_v1 = vld [vmem:[#allocation14 + $0x570] sm:$0xff]  ;;  %3627 = vmatpush.msra.mxu0 %v1517_v42  ;;  %v2534_v18 = vadd.f32 %v8478_v5, %v9976_v59  ;;  %v2761_v5 = vadd.f32 %v8516_v62, %v2738_v19  ;;  %v8619_v59 = vpop.f32.mrf.mxu3  ;;  %v2669_v62 = vadd.f32 %v8494_v7, %v2646_v45  ;;  %v8627_v50 = vpop.f32.mrf.mxu1 }
 0x4c9   :  { %v1797_v46 = vld [vmem:[#allocation14 + $0xa30] sm:$0xff]  ;;  %3650 = vmatpush.msra.mxu1 %v1645_v1  ;;  %v8616_v1 = vpop.f32.mrf.mxu0  ;;  %v8629_v52 = vpop.f32.mrf.mxu2 }
 0x4ca   :  { %v1925_v43 = vld [vmem:[#allocation14 + $0xe30] sm:$0xff]  ;;  %3670 = vmatpush.msra.mxu2 %v1797_v46  ;;  %v2557_v28 = vadd.f32 %v8482_v48, %v2534_v18  ;;  %v2499_v48 = vperm.slane %v8572_v9, 2  ;;  %v2500_v18 = vperm.slane %v8572_v9, 3 }
 0x4cb   :  { %v1509_v31 = vld [vmem:[#allocation14 + $0x130] sm:$0xff]  ;;  %3693 = vmatpush.msra.mxu3 %v1925_v43 }
 0x4cc   :  { %v1637_v11 = vld [vmem:[#allocation14 + $0x530] sm:$0xff]  ;;  %3628 = vmatpush.msra.mxu0 %v1509_v31  ;;  %v2580_v19 = vadd.f32 %v8484_v10, %v2557_v28 }
 0x4cd   :  { %v1789_v44 = vld [vmem:[#allocation14 + $0x9f0] sm:$0xff]  ;;  %3651 = vmatpush.msra.mxu1 %v1637_v11 }
 0x4ce   :  { %v1917_v12 = vld [vmem:[#allocation14 + $0xdf0] sm:$0xff]  ;;  %3671 = vmatpush.msra.mxu2 %v1789_v44 }
 0x4cf   :  { %v1501_v27 = vld [vmem:[#allocation14 + $0xf0] sm:$0xff]  ;;  %3694 = vmatpush.msra.mxu3 %v1917_v12 }
 0x4d0   :  { %v1629_v20 = vld [vmem:[#allocation14 + $0x4f0] sm:$0xff]  ;;  %3629 = vmatpush.msra.mxu0 %v1501_v27 }
 0x4d1   :  { %v1781_v35 = vld [vmem:[#allocation14 + $0x9b0] sm:$0xff]  ;;  %3652 = vmatpush.msra.mxu1 %v1629_v20 }
 0x4d2   :  { %v1909_v4 = vld [vmem:[#allocation14 + $0xdb0] sm:$0xff]  ;;  %3672 = vmatpush.msra.mxu2 %v1781_v35  ;;  %v2784_v35 = vadd.f32 %v8520_v17, %v2761_v5  ;;  %v2603_v5 = vadd.f32 %v8488_v51, %v2580_v19 }
 0x4d3   :  { %v1493_v42 = vld [vmem:[#allocation14 + $0xb0] sm:$0xff]  ;;  %3695 = vmatpush.msra.mxu3 %v1909_v4  ;;  %v9977_v4 = vperm.slane %v8572_v9, 1 }
 0x4d4   :  { %v1621_v46 = vld [vmem:[#allocation14 + $0x4b0] sm:$0xff]  ;;  %3630 = vmatpush.msra.mxu0 %v1493_v42  ;;  %v2807_v17 = vadd.f32 %v8526_v57, %v2784_v35  ;;  %v2626_v19 = vadd.f32 %v8497_v25, %v2603_v5 }
 0x4d5   :  { %v1773_v43 = vld [vmem:[#allocation14 + $0x970] sm:$0xff]  ;;  %3653 = vmatpush.msra.mxu1 %v1621_v46  ;;  %v2718_v42 = vadd.f32 %v8518_v36, %v9977_v4  ;;  %v8636_v46 = vpop.f32.mrf.mxu0  ;;  %v2899_v36 = vadd.f32 %v8549_v63, %v2499_v48 }
 0x4d6   :  { %v1901_v31 = vld [vmem:[#allocation14 + $0xd70] sm:$0xff]  ;;  %3673 = vmatpush.msra.mxu2 %v1773_v43 }
 0x4d7   :  { %v1485_v24 = vld [vmem:[#allocation14 + $0x70] sm:$0xff]  ;;  %3696 = vmatpush.msra.mxu3 %v1901_v31 }
 0x4d8   :  { %v1613_v3 = vld [vmem:[#allocation14 + $0x470] sm:$0xff]  ;;  %3631 = vmatpush.msra.mxu0 %v1485_v24 }
 0x4d9   :  { %v1765_v37 = vld [vmem:[#allocation14 + $0x930] sm:$0xff]  ;;  %3654 = vmatpush.msra.mxu1 %v1613_v3  ;;  %v8641_v3 = vadd.f32 %v8500_v53, %v2669_v62 }
 0x4da   :  { %v1893_v11 = vld [vmem:[#allocation14 + $0xd30] sm:$0xff]  ;;  %3674 = vmatpush.msra.mxu2 %v1765_v37 }
 0x4db   :  { %v1477_v44 = vld [vmem:[#allocation14 + $0x30] sm:$0xff]  ;;  %3697 = vmatpush.msra.mxu3 %v1893_v11  ;;  %v3083_v11 = vadd.f32 %v8596_v61, %v2500_v18  ;;  %v3985_v62 = vmul.f32 %v8641_v3, %v7779_v41 }
 0x4dc   :  { %v1605_v12 = vld [vmem:[#allocation14 + $0x430] sm:$0xff]  ;;  %3632 = vmatpush.msra.mxu0 %v1477_v44  ;;  %v2741_v44 = vadd.f32 %v8522_v34, %v2718_v42  ;;  %v2922_v34 = vadd.f32 %v8554_v13, %v2899_v36 }
 0x4dd   :  { %v1757_v27 = vld [vmem:[#allocation14 + $0x8f0] sm:$0xff]  ;;  %3655 = vmatpush.msra.mxu1 %v1605_v12  ;;  %3633 = vmatmul.f32.vlgmr.msra.gmra.mxu0 %v8023_v23  ;;  %v2830_v12 = vadd.f32 %v8532_v32, %v2807_v17  ;;  %v8658_v32 = vpop.f32.mrf.mxu1 }
 0x4de   :  { %v1885_v20 = vld [vmem:[#allocation14 + $0xcf0] sm:$0xff]  ;;  %3675 = vmatpush.msra.mxu2 %v1757_v27  ;;  %3656 = vmatmul.f32.vlgmr.msra.gmra.mxu1 %v8058_v2  ;;  %v8650_v27 = vpop.f32.mrf.mxu3 }
 0x4df   :  { %v2109_v24 = vld [vmem:[#allocation14 + $0x13f0] sm:$0xff]  ;;  %3698 = vmatpush.msra.mxu3 %v1885_v20  ;;  %v2764_v20 = vadd.f32 %v8524_v22, %v2741_v44  ;;  %v2853_v35 = vadd.f32 %v8534_v30, %v2830_v12  ;;  %v2945_v22 = vadd.f32 %v8556_v54, %v2922_v34  ;;  %v2902_v30 = vadd.f32 %v8558_v39, %v2499_v48  ;;  %v8673_v54 = vpop.f32.mrf.mxu0 }
 0x4e0   :  { %v2237_v10 = vld [vmem:[#allocation14 + $0x17f0] sm:$0xff]  ;;  %3709 = vmatpush.msrb.mxu0 %v2109_v24  ;;  %v8660_v24 = vpop.f32.mrf.mxu2 }
 0x4e1   :  { %v1749_v7 = vld [vmem:[#allocation14 + $0x8b0] sm:$0xff]  ;;  %3732 = vmatpush.msrb.mxu1 %v2237_v10  ;;  %v2787_v5 = vadd.f32 %v8530_v8, %v2764_v20  ;;  %v2968_v36 = vadd.f32 %v8560_v26, %v2945_v22 }
 0x4e2   :  { %v1877_v43 = vld [vmem:[#allocation14 + $0xcb0] sm:$0xff]  ;;  %3676 = vmatpush.msra.mxu2 %v1749_v7  ;;  %v3106_v7 = vadd.f32 %v8607_v38, %v3083_v11  ;;  %v2649_v38 = vadd.f32 %v8504_v40, %v2626_v19  ;;  %v9978_v19 = vld [vmem:[#allocation118_spill] sm:$0xff] }
 0x4e3   :  { %v2101_v31 = vld [vmem:[#allocation14 + $0x13b0] sm:$0xff]  ;;  %3699 = vmatpush.msra.mxu3 %v1877_v43  ;;  %v2991_v26 = vadd.f32 %v8566_v29, %v2968_v36 }
 0x4e4   :  { %v2229_v37 = vld [vmem:[#allocation14 + $0x17b0] sm:$0xff]  ;;  %3710 = vmatpush.msrb.mxu0 %v2101_v31  ;;  %v3129_v42 = vadd.f32 %v8609_v14, %v3106_v7  ;;  %v3993_v31 = vrot.slane %v3985_v62, 4  ;;  %v3086_v14 = vadd.f32 %v8616_v1, %v2500_v18  ;;  %v2672_v8 = vadd.f32 %v8506_v55, %v2649_v38 }
 0x4e5   :  { %v1741_v28 = vld [vmem:[#allocation14 + $0x870] sm:$0xff]  ;;  %3733 = vmatpush.msrb.mxu1 %v2229_v37  ;;  %v8671_v37 = vadd.f32 %v8542_v47, %v2853_v35  ;;  %3636 = vmatmul.f32.gmra.mxu0 %v8182_v33  ;;  %v2810_v47 = vadd.f32 %v8538_v0, %v2787_v5  ;;  %v8697_v35 = vpop.f32.mrf.mxu1 }
 0x4e6   :  { %v1869_v57 = vld [vmem:[#allocation14 + $0xc70] sm:$0xff]  ;;  %3677 = vmatpush.msra.mxu2 %v1741_v28  ;;  %3659 = vmatmul.f32.gmra.mxu1 %v8190_v6  ;;  %v3152_v1 = vadd.f32 %v8619_v59, %v3129_v42  ;;  %v3994_v44 = vadd.f32 %v3993_v31, %v3985_v62  ;;  %v9979_v62 = vld [vmem:[#allocation119_spill] sm:$0xff]  ;;  %v9983_v31 = vld [vmem:[#allocation122_spill] sm:$0xff] }
 0x4e7   :  { %v2093_v45 = vld [vmem:[#allocation14 + $0x1370] sm:$0xff]  ;;  %3700 = vmatpush.msra.mxu3 %v1869_v57  ;;  %v8683_v57 = vpop.f32.mrf.mxu3  ;;  %v3986_v55 = vmul.f32 %v8671_v37, %v7779_v41  ;;  %v2833_v20 = vadd.f32 %v9979_v62, %v2810_v47  ;;  %v9985_v47 = vld [vmem:[#allocation123_spill] sm:$0xff] }
 0x4e8   :  { %v2221_v51 = vld [vmem:[#allocation14 + $0x1770] sm:$0xff]  ;;  %3711 = vmatpush.msrb.mxu0 %v2093_v45  ;;  %v8699_v29 = vpop.f32.mrf.mxu2  ;;  %v3995_v7 = vrot.slane %v3994_v44, 2 }
 0x4e9   :  { %v1733_v53 = vld [vmem:[#allocation14 + $0x830] sm:$0xff]  ;;  %3734 = vmatpush.msrb.mxu1 %v2221_v51  ;;  %v2925_v51 = vadd.f32 %v8562_v16, %v2902_v30  ;;  %v3175_v16 = vadd.f32 %v8636_v46, %v3152_v1  ;;  %v8705_v30 = vpop.f32.mrf.mxu0  ;;  %v3999_v38 = vrot.slane %v3986_v55, 4 }
 0x4ea   :  { %v1861_v63 = vld [vmem:[#allocation14 + $0xc30] sm:$0xff]  ;;  %3678 = vmatpush.msra.mxu2 %v1733_v53  ;;  %v3996_v1 = vadd.f32 %v3995_v7, %v3994_v44  ;;  %v2501_v44 = vperm.slane %v8572_v9, 4  ;;  %v1710_v9 = vld [vmem:[#allocation14 + $0x778] sm:$0xff] }
 0x4eb   :  { %v2085_v61 = vld [vmem:[#allocation14 + $0x1330] sm:$0xff]  ;;  %3701 = vmatpush.msra.mxu3 %v1861_v63  ;;  %3679 = vmatmul.f32.vlgmr.msra.gmra.mxu2 %v8072_v56  ;;  %v2948_v12 = vadd.f32 %v8564_v15, %v2925_v51  ;;  %v3109_v63 = vadd.f32 %v8627_v50, %v3086_v14  ;;  %v3198_v5 = vadd.f32 %v8658_v32, %v3175_v16 }
 0x4ec   :  { %v2213_v10 = vld [vmem:[#allocation14 + $0x1730] sm:$0xff]  ;;  %3702 = vmatmul.f32.vlgmr.msra.gmra.mxu3 %v8099_v49  ;;  %3712 = vmatpush.msrb.mxu0 %v2085_v61  ;;  %v8694_v61 = vadd.f32 %v9978_v19, %v2672_v8 }
 0x4ed   :  { %v2365_v25 = vld [vmem:[#allocation14 + $0x1bf0] sm:$0xff]  ;;  %3735 = vmatpush.msrb.mxu1 %v2213_v10  ;;  %v3132_v50 = vadd.f32 %v8629_v52, %v3109_v63  ;;  %v2971_v52 = vadd.f32 %v9983_v31, %v2948_v12  ;;  %v4000_v12 = vadd.f32 %v3999_v38, %v3986_v55  ;;  %v3289_v62 = vpop.f32.mrf.mxu1 }
 0x4ee   :  { %v2493_v4 = vld [vmem:[#allocation14 + $0x1ff0] sm:$0xff]  ;;  %3755 = vmatpush.msrb.mxu2 %v2365_v25 }
 0x4ef   :  { %v2077_v13 = vld [vmem:[#allocation14 + $0x12f0] sm:$0xff]  ;;  %3778 = vmatpush.msrb.mxu3 %v2493_v4  ;;  %v2994_v36 = vadd.f32 %v9985_v47, %v2971_v52 }
 0x4f0   :  { %v2205_v17 = vld [vmem:[#allocation14 + $0x16f0] sm:$0xff]  ;;  %3713 = vmatpush.msrb.mxu0 %v2077_v13  ;;  %v3014_v13 = vadd.f32 %v8574_v58, %v2991_v26  ;;  %v8719_v26 = vpop.f32.mrf.mxu3 }
 0x4f1   :  { %v2357_v43 = vld [vmem:[#allocation14 + $0x1bb0] sm:$0xff]  ;;  %3736 = vmatpush.msrb.mxu1 %v2205_v17  ;;  %v3017_v55 = vadd.f32 %v8590_v21, %v2994_v36 }
 0x4f2   :  { %v2485_v39 = vld [vmem:[#allocation14 + $0x1fb0] sm:$0xff]  ;;  %3756 = vmatpush.msrb.mxu2 %v2357_v43  ;;  %v3037_v58 = vadd.f32 %v8576_v60, %v3014_v13  ;;  %v4001_v13 = vrot.slane %v4000_v12, 2 }
 0x4f3   :  { %v2069_v48 = vld [vmem:[#allocation14 + $0x12b0] sm:$0xff]  ;;  %3779 = vmatpush.msrb.mxu3 %v2485_v39 }
 0x4f4   :  { %v2197_v40 = vld [vmem:[#allocation14 + $0x16b0] sm:$0xff]  ;;  %3714 = vmatpush.msrb.mxu0 %v2069_v48 }
 0x4f5   :  { %v2349_v28 = vld [vmem:[#allocation14 + $0x1b70] sm:$0xff]  ;;  %3737 = vmatpush.msrb.mxu1 %v2197_v40 }
 0x4f6   :  { %v2477_v45 = vld [vmem:[#allocation14 + $0x1f70] sm:$0xff]  ;;  %3757 = vmatpush.msrb.mxu2 %v2349_v28 }
 0x4f7   :  { %v2061_v11 = vld [vmem:[#allocation14 + $0x1270] sm:$0xff]  ;;  %3780 = vmatpush.msrb.mxu3 %v2477_v45  ;;  %v3155_v45 = vadd.f32 %v8650_v27, %v3132_v50 }
 0x4f8   :  { %v2189_v18 = vld [vmem:[#allocation14 + $0x1670] sm:$0xff]  ;;  %3715 = vmatpush.msrb.mxu0 %v2061_v11  ;;  %v3221_v11 = vadd.f32 %v8660_v24, %v3198_v5  ;;  %v3267_v5 = vadd.f32 %v8705_v30, %v2501_v44 }
 0x4f9   :  { %v2341_v53 = vld [vmem:[#allocation14 + $0x1b30] sm:$0xff]  ;;  %3738 = vmatpush.msrb.mxu1 %v2189_v18  ;;  %v3178_v63 = vadd.f32 %v8673_v54, %v3155_v45  ;;  %v3335_v45 = vpop.f32.mrf.mxu3 }
 0x4fa   :  { %v2469_v0 = vld [vmem:[#allocation14 + $0x1f30] sm:$0xff]  ;;  %3758 = vmatpush.msrb.mxu2 %v2341_v53  ;;  %v8730_v54 = vadd.f32 %v8683_v57, %v3221_v11 }
 0x4fb   :  { %v2053_v59 = vld [vmem:[#allocation14 + $0x1230] sm:$0xff]  ;;  %3781 = vmatpush.msrb.mxu3 %v2469_v0  ;;  %v3201_v21 = vadd.f32 %v8697_v35, %v3178_v63 }
 0x4fc   :  { %v2181_v34 = vld [vmem:[#allocation14 + $0x1630] sm:$0xff]  ;;  %3716 = vmatpush.msrb.mxu0 %v2053_v59  ;;  %v3988_v35 = vmul.f32 %v8730_v54, %v7779_v41 }
 0x4fd   :  { %v2333_v15 = vld [vmem:[#allocation14 + $0x1af0] sm:$0xff]  ;;  %3739 = vmatpush.msrb.mxu1 %v2181_v34 }
 0x4fe   :  { %v9980_v46 = vld [vmem:[#allocation108_spill] sm:$0xff]  ;;  %v9982_v42 = vld [vmem:[#allocation109_spill] sm:$0xff]  ;;  %3759 = vmatpush.msrb.mxu2 %v2333_v15 }
 0x4ff   :  { %3682 = vmatmul.f32.gmra.mxu2 %v9980_v46  ;;  %v2461_v10 = vld [vmem:[#allocation14 + $0x1ef0] sm:$0xff]  ;;  %3705 = vmatmul.f32.gmra.mxu3 %v9982_v42 }
 0x500   :  { %v2045_v25 = vld [vmem:[#allocation14 + $0x11f0] sm:$0xff]  ;;  %3782 = vmatpush.msrb.mxu3 %v2461_v10 }
 0x501   :  { %v9981_v4 = vld [vmem:[#allocation120_spill] sm:$0xff]  ;;  %v9984_v14 = vld [vmem:[#allocation105_spill] sm:$0xff]  ;;  %3717 = vmatpush.msrb.mxu0 %v2045_v25  ;;  %v3997_v25 = vrot.slane %v3996_v1, 1 }
 0x502   :  { %v2856_v22 = vadd.f32 %v9981_v4, %v2833_v20  ;;  %v2173_v17 = vld [vmem:[#allocation14 + $0x15f0] sm:$0xff]  ;;  %v4225_v40 = vmul.f32 %v8694_v61, %v9984_v14  ;;  %v8726_v20 = vpop.f32.mrf.mxu2 }
 0x503   :  { %v2325_v43 = vld [vmem:[#allocation14 + $0x1ab0] sm:$0xff]  ;;  %3740 = vmatpush.msrb.mxu1 %v2173_v17  ;;  %v3998_v47 = vadd.f32 %v3997_v25, %v3996_v1 }
 0x504   :  { %v2453_v39 = vld [vmem:[#allocation14 + $0x1eb0] sm:$0xff]  ;;  %3760 = vmatpush.msrb.mxu2 %v2325_v43  ;;  %v4233_v16 = vrot.slane %v4225_v40, 4 }
 0x505   :  { %v2037_v48 = vld [vmem:[#allocation14 + $0x11b0] sm:$0xff]  ;;  %3783 = vmatpush.msrb.mxu3 %v2453_v39  ;;  %v3269_v39 = vpop.f32.mrf.mxu0 }
 0x506   :  { %v2165_v28 = vld [vmem:[#allocation14 + $0x15b0] sm:$0xff]  ;;  %3718 = vmatpush.msrb.mxu0 %v2037_v48  ;;  %v4234_v31 = vadd.f32 %v4233_v16, %v4225_v40  ;;  %v4011_v16 = vrot.slane %v3988_v35, 4 }
 0x507   :  { %v2317_v8 = vld [vmem:[#allocation14 + $0x1a70] sm:$0xff]  ;;  %3741 = vmatpush.msrb.mxu1 %v2165_v28  ;;  %v3224_v28 = vadd.f32 %v8699_v29, %v3201_v21  ;;  %v9991_v21 = vld [vmem:[#allocation110_spill] sm:$0xff] }
 0x508   :  { %v2445_v32 = vld [vmem:[#allocation14 + $0x1e70] sm:$0xff]  ;;  %3761 = vmatpush.msrb.mxu2 %v2317_v8  ;;  %v4235_v29 = vrot.slane %v4234_v31, 2 }
 0x509   :  { %v2029_v51 = vld [vmem:[#allocation14 + $0x1170] sm:$0xff]  ;;  %3784 = vmatpush.msrb.mxu3 %v2445_v32  ;;  %v4002_v32 = vadd.f32 %v4001_v13, %v4000_v12 }
 0x50a   :  { %v9986_v18 = vld [vmem:[#allocation121_spill] sm:$0xff]  ;;  %v9987_v59 = vld [vmem:[#allocation124_spill] sm:$0xff]  ;;  %3719 = vmatpush.msrb.mxu0 %v2029_v51  ;;  %v9989_v51 = vld [vmem:[#allocation126_spill] sm:$0xff]  ;;  %v3315_v25 = vpop.f32.mrf.mxu2 }
 0x50b   :  { %v8717_v53 = vadd.f32 %v9986_v18, %v2856_v22  ;;  %v2157_v60 = vld [vmem:[#allocation14 + $0x1570] sm:$0xff]  ;;  %v8723_v19 = vadd.f32 %v9987_v59, %v3037_v58  ;;  %v8748_v59 = vadd.f32 %v8719_v26, %v3224_v28  ;;  %v1726_v26 = vld [vmem:[#allocation14 + $0x7f8] sm:$0xff] }
 0x50c   :  { %v2309_v0 = vld [vmem:[#allocation14 + $0x1a30] sm:$0xff]  ;;  %3742 = vmatpush.msrb.mxu1 %v2157_v60  ;;  %v1718_v28 = vld [vmem:[#allocation14 + $0x7b8] sm:$0xff] }
 0x50d   :  { %v2437_v27 = vld [vmem:[#allocation14 + $0x1e30] sm:$0xff]  ;;  %3762 = vmatpush.msrb.mxu2 %v2309_v0  ;;  %v4226_v7 = vmul.f32 %v8717_v53, %v9984_v14  ;;  %v3987_v52 = vmul.f32 %v8723_v19, %v7779_v41 }
 0x50e   :  { %v2021_v24 = vld [vmem:[#allocation14 + $0x1130] sm:$0xff]  ;;  %3785 = vmatpush.msrb.mxu3 %v2437_v27  ;;  %v3290_v27 = vadd.f32 %v3289_v62, %v3267_v5  ;;  %v1598_v62 = vld [vmem:[#allocation14 + $0x3f8] sm:$0xff]  ;;  %v4228_v5 = vmul.f32 %v8748_v59, %v9984_v14 }
 0x50f   :  { %v2149_v34 = vld [vmem:[#allocation14 + $0x1530] sm:$0xff]  ;;  %3720 = vmatpush.msrb.mxu0 %v2021_v24  ;;  %v4239_v36 = vrot.slane %v4226_v7, 4  ;;  %v4005_v63 = vrot.slane %v3987_v52, 4 }
 0x510   :  { %v2301_v15 = vld [vmem:[#allocation14 + $0x19f0] sm:$0xff]  ;;  %3743 = vmatpush.msrb.mxu1 %v2149_v34  ;;  %v9990_v34 = vld [vmem:[#allocation106_spill] sm:$0xff] }
 0x511   :  { %v2429_v50 = vld [vmem:[#allocation14 + $0x1df0] sm:$0xff]  ;;  %3763 = vmatpush.msrb.mxu2 %v2301_v15  ;;  %v4041_v15 = vmul.f32 %v3998_v47, %v9990_v34 }
 0x512   :  { %v2013_v10 = vld [vmem:[#allocation14 + $0x10f0] sm:$0xff]  ;;  %3786 = vmatpush.msrb.mxu3 %v2429_v50  ;;  %v3292_v50 = vpop.f32.mrf.mxu1 }
 0x513   :  { %v2141_v4 = vld [vmem:[#allocation14 + $0x14f0] sm:$0xff]  ;;  %3721 = vmatpush.msrb.mxu0 %v2013_v10  ;;  %v3313_v10 = vadd.f32 %v8726_v20, %v3290_v27  ;;  %v1590_v20 = vld [vmem:[#allocation14 + $0x3b8] sm:$0xff] }
 0x514   :  { %v2293_v22 = vld [vmem:[#allocation14 + $0x19b0] sm:$0xff]  ;;  %3744 = vmatpush.msrb.mxu1 %v2141_v4  ;;  %v4003_v4 = vrot.slane %v4002_v32, 1 }
 0x515   :  { %v9988_v17 = vld [vmem:[#allocation125_spill] sm:$0xff]  ;;  %3764 = vmatpush.msrb.mxu2 %v2293_v22 }
 0x516   :  { %v3040_v43 = vadd.f32 %v9988_v17, %v3017_v55  ;;  %v2421_v57 = vld [vmem:[#allocation14 + $0x1db0] sm:$0xff]  ;;  %v4240_v55 = vadd.f32 %v4239_v36, %v4226_v7  ;;  %v4236_v17 = vadd.f32 %v4235_v29, %v4234_v31  ;;  %v3358_v7 = vpop.f32.mrf.mxu0  ;;  %v8761_v31 = vsub.f32 %v8641_v3, %v4041_v15 }
 0x517   :  { %v2005_v38 = vld [vmem:[#allocation14 + $0x10b0] sm:$0xff]  ;;  %3787 = vmatpush.msrb.mxu3 %v2421_v57  ;;  %v4004_v36 = vadd.f32 %v4003_v4, %v4002_v32  ;;  %v4251_v29 = vrot.slane %v4228_v5, 4 }
 0x518   :  { %v2133_v48 = vld [vmem:[#allocation14 + $0x14b0] sm:$0xff]  ;;  %3722 = vmatpush.msrb.mxu0 %v2005_v38  ;;  %v8745_v18 = vadd.f32 %v9989_v51, %v3040_v43  ;;  %v4006_v43 = vadd.f32 %v4005_v63, %v3987_v52  ;;  %v4012_v38 = vadd.f32 %v4011_v16, %v3988_v35  ;;  %v4241_v52 = vrot.slane %v4240_v55, 2  ;;  %v1582_v35 = vld [vmem:[#allocation14 + $0x378] sm:$0xff]  ;;  %v3338_v51 = vpop.f32.mrf.mxu3 }
 0x519   :  { %v2285_v58 = vld [vmem:[#allocation14 + $0x1970] sm:$0xff]  ;;  %3745 = vmatpush.msrb.mxu1 %v2133_v48  ;;  %v3270_v48 = vadd.f32 %v3269_v39, %v2501_v44  ;;  %v4237_v39 = vrot.slane %v4236_v17, 1  ;;  %v1574_v63 = vld [vmem:[#allocation14 + $0x338] sm:$0xff]  ;;  %v4057_v32 = vmul.f32 %v8761_v31, %v8761_v31  ;;  %v4042_v15 = vmul.f32 %v4004_v36, %v9990_v34 }
 0x51a   :  { %v2413_v40 = vld [vmem:[#allocation14 + $0x1d70] sm:$0xff]  ;;  %3765 = vmatpush.msrb.mxu2 %v2285_v58  ;;  %v4227_v22 = vmul.f32 %v8745_v18, %v9984_v14  ;;  %v9992_v58 = vld [vmem:[#allocation111_spill] sm:$0xff]  ;;  %v4242_v27 = vadd.f32 %v4241_v52, %v4240_v55  ;;  %v1854_v16 = vld [vmem:[#allocation14 + $0xbf8] sm:$0xff] }
 0x51b   :  { %v1997_v8 = vld [vmem:[#allocation14 + $0x1070] sm:$0xff]  ;;  %3788 = vmatpush.msrb.mxu3 %v2413_v40  ;;  %v1566_v55 = vld [vmem:[#allocation14 + $0x2f8] sm:$0xff] }
 0x51c   :  { %v2125_v30 = vld [vmem:[#allocation14 + $0x1470] sm:$0xff]  ;;  %3723 = vmatpush.msrb.mxu0 %v1997_v8  ;;  %v3336_v8 = vadd.f32 %v3335_v45, %v3313_v10  ;;  %v3293_v45 = vadd.f32 %v3292_v50, %v3270_v48  ;;  %v1982_v50 = vld [vmem:[#allocation14 + $0xff8] sm:$0xff]  ;;  %v4252_v48 = vadd.f32 %v4251_v29, %v4228_v5  ;;  %v9996_v5 = vld [vmem:[#allocation115_spill] sm:$0xff] }
 0x51d   :  { %v2277_v11 = vld [vmem:[#allocation14 + $0x1930] sm:$0xff]  ;;  %3746 = vmatpush.msrb.mxu1 %v2125_v30  ;;  %v4245_v30 = vrot.slane %v4227_v22, 4  ;;  %v9995_v52 = vld [vmem:[#allocation114_spill] sm:$0xff] }
 0x51e   :  { %v2405_v60 = vld [vmem:[#allocation14 + $0x1d30] sm:$0xff]  ;;  %3766 = vmatpush.msrb.mxu2 %v2277_v11  ;;  %v4007_v11 = vrot.slane %v4006_v43, 2 }
 0x51f   :  { %v1989_v0 = vld [vmem:[#allocation14 + $0x1030] sm:$0xff]  ;;  %3789 = vmatpush.msrb.mxu3 %v2405_v60  ;;  %v3359_v60 = vadd.f32 %v3358_v7, %v3336_v8  ;;  %v4246_v10 = vadd.f32 %v4245_v30, %v4227_v22  ;;  %v4065_v22 = vmul.f32 %v4057_v32, %v7779_v41  ;;  %v1974_v8 = vld [vmem:[#allocation14 + $0xfb8] sm:$0xff] }
 0x520   :  { %v2117_v1 = vld [vmem:[#allocation14 + $0x1430] sm:$0xff]  ;;  %3724 = vmatpush.msrb.mxu0 %v1989_v0  ;;  %v4013_v0 = vrot.slane %v4012_v38, 2  ;;  %v1686_v30 = vld [vmem:[#allocation14 + $0x6b8] sm:$0xff] }
 0x521   :  { %v2269_v24 = vld [vmem:[#allocation14 + $0x18f0] sm:$0xff]  ;;  %3747 = vmatpush.msrb.mxu1 %v2117_v1  ;;  %3725 = vmatmul.f32.vlgmr.msrb.gmra.mxu0 %v9991_v21  ;;  %v3381_v1 = vpop.f32.mrf.mxu1  ;;  %v4247_v36 = vrot.slane %v4246_v10, 2  ;;  %v4073_v32 = vrot.slane %v4065_v22, 4 }
 0x522   :  { %v2397_v12 = vld [vmem:[#allocation14 + $0x1cf0] sm:$0xff]  ;;  %3767 = vmatpush.msrb.mxu2 %v2269_v24  ;;  %3748 = vmatmul.f32.vlgmr.msrb.gmra.mxu1 %v9992_v58  ;;  %v1702_v24 = vld [vmem:[#allocation14 + $0x738] sm:$0xff]  ;;  %v3382_v7 = vadd.f32 %v3381_v1, %v3359_v60 }
 0x523   :  { %v2261_v13 = vld [vmem:[#allocation14 + $0x18b0] sm:$0xff]  ;;  %3790 = vmatpush.msrb.mxu3 %v2397_v12  ;;  %3801 = vmatpush.msra.mxu0 %v1598_v62  ;;  %v3404_v12 = vpop.f32.mrf.mxu2  ;;  %v3316_v62 = vadd.f32 %v3315_v25, %v3293_v45  ;;  %v4243_v25 = vrot.slane %v4242_v27, 1  ;;  %v1966_v60 = vld [vmem:[#allocation14 + $0xf78] sm:$0xff]  ;;  %v4253_v45 = vrot.slane %v4252_v48, 2 }
 0x524   :  { %v2389_v57 = vld [vmem:[#allocation14 + $0x1cb0] sm:$0xff]  ;;  %3824 = vmatpush.msra.mxu1 %v1726_v26  ;;  %3768 = vmatpush.msrb.mxu2 %v2261_v13  ;;  %v4238_v26 = vadd.f32 %v4237_v39, %v4236_v17  ;;  %v4008_v13 = vadd.f32 %v4007_v11, %v4006_v43  ;;  %v3361_v17 = vpop.f32.mrf.mxu0  ;;  %v1558_v43 = vld [vmem:[#allocation14 + $0x2b8] sm:$0xff] }
 0x525   :  { %v2253_v40 = vld [vmem:[#allocation14 + $0x1870] sm:$0xff]  ;;  %3791 = vmatpush.msrb.mxu3 %v2389_v57  ;;  %3802 = vmatpush.msra.mxu0 %v1590_v20  ;;  %v4014_v20 = vadd.f32 %v4013_v0, %v4012_v38  ;;  %v3339_v38 = vadd.f32 %v3338_v51, %v3316_v62  ;;  %v3427_v0 = vpop.f32.mrf.mxu3  ;;  %v1830_v51 = vld [vmem:[#allocation14 + $0xb38] sm:$0xff]  ;;  %v4244_v1 = vadd.f32 %v4243_v25, %v4242_v27 }
 0x526   :  { %v2381_v47 = vld [vmem:[#allocation14 + $0x1c70] sm:$0xff]  ;;  %3825 = vmatpush.msra.mxu1 %v1718_v28  ;;  %3769 = vmatpush.msrb.mxu2 %v2253_v40  ;;  %v1694_v28 = vld [vmem:[#allocation14 + $0x6f8] sm:$0xff]  ;;  %v4009_v11 = vrot.slane %v4008_v13, 1  ;;  %v4254_v25 = vadd.f32 %v4253_v45, %v4252_v48 }
 0x527   :  { %v2245_v44 = vld [vmem:[#allocation14 + $0x1830] sm:$0xff]  ;;  %3792 = vmatpush.msrb.mxu3 %v2381_v47  ;;  %3803 = vmatpush.msra.mxu0 %v1582_v35  ;;  %v1846_v40 = vld [vmem:[#allocation14 + $0xbb8] sm:$0xff]  ;;  %v3405_v47 = vadd.f32 %v3404_v12, %v3382_v7  ;;  %v8771_v35 = vsub.f32 %v8671_v37, %v4042_v15  ;;  %v4015_v29 = vrot.slane %v4014_v20, 1  ;;  %v3362_v37 = vadd.f32 %v3361_v17, %v3339_v38 }
 0x528   :  { %v2373_v3 = vld [vmem:[#allocation14 + $0x1c30] sm:$0xff]  ;;  %3826 = vmatpush.msra.mxu1 %v1710_v9  ;;  %3770 = vmatpush.msrb.mxu2 %v2245_v44  ;;  %v1838_v9 = vld [vmem:[#allocation14 + $0xb78] sm:$0xff]  ;;  %v9997_v44 = vld [vmem:[#allocation107_spill] sm:$0xff]  ;;  %v4248_v15 = vadd.f32 %v4247_v36, %v4246_v10  ;;  %v4255_v45 = vrot.slane %v4254_v25, 1 }
 0x529   :  { %3793 = vmatpush.msrb.mxu3 %v2373_v3  ;;  %v9993_v4 = vld [vmem:[#allocation112_spill] sm:$0xff]  ;;  %v9994_v57 = vld [vmem:[#allocation113_spill] sm:$0xff]  ;;  %3804 = vmatpush.msra.mxu0 %v1574_v63  ;;  %v4281_v39 = vmul.f32 %v4238_v26, %v9997_v44  ;;  %v4058_v12 = vmul.f32 %v8771_v35, %v8771_v35  ;;  %v4010_v26 = vadd.f32 %v4009_v11, %v4008_v13  ;;  %v3384_v7 = vpop.f32.mrf.mxu1 }
 0x52a   :  { %3771 = vmatmul.f32.vlgmr.msrb.gmra.mxu2 %v9993_v4  ;;  %3794 = vmatmul.f32.vlgmr.msrb.gmra.mxu3 %v9994_v57  ;;  %v1550_v3 = vld [vmem:[#allocation14 + $0x278] sm:$0xff]  ;;  %v9998_v17 = vld [vmem:[#allocation116_spill] sm:$0xff]  ;;  %v4282_v36 = vmul.f32 %v4244_v1, %v9997_v44  ;;  %v4249_v48 = vrot.slane %v4248_v15, 1 }
 0x52b   :  { %3827 = vmatpush.msra.mxu1 %v1702_v24  ;;  %3847 = vmatpush.msra.mxu2 %v1854_v16  ;;  %v1678_v63 = vld [vmem:[#allocation14 + $0x678] sm:$0xff]  ;;  %v8775_v16 = vadd.f32 %v3427_v0, %v3405_v47  ;;  %v4074_v47 = vadd.f32 %v4073_v32, %v4065_v22 }
 0x52c   :  { %3870 = vmatpush.msra.mxu3 %v1982_v50  ;;  %3728 = vmatmul.f32.gmra.mxu0 %v9995_v52  ;;  %v1958_v24 = vld [vmem:[#allocation14 + $0xf38] sm:$0xff]  ;;  %v8780_v50 = vsub.f32 %v8694_v61, %v4281_v39  ;;  %v8793_v32 = vsub.f32 %v8717_v53, %v4282_v36  ;;  %v4256_v36 = vadd.f32 %v4255_v45, %v4254_v25 }
 0x52d   :  { %3751 = vmatmul.f32.gmra.mxu1 %v9996_v5  ;;  %3805 = vmatpush.msra.mxu0 %v1566_v55  ;;  %v1542_v62 = vld [vmem:[#allocation14 + $0x238] sm:$0xff]  ;;  %v3989_v61 = vmul.f32 %v8775_v16, %v7779_v41 }
 0x52e   :  { %3828 = vmatpush.msra.mxu1 %v1694_v28  ;;  %3848 = vmatpush.msra.mxu2 %v1846_v40  ;;  %v1670_v27 = vld [vmem:[#allocation14 + $0x638] sm:$0xff]  ;;  %v3407_v28 = vpop.f32.mrf.mxu2  ;;  %v4016_v40 = vadd.f32 %v4015_v29, %v4014_v20  ;;  %v4066_v20 = vmul.f32 %v4058_v12, %v7779_v41  ;;  %v4297_v22 = vmul.f32 %v8780_v50, %v8780_v50 }
 0x52f   :  { %3871 = vmatpush.msra.mxu3 %v1974_v8  ;;  %3806 = vmatpush.msra.mxu0 %v1558_v43  ;;  %v1822_v55 = vld [vmem:[#allocation14 + $0xaf8] sm:$0xff]  ;;  %v3385_v8 = vadd.f32 %v3384_v7, %v3362_v37  ;;  %v4017_v1 = vrot.slane %v3989_v61, 4  ;;  %v4250_v7 = vadd.f32 %v4249_v48, %v4248_v15  ;;  %v4298_v48 = vmul.f32 %v8793_v32, %v8793_v32 }
 0x530   :  { %3829 = vmatpush.msra.mxu1 %v1686_v30  ;;  %3849 = vmatpush.msra.mxu2 %v1838_v9  ;;  %v1950_v10 = vld [vmem:[#allocation14 + $0xef8] sm:$0xff]  ;;  %v4044_v29 = vmul.f32 %v4016_v40, %v9990_v34  ;;  %v4305_v40 = vmul.f32 %v4297_v22, %v9984_v14 }
 0x531   :  { %3872 = vmatpush.msra.mxu3 %v1966_v60  ;;  %3807 = vmatpush.msra.mxu0 %v1550_v3  ;;  %v1534_v43 = vld [vmem:[#allocation14 + $0x1f8] sm:$0xff]  ;;  %v3408_v11 = vadd.f32 %v3407_v28, %v3385_v8  ;;  %v4043_v60 = vmul.f32 %v4010_v26, %v9990_v34  ;;  %v4079_v26 = vrot.slane %v4066_v20, 4  ;;  %v4283_v22 = vmul.f32 %v4250_v7, %v9997_v44 }
 0x532   :  { %3830 = vmatpush.msra.mxu1 %v1678_v63  ;;  %3850 = vmatpush.msra.mxu2 %v1830_v51  ;;  %v9999_v13 = vld [vmem:[#allocation117_spill] sm:$0xff]  ;;  %v4075_v51 = vrot.slane %v4074_v47, 2 }
 0x533   :  { %3873 = vmatpush.msra.mxu3 %v1958_v24  ;;  %3774 = vmatmul.f32.gmra.mxu2 %v9998_v17  ;;  %v1662_v38 = vld [vmem:[#allocation14 + $0x5f8] sm:$0xff]  ;;  %v8799_v8 = vsub.f32 %v8723_v19, %v4043_v60 }
 0x534   :  { %3797 = vmatmul.f32.gmra.mxu3 %v9999_v13  ;;  %3808 = vmatpush.msra.mxu0 %v1542_v62  ;;  %v1814_v30 = vld [vmem:[#allocation14 + $0xab8] sm:$0xff]  ;;  %v3430_v62 = vpop.f32.mrf.mxu3 }
 0x535   :  { %3831 = vmatpush.msra.mxu1 %v1670_v27  ;;  %3851 = vmatpush.msra.mxu2 %v1822_v55  ;;  %v1942_v9 = vld [vmem:[#allocation14 + $0xeb8] sm:$0xff]  ;;  %v8795_v55 = vadd.f32 %v3430_v62, %v3408_v11  ;;  %v4080_v11 = vadd.f32 %v4079_v26, %v4066_v20  ;;  %v8816_v26 = vsub.f32 %v8745_v18, %v4283_v22 }
 0x536   :  { %v1526_v39 = vld [vmem:[#allocation14 + $0x1b8] sm:$0xff]  ;;  %3874 = vmatpush.msra.mxu3 %v1950_v10  ;;  %3809 = vmatpush.msra.mxu0 %v1534_v43  ;;  %v8802_v43 = vsub.f32 %v8730_v54, %v4044_v29  ;;  %v4284_v29 = vmul.f32 %v4256_v36, %v9997_v44 }
 0x537   :  { %v1654_v3 = vld [vmem:[#allocation14 + $0x5b8] sm:$0xff]  ;;  %3832 = vmatpush.msra.mxu1 %v1662_v38  ;;  %3852 = vmatpush.msra.mxu2 %v1814_v30  ;;  %v4076_v30 = vadd.f32 %v4075_v51, %v4074_v47  ;;  %v4229_v54 = vmul.f32 %v8795_v55, %v9984_v14  ;;  %v4059_v47 = vmul.f32 %v8799_v8, %v8799_v8  ;;  %v4081_v62 = vrot.slane %v4080_v11, 2 }
 0x538   :  { %v1806_v0 = vld [vmem:[#allocation14 + $0xa78] sm:$0xff]  ;;  %3875 = vmatpush.msra.mxu3 %v1942_v9  ;;  %3810 = vmatpush.msra.mxu0 %v1526_v39  ;;  %v4018_v9 = vadd.f32 %v4017_v1, %v3989_v61  ;;  %v4060_v20 = vmul.f32 %v8802_v43, %v8802_v43  ;;  %v4306_v51 = vmul.f32 %v4298_v48, %v9984_v14 }
 0x539   :  { %v1934_v37 = vld [vmem:[#allocation14 + $0xe78] sm:$0xff]  ;;  %3833 = vmatpush.msra.mxu1 %v1654_v3  ;;  %3853 = vmatpush.msra.mxu2 %v1806_v0  ;;  %v4313_v3 = vrot.slane %v4305_v40, 4  ;;  %v4257_v7 = vrot.slane %v4229_v54, 4  ;;  %v8821_v48 = vsub.f32 %v8748_v59, %v4284_v29 }
 0x53a   :  { %v1518_v63 = vld [vmem:[#allocation14 + $0x178] sm:$0xff]  ;;  %3876 = vmatpush.msra.mxu3 %v1934_v37  ;;  %v4019_v1 = vrot.slane %v4018_v9, 2 }
 0x53b   :  { %v1646_v24 = vld [vmem:[#allocation14 + $0x578] sm:$0xff]  ;;  %3811 = vmatpush.msra.mxu0 %v1518_v63  ;;  %v4077_v63 = vrot.slane %v4076_v30, 1  ;;  %v4300_v29 = vmul.f32 %v8821_v48, %v8821_v48 }
 0x53c   :  { %v1798_v12 = vld [vmem:[#allocation14 + $0xa38] sm:$0xff]  ;;  %3834 = vmatpush.msra.mxu1 %v1646_v24  ;;  %v4020_v22 = vadd.f32 %v4019_v1, %v4018_v9 }
 0x53d   :  { %v1926_v27 = vld [vmem:[#allocation14 + $0xe38] sm:$0xff]  ;;  %3854 = vmatpush.msra.mxu2 %v1798_v12 }
 0x53e   :  { %v1510_v28 = vld [vmem:[#allocation14 + $0x138] sm:$0xff]  ;;  %3877 = vmatpush.msra.mxu3 %v1926_v27 }
 0x53f   :  { %v1638_v53 = vld [vmem:[#allocation14 + $0x538] sm:$0xff]  ;;  %3812 = vmatpush.msra.mxu0 %v1510_v28 }
 0x540   :  { %v1790_v10 = vld [vmem:[#allocation14 + $0x9f8] sm:$0xff]  ;;  %3835 = vmatpush.msra.mxu1 %v1638_v53  ;;  %v4314_v53 = vadd.f32 %v4313_v3, %v4305_v40  ;;  %v4258_v3 = vadd.f32 %v4257_v7, %v4229_v54 }
 0x541   :  { %v1918_v15 = vld [vmem:[#allocation14 + $0xdf8] sm:$0xff]  ;;  %3855 = vmatpush.msra.mxu2 %v1790_v10  ;;  %v4067_v10 = vmul.f32 %v4059_v47, %v7779_v41 }
 0x542   :  { %v1502_v38 = vld [vmem:[#allocation14 + $0xf8] sm:$0xff]  ;;  %3878 = vmatpush.msra.mxu3 %v1918_v15  ;;  %v4315_v59 = vrot.slane %v4314_v53, 2 }
 0x543   :  { %v1630_v19 = vld [vmem:[#allocation14 + $0x4f8] sm:$0xff]  ;;  %3813 = vmatpush.msra.mxu0 %v1502_v38  ;;  %v4068_v38 = vmul.f32 %v4060_v20, %v7779_v41 }
 0x544   :  { %v1782_v39 = vld [vmem:[#allocation14 + $0x9b8] sm:$0xff]  ;;  %3836 = vmatpush.msra.mxu1 %v1630_v19  ;;  %v4078_v19 = vadd.f32 %v4077_v63, %v4076_v30 }
 0x545   :  { %v1910_v25 = vld [vmem:[#allocation14 + $0xdb8] sm:$0xff]  ;;  %3856 = vmatpush.msra.mxu2 %v1782_v39  ;;  %v4319_v39 = vrot.slane %v4306_v51, 4  ;;  %v4091_v9 = vrot.slane %v4068_v38, 4 }
 0x546   :  { %v1494_v60 = vld [vmem:[#allocation14 + $0xb8] sm:$0xff]  ;;  %3879 = vmatpush.msra.mxu3 %v1910_v25  ;;  %v4082_v25 = vadd.f32 %v4081_v62, %v4080_v11  ;;  %v4259_v62 = vrot.slane %v4258_v3, 2 }
 0x547   :  { %v1622_v61 = vld [vmem:[#allocation14 + $0x4b8] sm:$0xff]  ;;  %3814 = vmatpush.msra.mxu0 %v1494_v60  ;;  %v4299_v60 = vmul.f32 %v8816_v26, %v8816_v26 }
 0x548   :  { %v1774_v0 = vld [vmem:[#allocation14 + $0x978] sm:$0xff]  ;;  %3837 = vmatpush.msra.mxu1 %v1622_v61 }
 0x549   :  { %v1902_v45 = vld [vmem:[#allocation14 + $0xd78] sm:$0xff]  ;;  %3857 = vmatpush.msra.mxu2 %v1774_v0  ;;  %v4085_v0 = vrot.slane %v4067_v10, 4 }
 0x54a   :  { %v1486_v37 = vld [vmem:[#allocation14 + $0x78] sm:$0xff]  ;;  %3880 = vmatpush.msra.mxu3 %v1902_v45  ;;  %v4320_v45 = vadd.f32 %v4319_v39, %v4306_v51 }
 0x54b   :  { %v1614_v24 = vld [vmem:[#allocation14 + $0x478] sm:$0xff]  ;;  %3815 = vmatpush.msra.mxu0 %v1486_v37  ;;  %v4021_v37 = vrot.slane %v4020_v22, 1 }
 0x54c   :  { %v1766_v12 = vld [vmem:[#allocation14 + $0x938] sm:$0xff]  ;;  %3838 = vmatpush.msra.mxu1 %v1614_v24  ;;  %v4121_v24 = vmul.f32 %v4078_v19, %v9990_v34  ;;  %v4321_v39 = vrot.slane %v4320_v45, 2 }
 0x54d   :  { %v1894_v27 = vld [vmem:[#allocation14 + $0xd38] sm:$0xff]  ;;  %3858 = vmatpush.msra.mxu2 %v1766_v12  ;;  %v4307_v12 = vmul.f32 %v4299_v60, %v9984_v14 }
 0x54e   :  { %v1478_v28 = vld [vmem:[#allocation14 + $0x38] sm:$0xff]  ;;  %3881 = vmatpush.msra.mxu3 %v1894_v27 }
 0x54f   :  { %v1606_v36 = vld [vmem:[#allocation14 + $0x438] sm:$0xff]  ;;  %3816 = vmatpush.msra.mxu0 %v1478_v28  ;;  %v4086_v28 = vadd.f32 %v4085_v0, %v4067_v10  ;;  %v4325_v10 = vrot.slane %v4307_v12, 4 }
 0x550   :  { %v1758_v15 = vld [vmem:[#allocation14 + $0x8f8] sm:$0xff]  ;;  %3839 = vmatpush.msra.mxu1 %v1606_v36  ;;  %3817 = vmatmul.f32.vlgmr.msra.gmra.mxu0 %v8023_v23  ;;  %v4083_v23 = vrot.slane %v4082_v25, 1  ;;  %v3450_v36 = vpop.f32.mrf.mxu0 }
 0x551   :  { %v1886_v18 = vld [vmem:[#allocation14 + $0xcf8] sm:$0xff]  ;;  %3859 = vmatpush.msra.mxu2 %v1758_v15  ;;  %3840 = vmatmul.f32.vlgmr.msra.gmra.mxu1 %v8058_v2  ;;  %v4316_v2 = vadd.f32 %v4315_v59, %v4314_v53  ;;  %v4092_v15 = vadd.f32 %v4091_v9, %v4068_v38  ;;  %v4260_v59 = vadd.f32 %v4259_v62, %v4258_v3 }
 0x552   :  { %v2110_v40 = vld [vmem:[#allocation14 + $0x13f8] sm:$0xff]  ;;  %3882 = vmatpush.msra.mxu3 %v1886_v18  ;;  %v4308_v18 = vmul.f32 %v4300_v29, %v9984_v14  ;;  %v4084_v53 = vadd.f32 %v4083_v23, %v4082_v25  ;;  %v8836_v29 = vld [vmem:[#allocation16] sm:$0xff] }
 0x553   :  { %v2238_v47 = vld [vmem:[#allocation14 + $0x17f8] sm:$0xff]  ;;  %3893 = vmatpush.msrb.mxu0 %v2110_v40  ;;  %v4022_v40 = vadd.f32 %v4021_v37, %v4020_v22  ;;  %v4317_v0 = vrot.slane %v4316_v2, 1  ;;  %v4093_v22 = vrot.slane %v4092_v15, 2  ;;  %v3473_v37 = vpop.f32.mrf.mxu1  ;;  %v4261_v23 = vrot.slane %v4260_v59, 1 }
 0x554   :  { %v1750_v61 = vld [vmem:[#allocation14 + $0x8b8] sm:$0xff]  ;;  %3916 = vmatpush.msrb.mxu1 %v2238_v47  ;;  %v4331_v9 = vrot.slane %v4308_v18, 4 }
 0x555   :  { %v1878_v30 = vld [vmem:[#allocation14 + $0xcb8] sm:$0xff]  ;;  %3860 = vmatpush.msra.mxu2 %v1750_v61  ;;  %v8832_v61 = vadd.f32 1e-05, %v4121_v24  ;;  %v4326_v24 = vadd.f32 %v4325_v10, %v4307_v12  ;;  %v3519_v10 = vpop.f32.mrf.mxu3 }
 0x556   :  { %v2102_v20 = vld [vmem:[#allocation14 + $0x13b8] sm:$0xff]  ;;  %3883 = vmatpush.msra.mxu3 %v1878_v30  ;;  %v4087_v30 = vrot.slane %v4086_v28, 2 }
 0x557   :  { %v2230_v11 = vld [vmem:[#allocation14 + $0x17b8] sm:$0xff]  ;;  %3894 = vmatpush.msrb.mxu0 %v2102_v20  ;;  %6333 = vrsqrt.f32 %v8832_v61  ;;  %vm4143_vm3 = vweird.f32 %v8832_v61 }
 0x558   :  { %v1742_v54 = vld [vmem:[#allocation14 + $0x878] sm:$0xff]  ;;  %3917 = vmatpush.msrb.mxu1 %v2230_v11  ;;  %v2502_v11 = vperm.slane %v8836_v29, 5  ;;  %3820 = vmatmul.f32.gmra.mxu0 %v8182_v33  ;;  %v3496_v33 = vpop.f32.mrf.mxu2 }
 0x559   :  { %v1870_v63 = vld [vmem:[#allocation14 + $0xc78] sm:$0xff]  ;;  %3861 = vmatpush.msra.mxu2 %v1742_v54  ;;  %v4322_v54 = vadd.f32 %v4321_v39, %v4320_v45  ;;  %3843 = vmatmul.f32.gmra.mxu1 %v8190_v6  ;;  %v4318_v45 = vadd.f32 %v4317_v0, %v4316_v2  ;;  %v4094_v39 = vadd.f32 %v4093_v22, %v4092_v15  ;;  %v8849_v2 = vpop.f32.mrf.mxu0  ;;  %v4327_v15 = vrot.slane %v4326_v24, 2 }
 0x55a   :  { %v2094_v1 = vld [vmem:[#allocation14 + $0x1378] sm:$0xff]  ;;  %3884 = vmatpush.msra.mxu3 %v1870_v63 }
 0x55b   :  { %v2222_v7 = vld [vmem:[#allocation14 + $0x1778] sm:$0xff]  ;;  %3895 = vmatpush.msrb.mxu0 %v2094_v1  ;;  %v4122_v1 = vmul.f32 %v4084_v53, %v9990_v34  ;;  %v4323_v6 = vrot.slane %v4322_v54, 1  ;;  %v4361_v22 = vmul.f32 %v4318_v45, %v9997_v44 }
 0x55c   :  { %v1734_v27 = vld [vmem:[#allocation14 + $0x838] sm:$0xff]  ;;  %3918 = vmatpush.msrb.mxu1 %v2222_v7 }
 0x55d   :  { %v1862_v51 = vld [vmem:[#allocation14 + $0xc38] sm:$0xff]  ;;  %3862 = vmatpush.msra.mxu2 %v1734_v27  ;;  %v4088_v27 = vadd.f32 %v4087_v30, %v4086_v28 }
 0x55e   :  { %v2086_v19 = vld [vmem:[#allocation14 + $0x1338] sm:$0xff]  ;;  %3885 = vmatpush.msra.mxu3 %v1862_v51  ;;  %3863 = vmatmul.f32.vlgmr.msra.gmra.mxu2 %v8072_v56  ;;  %v4045_v56 = vmul.f32 %v4022_v40, %v9990_v34  ;;  %v4332_v40 = vadd.f32 %v4331_v9, %v4308_v18  ;;  %v4262_v18 = vadd.f32 %v4261_v23, %v4260_v59  ;;  %v4095_v9 = vrot.slane %v4094_v39, 1 }
 0x55f   :  { %v2214_v60 = vld [vmem:[#allocation14 + $0x1738] sm:$0xff]  ;;  %3886 = vmatmul.f32.vlgmr.msra.gmra.mxu3 %v8099_v49  ;;  %3896 = vmatpush.msrb.mxu0 %v2086_v19  ;;  %v4089_v0 = vrot.slane %v4088_v27, 1 }
 0x560   :  { %v2366_v47 = vld [vmem:[#allocation14 + $0x1bf8] sm:$0xff]  ;;  %3919 = vmatpush.msrb.mxu1 %v2214_v60  ;;  %v3451_v60 = vadd.f32 %v3450_v36, %v2502_v11  ;;  %v8847_v53 = vsub.f32 %v8775_v16, %v4045_v56  ;;  %v8853_v16 = vpop.eup %6333 }
 0x561   :  { %v2494_v38 = vld [vmem:[#allocation14 + $0x1ff8] sm:$0xff]  ;;  %3939 = vmatpush.msrb.mxu2 %v2366_v47  ;;  %vm4144_vm2 = vweird.f32 %v8853_v16 }
 0x562   :  { %v2078_v20 = vld [vmem:[#allocation14 + $0x12f8] sm:$0xff]  ;;  %3962 = vmatpush.msrb.mxu3 %v2494_v38  ;;  %v8851_v38 = vadd.f32 1e-05, %v4122_v1  ;;  %vm8937_vm4 = vmor %vm4143_vm3, %vm4144_vm2 }
 0x563   :  { %v2206_v25 = vld [vmem:[#allocation14 + $0x16f8] sm:$0xff]  ;;  %3897 = vmatpush.msrb.mxu0 %v2078_v20 }
 0x564   :  { %v2358_v3 = vld [vmem:[#allocation14 + $0x1bb8] sm:$0xff]  ;;  %3920 = vmatpush.msrb.mxu1 %v2206_v25  ;;  %v4333_v25 = vrot.slane %v4332_v40, 2  ;;  %6335 = vrsqrt.f32 %v8851_v38  ;;  %vm4153_vm6 = vweird.f32 %v8851_v38 }
 0x565   :  { %v2486_v49 = vld [vmem:[#allocation14 + $0x1fb8] sm:$0xff]  ;;  %3940 = vmatpush.msrb.mxu2 %v2358_v3  ;;  %v3474_v3 = vadd.f32 %v3473_v37, %v3451_v60 }
 0x566   :  { %v2070_v63 = vld [vmem:[#allocation14 + $0x12b8] sm:$0xff]  ;;  %3963 = vmatpush.msrb.mxu3 %v2486_v49  ;;  %3866 = vmatmul.f32.gmra.mxu2 %v9980_v46  ;;  %v4324_v49 = vadd.f32 %v4323_v6, %v4322_v54  ;;  %v4138_v54 = vmul.f32 %v8853_v16, %v8832_v61 }
 0x567   :  { %v2198_v62 = vld [vmem:[#allocation14 + $0x16b8] sm:$0xff]  ;;  %3898 = vmatpush.msrb.mxu0 %v2070_v63  ;;  %v4061_v63 = vmul.f32 %v8847_v53, %v8847_v53  ;;  %3889 = vmatmul.f32.gmra.mxu3 %v9982_v42  ;;  %v3497_v37 = vadd.f32 %v3496_v33, %v3474_v3 }
 0x568   :  { %v2350_v7 = vld [vmem:[#allocation14 + $0x1b78] sm:$0xff]  ;;  %3921 = vmatpush.msrb.mxu1 %v2198_v62  ;;  %v4328_v62 = vadd.f32 %v4327_v15, %v4326_v24  ;;  %v4334_v24 = vadd.f32 %v4333_v25, %v4332_v40  ;;  %v4139_v25 = vmul.f32 %v8853_v16, %v4138_v54 }
 0x569   :  { %v2478_v51 = vld [vmem:[#allocation14 + $0x1f78] sm:$0xff]  ;;  %3941 = vmatpush.msrb.mxu2 %v2350_v7  ;;  %v4285_v7 = vmul.f32 %v4262_v18, %v9997_v44  ;;  %v4069_v15 = vmul.f32 %v4061_v63, %v7779_v41  ;;  %v3520_v40 = vadd.f32 %v3519_v10, %v3497_v37 }
 0x56a   :  { %v2062_v19 = vld [vmem:[#allocation14 + $0x1278] sm:$0xff]  ;;  %3964 = vmatpush.msrb.mxu3 %v2478_v51  ;;  %v4090_v51 = vadd.f32 %v4089_v0, %v4088_v27  ;;  %v3542_v0 = vpop.f32.mrf.mxu0 }
 0x56b   :  { %v2190_v12 = vld [vmem:[#allocation14 + $0x1678] sm:$0xff]  ;;  %3899 = vmatpush.msrb.mxu0 %v2062_v19  ;;  %v3476_v19 = vpop.f32.mrf.mxu1  ;;  %v3543_v63 = vadd.f32 %v3542_v0, %v3520_v40 }
 0x56c   :  { %v2342_v47 = vld [vmem:[#allocation14 + $0x1b38] sm:$0xff]  ;;  %3922 = vmatpush.msrb.mxu1 %v2190_v12  ;;  %v8864_v12 = vadd.f32 1e-05, %v4361_v22  ;;  %v4123_v3 = vmul.f32 %v4090_v51, %v9990_v34 }
 0x56d   :  { %v2470_v28 = vld [vmem:[#allocation14 + $0x1f38] sm:$0xff]  ;;  %3942 = vmatpush.msrb.mxu2 %v2342_v47  ;;  %v4096_v47 = vadd.f32 %v4095_v9, %v4094_v39  ;;  %v3454_v39 = vadd.f32 %v8849_v2, %v2502_v11  ;;  %v4335_v11 = vrot.slane %v4334_v24, 1 }
 0x56e   :  { %v2054_v36 = vld [vmem:[#allocation14 + $0x1238] sm:$0xff]  ;;  %3965 = vmatpush.msrb.mxu3 %v2470_v28  ;;  %v4362_v28 = vmul.f32 %v4324_v49, %v9997_v44  ;;  %v8878_v49 = vpop.eup %6335  ;;  %6337 = vrsqrt.f32 %v8864_v12  ;;  %vm4383_vm9 = vweird.f32 %v8864_v12 }
 0x56f   :  { %v2182_v30 = vld [vmem:[#allocation14 + $0x1638] sm:$0xff]  ;;  %3900 = vmatpush.msrb.mxu0 %v2054_v36  ;;  %v3499_v36 = vpop.f32.mrf.mxu2  ;;  %v4124_v29 = vmul.f32 %v4096_v47, %v9990_v34  ;;  %v3477_v54 = vadd.f32 %v3476_v19, %v3454_v39  ;;  %v4148_v47 = vmul.f32 %v8878_v49, %v8851_v38  ;;  %vm4154_vm5 = vweird.f32 %v8878_v49 }
 0x570   :  { %v2334_v20 = vld [vmem:[#allocation14 + $0x1af8] sm:$0xff]  ;;  %3923 = vmatpush.msrb.mxu1 %v2182_v30  ;;  %v4329_v30 = vrot.slane %v4328_v62, 1  ;;  %v8882_v37 = vadd.f32 1e-05, %v4362_v28  ;;  %vm9004_vm7 = vmor %vm4153_vm6, %vm4154_vm5 }
 0x571   :  { %v2462_v56 = vld [vmem:[#allocation14 + $0x1ef8] sm:$0xff]  ;;  %3943 = vmatpush.msrb.mxu2 %v2334_v20  ;;  %v8869_v20 = vsub.f32 %v8795_v55, %v4285_v7  ;;  %v3500_v0 = vadd.f32 %v3499_v36, %v3477_v54 }
 0x572   :  { %v2046_v59 = vld [vmem:[#allocation14 + $0x11f8] sm:$0xff]  ;;  %3966 = vmatpush.msrb.mxu3 %v2462_v56  ;;  %v8876_v56 = vpop.f32.mrf.mxu3  ;;  %6339 = vrsqrt.f32 %v8882_v37  ;;  %vm4393_vm3 = vweird.f32 %v8882_v37 }
 0x573   :  { %v2174_v1 = vld [vmem:[#allocation14 + $0x15f8] sm:$0xff]  ;;  %3901 = vmatpush.msrb.mxu0 %v2046_v59 }
 0x574   :  { %v2326_v23 = vld [vmem:[#allocation14 + $0x1ab8] sm:$0xff]  ;;  %3924 = vmatpush.msrb.mxu1 %v2174_v1  ;;  %v4097_v1 = vrot.slane %v4069_v15, 4 }
 0x575   :  { %v2454_v46 = vld [vmem:[#allocation14 + $0x1eb8] sm:$0xff]  ;;  %3944 = vmatpush.msrb.mxu2 %v2326_v23 }
 0x576   :  { %v2038_v45 = vld [vmem:[#allocation14 + $0x11b8] sm:$0xff]  ;;  %3967 = vmatpush.msrb.mxu3 %v2454_v46  ;;  %v4330_v46 = vadd.f32 %v4329_v30, %v4328_v62  ;;  %v8890_v62 = vadd.f32 1e-05, %v4124_v29  ;;  %v4098_v40 = vadd.f32 %v4097_v1, %v4069_v15  ;;  %v4149_v15 = vmul.f32 %v8878_v49, %v4148_v47 }
 0x577   :  { %v2166_v42 = vld [vmem:[#allocation14 + $0x15b8] sm:$0xff]  ;;  %3902 = vmatpush.msrb.mxu0 %v2038_v45  ;;  %v4301_v45 = vmul.f32 %v8869_v20, %v8869_v20 }
 0x578   :  { %v2318_v60 = vld [vmem:[#allocation14 + $0x1a78] sm:$0xff]  ;;  %3925 = vmatpush.msrb.mxu1 %v2166_v42  ;;  %vm4173_vm2 = vweird.f32 %v8890_v62 }
 0x579   :  { %v2446_v33 = vld [vmem:[#allocation14 + $0x1e78] sm:$0xff]  ;;  %3945 = vmatpush.msrb.mxu2 %v2318_v60  ;;  %v4140_v60 = vmul.f32 0.5, %v4139_v25  ;;  %v3588_v25 = vpop.f32.mrf.mxu2 }
 0x57a   :  { %v2030_v6 = vld [vmem:[#allocation14 + $0x1178] sm:$0xff]  ;;  %3968 = vmatpush.msrb.mxu3 %v2446_v33  ;;  %v8888_v33 = vadd.f32 1e-05, %v4123_v3  ;;  %v8892_v3 = vpop.eup %6337  ;;  %v3611_v1 = vpop.f32.mrf.mxu3 }
 0x57b   :  { %v2158_v27 = vld [vmem:[#allocation14 + $0x1578] sm:$0xff]  ;;  %3903 = vmatpush.msrb.mxu0 %v2030_v6  ;;  %v4378_v54 = vmul.f32 %v8892_v3, %v8864_v12  ;;  %vm4384_vm8 = vweird.f32 %v8892_v3 }
 0x57c   :  { %v2310_v18 = vld [vmem:[#allocation14 + $0x1a38] sm:$0xff]  ;;  %3926 = vmatpush.msrb.mxu1 %v2158_v27  ;;  %v3565_v27 = vpop.f32.mrf.mxu1  ;;  %6341 = vrsqrt.f32 %v8888_v33  ;;  %vm9052_vm10 = vmor %vm4383_vm9, %vm4384_vm8  ;;  %vm4163_vm14 = vweird.f32 %v8888_v33 }
 0x57d   :  { %v2438_v22 = vld [vmem:[#allocation14 + $0x1e38] sm:$0xff]  ;;  %3946 = vmatpush.msrb.mxu2 %v2310_v18  ;;  %v4336_v18 = vadd.f32 %v4335_v11, %v4334_v24  ;;  %v3566_v39 = vadd.f32 %v3565_v27, %v3543_v63  ;;  %v4309_v24 = vmul.f32 %v4301_v45, %v9984_v14  ;;  %v4141_v11 = vsub.f32 1.5, %v4140_v60  ;;  %v3545_v63 = vpop.f32.mrf.mxu0 }
 0x57e   :  { %v2022_v9 = vld [vmem:[#allocation14 + $0x1138] sm:$0xff]  ;;  %3969 = vmatpush.msrb.mxu3 %v2438_v22  ;;  %6343 = vrsqrt.f32 %v8890_v62 }
 0x57f   :  { %v2150_v59 = vld [vmem:[#allocation14 + $0x1538] sm:$0xff]  ;;  %3904 = vmatpush.msrb.mxu0 %v2022_v9  ;;  %v3589_v29 = vadd.f32 %v3588_v25, %v3566_v39  ;;  %v4337_v47 = vrot.slane %v4309_v24, 4  ;;  %v8920_v39 = vpop.eup %6339 }
 0x580   :  { %v2302_v55 = vld [vmem:[#allocation14 + $0x19f8] sm:$0xff]  ;;  %3927 = vmatpush.msrb.mxu1 %v2150_v59  ;;  %v4363_v59 = vmul.f32 %v4330_v46, %v9997_v44  ;;  %vm4394_vm11 = vweird.f32 %v8920_v39 }
 0x581   :  { %v2430_v2 = vld [vmem:[#allocation14 + $0x1df8] sm:$0xff]  ;;  %3947 = vmatpush.msrb.mxu2 %v2302_v55  ;;  %v8902_v45 = vadd.f32 %v3611_v1, %v3589_v29  ;;  %v4338_v61 = vadd.f32 %v4337_v47, %v4309_v24  ;;  %vm9137_vm5 = vmor %vm4393_vm3, %vm4394_vm11 }
 0x582   :  { %v2014_v10 = vld [vmem:[#allocation14 + $0x10f8] sm:$0xff]  ;;  %3970 = vmatpush.msrb.mxu3 %v2430_v2  ;;  %v8907_v60 = vadd.f32 1e-05, %v4363_v59 }
 0x583   :  { %v2142_v23 = vld [vmem:[#allocation14 + $0x14f8] sm:$0xff]  ;;  %3905 = vmatpush.msrb.mxu0 %v2014_v10  ;;  %v3990_v27 = vmul.f32 %v8902_v45, %v7779_v41 }
 0x584   :  { %v2294_v7 = vld [vmem:[#allocation14 + $0x19b8] sm:$0xff]  ;;  %3928 = vmatpush.msrb.mxu1 %v2142_v23  ;;  %v4364_v23 = vmul.f32 %v4336_v18, %v9997_v44  ;;  %v8913_v18 = vmul.f32 %v8853_v16, %v4141_v11  ;;  %6345 = vrsqrt.f32 %v8907_v60 }
 0x585   :  { %v2422_v51 = vld [vmem:[#allocation14 + $0x1db8] sm:$0xff]  ;;  %3948 = vmatpush.msrb.mxu2 %v2294_v7  ;;  %v3523_v7 = vadd.f32 %v8876_v56, %v3500_v0  ;;  %v4580_v56 = vld [vmem:[%s10000_s23 + $0xf8] sm:$0xff]  ;;  %v8916_v0 = vmul.f32 0.5, %v4149_v15  ;;  %v4023_v59 = vrot.slane %v3990_v27, 4  ;;  %v3568_v15 = vpop.f32.mrf.mxu1 }
 0x586   :  { %v2006_v42 = vld [vmem:[#allocation14 + $0x10b8] sm:$0xff]  ;;  %3971 = vmatpush.msrb.mxu3 %v2422_v51  ;;  %v4099_v51 = vrot.slane %v4098_v40, 2 }
 0x587   :  { %v2134_v6 = vld [vmem:[#allocation14 + $0x14b8] sm:$0xff]  ;;  %3906 = vmatpush.msrb.mxu0 %v2006_v42  ;;  %v4564_v42 = vld [vmem:[%s10000_s23 + $0x78] sm:$0xff]  ;;  %v4024_v1 = vadd.f32 %v4023_v59, %v3990_v27 }
 0x588   :  { %v2286_v28 = vld [vmem:[#allocation14 + $0x1978] sm:$0xff]  ;;  %3929 = vmatpush.msrb.mxu1 %v2134_v6 }
 0x589   :  { %v2414_v19 = vld [vmem:[#allocation14 + $0x1d78] sm:$0xff]  ;;  %3949 = vmatpush.msrb.mxu2 %v2286_v28  ;;  %v3546_v28 = vadd.f32 %v3545_v63, %v3523_v7  ;;  %v4151_v7 = vsub.f32 1.5, %v8916_v0  ;;  %v4025_v47 = vrot.slane %v4024_v1, 2  ;;  %v4596_v0 = vld [vmem:[%s10000_s23 + $0x178] sm:$0xff] }
 0x58a   :  { %v1998_v30 = vld [vmem:[#allocation14 + $0x1078] sm:$0xff]  ;;  %3972 = vmatpush.msrb.mxu3 %v2414_v19 }
 0x58b   :  { %v2126_v22 = vld [vmem:[#allocation14 + $0x1478] sm:$0xff]  ;;  %3907 = vmatpush.msrb.mxu0 %v1998_v30  ;;  %v4563_v30 = vld [vmem:[%s10000_s23 + $0x70] sm:$0xff]  ;;  %v3569_v63 = vadd.f32 %v3568_v15, %v3546_v28  ;;  %v4560_v15 = vld [vmem:[%s10000_s23 + $0x58] sm:$0xff] }
 0x58c   :  { %v2278_v9 = vld [vmem:[#allocation14 + $0x1938] sm:$0xff]  ;;  %3930 = vmatpush.msrb.mxu1 %v2126_v22  ;;  %v8922_v22 = vadd.f32 1e-05, %v4364_v23  ;;  %v4146_v23 = vsel %vm8937_vm4, %v8853_v16, %v8913_v18 }
 0x58d   :  { %v2406_v36 = vld [vmem:[#allocation14 + $0x1d38] sm:$0xff]  ;;  %3950 = vmatpush.msrb.mxu2 %v2278_v9  ;;  %v4579_v9 = vld [vmem:[%s10000_s23 + $0xf0] sm:$0xff] }
 0x58e   :  { %v1990_v55 = vld [vmem:[#allocation14 + $0x1038] sm:$0xff]  ;;  %3973 = vmatpush.msrb.mxu3 %v2406_v36  ;;  %v8926_v36 = vpop.eup %6341  ;;  %6347 = vrsqrt.f32 %v8922_v22 }
 0x58f   :  { %v2118_v2 = vld [vmem:[#allocation14 + $0x1438] sm:$0xff]  ;;  %3908 = vmatpush.msrb.mxu0 %v1990_v55  ;;  %v8930_v55 = vadd.f32 %v4099_v51, %v4098_v40  ;;  %v8950_v51 = vld [vmem:[#allocation17] sm:$0xff]  ;;  %vm4164_vm12 = vweird.f32 %v8926_v36 }
 0x590   :  { %v2270_v10 = vld [vmem:[#allocation14 + $0x18f8] sm:$0xff]  ;;  %3931 = vmatpush.msrb.mxu1 %v2118_v2  ;;  %3909 = vmatmul.f32.vlgmr.msrb.gmra.mxu0 %v9991_v21  ;;  %v4379_v21 = vmul.f32 %v8892_v3, %v4378_v54  ;;  %v8933_v2 = vpop.eup %6343  ;;  %v3591_v54 = vpop.f32.mrf.mxu2  ;;  %vm9105_vm15 = vmor %vm4163_vm14, %vm4164_vm12 }
 0x591   :  { %v2398_v46 = vld [vmem:[#allocation14 + $0x1cf8] sm:$0xff]  ;;  %3951 = vmatpush.msrb.mxu2 %v2270_v10  ;;  %3932 = vmatmul.f32.vlgmr.msrb.gmra.mxu1 %v9992_v58  ;;  %v4168_v28 = vmul.f32 %v8933_v2, %v8890_v62  ;;  %v4101_v27 = vrot.slane %v8930_v55, 1  ;;  %v8975_v58 = vld [vmem:[#allocation19] sm:$0xff]  ;;  %vm4174_vm13 = vweird.f32 %v8933_v2 }
 0x592   :  { %v2262_v6 = vld [vmem:[#allocation14 + $0x18b8] sm:$0xff]  ;;  %3974 = vmatpush.msrb.mxu3 %v2398_v46  ;;  %4681 = vmatpush.msra.mxu0 %v4564_v42  ;;  %v4388_v46 = vmul.f32 %v8920_v39, %v8882_v37  ;;  %v4158_v42 = vmul.f32 %v8926_v36, %v8888_v33  ;;  %v4502_v12 = vperm.slane %v8975_v58, 1  ;;  %vm9119_vm4 = vmor %vm4173_vm2, %vm4174_vm13  ;;  %v4552_v37 = vld [vmem:[%s10000_s23 + $0x18] sm:$0xff] }
 0x593   :  { %v2390_v19 = vld [vmem:[#allocation14 + $0x1cb8] sm:$0xff]  ;;  %4704 = vmatpush.msra.mxu1 %v4580_v56  ;;  %3952 = vmatpush.msrb.mxu2 %v2262_v6  ;;  %v3592_v56 = vadd.f32 %v3591_v54, %v3569_v63  ;;  %v8956_v6 = vmul.f32 0.5, %v4379_v21  ;;  %v4217_v21 = vmul.f32 %v4146_v23, %v8761_v31  ;;  %v4595_v63 = vld [vmem:[%s10000_s23 + $0x170] sm:$0xff] }
 0x594   :  { %v2254_v25 = vld [vmem:[#allocation14 + $0x1878] sm:$0xff]  ;;  %3975 = vmatpush.msrb.mxu3 %v2390_v19  ;;  %4682 = vmatpush.msra.mxu0 %v4563_v30  ;;  %v3614_v19 = vpop.f32.mrf.mxu3  ;;  %v4339_v30 = vrot.slane %v4338_v61, 2  ;;  %v4159_v31 = vmul.f32 %v8926_v36, %v4158_v42  ;;  %v4559_v54 = vld [vmem:[%s10000_s23 + $0x50] sm:$0xff] }
 0x595   :  { %v2382_v29 = vld [vmem:[#allocation14 + $0x1c78] sm:$0xff]  ;;  %4705 = vmatpush.msra.mxu1 %v4579_v9  ;;  %3953 = vmatpush.msrb.mxu2 %v2254_v25  ;;  %v4612_v9 = vld [vmem:[%s10000_s23 + $0x1f8] sm:$0xff]  ;;  %v4026_v25 = vadd.f32 %v4025_v47, %v4024_v1  ;;  %v8965_v59 = vadd.f32 %v3614_v19, %v3592_v56  ;;  %v4381_v23 = vsub.f32 1.5, %v8956_v6  ;;  %v4575_v47 = vld [vmem:[%s10000_s23 + $0xd0] sm:$0xff] }
 0x596   :  { %v4562_v11 = vld [vmem:[%s10000_s23 + $0x68] sm:$0xff]  ;;  %3976 = vmatpush.msrb.mxu3 %v2382_v29  ;;  %v4561_v16 = vld [vmem:[%s10000_s23 + $0x60] sm:$0xff]  ;;  %v4467_v29 = vperm.slane %v8950_v51, 0  ;;  %v9017_v19 = vmul.f32 0.5, %v4159_v31 }
 0x597   :  { %v4578_v40 = vld [vmem:[%s10000_s23 + $0xe8] sm:$0xff]  ;;  %4683 = vmatpush.msra.mxu0 %v4562_v11  ;;  %v4577_v18 = vld [vmem:[%s10000_s23 + $0xe0] sm:$0xff]  ;;  %v4389_v11 = vmul.f32 %v8920_v39, %v4388_v46  ;;  %v4027_v1 = vrot.slane %v4026_v25, 1  ;;  %v4169_v46 = vmul.f32 %v8933_v2, %v4168_v28  ;;  %v4501_v28 = vperm.slane %v8975_v58, 0 }
 0x598   :  { %v2246_v10 = vld [vmem:[#allocation14 + $0x1838] sm:$0xff]  ;;  %4706 = vmatpush.msra.mxu1 %v4578_v40  ;;  %v4152_v40 = vmul.f32 %v8878_v49, %v4151_v7  ;;  %3912 = vmatmul.f32.gmra.mxu0 %v9995_v52  ;;  %v4611_v7 = vld [vmem:[%s10000_s23 + $0x1f0] sm:$0xff]  ;;  %v8999_v52 = vmul.f32 %v4467_v29, %v4217_v21 }
 0x599   :  { %v2374_v24 = vld [vmem:[#allocation14 + $0x1c38] sm:$0xff]  ;;  %3954 = vmatpush.msrb.mxu2 %v2246_v10  ;;  %4684 = vmatpush.msra.mxu0 %v4561_v16  ;;  %v4576_v10 = vld [vmem:[%s10000_s23 + $0xd8] sm:$0xff]  ;;  %v8992_v16 = vadd.f32 %v4339_v30, %v4338_v61 }
 0x59a   :  { %3977 = vmatpush.msrb.mxu3 %v2374_v24  ;;  %3955 = vmatmul.f32.vlgmr.msrb.gmra.mxu2 %v9993_v4  ;;  %v8973_v4 = vpop.eup %6345  ;;  %v4102_v24 = vadd.f32 %v4101_v27, %v8930_v55  ;;  %v4594_v56 = vld [vmem:[%s10000_s23 + $0x168] sm:$0xff]  ;;  %v4028_v55 = vadd.f32 %v4027_v1, %v4026_v25  ;;  %v4557_v1 = vld [vmem:[%s10000_s23 + $0x40] sm:$0xff] }
 0x59b   :  { %3978 = vmatmul.f32.vlgmr.msrb.gmra.mxu3 %v9994_v57  ;;  %4707 = vmatpush.msra.mxu1 %v4577_v18  ;;  %v4230_v57 = vmul.f32 %v8965_v59, %v9984_v14  ;;  %v8989_v42 = vpop.eup %6347  ;;  %v4398_v61 = vmul.f32 %v8973_v4, %v8907_v60  ;;  %v4610_v27 = vld [vmem:[%s10000_s23 + $0x1e8] sm:$0xff]  ;;  %v4341_v31 = vrot.slane %v8992_v16, 1  ;;  %v4569_v38 = vld [vmem:[%s10000_s23 + $0xa0] sm:$0xff]  ;;  %vm4404_vm6 = vweird.f32 %v8973_v4 }
 0x59c   :  { %4727 = vmatpush.msra.mxu2 %v4596_v0  ;;  %4750 = vmatpush.msra.mxu3 %v4612_v9  ;;  %v4558_v18 = vld [vmem:[%s10000_s23 + $0x48] sm:$0xff]  ;;  %v4156_v0 = vsel %vm9004_vm7, %v8878_v49, %v4152_v40  ;;  %v4593_v9 = vld [vmem:[%s10000_s23 + $0x160] sm:$0xff]  ;;  %v4046_v25 = vmul.f32 %v4028_v55, %v9990_v34  ;;  %v9030_v40 = vmul.f32 %v8892_v3, %v4381_v23  ;;  %v4556_v55 = vld [vmem:[%s10000_s23 + $0x38] sm:$0xff]  ;;  %vm4403_vm7 = vweird.f32 %v8907_v60 }
 0x59d   :  { %3935 = vmatmul.f32.gmra.mxu1 %v9996_v5  ;;  %4685 = vmatpush.msra.mxu0 %v4560_v15  ;;  %v4263_v6 = vrot.slane %v4230_v57, 4  ;;  %v9008_v5 = vmul.f32 0.5, %v4389_v11  ;;  %v4574_v30 = vld [vmem:[%s10000_s23 + $0xc8] sm:$0xff]  ;;  %v9023_v11 = vmul.f32 0.5, %v4169_v46  ;;  %v4408_v15 = vmul.f32 %v8989_v42, %v8922_v22  ;;  %v4609_v49 = vld [vmem:[%s10000_s23 + $0x1e0] sm:$0xff]  ;;  %vm9180_vm9 = vmor %vm4403_vm7, %vm4404_vm6 }
 0x59e   :  { %4708 = vmatpush.msra.mxu1 %v4576_v10  ;;  %4728 = vmatpush.msra.mxu2 %v4595_v63  ;;  %v4125_v10 = vmul.f32 %v4102_v24, %v9990_v34  ;;  %v9034_v63 = vsub.f32 %v8902_v45, %v4046_v25  ;;  %v4218_v46 = vmul.f32 %v4156_v0, %v8771_v35  ;;  %v4468_v24 = vperm.slane %v8950_v51, 1  ;;  %v4555_v25 = vld [vmem:[%s10000_s23 + $0x30] sm:$0xff]  ;;  %v4549_v33 = vld [vmem:[%s10000_s23] sm:$0xff] }
 0x59f   :  { %4751 = vmatpush.msra.mxu3 %v4611_v7  ;;  %4686 = vmatpush.msra.mxu0 %v4559_v54  ;;  %v4264_v21 = vadd.f32 %v4263_v6, %v4230_v57  ;;  %v4391_v7 = vsub.f32 1.5, %v9008_v5  ;;  %v4399_v23 = vmul.f32 %v8973_v4, %v4398_v61  ;;  %v4573_v54 = vld [vmem:[%s10000_s23 + $0xc0] sm:$0xff]  ;;  %v4161_v45 = vsub.f32 1.5, %v9017_v19 }
 0x5a0   :  { %4709 = vmatpush.msra.mxu1 %v4575_v47  ;;  %4729 = vmatpush.msra.mxu2 %v4594_v56  ;;  %v4592_v47 = vld [vmem:[%s10000_s23 + $0x158] sm:$0xff]  ;;  %v4062_v35 = vmul.f32 %v9034_v63, %v9034_v63  ;;  %v4171_v5 = vsub.f32 1.5, %v9023_v11  ;;  %v4409_v61 = vmul.f32 %v8989_v42, %v4408_v15  ;;  %v4386_v0 = vsel %vm9052_vm10, %v8892_v3, %v9030_v40  ;;  %v4590_v15 = vld [vmem:[%s10000_s23 + $0x148] sm:$0xff] }
 0x5a1   :  { %4752 = vmatpush.msra.mxu3 %v4610_v27  ;;  %4687 = vmatpush.msra.mxu0 %v4558_v18  ;;  %v4265_v57 = vrot.slane %v4264_v21, 2  ;;  %v4608_v56 = vld [vmem:[%s10000_s23 + $0x1d8] sm:$0xff]  ;;  %v9059_v27 = vadd.f32 1e-05, %v4125_v10  ;;  %v4591_v18 = vld [vmem:[%s10000_s23 + $0x150] sm:$0xff]  ;;  %v4342_v19 = vadd.f32 %v4341_v31, %v8992_v16  ;;  %v9075_v11 = vmul.f32 %v8920_v39, %v4391_v7  ;;  %v4606_v40 = vld [vmem:[%s10000_s23 + $0x1c8] sm:$0xff] }
 0x5a2   :  { %4710 = vmatpush.msra.mxu1 %v4574_v30  ;;  %4730 = vmatpush.msra.mxu2 %v4593_v9  ;;  %v4070_v30 = vmul.f32 %v4062_v35, %v7779_v41  ;;  %v4607_v9 = vld [vmem:[%s10000_s23 + $0x1d0] sm:$0xff]  ;;  %v9078_v3 = vmul.f32 0.5, %v4399_v23  ;;  %v4162_v10 = vmul.f32 %v8926_v36, %v4161_v45  ;;  %v4554_v31 = vld [vmem:[%s10000_s23 + $0x28] sm:$0xff]  ;;  %v4589_v23 = vld [vmem:[%s10000_s23 + $0x140] sm:$0xff]  ;;  %vm4414_vm8 = vweird.f32 %v8989_v42 }
 0x5a3   :  { %4753 = vmatpush.msra.mxu3 %v4609_v49  ;;  %3958 = vmatmul.f32.gmra.mxu2 %v9998_v17  ;;  %v4266_v6 = vadd.f32 %v4265_v57, %v4264_v21  ;;  %v4572_v17 = vld [vmem:[%s10000_s23 + $0xb8] sm:$0xff]  ;;  %v4484_v21 = vmul.f32 %v4468_v24, %v4218_v46  ;;  %v4571_v16 = vld [vmem:[%s10000_s23 + $0xb0] sm:$0xff]  ;;  %v4172_v57 = vmul.f32 %v8933_v2, %v4171_v5  ;;  %v9088_v46 = vmul.f32 0.5, %v4409_v61  ;;  %v4570_v7 = vld [vmem:[%s10000_s23 + $0xa8] sm:$0xff] }
 0x5a4   :  { %3981 = vmatmul.f32.gmra.mxu3 %v9999_v13  ;;  %4688 = vmatpush.msra.mxu0 %v4557_v1  ;;  %v4103_v49 = vrot.slane %v4070_v30, 4  ;;  %6349 = vrsqrt.f32 %v9059_v27  ;;  %v4605_v45 = vld [vmem:[%s10000_s23 + $0x1c0] sm:$0xff]  ;;  %v4588_v5 = vld [vmem:[%s10000_s23 + $0x138] sm:$0xff]  ;;  %vm4413_vm10 = vweird.f32 %v8922_v22  ;;  %vm4183_vm13 = vweird.f32 %v9059_v27 }
 0x5a5   :  { %4711 = vmatpush.msra.mxu1 %v4573_v54  ;;  %4731 = vmatpush.msra.mxu2 %v4592_v47  ;;  %v4267_v13 = vrot.slane %v4266_v6, 1  ;;  %v4365_v54 = vmul.f32 %v4342_v19, %v9997_v44  ;;  %v9129_v19 = vmul.f32 %v4386_v0, %v8780_v50  ;;  %v4568_v50 = vld [vmem:[%s10000_s23 + $0x98] sm:$0xff]  ;;  %v4587_v0 = vld [vmem:[%s10000_s23 + $0x130] sm:$0xff]  ;;  %vm9204_vm11 = vmor %vm4413_vm10, %vm4414_vm8 }
 0x5a6   :  { %4754 = vmatpush.msra.mxu3 %v4608_v56  ;;  %4689 = vmatpush.msra.mxu0 %v4556_v55  ;;  %v4104_v47 = vadd.f32 %v4103_v49, %v4070_v30  ;;  %v4553_v56 = vld [vmem:[%s10000_s23 + $0x20] sm:$0xff]  ;;  %v9101_v55 = vadd.f32 %v4501_v28, %v8999_v52  ;;  %v4166_v52 = vsel %vm9105_vm15, %v8926_v36, %v4162_v10  ;;  %v4469_v49 = vperm.slane %v8950_v51, 2  ;;  %v4584_v61 = vld [vmem:[%s10000_s23 + $0x118] sm:$0xff] }
 0x5a7   :  { %4712 = vmatpush.msra.mxu1 %v4572_v17  ;;  %4732 = vmatpush.msra.mxu2 %v4591_v18  ;;  %v4268_v1 = vadd.f32 %v4267_v13, %v4266_v6  ;;  %v4401_v6 = vsub.f32 1.5, %v9078_v3  ;;  %v4604_v18 = vld [vmem:[%s10000_s23 + $0x1b8] sm:$0xff]  ;;  %v9133_v36 = vadd.f32 %v4502_v12, %v4484_v21  ;;  %v9151_v13 = vadd.f32 1e-05, %v4365_v54 }
 0x5a8   :  { %4755 = vmatpush.msra.mxu3 %v4607_v9  ;;  %4690 = vmatpush.msra.mxu0 %v4555_v25  ;;  %v4105_v17 = vrot.slane %v4104_v47, 2  ;;  %v4411_v9 = vsub.f32 1.5, %v9088_v46  ;;  %v4396_v25 = vsel %vm9137_vm5, %v8920_v39, %v9075_v11  ;;  %v4219_v10 = vmul.f32 %v4166_v52, %v8799_v8  ;;  %v4567_v11 = vld [vmem:[%s10000_s23 + $0x90] sm:$0xff]  ;;  %v4602_v46 = vld [vmem:[%s10000_s23 + $0x1a8] sm:$0xff]  ;;  %v4565_v52 = vld [vmem:[%s10000_s23 + $0x80] sm:$0xff] }
 0x5a9   :  { %4713 = vmatpush.msra.mxu1 %v4571_v16  ;;  %4733 = vmatpush.msra.mxu2 %v4590_v15  ;;  %v4286_v35 = vmul.f32 %v4268_v1, %v9997_v44  ;;  %v4551_v16 = vld [vmem:[%s10000_s23 + $0x10] sm:$0xff]  ;;  %v9162_v39 = vmul.f32 %v8973_v4, %v4401_v6  ;;  %v4470_v1 = vperm.slane %v8950_v51, 3  ;;  %6351 = vrsqrt.f32 %v9151_v13  ;;  %v4600_v22 = vld [vmem:[%s10000_s23 + $0x198] sm:$0xff] }
 0x5aa   :  { %4756 = vmatpush.msra.mxu3 %v4606_v40  ;;  %4691 = vmatpush.msra.mxu0 %v4554_v31  ;;  %v4106_v21 = vadd.f32 %v4105_v17, %v4104_v47  ;;  %v9157_v15 = vpop.eup %6349  ;;  %v4586_v40 = vld [vmem:[%s10000_s23 + $0x128] sm:$0xff]  ;;  %v4412_v54 = vmul.f32 %v8989_v42, %v4411_v9  ;;  %v4585_v47 = vld [vmem:[%s10000_s23 + $0x120] sm:$0xff]  ;;  %v4485_v6 = vmul.f32 %v4469_v49, %v4219_v10  ;;  %v4534_v9 = vmax.f32 %v9133_v36, 0.0  ;;  %v4583_v36 = vld [vmem:[%s10000_s23 + $0x110] sm:$0xff] }
 0x5ab   :  { %4714 = vmatpush.msra.mxu1 %v4570_v7  ;;  %4734 = vmatpush.msra.mxu2 %v4589_v23  ;;  %v9124_v62 = vsub.f32 %v8965_v59, %v4286_v35  ;;  %v4176_v59 = vsel %vm9119_vm4, %v8933_v2, %v4172_v57  ;;  %v4603_v2 = vld [vmem:[%s10000_s23 + $0x1b0] sm:$0xff]  ;;  %v4550_v7 = vld [vmem:[%s10000_s23 + $0x8] sm:$0xff]  ;;  %v4458_v23 = vmul.f32 %v4396_v25, %v8793_v32  ;;  %vm4184_vm12 = vweird.f32 %v9157_v15 }
 0x5ac   :  { %4757 = vmatpush.msra.mxu3 %v4605_v45  ;;  %4692 = vmatpush.msra.mxu0 %v4553_v56  ;;  %v4220_v31 = vmul.f32 %v4176_v59, %v8802_v43  ;;  %v4107_v57 = vrot.slane %v4106_v21, 1  ;;  %v4566_v43 = vld [vmem:[%s10000_s23 + $0x88] sm:$0xff]  ;;  %v4178_v32 = vmul.f32 %v9157_v15, %v9059_v27  ;;  %v4601_v56 = vld [vmem:[%s10000_s23 + $0x1a0] sm:$0xff]  ;;  %v4533_v59 = vmax.f32 %v9101_v55, 0.0  ;;  %vm9287_vm14 = vmor %vm4183_vm13, %vm4184_vm12  ;;  %v3703_v27 = vpop.f32.mrf.mxu3 }
 0x5ad   :  { %v4302_v3 = vmul.f32 %v9124_v62, %v9124_v62  ;;  %4715 = vmatpush.msra.mxu1 %v4569_v38  ;;  %4735 = vmatpush.msra.mxu2 %v4588_v5  ;;  %v4503_v38 = vperm.slane %v8975_v58, 2  ;;  %v4406_v5 = vsel %vm9180_vm9, %v8973_v4, %v9162_v39  ;;  %v4491_v25 = vmul.f32 %v4467_v29, %v9129_v19  ;;  %v4627_v29 = vld [vmem:[%s10000_s23 + $0x270] sm:$0xff]  ;;  %v4644_v19 = vld [vmem:[%s10000_s23 + $0x2f8] sm:$0xff] }
 0x5ae   :  { %4758 = vmatpush.msra.mxu3 %v4604_v18  ;;  %4693 = vmatpush.msra.mxu0 %v4552_v37  ;;  %v4108_v60 = vadd.f32 %v4107_v57, %v4106_v21  ;;  %v4486_v17 = vmul.f32 %v4470_v1, %v4220_v31  ;;  %v4504_v18 = vperm.slane %v8975_v58, 3  ;;  %v4179_v21 = vmul.f32 %v9157_v15, %v4178_v32  ;;  %v4598_v31 = vld [vmem:[%s10000_s23 + $0x188] sm:$0xff]  ;;  %v3634_v32 = vpop.f32.mrf.mxu0  ;;  %v4624_v37 = vld [vmem:[%s10000_s23 + $0x258] sm:$0xff] }
 0x5af   :  { %v4310_v8 = vmul.f32 %v4302_v3, %v9984_v14  ;;  %4716 = vmatpush.msra.mxu1 %v4568_v50  ;;  %4736 = vmatpush.msra.mxu2 %v4587_v0  ;;  %v4416_v50 = vsel %vm9204_vm11, %v8989_v42, %v4412_v54  ;;  %v4628_v0 = vld [vmem:[%s10000_s23 + $0x278] sm:$0xff]  ;;  %v4492_v42 = vmul.f32 %v4468_v24, %v4458_v23  ;;  %v9231_v39 = vpop.eup %6351  ;;  %v4626_v57 = vld [vmem:[%s10000_s23 + $0x268] sm:$0xff]  ;;  %v4581_v23 = vld [vmem:[%s10000_s23 + $0x100] sm:$0xff]  ;;  %vm4423_vm5 = vweird.f32 %v9151_v13 }
 0x5b0   :  { %4759 = vmatpush.msra.mxu3 %v4603_v2  ;;  %4694 = vmatpush.msra.mxu0 %v4551_v16  ;;  %v4126_v4 = vmul.f32 %v4108_v60, %v9990_v34  ;;  %v4599_v2 = vld [vmem:[%s10000_s23 + $0x190] sm:$0xff]  ;;  %v4519_v16 = vadd.f32 %v4503_v38, %v4485_v6  ;;  %v4459_v10 = vmul.f32 %v4406_v5, %v8816_v26  ;;  %v4582_v26 = vld [vmem:[%s10000_s23 + $0x108] sm:$0xff]  ;;  %v4597_v54 = vld [vmem:[%s10000_s23 + $0x180] sm:$0xff]  ;;  %vm4424_vm4 = vweird.f32 %v9231_v39 }
 0x5b1   :  { %v4343_v35 = vrot.slane %v4310_v8, 4  ;;  %4717 = vmatpush.msra.mxu1 %v4567_v11  ;;  %4737 = vmatpush.msra.mxu2 %v4586_v40  ;;  %v4520_v11 = vadd.f32 %v4504_v18, %v4486_v17  ;;  %v4460_v24 = vmul.f32 %v4416_v50, %v8821_v48  ;;  %v4525_v48 = vadd.f32 %v4501_v28, %v4491_v25  ;;  %v4640_v25 = vld [vmem:[%s10000_s23 + $0x2d8] sm:$0xff]  ;;  %vm9325_vm6 = vmor %vm4423_vm5, %vm4424_vm4 }
 0x5b2   :  { %4760 = vmatpush.msra.mxu3 %v4602_v46  ;;  %4695 = vmatpush.msra.mxu0 %v4550_v7  ;;  %v9220_v3 = vadd.f32 1e-05, %v4126_v4  ;;  %v4180_v46 = vmul.f32 0.5, %v4179_v21  ;;  %v4418_v45 = vmul.f32 %v9231_v39, %v9151_v13  ;;  %v4493_v28 = vmul.f32 %v4469_v49, %v4459_v10  ;;  %v4641_v49 = vld [vmem:[%s10000_s23 + $0x2e0] sm:$0xff] }
 0x5b3   :  { %v4344_v30 = vadd.f32 %v4343_v35, %v4310_v8  ;;  %4718 = vmatpush.msra.mxu1 %v4566_v43  ;;  %4738 = vmatpush.msra.mxu2 %v4585_v47  ;;  %v4643_v8 = vld [vmem:[%s10000_s23 + $0x2f0] sm:$0xff]  ;;  %v4526_v43 = vadd.f32 %v4502_v12, %v4492_v42  ;;  %v4535_v47 = vmax.f32 %v4519_v16, 0.0  ;;  %v4536_v60 = vmax.f32 %v4520_v11, 0.0  ;;  %v4621_v11 = vld [vmem:[%s10000_s23 + $0x240] sm:$0xff] }
 0x5b4   :  { %4761 = vmatpush.msra.mxu3 %v4601_v56  ;;  %4696 = vmatpush.msra.mxu0 %v4549_v33  ;;  %6353 = vrsqrt.f32 %v9220_v3  ;;  %v4625_v56 = vld [vmem:[%s10000_s23 + $0x260] sm:$0xff]  ;;  %v4494_v12 = vmul.f32 %v4470_v1, %v4460_v24  ;;  %v4642_v33 = vld [vmem:[%s10000_s23 + $0x2e8] sm:$0xff]  ;;  %v4181_v5 = vsub.f32 1.5, %v4180_v46  ;;  %v4419_v4 = vmul.f32 %v9231_v39, %v4418_v45  ;;  %v4639_v42 = vld [vmem:[%s10000_s23 + $0x2d0] sm:$0xff] }
 0x5b5   :  { %v4345_v55 = vrot.slane %v4344_v30, 2  ;;  %4719 = vmatpush.msra.mxu1 %v4565_v52  ;;  %4739 = vmatpush.msra.mxu2 %v4584_v61  ;;  %v4541_v61 = vmax.f32 %v4525_v48, 0.0  ;;  %v4542_v17 = vmax.f32 %v4526_v43, 0.0  ;;  %v4527_v50 = vadd.f32 %v4503_v38, %v4493_v28  ;;  %v4638_v24 = vld [vmem:[%s10000_s23 + $0x2c8] sm:$0xff]  ;;  %v4637_v46 = vld [vmem:[%s10000_s23 + $0x2c0] sm:$0xff]  ;;  %v4636_v43 = vld [vmem:[%s10000_s23 + $0x2b8] sm:$0xff] }
 0x5b6   :  { %4762 = vmatpush.msra.mxu3 %v4600_v22  ;;  %4697 = vmatmul.f32.vlgmr.msra.gmra.mxu0 %v4533_v59  ;;  %v9265_v22 = vld [vmem:[#allocation16] sm:$0xff]  ;;  %v4420_v38 = vmul.f32 0.5, %v4419_v4  ;;  %vm4193_vm2 = vweird.f32 %v9220_v3  ;;  %v4471_v45 = vperm.slane %v8950_v51, 4 }
 0x5b7   :  { %v4346_v40 = vadd.f32 %v4345_v55, %v4344_v30  ;;  %4720 = vmatmul.f32.vlgmr.msra.gmra.mxu1 %v4534_v9  ;;  %4773 = vmatpush.msrb.mxu0 %v4628_v0  ;;  %v2503_v59 = vperm.slane %v9265_v22, 6  ;;  %v4623_v9 = vld [vmem:[%s10000_s23 + $0x250] sm:$0xff]  ;;  %v4528_v0 = vadd.f32 %v4504_v18, %v4494_v12  ;;  %v3657_v55 = vpop.f32.mrf.mxu1  ;;  %v3680_v18 = vpop.f32.mrf.mxu2  ;;  %v4618_v28 = vld [vmem:[%s10000_s23 + $0x228] sm:$0xff] }
 0x5b8   :  { %4740 = vmatpush.msra.mxu2 %v4583_v36  ;;  %4763 = vmatpush.msra.mxu3 %v4599_v2  ;;  %v4182_v36 = vmul.f32 %v9157_v15, %v4181_v5  ;;  %v4622_v2 = vld [vmem:[%s10000_s23 + $0x248] sm:$0xff]  ;;  %v4635_v12 = vld [vmem:[%s10000_s23 + $0x2b0] sm:$0xff]  ;;  %v4617_v5 = vld [vmem:[%s10000_s23 + $0x220] sm:$0xff] }
 0x5b9   :  { %v4347_v7 = vrot.slane %v4346_v40, 1  ;;  %4774 = vmatpush.msrb.mxu0 %v4627_v29  ;;  %4796 = vmatpush.msrb.mxu1 %v4644_v19  ;;  %v3635_v10 = vadd.f32 %v3634_v32, %v2503_v59  ;;  %v4543_v29 = vmax.f32 %v4527_v50, 0.0  ;;  %v4544_v19 = vmax.f32 %v4528_v0, 0.0  ;;  %v4616_v0 = vld [vmem:[%s10000_s23 + $0x218] sm:$0xff] }
 0x5ba   :  { %4741 = vmatpush.msra.mxu2 %v4582_v26  ;;  %4764 = vmatpush.msra.mxu3 %v4598_v31  ;;  %v9255_v6 = vpop.eup %6353  ;;  %v3637_v31 = vpop.f32.mrf.mxu0 }
 0x5bb   :  { %v4348_v35 = vadd.f32 %v4347_v7, %v4346_v40  ;;  %4775 = vmatpush.msrb.mxu0 %v4626_v57  ;;  %4797 = vmatpush.msrb.mxu1 %v4643_v8  ;;  %v4188_v1 = vmul.f32 %v9255_v6, %v9220_v3  ;;  %vm4194_vm15 = vweird.f32 %v9255_v6  ;;  %v4186_v57 = vsel %vm9287_vm14, %v9157_v15, %v4182_v36  ;;  %v4620_v8 = vld [vmem:[%s10000_s23 + $0x238] sm:$0xff]  ;;  %v4619_v15 = vld [vmem:[%s10000_s23 + $0x230] sm:$0xff]  ;;  %v3706_v36 = vpop.f32.mrf.mxu3 }
 0x5bc   :  { %4742 = vmatpush.msra.mxu2 %v4581_v23  ;;  %4765 = vmatpush.msra.mxu3 %v4597_v54  ;;  %v4421_v7 = vsub.f32 1.5, %v4420_v38  ;;  %vm4195_vm3 = vmor %vm4193_vm2, %vm4194_vm15  ;;  %v3658_v48 = vadd.f32 %v3657_v55, %v3635_v10  ;;  %v3638_v13 = vadd.f32 %v3637_v31, %v2503_v59  ;;  %v4614_v10 = vld [vmem:[%s10000_s23 + $0x208] sm:$0xff]  ;;  %vm4953_vm2 = vcmask 1043456  }
 0x5bd   :  { %v4366_v52 = vmul.f32 %v4348_v35, %v9997_v44  ;;  %4743 = vmatmul.f32.vlgmr.msra.gmra.mxu2 %v4535_v47  ;;  %4766 = vmatmul.f32.vlgmr.msra.gmra.mxu3 %v4536_v60  ;;  %v4189_v21 = vmul.f32 %v9255_v6, %v4188_v1  ;;  %v4221_v47 = vmul.f32 %v4186_v57, %v8847_v53  ;;  %v4472_v35 = vperm.slane %v8950_v51, 5  ;;  %v4630_v31 = vld [vmem:[%s10000_s23 + $0x288] sm:$0xff] }
 0x5be   :  { %4776 = vmatpush.msrb.mxu0 %v4625_v56  ;;  %4798 = vmatpush.msrb.mxu1 %v4642_v33  ;;  %v3681_v56 = vadd.f32 %v3680_v18, %v3658_v48  ;;  %v4422_v53 = vmul.f32 %v9231_v39, %v4421_v7  ;;  %v4629_v7 = vld [vmem:[%s10000_s23 + $0x280] sm:$0xff] }
 0x5bf   :  { %v9263_v30 = vadd.f32 1e-05, %v4366_v52  ;;  %4700 = vmatmul.f32.gmra.mxu0 %v4541_v61  ;;  %4723 = vmatmul.f32.gmra.mxu1 %v4542_v17  ;;  %v4190_v16 = vmul.f32 0.5, %v4189_v21  ;;  %v4634_v52 = vld [vmem:[%s10000_s23 + $0x2a8] sm:$0xff]  ;;  %v4505_v61 = vperm.slane %v8975_v58, 4 }
 0x5c0   :  { %4777 = vmatpush.msrb.mxu0 %v4624_v37  ;;  %4799 = vmatpush.msrb.mxu1 %v4641_v49  ;;  %v3683_v37 = vpop.f32.mrf.mxu2  ;;  %v3704_v50 = vadd.f32 %v3703_v27, %v3681_v56  ;;  %v4426_v21 = vsel %vm9325_vm6, %v9231_v39, %v4422_v53 }
 0x5c1   :  { %6355 = vrsqrt.f32 %v9263_v30  ;;  %v4191_v26 = vsub.f32 1.5, %v4190_v16  ;;  %vm4433_vm8 = vweird.f32 %v9263_v30  ;;  %v4461_v39 = vmul.f32 %v4426_v21, %v8869_v20 }
 0x5c2   :  { %4778 = vmatpush.msrb.mxu0 %v4623_v9  ;;  %4800 = vmatpush.msrb.mxu1 %v4640_v25  ;;  %v3726_v49 = vpop.f32.mrf.mxu0  ;;  %v4506_v9 = vperm.slane %v8975_v58, 5  ;;  %v4633_v25 = vld [vmem:[%s10000_s23 + $0x2a0] sm:$0xff] }
 0x5c3   :  { %v4192_v23 = vmul.f32 %v9255_v6, %v4191_v26  ;;  %v3727_v58 = vadd.f32 %v3726_v49, %v3704_v50 }
 0x5c4   :  { %4779 = vmatpush.msrb.mxu0 %v4622_v2  ;;  %4801 = vmatpush.msrb.mxu1 %v4639_v42  ;;  %v4615_v2 = vld [vmem:[%s10000_s23 + $0x210] sm:$0xff]  ;;  %v4632_v42 = vld [vmem:[%s10000_s23 + $0x298] sm:$0xff] }
 0x5c5   :  { %4746 = vmatmul.f32.gmra.mxu2 %v4543_v29  ;;  %4769 = vmatmul.f32.gmra.mxu3 %v4544_v19  ;;  %v4196_v32 = vsel %vm4195_vm3, %v9255_v6, %v4192_v23  ;;  %v3660_v6 = vpop.f32.mrf.mxu1  ;;  %v4631_v29 = vld [vmem:[%s10000_s23 + $0x290] sm:$0xff]  ;;  %vm4887_vm3 = vcmask 31744  }
 0x5c6   :  { %4780 = vmatpush.msrb.mxu0 %v4621_v11  ;;  %4802 = vmatpush.msrb.mxu1 %v4638_v24  ;;  %v4222_v60 = vmul.f32 %v4196_v32, %v9034_v63  ;;  %v4487_v63 = vmul.f32 %v4471_v45, %v4221_v47  ;;  %v3661_v18 = vadd.f32 %v3660_v6, %v3638_v13  ;;  %v4660_v13 = vld [vmem:[%s10000_s23 + $0x378] sm:$0xff] }
 0x5c7   :  { %v9299_v54 = vpop.eup %6355  ;;  %4819 = vmatpush.msrb.mxu2 %v4660_v13 }
 0x5c8   :  { %v4428_v3 = vmul.f32 %v9299_v54, %v9263_v30  ;;  %4781 = vmatpush.msrb.mxu0 %v4620_v8  ;;  %4803 = vmatpush.msrb.mxu1 %v4637_v46  ;;  %v4488_v1 = vmul.f32 %v4472_v35, %v4222_v60  ;;  %vm4434_vm7 = vweird.f32 %v9299_v54  ;;  %v4521_v38 = vadd.f32 %v4505_v61, %v4487_v63  ;;  %v4613_v30 = vld [vmem:[%s10000_s23 + $0x200] sm:$0xff]  ;;  %v3772_v20 = vpop.f32.mrf.mxu2 }
 0x5c9   :  { %vm4435_vm9 = vmor %vm4433_vm8, %vm4434_vm7  ;;  %v3684_v40 = vadd.f32 %v3683_v37, %v3661_v18  ;;  %v4495_v8 = vmul.f32 %v4471_v45, %v4461_v39  ;;  %v4656_v39 = vld [vmem:[%s10000_s23 + $0x358] sm:$0xff] }
 0x5ca   :  { %v4429_v33 = vmul.f32 %v9299_v54, %v4428_v3  ;;  %4782 = vmatpush.msrb.mxu0 %v4619_v15  ;;  %4804 = vmatpush.msrb.mxu1 %v4636_v43  ;;  %v4522_v16 = vadd.f32 %v4506_v9, %v4488_v1  ;;  %v4537_v27 = vmax.f32 %v4521_v38, 0.0 }
 0x5cb   :  { %v3707_v48 = vadd.f32 %v3706_v36, %v3684_v40  ;;  %v4529_v43 = vadd.f32 %v4505_v61, %v4495_v8  ;;  %v4658_v36 = vld [vmem:[%s10000_s23 + $0x368] sm:$0xff]  ;;  %v4651_v8 = vld [vmem:[%s10000_s23 + $0x330] sm:$0xff] }
 0x5cc   :  { %v4430_v17 = vmul.f32 0.5, %v4429_v33  ;;  %4783 = vmatpush.msrb.mxu0 %v4618_v28  ;;  %4805 = vmatpush.msrb.mxu1 %v4635_v12  ;;  %v4538_v57 = vmax.f32 %v4522_v16, 0.0 }
 0x5cd   :  { %v3749_v11 = vpop.f32.mrf.mxu1  ;;  %v4545_v56 = vmax.f32 %v4529_v43, 0.0 }
 0x5ce   :  { %v4431_v55 = vsub.f32 1.5, %v4430_v17  ;;  %4784 = vmatpush.msrb.mxu0 %v4617_v5  ;;  %4806 = vmatpush.msrb.mxu1 %v4634_v52  ;;  %v3750_v26 = vadd.f32 %v3749_v11, %v3727_v58  ;;  %v4654_v11 = vld [vmem:[%s10000_s23 + $0x348] sm:$0xff] }
 0x5d0   :  { %v4432_v59 = vmul.f32 %v9299_v54, %v4431_v55  ;;  %4785 = vmatpush.msrb.mxu0 %v4616_v0  ;;  %4807 = vmatpush.msrb.mxu1 %v4633_v25  ;;  %v3773_v46 = vadd.f32 %v3772_v20, %v3750_v26  ;;  %v3775_v12 = vpop.f32.mrf.mxu2  ;;  %v4659_v25 = vld [vmem:[%s10000_s23 + $0x370] sm:$0xff] }
 0x5d1   :  { %4820 = vmatpush.msrb.mxu2 %v4659_v25 }
 0x5d2   :  { %v4436_v19 = vsel %vm4435_vm9, %v9299_v54, %v4432_v59  ;;  %4786 = vmatpush.msrb.mxu0 %v4615_v2  ;;  %4808 = vmatpush.msrb.mxu1 %v4632_v42  ;;  %v3729_v54 = vpop.f32.mrf.mxu0  ;;  %v4657_v42 = vld [vmem:[%s10000_s23 + $0x360] sm:$0xff] }
 0x5d3   :  { %v4462_v24 = vmul.f32 %v4436_v19, %v9124_v62  ;;  %v3795_v62 = vpop.f32.mrf.mxu3  ;;  %v3730_v47 = vadd.f32 %v3729_v54, %v3707_v48  ;;  %4821 = vmatpush.msrb.mxu2 %v4658_v36  ;;  %v4649_v54 = vld [vmem:[%s10000_s23 + $0x320] sm:$0xff] }
 0x5d4   :  { %4787 = vmatpush.msrb.mxu0 %v4614_v10  ;;  %4809 = vmatpush.msrb.mxu1 %v4631_v29  ;;  %v3796_v15 = vadd.f32 %v3795_v62, %v3773_v46  ;;  %v4655_v10 = vld [vmem:[%s10000_s23 + $0x350] sm:$0xff]  ;;  %v4650_v46 = vld [vmem:[%s10000_s23 + $0x328] sm:$0xff] }
 0x5d5   :  { %v4496_v23 = vmul.f32 %v4472_v35, %v4462_v24  ;;  %v3752_v60 = vpop.f32.mrf.mxu1  ;;  %4822 = vmatpush.msrb.mxu2 %v4657_v42  ;;  %v4938_v42 = vld [vmem:[#allocation22 + $0x20] sm:$0xff] }
 0x5d6   :  { %4788 = vmatpush.msrb.mxu0 %v4613_v30  ;;  %4810 = vmatpush.msrb.mxu1 %v4630_v31  ;;  %v3991_v32 = vmul.f32 %v3796_v15, %v7779_v41  ;;  %v3753_v28 = vadd.f32 %v3752_v60, %v3730_v47  ;;  %v4653_v30 = vld [vmem:[%s10000_s23 + $0x340] sm:$0xff]  ;;  %v4646_v60 = vld [vmem:[%s10000_s23 + $0x308] sm:$0xff] }
 0x5d7   :  { %4789 = vmatmul.f32.vlgmr.msrb.gmra.mxu0 %v4537_v27  ;;  %v4530_v3 = vadd.f32 %v4506_v9, %v4496_v23  ;;  %4823 = vmatpush.msrb.mxu2 %v4656_v39  ;;  %v4652_v27 = vld [vmem:[%s10000_s23 + $0x338] sm:$0xff] }
 0x5d8   :  { %4811 = vmatpush.msrb.mxu1 %v4629_v7  ;;  %v4029_v45 = vrot.slane %v3991_v32, 4  ;;  %v3776_v33 = vadd.f32 %v3775_v12, %v3753_v28 }
 0x5d9   :  { %4812 = vmatmul.f32.vlgmr.msrb.gmra.mxu1 %v4538_v57  ;;  %v4546_v35 = vmax.f32 %v4530_v3, 0.0  ;;  %4824 = vmatpush.msrb.mxu2 %v4655_v10 }
 0x5da   :  { %v4030_v51 = vadd.f32 %v4029_v45, %v3991_v32  ;;  %v3818_v43 = vpop.f32.mrf.mxu0  ;;  %v4647_v32 = vld [vmem:[%s10000_s23 + $0x310] sm:$0xff] }
 0x5db   :  { %v3798_v6 = vpop.f32.mrf.mxu3  ;;  %4825 = vmatpush.msrb.mxu2 %v4654_v11 }
 0x5dc   :  { %v4031_v53 = vrot.slane %v4030_v51, 2  ;;  %v3799_v52 = vadd.f32 %v3798_v6, %v3776_v33 }
 0x5dd   :  { %4826 = vmatpush.msrb.mxu2 %v4653_v30 }
 0x5de   :  { %v4032_v5 = vadd.f32 %v4031_v53, %v4030_v51  ;;  %v4231_v61 = vmul.f32 %v3799_v52, %v9984_v14  ;;  %v2504_v51 = vperm.slane %v9265_v22, 7  ;;  %v3841_v53 = vpop.f32.mrf.mxu1 }
 0x5df   :  { %4792 = vmatmul.f32.gmra.mxu0 %v4545_v56  ;;  %4827 = vmatpush.msrb.mxu2 %v4652_v27 }
 0x5e0   :  { %v4033_v63 = vrot.slane %v4032_v5, 1  ;;  %v4269_v37 = vrot.slane %v4231_v61, 4 }
 0x5e1   :  { %4815 = vmatmul.f32.gmra.mxu1 %v4546_v35  ;;  %4828 = vmatpush.msrb.mxu2 %v4651_v8  ;;  %v4645_v35 = vld [vmem:[%s10000_s23 + $0x300] sm:$0xff]  ;;  %v3864_v6 = vpop.f32.mrf.mxu2 }
 0x5e2   :  { %v4034_v17 = vadd.f32 %v4033_v63, %v4032_v5  ;;  %v4270_v4 = vadd.f32 %v4269_v37, %v4231_v61  ;;  %v3819_v5 = vadd.f32 %v3818_v43, %v2504_v51  ;;  %v3821_v63 = vpop.f32.mrf.mxu0 }
 0x5e3   :  { %4829 = vmatpush.msrb.mxu2 %v4650_v46  ;;  %v3887_v61 = vpop.f32.mrf.mxu3  ;;  %v3822_v10 = vadd.f32 %v3821_v63, %v2504_v51 }
 0x5e4   :  { %v4047_v49 = vmul.f32 %v4034_v17, %v9990_v34  ;;  %v4271_v9 = vrot.slane %v4270_v4, 2 }
 0x5e5   :  { %4830 = vmatpush.msrb.mxu2 %v4649_v54 }
 0x5e6   :  { %v9359_v1 = vsub.f32 %v3796_v15, %v4047_v49  ;;  %v4272_v0 = vadd.f32 %v4271_v9, %v4270_v4  ;;  %v4648_v15 = vld [vmem:[%s10000_s23 + $0x318] sm:$0xff]  ;;  %v3842_v4 = vadd.f32 %v3841_v53, %v3819_v5 }
 0x5e7   :  { %4831 = vmatpush.msrb.mxu2 %v4648_v15  ;;  %v9389_v49 = vld [vmem:[#allocation17] sm:$0xff] }
 0x5e8   :  { %v4063_v50 = vmul.f32 %v9359_v1, %v9359_v1  ;;  %v4273_v55 = vrot.slane %v4272_v0, 1  ;;  %v4473_v22 = vperm.slane %v9389_v49, 6  ;;  %v4676_v5 = vld [vmem:[%s10000_s23 + $0x3f8] sm:$0xff] }
 0x5e9   :  { %4832 = vmatpush.msrb.mxu2 %v4647_v32  ;;  %4842 = vmatpush.msrb.mxu3 %v4676_v5 }
 0x5ea   :  { %v4071_v21 = vmul.f32 %v4063_v50, %v7779_v41  ;;  %v4274_v58 = vadd.f32 %v4273_v55, %v4272_v0  ;;  %v9393_v0 = vld [vmem:[#allocation19] sm:$0xff] }
 0x5eb   :  { %4833 = vmatpush.msrb.mxu2 %v4646_v60  ;;  %v4507_v25 = vperm.slane %v9393_v0, 6  ;;  %v4940_v55 = vld [vmem:[#allocation22 + $0x30] sm:$0xff] }
 0x5ec   :  { %v4109_v2 = vrot.slane %v4071_v21, 4  ;;  %v4287_v59 = vmul.f32 %v4274_v58, %v9997_v44 }
 0x5ed   :  { %4834 = vmatpush.msrb.mxu2 %v4645_v35 }
 0x5ee   :  { %v4110_v38 = vadd.f32 %v4109_v2, %v4071_v21  ;;  %v9370_v18 = vsub.f32 %v3799_v52, %v4287_v59  ;;  %v3865_v21 = vadd.f32 %v3864_v6, %v3842_v4  ;;  %v3844_v2 = vpop.f32.mrf.mxu1  ;;  %v3867_v59 = vpop.f32.mrf.mxu2  ;;  %v9407_v4 = vld [vmem:[#allocation2] sm:$0xff] }
 0x5ef   :  { %5016 = vmatpush.msra.mxu2 %v4940_v55  ;;  %v3845_v27 = vadd.f32 %v3844_v2, %v3822_v10  ;;  %v9415_v2 = vld [vmem:[#allocation20] ss:$0 sm:$0xff]  ;;  %v4670_v10 = vld [vmem:[%s10000_s23 + $0x3c8] sm:$0xff] }
 0x5f0   :  { %v4111_v16 = vrot.slane %v4110_v38, 2  ;;  %v4303_v19 = vmul.f32 %v9370_v18, %v9370_v18 }
 0x5f1   :  { %5017 = vmatpush.msra.mxu2 %v4938_v42  ;;  %v3868_v46 = vadd.f32 %v3867_v59, %v3845_v27 }
 0x5f2   :  { %v4112_v29 = vadd.f32 %v4111_v16, %v4110_v38  ;;  %v4311_v40 = vmul.f32 %v4303_v19, %v9984_v14  ;;  %v4936_v19 = vld [vmem:[#allocation22 + $0x10] sm:$0xff] }
 0x5f3   :  { %5018 = vmatpush.msra.mxu2 %v4936_v19 }
 0x5f4   :  { %v4113_v24 = vrot.slane %v4112_v29, 1  ;;  %v4349_v31 = vrot.slane %v4311_v40, 4 }
 0x5f6   :  { %v4114_v26 = vadd.f32 %v4113_v24, %v4112_v29  ;;  %v4350_v57 = vadd.f32 %v4349_v31, %v4311_v40  ;;  %v3888_v29 = vadd.f32 %v3887_v61, %v3865_v21  ;;  %v3890_v24 = vpop.f32.mrf.mxu3 }
 0x5f7   :  { %v3891_v32 = vadd.f32 %v3890_v24, %v3868_v46  ;;  %v4669_v24 = vld [vmem:[%s10000_s23 + $0x3c0] sm:$0xff] }
 0x5f8   :  { %v4127_v20 = vmul.f32 %v4114_v26, %v9990_v34  ;;  %v4351_v23 = vrot.slane %v4350_v57, 2  ;;  %v4934_v26 = vld [vmem:[#allocation22] sm:$0xff] }
 0x5f9   :  { %5019 = vmatpush.msra.mxu2 %v4934_v26 }
 0x5fa   :  { %v4135_v7 = vadd.f32 1e-05, %v4127_v20  ;;  %v4352_v62 = vadd.f32 %v4351_v23, %v4350_v57 }
 0x5fc   :  { %6357 = vrsqrt.f32 %v4135_v7  ;;  %v4353_v48 = vrot.slane %v4352_v62, 1  ;;  %vm4203_vm11 = vweird.f32 %v4135_v7 }
 0x5fe   :  { %v4354_v47 = vadd.f32 %v4353_v48, %v4352_v62 }
 0x600   :  { %v4367_v45 = vmul.f32 %v4354_v47, %v9997_v44  ;;  %v9399_v47 = vld [vmem:[%s10021_s24] sm:$0xff] }
 0x602   :  { %v6358_v3 = vpop.eup %6357  ;;  %v4375_v28 = vadd.f32 1e-05, %v4367_v45 }
 0x603   :  { %v4198_v56 = vmul.f32 %v6358_v3, %v4135_v7  ;;  %vm4204_vm10 = vweird.f32 %v6358_v3 }
 0x604   :  { %6359 = vrsqrt.f32 %v4375_v28  ;;  %vm4205_vm12 = vmor %vm4203_vm11, %vm4204_vm10  ;;  %vm4443_vm14 = vweird.f32 %v4375_v28 }
 0x605   :  { %v4199_v12 = vmul.f32 %v6358_v3, %v4198_v56 }
 0x607   :  { %v4200_v33 = vmul.f32 0.5, %v4199_v12 }
 0x609   :  { %v4201_v52 = vsub.f32 1.5, %v4200_v33 }
 0x60a   :  { %v6360_v37 = vpop.eup %6359 }
 0x60b   :  { %v4202_v17 = vmul.f32 %v6358_v3, %v4201_v52  ;;  %v4438_v13 = vmul.f32 %v6360_v37, %v4375_v28  ;;  %vm4444_vm13 = vweird.f32 %v6360_v37 }
 0x60c   :  { %vm4445_vm15 = vmor %vm4443_vm14, %vm4444_vm13 }
 0x60d   :  { %v4206_v9 = vsel %vm4205_vm12, %v6358_v3, %v4202_v17  ;;  %v4439_v36 = vmul.f32 %v6360_v37, %v4438_v13  ;;  %v3910_v39 = vpop.f32.mrf.mxu0  ;;  %v4675_v17 = vld [vmem:[%s10000_s23 + $0x3f0] sm:$0xff] }
 0x60e   :  { %v4223_v50 = vmul.f32 %v4206_v9, %v9359_v1  ;;  %v4942_v1 = vld [vmem:[#allocation23] sm:$0xff]  ;;  %v3911_v30 = vadd.f32 %v3910_v39, %v3888_v29  ;;  %v3933_v57 = vpop.f32.mrf.mxu1  ;;  %4843 = vmatpush.msrb.mxu3 %v4675_v17  ;;  %v4939_v17 = vld [vmem:[#allocation22 + $0x28] sm:$0xff] }
 0x60f   :  { %v4440_v38 = vmul.f32 0.5, %v4439_v36  ;;  %4944 = vst [vmem:[#allocation1] ss:$2 sm:$0xff] %v4942_v1  ;;  %v4674_v9 = vld [vmem:[%s10000_s23 + $0x3e8] sm:$0xff]  ;;  %v4672_v36 = vld [vmem:[%s10000_s23 + $0x3d8] sm:$0xff] }
 0x610   :  { %v4489_v58 = vmul.f32 %v4473_v22, %v4223_v50  ;;  %v3934_v7 = vadd.f32 %v3933_v57, %v3911_v30  ;;  %4844 = vmatpush.msrb.mxu3 %v4674_v9  ;;  %v4667_v57 = vld [vmem:[%s10000_s23 + $0x3b0] sm:$0xff] }
 0x611   :  { %v4441_v11 = vsub.f32 1.5, %v4440_v38  ;;  %v4671_v38 = vld [vmem:[%s10000_s23 + $0x3d0] sm:$0xff] }
 0x612   :  { %v4523_v16 = vadd.f32 %v4507_v25, %v4489_v58 }
 0x613   :  { %v4442_v31 = vmul.f32 %v6360_v37, %v4441_v11 }
 0x614   :  { %v4539_v40 = vmax.f32 %v4523_v16, 0.0 }
 0x615   :  { %v4446_v20 = vsel %vm4445_vm15, %v6360_v37, %v4442_v31  ;;  %v3913_v15 = vpop.f32.mrf.mxu0  ;;  %v4668_v31 = vld [vmem:[%s10000_s23 + $0x3b8] sm:$0xff] }
 0x616   :  { %4835 = vmatmul.f32.vlgmr.msrb.gmra.mxu2 %v4539_v40  ;;  %v4463_v8 = vmul.f32 %v4446_v20, %v9370_v18  ;;  %v4945_v48 = vld.sshfl [vmem:[#allocation1] sm:$0xff pattern:$0x75316420]  ;;  %v3914_v18 = vadd.f32 %v3913_v15, %v3891_v32 }
 0x617   :  { %6173 = vmatpush.msk.msra.mxu0 %vm4953_vm2, %v4945_v48 }
 0x618   :  { %v4497_v62 = vmul.f32 %v4473_v22, %v4463_v8  ;;  %6174 = vmatmul.msk.f32.vlgmr.msra.gmra.mxu0 %vm4887_vm3, %v9399_v47 }
 0x61a   :  { %v4531_v45 = vadd.f32 %v4507_v25, %v4497_v62  ;;  %v3936_v51 = vpop.f32.mrf.mxu1  ;;  %v4673_v25 = vld [vmem:[%s10000_s23 + $0x3e0] sm:$0xff] }
 0x61b   :  { %v3937_v35 = vadd.f32 %v3936_v51, %v3914_v18  ;;  %4845 = vmatpush.msrb.mxu3 %v4673_v25  ;;  %v4665_v62 = vld [vmem:[%s10000_s23 + $0x3a0] sm:$0xff] }
 0x61c   :  { %v4547_v56 = vmax.f32 %v4531_v45, 0.0 }
 0x61d   :  { %v3956_v23 = vpop.f32.mrf.mxu2  ;;  %4846 = vmatpush.msrb.mxu3 %v4672_v36 }
 0x61e   :  { %v3957_v54 = vadd.f32 %v3956_v23, %v3934_v7  ;;  %v3979_v43 = vpop.f32.mrf.mxu3  ;;  %4838 = vmatmul.f32.gmra.mxu2 %v4547_v56  ;;  %v4666_v7 = vld [vmem:[%s10000_s23 + $0x3a8] sm:$0xff] }
 0x61f   :  { %4847 = vmatpush.msrb.mxu3 %v4671_v38  ;;  %v4946_v38 = vld.sshfl [vmem:[#allocation1 + $0x8] sm:$0xff pattern:$0x75316420] }
 0x620   :  { %v3980_v3 = vadd.f32 %v3979_v43, %v3957_v54  ;;  %v4664_v43 = vld [vmem:[%s10000_s23 + $0x398] sm:$0xff]  ;;  %6176 = vmatpush.msk.msra.mxu1 %vm4953_vm2, %v4946_v38 }
 0x621   :  { %4848 = vmatpush.msrb.mxu3 %v4670_v10  ;;  %6177 = vmatmul.msk.f32.vlgmr.msra.gmra.mxu1 %vm4887_vm3, %v9399_v47 }
 0x622   :  { %v3992_v60 = vmul.f32 %v3980_v3, %v7779_v41 }
 0x623   :  { %4849 = vmatpush.msrb.mxu3 %v4669_v24 }
 0x624   :  { %v4035_v28 = vrot.slane %v3992_v60, 4 }
 0x625   :  { %4850 = vmatpush.msrb.mxu3 %v4668_v31  ;;  %v4508_v31 = vperm.slane %v9393_v0, 7 }
 0x626   :  { %v4036_v12 = vadd.f32 %v4035_v28, %v3992_v60  ;;  %v3959_v53 = vpop.f32.mrf.mxu2  ;;  %6179 = vmatmul.msk.f32.vlgmr.msra.gmra.mxu2 %vm723_vm0, %v9407_v4  ;;  %v4663_v60 = vld [vmem:[%s10000_s23 + $0x390] sm:$0xff] }
 0x627   :  { %v3960_v6 = vadd.f32 %v3959_v53, %v3937_v35  ;;  %v3982_v52 = vpop.f32.mrf.mxu3  ;;  %4851 = vmatpush.msrb.mxu3 %v4667_v57  ;;  %v4661_v53 = vld [vmem:[%s10000_s23 + $0x380] sm:$0xff] }
 0x628   :  { %v4037_v33 = vrot.slane %v4036_v12, 2 }
 0x629   :  { %v3983_v61 = vadd.f32 %v3982_v52, %v3960_v6  ;;  %4852 = vmatpush.msrb.mxu3 %v4666_v7 }
 0x62a   :  { %v4038_v63 = vadd.f32 %v4037_v33, %v4036_v12  ;;  %v4662_v12 = vld [vmem:[%s10000_s23 + $0x388] sm:$0xff] }
 0x62b   :  { %v4232_v22 = vmul.f32 %v3983_v61, %v9984_v14  ;;  %4853 = vmatpush.msrb.mxu3 %v4665_v62 }
 0x62c   :  { %v4039_v37 = vrot.slane %v4038_v63, 1 }
 0x62d   :  { %v4275_v50 = vrot.slane %v4232_v22, 4  ;;  %4854 = vmatpush.msrb.mxu3 %v4664_v43 }
 0x62e   :  { %v4040_v13 = vadd.f32 %v4039_v37, %v4038_v63  ;;  %6180 = vmatmul.msk.f32.gmra.mxu2 %vm723_vm0, %v9407_v4 }
 0x62f   :  { %v4276_v55 = vadd.f32 %v4275_v50, %v4232_v22  ;;  %4855 = vmatpush.msrb.mxu3 %v4663_v60 }
 0x630   :  { %v4048_v21 = vmul.f32 %v4040_v13, %v9990_v34  ;;  %v4937_v13 = vld [vmem:[#allocation22 + $0x18] sm:$0xff] }
 0x631   :  { %v4277_v42 = vrot.slane %v4276_v55, 2  ;;  %4856 = vmatpush.msrb.mxu3 %v4662_v12 }
 0x632   :  { %v9417_v58 = vsub.f32 %v3980_v3, %v4048_v21 }
 0x633   :  { %v4278_v39 = vadd.f32 %v4277_v42, %v4276_v55  ;;  %v4698_v16 = vpop.f32.mrf.mxu0  ;;  %4857 = vmatpush.msrb.mxu3 %v4661_v53  ;;  %v4935_v55 = vld [vmem:[#allocation22 + $0x8] sm:$0xff] }
 0x634   :  { %v4064_v59 = vmul.f32 %v9417_v58, %v9417_v58  ;;  %v4699_v29 = vadd.f32 %v9415_v2, %v4698_v16  ;;  %v4721_v11 = vpop.f32.mrf.mxu1 }
 0x635   :  { %v4279_v1 = vrot.slane %v4278_v39, 1 }
 0x636   :  { %v4072_v19 = vmul.f32 %v4064_v59, %v7779_v41  ;;  %v4722_v40 = vadd.f32 %v4721_v11, %v4699_v29  ;;  %v4903_v59 = vld [vmem:[%s10022_s0] sm:$0xff]  ;;  %v4474_v11 = vperm.slane %v9389_v49, 7 }
 0x637   :  { %v4280_v26 = vadd.f32 %v4279_v1, %v4278_v39  ;;  %4905 = vrot.lane.b32.xlu2 %v4903_v59, %s7403_s28 }
 0x638   :  { %v4115_v30 = vrot.slane %v4072_v19, 4 }
 0x639   :  { %v4288_v20 = vmul.f32 %v4280_v26, %v9997_v44 }
 0x63a   :  { %v4116_v27 = vadd.f32 %v4115_v30, %v4072_v19 }
 0x63b   :  { %v9431_v46 = vsub.f32 %v3983_v61, %v4288_v20  ;;  %v4941_v61 = vld [vmem:[#allocation22 + $0x38] sm:$0xff] }
 0x63c   :  { %v4117_v8 = vrot.slane %v4116_v27, 2  ;;  %v9443_v37 = vpop.f32.mrf.mxu0  ;;  %5039 = vmatpush.msra.mxu3 %v4941_v61  ;;  %v4724_v25 = vpop.f32.mrf.mxu1 }
 0x63d   :  { %v4304_v54 = vmul.f32 %v9431_v46, %v9431_v46 }
 0x63e   :  { %v4118_v23 = vadd.f32 %v4117_v8, %v4116_v27  ;;  %5040 = vmatpush.msra.mxu3 %v4939_v17 }
 0x63f   :  { %v4312_v15 = vmul.f32 %v4304_v54, %v9984_v14 }
 0x640   :  { %v4119_v48 = vrot.slane %v4118_v23, 1  ;;  %v4744_v32 = vpop.f32.mrf.mxu2  ;;  %v4767_v56 = vpop.f32.mrf.mxu3  ;;  %5041 = vmatpush.msra.mxu3 %v4937_v13 }
 0x641   :  { %v4355_v45 = vrot.slane %v4312_v15, 4  ;;  %v4745_v18 = vadd.f32 %v4744_v32, %v4722_v40 }
 0x642   :  { %v4120_v3 = vadd.f32 %v4119_v48, %v4118_v23  ;;  %5042 = vmatpush.msra.mxu3 %v4935_v55 }
 0x643   :  { %v4356_v51 = vadd.f32 %v4355_v45, %v4312_v15  ;;  %v4768_v35 = vadd.f32 %v4767_v56, %v4745_v18  ;;  %v9459_v56 = vld [vmem:[#allocation25] sm:$0x3] }
 0x644   :  { %v4128_v28 = vmul.f32 %v4120_v3, %v9990_v34  ;;  %v5053_v55 = vperm.slane %v9459_v56, 1 }
 0x645   :  { %v4357_v6 = vrot.slane %v4356_v51, 2 }
 0x646   :  { %v4136_v33 = vadd.f32 1e-05, %v4128_v28  ;;  %v4702_v28 = vadd.f32 %v9415_v2, %v9443_v37 }
 0x647   :  { %v4358_v5 = vadd.f32 %v4357_v6, %v4356_v51 }
 0x648   :  { %6361 = vrsqrt.f32 %v4136_v33  ;;  %vm4213_vm5 = vweird.f32 %v4136_v33  ;;  %v4747_v0 = vpop.f32.mrf.mxu2  ;;  %v4725_v12 = vadd.f32 %v4724_v25, %v4702_v28  ;;  %v5216_v28 = vld [vmem:[#allocation29 + $0x60] sm:$0xff] }
 0x649   :  { %v4359_v52 = vrot.slane %v4358_v5, 1 }
 0x64a   :  { %v4748_v53 = vadd.f32 %v4747_v0, %v4725_v12  ;;  %v5219_v0 = vld [vmem:[#allocation29 + $0x78] sm:$0xff] }
 0x64b   :  { %v4360_v63 = vadd.f32 %v4359_v52, %v4358_v5  ;;  %5240 = vmatpush.msrb.mxu0 %v5219_v0 }
 0x64d   :  { %v4368_v9 = vmul.f32 %v4360_v63, %v9997_v44 }
 0x64e   :  { %v6362_v22 = vpop.eup %6361 }
 0x64f   :  { %v4208_v50 = vmul.f32 %v6362_v22, %v4136_v33  ;;  %v4376_v21 = vadd.f32 1e-05, %v4368_v9  ;;  %vm4214_vm4 = vweird.f32 %v6362_v22 }
 0x650   :  { %vm4215_vm6 = vmor %vm4213_vm5, %vm4214_vm4 }
 0x651   :  { %v4209_v36 = vmul.f32 %v6362_v22, %v4208_v50  ;;  %6363 = vrsqrt.f32 %v4376_v21  ;;  %vm4453_vm8 = vweird.f32 %v4376_v21 }
 0x653   :  { %v4210_v42 = vmul.f32 0.5, %v4209_v36 }
 0x654   :  { %v4790_v16 = vpop.f32.mrf.mxu0 }
 0x655   :  { %v4211_v39 = vsub.f32 1.5, %v4210_v42  ;;  %v4791_v10 = vadd.f32 %v4790_v16, %v4768_v35  ;;  %v5052_v35 = vperm.slane %v9459_v56, 0 }
 0x656   :  { %v4813_v19 = vpop.f32.mrf.mxu1 }
 0x657   :  { %v4212_v29 = vmul.f32 %v6362_v22, %v4211_v39  ;;  %v6364_v1 = vpop.eup %6363  ;;  %v4814_v24 = vadd.f32 %v4813_v19, %v4791_v10 }
 0x658   :  { %v4448_v30 = vmul.f32 %v6364_v1, %v4376_v21  ;;  %vm4454_vm7 = vweird.f32 %v6364_v1 }
 0x659   :  { %v4216_v40 = vsel %vm4215_vm6, %v6362_v22, %v4212_v29  ;;  %vm4455_vm9 = vmor %vm4453_vm8, %vm4454_vm7 }
 0x65a   :  { %v4224_v26 = vmul.f32 %v4216_v40, %v9417_v58  ;;  %v4449_v27 = vmul.f32 %v6364_v1, %v4448_v30 }
 0x65c   :  { %v4490_v20 = vmul.f32 %v4474_v11, %v4224_v26  ;;  %v4450_v57 = vmul.f32 0.5, %v4449_v27  ;;  %v4793_v45 = vpop.f32.mrf.mxu0 }
 0x65e   :  { %v4524_v8 = vadd.f32 %v4508_v31, %v4490_v20  ;;  %v4451_v7 = vsub.f32 1.5, %v4450_v57  ;;  %v4816_v63 = vpop.f32.mrf.mxu1 }
 0x660   :  { %v4540_v23 = vmax.f32 %v4524_v8, 0.0  ;;  %v4452_v54 = vmul.f32 %v6364_v1, %v4451_v7 }
 0x662   :  { %4858 = vmatmul.f32.vlgmr.msrb.gmra.mxu3 %v4540_v23  ;;  %v4456_v62 = vsel %vm4455_vm9, %v6364_v1, %v4452_v54 }
 0x663   :  { %v4464_v49 = vmul.f32 %v4456_v62, %v9431_v46  ;;  %v4770_v46 = vpop.f32.mrf.mxu3 }
 0x664   :  { %v4771_v52 = vadd.f32 %v4770_v46, %v4748_v53  ;;  %v5233_v46 = vld [vmem:[#allocation29 + $0xe8] sm:$0xff] }
 0x665   :  { %v4498_v48 = vmul.f32 %v4474_v11, %v4464_v49 }
 0x666   :  { %v4794_v61 = vadd.f32 %v4793_v45, %v4771_v52  ;;  %v5234_v45 = vld [vmem:[#allocation29 + $0xf0] sm:$0xff] }
 0x667   :  { %v4532_v15 = vadd.f32 %v4508_v31, %v4498_v48  ;;  %v5214_v52 = vld [vmem:[#allocation29 + $0x50] sm:$0xff] }
 0x668   :  { %v4817_v22 = vadd.f32 %v4816_v63, %v4794_v61  ;;  %v5230_v63 = vld [vmem:[#allocation29 + $0xd0] sm:$0xff] }
 0x669   :  { %v4548_v43 = vmax.f32 %v4532_v15, 0.0 }
 0x66b   :  { %4861 = vmatmul.f32.gmra.mxu3 %v4548_v43 }
 0x673   :  { %6181 = vmatmul.msk.f32.vlgmr.msra.gmra.mxu3 %vm723_vm0, %v9407_v4 }
 0x67b   :  { %6182 = vmatmul.msk.f32.gmra.mxu3 %vm723_vm0, %v9407_v4 }
 0x691   :  { %v4906_v59 = vpop.permute.xlu2 %4905 }
 0x695   :  { %v4975_v18 = vpop.f32.mrf.mxu0 }
 0x699   :  { %v4836_v58 = vpop.f32.mrf.mxu2 }
 0x69a   :  { %v4837_v32 = vadd.f32 %v4836_v58, %v4814_v24  ;;  %v5235_v58 = vld [vmem:[#allocation29 + $0xf8] sm:$0xff] }
 0x69b   :  { %5263 = vmatpush.msrb.mxu1 %v5235_v58 }
 0x69d   :  { %5264 = vmatpush.msrb.mxu1 %v5234_v45 }
 0x69e   :  { %v4998_v21 = vpop.f32.mrf.mxu1 }
 0x69f   :  { %5265 = vmatpush.msrb.mxu1 %v5233_v46 }
 0x6a1   :  { %v4839_v3 = vpop.f32.mrf.mxu2 }
 0x6a2   :  { %v4840_v9 = vadd.f32 %v4839_v3, %v4817_v22  ;;  %v5213_v22 = vld [vmem:[#allocation29 + $0x48] sm:$0xff] }
 0x6a9   :  { %v5021_v60 = vpop.f32.mrf.mxu2 }
 0x6aa   :  { %v5022_v51 = vadd.f32 %v5021_v60, %v4975_v18  ;;  %v5217_v60 = vld [vmem:[#allocation29 + $0x68] sm:$0xff] }
 0x6ac   :  { %v5056_v4 = vadd.f32 %v5052_v35, %v5022_v51  ;;  %v5232_v51 = vld [vmem:[#allocation29 + $0xe0] sm:$0xff] }
 0x6ad   :  { %5266 = vmatpush.msrb.mxu1 %v5232_v51  ;;  %v9498_v51 = vld [vmem:[#allocation28] sm:$0x3] }
 0x6ae   :  { %v5060_v5 = vmul.f32 %v5056_v4, %v7779_v41 }
 0x6b0   :  { %v5062_v17 = vrot.slane %v5060_v5, 4 }
 0x6b2   :  { %v5063_v2 = vadd.f32 %v5062_v17, %v5060_v5  ;;  %v5231_v5 = vld [vmem:[#allocation29 + $0xd8] sm:$0xff] }
 0x6b3   :  { %5267 = vmatpush.msrb.mxu1 %v5231_v5 }
 0x6b4   :  { %v5064_v25 = vrot.slane %v5063_v2, 2 }
 0x6b5   :  { %5268 = vmatpush.msrb.mxu1 %v5230_v63  ;;  %v5193_v63 = vperm.slane %v9498_v51, 1 }
 0x6b6   :  { %v5065_v36 = vadd.f32 %v5064_v25, %v5063_v2  ;;  %v5212_v2 = vld [vmem:[#allocation29 + $0x40] sm:$0xff] }
 0x6b8   :  { %v5066_v10 = vrot.slane %v5065_v36, 1 }
 0x6ba   :  { %v5067_v11 = vadd.f32 %v5066_v10, %v5065_v36  ;;  %v5227_v36 = vld [vmem:[#allocation29 + $0xb8] sm:$0xff] }
 0x6bc   :  { %v5074_v30 = vmul.f32 %v5067_v11, %v9990_v34 }
 0x6be   :  { %v9478_v27 = vsub.f32 %v5056_v4, %v5074_v30  ;;  %v5428_v4 = vld [vmem:[#allocation38] sm:$0xf]  ;;  %v5223_v30 = vld [vmem:[#allocation29 + $0x98] sm:$0xff] }
 0x6bf   :  { %6183 = vmatpush.msk.msrb.mxu3 %vm4953_vm2, %v5428_v4 }
 0x6c0   :  { %v5078_v8 = vmul.f32 %v9478_v27, %v9478_v27  ;;  %6184 = vmatmul.msk.f32.vlgmr.msrb.gmra.mxu3 %vm4887_vm3, %v9399_v47  ;;  %v5226_v47 = vld [vmem:[#allocation29 + $0xb0] sm:$0xff] }
 0x6c2   :  { %v5080_v54 = vmul.f32 %v5078_v8, %v7779_v41  ;;  %v5205_v8 = vld [vmem:[#allocation29 + $0x8] sm:$0xff] }
 0x6c4   :  { %v5082_v49 = vrot.slane %v5080_v54, 4 }
 0x6c6   :  { %v5083_v15 = vadd.f32 %v5082_v49, %v5080_v54  ;;  %v5204_v54 = vld [vmem:[#allocation29] sm:$0xff] }
 0x6c8   :  { %v5084_v3 = vrot.slane %v5083_v15, 2 }
 0x6ca   :  { %v5085_v12 = vadd.f32 %v5084_v3, %v5083_v15 }
 0x6cc   :  { %v5086_v61 = vrot.slane %v5085_v12, 1 }
 0x6e5   :  { %v4859_v33 = vpop.f32.mrf.mxu3 }
 0x6e6   :  { %v9466_v6 = vadd.f32 %v4859_v33, %v4837_v32  ;;  %v5218_v32 = vld [vmem:[#allocation29 + $0x70] sm:$0xff]  ;;  %v5215_v33 = vld [vmem:[#allocation29 + $0x58] sm:$0xff] }
 0x6e7   :  { %5241 = vmatpush.msrb.mxu0 %v5218_v32 }
 0x6e9   :  { %5242 = vmatpush.msrb.mxu0 %v5217_v60 }
 0x6eb   :  { %5243 = vmatpush.msrb.mxu0 %v5216_v28 }
 0x6ed   :  { %5244 = vmatpush.msrb.mxu0 %v5215_v33 }
 0x6ee   :  { %v4862_v37 = vpop.f32.mrf.mxu3 }
 0x6ef   :  { %v9469_v13 = vadd.f32 %v4862_v37, %v4840_v9  ;;  %v5229_v9 = vld [vmem:[#allocation29 + $0xc8] sm:$0xff]  ;;  %5245 = vmatpush.msrb.mxu0 %v5214_v52  ;;  %v5228_v37 = vld [vmem:[#allocation29 + $0xc0] sm:$0xff] }
 0x6f0   :  { %5269 = vmatpush.msrb.mxu1 %v5229_v9  ;;  %v5024_v9 = vpop.f32.mrf.mxu2 }
 0x6f1   :  { %v4901_v50 = vmul.f32 1.442695, %v9469_v13  ;;  %5246 = vmatpush.msrb.mxu0 %v5213_v22 }
 0x6f2   :  { %5270 = vmatpush.msrb.mxu1 %v5228_v37 }
 0x6f3   :  { %6365 = vpow2.f32 %v4901_v50  ;;  %v5087_v50 = vadd.f32 %v5086_v61, %v5085_v12  ;;  %5247 = vmatpush.msrb.mxu0 %v5212_v2 }
 0x6f4   :  { %5271 = vmatpush.msrb.mxu1 %v5227_v36 }
 0x6f6   :  { %v5044_v42 = vpop.f32.mrf.mxu3  ;;  %5272 = vmatpush.msrb.mxu1 %v5226_v47 }
 0x6f7   :  { %v5045_v38 = vadd.f32 %v5044_v42, %v4998_v21  ;;  %v5211_v21 = vld [vmem:[#allocation29 + $0x38] sm:$0xff]  ;;  %v5210_v42 = vld [vmem:[#allocation29 + $0x30] sm:$0xff] }
 0x6f8   :  { %5248 = vmatpush.msrb.mxu0 %v5211_v21 }
 0x6f9   :  { %v6366_v39 = vpop.eup %6365  ;;  %v5057_v16 = vadd.f32 %v5053_v55, %v5045_v38  ;;  %v5094_v38 = vmul.f32 %v5087_v50, %v9990_v34 }
 0x6fa   :  { %v4908_v29 = vmul.f32 %v6366_v39, %v4906_v59  ;;  %v5209_v39 = vld [vmem:[#allocation29 + $0x28] sm:$0xff]  ;;  %5249 = vmatpush.msrb.mxu0 %v5210_v42 }
 0x6fb   :  { %v5061_v19 = vmul.f32 %v5057_v16, %v7779_v41  ;;  %v5096_v10 = vadd.f32 1e-05, %v5094_v38 }
 0x6fc   :  { %4910 = vrot.lane.b32.xlu2 %v4908_v29, %s7404_s19  ;;  %5250 = vmatpush.msrb.mxu0 %v5209_v39 }
 0x6fd   :  { %v5068_v1 = vrot.slane %v5061_v19, 4  ;;  %6367 = vrsqrt.f32 %v5096_v10  ;;  %vm5104_vm12 = vweird.f32 %v5096_v10 }
 0x6fe   :  { %v5047_v2 = vpop.f32.mrf.mxu3 }
 0x6ff   :  { %v5069_v24 = vadd.f32 %v5068_v1, %v5061_v19  ;;  %v5208_v19 = vld [vmem:[#allocation29 + $0x20] sm:$0xff] }
 0x700   :  { %v5224_v1 = vld [vmem:[#allocation29 + $0xa0] sm:$0xff]  ;;  %5251 = vmatpush.msrb.mxu0 %v5208_v19 }
 0x701   :  { %v5070_v40 = vrot.slane %v5069_v24, 2 }
 0x703   :  { %v5071_v26 = vadd.f32 %v5070_v40, %v5069_v24  ;;  %v6368_v11 = vpop.eup %6367  ;;  %v5207_v40 = vld [vmem:[#allocation29 + $0x18] sm:$0xff] }
 0x704   :  { %5252 = vmatpush.msrb.mxu0 %v5207_v40  ;;  %vm5105_vm10 = vweird.f32 %v6368_v11 }
 0x705   :  { %v5072_v31 = vrot.slane %v5071_v26, 1  ;;  %vm5106_vm13 = vmor %vm5104_vm12, %vm5105_vm10 }
 0x707   :  { %v5073_v20 = vadd.f32 %v5072_v31, %v5071_v26  ;;  %v5206_v26 = vld [vmem:[#allocation29 + $0x10] sm:$0xff] }
 0x708   :  { %v5222_v31 = vld [vmem:[#allocation29 + $0x90] sm:$0xff]  ;;  %5253 = vmatpush.msrb.mxu0 %v5206_v26 }
 0x709   :  { %v5075_v57 = vmul.f32 %v5073_v20, %v9990_v34  ;;  %v5099_v20 = vmul.f32 %v6368_v11, %v5096_v10 }
 0x70a   :  { %5254 = vmatpush.msrb.mxu0 %v5205_v8 }
 0x70b   :  { %v9483_v7 = vsub.f32 %v5057_v16, %v5075_v57  ;;  %v5225_v16 = vld [vmem:[#allocation29 + $0xa8] sm:$0xff]  ;;  %v5100_v49 = vmul.f32 %v6368_v11, %v5099_v20 }
 0x70c   :  { %5273 = vmatpush.msrb.mxu1 %v5225_v16  ;;  %5255 = vmatpush.msrb.mxu0 %v5204_v54  ;;  %v5375_v54 = vld [vmem:[%s10023_s17 + $0x78] sm:$0xff] }
 0x70d   :  { %v5079_v23 = vmul.f32 %v9483_v7, %v9483_v7  ;;  %v5101_v15 = vmul.f32 0.5, %v5100_v49  ;;  %5380 = vmatpush.msrb.mxu2 %v5375_v54  ;;  %v5362_v54 = vld [vmem:[%s10023_s17 + $0x10] sm:$0xff] }
 0x70e   :  { %5274 = vmatpush.msrb.mxu1 %v5224_v1 }
 0x70f   :  { %v5081_v62 = vmul.f32 %v5079_v23, %v7779_v41  ;;  %v5221_v23 = vld [vmem:[#allocation29 + $0x88] sm:$0xff]  ;;  %v5102_v0 = vsub.f32 1.5, %v5101_v15  ;;  %v5374_v15 = vld [vmem:[%s10023_s17 + $0x70] sm:$0xff] }
 0x710   :  { %5275 = vmatpush.msrb.mxu1 %v5223_v30  ;;  %5381 = vmatpush.msrb.mxu2 %v5374_v15  ;;  %v4932_v15 = vld [vmem:[%s10024_s1] sm:$0xff] }
 0x711   :  { %v5088_v48 = vrot.slane %v5081_v62, 4  ;;  %v5103_v32 = vmul.f32 %v6368_v11, %v5102_v0  ;;  %5409 = vrot.lane.b32.xlu0 %v4932_v15, %s7376_s11 }
 0x712   :  { %5276 = vmatpush.msrb.mxu1 %v5222_v31 }
 0x713   :  { %v5089_v43 = vadd.f32 %v5088_v48, %v5081_v62  ;;  %v5220_v62 = vld [vmem:[#allocation29 + $0x80] sm:$0xff]  ;;  %v5107_v45 = vsel %vm5106_vm13, %v6368_v11, %v5103_v32  ;;  %v5373_v32 = vld [vmem:[%s10023_s17 + $0x68] sm:$0xff] }
 0x714   :  { %5277 = vmatpush.msrb.mxu1 %v5221_v23  ;;  %v5118_v46 = vmul.f32 %v5107_v45, %v9478_v27  ;;  %5382 = vmatpush.msrb.mxu2 %v5373_v32 }
 0x715   :  { %v5090_v18 = vrot.slane %v5089_v43, 2 }
 0x716   :  { %5278 = vmatpush.msrb.mxu1 %v5220_v62 }
 0x717   :  { %v5091_v53 = vadd.f32 %v5090_v18, %v5089_v43  ;;  %v9494_v18 = vld [vmem:[#allocation26] sm:$0x3] }
 0x718   :  { %v5182_v28 = vperm.slane %v9494_v18, 0  ;;  %v5183_v4 = vperm.slane %v9494_v18, 1 }
 0x719   :  { %v5092_v17 = vrot.slane %v5091_v53, 1 }
 0x71a   :  { %v5186_v5 = vmul.f32 %v5182_v28, %v5118_v46  ;;  %v5372_v46 = vld [vmem:[%s10023_s17 + $0x60] sm:$0xff] }
 0x71b   :  { %v5093_v25 = vadd.f32 %v5092_v17, %v5091_v53  ;;  %v5192_v53 = vperm.slane %v9498_v51, 0  ;;  %5383 = vmatpush.msrb.mxu2 %v5372_v46 }
 0x71d   :  { %v5095_v59 = vmul.f32 %v5093_v25, %v9990_v34 }
 0x71f   :  { %v5097_v29 = vadd.f32 1e-05, %v5095_v59  ;;  %v9527_v59 = vld [vmem:[#allocation31] ss:$0 sm:$0xff] }
 0x721   :  { %6369 = vrsqrt.f32 %v5097_v29  ;;  %vm5114_vm14 = vweird.f32 %v5097_v29 }
 0x727   :  { %v6370_v24 = vpop.eup %6369 }
 0x728   :  { %v5109_v57 = vmul.f32 %v6370_v24, %v5097_v29  ;;  %vm5115_vm11 = vweird.f32 %v6370_v24 }
 0x729   :  { %vm5116_vm15 = vmor %vm5114_vm14, %vm5115_vm11 }
 0x72a   :  { %v5110_v48 = vmul.f32 %v6370_v24, %v5109_v57 }
 0x72c   :  { %v5111_v43 = vmul.f32 0.5, %v5110_v48 }
 0x72e   :  { %v5112_v58 = vsub.f32 1.5, %v5111_v43 }
 0x730   :  { %v5113_v3 = vmul.f32 %v6370_v24, %v5112_v58 }
 0x732   :  { %v5117_v60 = vsel %vm5116_vm15, %v6370_v24, %v5113_v3  ;;  %vm5455_vm15 = vcmask 64512  }
 0x733   :  { %v5119_v12 = vmul.f32 %v5117_v60, %v9483_v7  ;;  %v5196_v7 = vadd.f32 %v5192_v53, %v5186_v5 }
 0x735   :  { %v5187_v52 = vmul.f32 %v5183_v4, %v5119_v12  ;;  %v5200_v17 = vmax.f32 %v5196_v7, 0.0 }
 0x737   :  { %v5197_v61 = vadd.f32 %v5193_v63, %v5187_v52  ;;  %v5371_v52 = vld [vmem:[%s10023_s17 + $0x58] sm:$0xff] }
 0x738   :  { %5384 = vmatpush.msrb.mxu2 %v5371_v52 }
 0x739   :  { %v5201_v22 = vmax.f32 %v5197_v61, 0.0 }
 0x756   :  { %v4911_v33 = vpop.permute.xlu2 %4910 }
 0x757   :  { %v9509_v27 = vadd.f32 %v4911_v33, %v9469_v13 }
 0x759   :  { %6175 = vmatmul.msk.f32.gmra.mxu0 %vm4887_vm3, %v9509_v27  ;;  %6178 = vmatmul.msk.f32.gmra.mxu1 %vm4887_vm3, %v9509_v27 }
 0x75a   :  { %6185 = vmatmul.msk.f32.gmra.mxu3 %vm4887_vm3, %v9509_v27 }
 0x761   :  { %5256 = vmatmul.f32.vlgmr.msrb.gmra.mxu0 %v5200_v17  ;;  %5279 = vmatmul.f32.vlgmr.msrb.gmra.mxu1 %v5201_v22  ;;  %v5370_v22 = vld [vmem:[%s10023_s17 + $0x50] sm:$0xff] }
 0x762   :  { %5385 = vmatpush.msrb.mxu2 %v5370_v22 }
 0x7d6   :  { %v4978_v37 = vpop.f32.mrf.mxu0  ;;  %v5001_v50 = vpop.f32.mrf.mxu1 }
 0x7d7   :  { %v5048_v25 = vadd.f32 %v5047_v2, %v5001_v50  ;;  %v5025_v21 = vadd.f32 %v5024_v9, %v4978_v37  ;;  %v5369_v50 = vld [vmem:[%s10023_s17 + $0x48] sm:$0xff] }
 0x7d8   :  { %5386 = vmatpush.msrb.mxu2 %v5369_v50 }
 0x7d9   :  { %v5059_v36 = vadd.f32 %v5053_v55, %v5048_v25  ;;  %v5058_v42 = vadd.f32 %v5052_v35, %v5025_v21 }
 0x7db   :  { %v5121_v47 = vmul.f32 %v5059_v36, %v9984_v14  ;;  %v5120_v38 = vmul.f32 %v5058_v42, %v9984_v14 }
 0x7dd   :  { %v5128_v39 = vrot.slane %v5121_v47, 4  ;;  %v5122_v16 = vrot.slane %v5120_v38, 4 }
 0x7de   :  { %v5257_v10 = vpop.f32.mrf.mxu0  ;;  %v5280_v11 = vpop.f32.mrf.mxu1 }
 0x7df   :  { %v5129_v29 = vadd.f32 %v5128_v39, %v5121_v47  ;;  %v5123_v19 = vadd.f32 %v5122_v16, %v5120_v38  ;;  %v5258_v1 = vadd.f32 %v9527_v59, %v5257_v10  ;;  %v5367_v16 = vld [vmem:[%s10023_s17 + $0x38] sm:$0xff] }
 0x7e1   :  { %v5130_v24 = vrot.slane %v5129_v29, 2  ;;  %v5124_v55 = vrot.slane %v5123_v19, 2  ;;  %v5281_v56 = vadd.f32 %v5280_v11, %v5258_v1  ;;  %v5366_v1 = vld [vmem:[%s10023_s17 + $0x30] sm:$0xff] }
 0x7e3   :  { %v5131_v35 = vadd.f32 %v5130_v24, %v5129_v29  ;;  %v5125_v40 = vadd.f32 %v5124_v55, %v5123_v19  ;;  %v5286_v30 = vmul.f32 %v5281_v56, %v7779_v41 }
 0x7e5   :  { %v5132_v26 = vrot.slane %v5131_v35, 1  ;;  %v5126_v31 = vrot.slane %v5125_v40, 1  ;;  %v5287_v20 = vrot.slane %v5286_v30, 4 }
 0x7e7   :  { %v5133_v57 = vadd.f32 %v5132_v26, %v5131_v35  ;;  %v5127_v8 = vadd.f32 %v5126_v31, %v5125_v40  ;;  %v5288_v23 = vadd.f32 %v5287_v20, %v5286_v30  ;;  %v5364_v26 = vld [vmem:[%s10023_s17 + $0x20] sm:$0xff] }
 0x7e9   :  { %v5135_v62 = vmul.f32 %v5133_v57, %v9997_v44  ;;  %v5134_v49 = vmul.f32 %v5127_v8, %v9997_v44  ;;  %v5289_v48 = vrot.slane %v5288_v23, 2  ;;  %v5363_v8 = vld [vmem:[%s10023_s17 + $0x18] sm:$0xff] }
 0x7eb   :  { %v9535_v43 = vsub.f32 %v5059_v36, %v5135_v62  ;;  %v9537_v0 = vsub.f32 %v5058_v42, %v5134_v49  ;;  %v5290_v58 = vadd.f32 %v5289_v48, %v5288_v23  ;;  %v5368_v42 = vld [vmem:[%s10023_s17 + $0x40] sm:$0xff]  ;;  %v5361_v62 = vld [vmem:[%s10023_s17 + $0x8] sm:$0xff] }
 0x7ec   :  { %5387 = vmatpush.msrb.mxu2 %v5368_v42  ;;  %v5360_v48 = vld [vmem:[%s10023_s17] sm:$0xff] }
 0x7ed   :  { %v5139_v3 = vmul.f32 %v9535_v43, %v9535_v43  ;;  %v5138_v45 = vmul.f32 %v9537_v0, %v9537_v0  ;;  %v5291_v60 = vrot.slane %v5290_v58, 1 }
 0x7ee   :  { %5388 = vmatpush.msrb.mxu2 %v5367_v16 }
 0x7ef   :  { %v5141_v12 = vmul.f32 %v5139_v3, %v9984_v14  ;;  %v5140_v33 = vmul.f32 %v5138_v45, %v9984_v14  ;;  %v5292_v5 = vadd.f32 %v5291_v60, %v5290_v58 }
 0x7f0   :  { %5389 = vmatpush.msrb.mxu2 %v5366_v1 }
 0x7f1   :  { %v5148_v7 = vrot.slane %v5141_v12, 4  ;;  %v5142_v61 = vrot.slane %v5140_v33, 4  ;;  %v5293_v17 = vmul.f32 %v5292_v5, %v9990_v34 }
 0x7f3   :  { %v5149_v9 = vadd.f32 %v5148_v7, %v5141_v12  ;;  %v5143_v2 = vadd.f32 %v5142_v61, %v5140_v33  ;;  %v9550_v37 = vsub.f32 %v5281_v56, %v5293_v17  ;;  %v5365_v56 = vld [vmem:[%s10023_s17 + $0x28] sm:$0xff] }
 0x7f4   :  { %5390 = vmatpush.msrb.mxu2 %v5365_v56 }
 0x7f5   :  { %v5150_v25 = vrot.slane %v5149_v9, 2  ;;  %v5144_v21 = vrot.slane %v5143_v2, 2  ;;  %v5295_v36 = vmul.f32 %v9550_v37, %v9550_v37 }
 0x7f6   :  { %5391 = vmatpush.msrb.mxu2 %v5364_v26  ;;  %v6291_v26 = vld [vmem:[#allocation35] ss:$0 sm:$0xff] }
 0x7f7   :  { %v5151_v47 = vadd.f32 %v5150_v25, %v5149_v9  ;;  %v5145_v38 = vadd.f32 %v5144_v21, %v5143_v2  ;;  %v5296_v39 = vmul.f32 %v5295_v36, %v7779_v41 }
 0x7f8   :  { %5392 = vmatpush.msrb.mxu2 %v5363_v8 }
 0x7f9   :  { %v5152_v10 = vrot.slane %v5151_v47, 1  ;;  %v5146_v29 = vrot.slane %v5145_v38, 1  ;;  %v5297_v19 = vrot.slane %v5296_v39, 4 }
 0x7fa   :  { %5393 = vmatpush.msrb.mxu2 %v5362_v54 }
 0x7fb   :  { %v5153_v11 = vadd.f32 %v5152_v10, %v5151_v47  ;;  %v5147_v24 = vadd.f32 %v5146_v29, %v5145_v38  ;;  %v5298_v55 = vadd.f32 %v5297_v19, %v5296_v39  ;;  %v6289_v19 = vld [vmem:[#allocation32] ss:$0 sm:$0xff] }
 0x7fc   :  { %5394 = vmatpush.msrb.mxu2 %v5361_v62 }
 0x7fd   :  { %v5155_v35 = vmul.f32 %v5153_v11, %v9997_v44  ;;  %v5154_v40 = vmul.f32 %v5147_v24, %v9997_v44  ;;  %v5299_v30 = vrot.slane %v5298_v55, 2  ;;  %v6290_v24 = vld [vmem:[#allocation34] ss:$0 sm:$0xff] }
 0x7fe   :  { %5395 = vmatpush.msrb.mxu2 %v5360_v48 }
 0x7ff   :  { %v5157_v31 = vadd.f32 1e-05, %v5155_v35  ;;  %v5156_v20 = vadd.f32 1e-05, %v5154_v40  ;;  %v5300_v57 = vadd.f32 %v5299_v30, %v5298_v55 }
 0x801   :  { %6371 = vrsqrt.f32 %v5157_v31  ;;  %v5301_v23 = vrot.slane %v5300_v57, 1  ;;  %vm5174_vm5 = vweird.f32 %v5157_v31  ;;  %vm5164_vm7 = vweird.f32 %v5156_v20 }
 0x802   :  { %6373 = vrsqrt.f32 %v5156_v20 }
 0x803   :  { %v5302_v49 = vadd.f32 %v5301_v23, %v5300_v57 }
 0x805   :  { %v5303_v58 = vmul.f32 %v5302_v49, %v9990_v34  ;;  %v5410_v49 = vpop.permute.xlu0 %5409 }
 0x807   :  { %v6372_v32 = vpop.eup %6371  ;;  %v5304_v3 = vadd.f32 1e-05, %v5303_v58 }
 0x808   :  { %v6374_v45 = vpop.eup %6373  ;;  %v5169_v60 = vmul.f32 %v6372_v32, %v5157_v31  ;;  %vm5175_vm2 = vweird.f32 %v6372_v32 }
 0x809   :  { %v5159_v46 = vmul.f32 %v6374_v45, %v5156_v20  ;;  %6375 = vrsqrt.f32 %v5304_v3  ;;  %vm5165_vm4 = vweird.f32 %v6374_v45  ;;  %vm5176_vm6 = vmor %vm5174_vm5, %vm5175_vm2  ;;  %vm5311_vm10 = vweird.f32 %v5304_v3 }
 0x80a   :  { %v5170_v12 = vmul.f32 %v6372_v32, %v5169_v60  ;;  %vm5166_vm8 = vmor %vm5164_vm7, %vm5165_vm4 }
 0x80b   :  { %v5160_v33 = vmul.f32 %v6374_v45, %v5159_v46 }
 0x80c   :  { %v5171_v5 = vmul.f32 0.5, %v5170_v12 }
 0x80d   :  { %v5161_v52 = vmul.f32 0.5, %v5160_v33 }
 0x80e   :  { %v5172_v7 = vsub.f32 1.5, %v5171_v5  ;;  %v4933_v5 = vld [vmem:[%s10025_s7] sm:$0xff] }
 0x80f   :  { %v6376_v61 = vpop.eup %6375  ;;  %v5162_v17 = vsub.f32 1.5, %v5161_v52  ;;  %5411 = vrot.lane.b32.xlu1 %v4933_v5, %s7376_s11  ;;  %v5581_v5 = vld [vmem:[#allocation44 + $0x80] sm:$0xff] }
 0x810   :  { %v5173_v22 = vmul.f32 %v6372_v32, %v5172_v7  ;;  %v5306_v9 = vmul.f32 %v6376_v61, %v5304_v3  ;;  %vm5312_vm9 = vweird.f32 %v6376_v61 }
 0x811   :  { %v5163_v2 = vmul.f32 %v6374_v45, %v5162_v17  ;;  %vm5313_vm11 = vmor %vm5311_vm10, %vm5312_vm9 }
 0x812   :  { %v5177_v50 = vsel %vm5176_vm6, %v6372_v32, %v5173_v22  ;;  %v5307_v25 = vmul.f32 %v6376_v61, %v5306_v9 }
 0x813   :  { %v5179_v21 = vmul.f32 %v5177_v50, %v9535_v43  ;;  %v5167_v36 = vsel %vm5166_vm8, %v6374_v45, %v5163_v2 }
 0x814   :  { %v5178_v42 = vmul.f32 %v5167_v36, %v9537_v0  ;;  %v5308_v47 = vmul.f32 0.5, %v5307_v25 }
 0x815   :  { %v5189_v38 = vmul.f32 %v5183_v4, %v5179_v21 }
 0x816   :  { %v5309_v39 = vsub.f32 1.5, %v5308_v47  ;;  %v5188_v16 = vmul.f32 %v5182_v28, %v5178_v42 }
 0x817   :  { %v5199_v10 = vadd.f32 %v5193_v63, %v5189_v38  ;;  %v5427_v38 = vld [vmem:[#allocation37] sm:$0xff] }
 0x818   :  { %v5310_v29 = vmul.f32 %v6376_v61, %v5309_v39  ;;  %v5198_v43 = vadd.f32 %v5192_v53, %v5188_v16  ;;  %5477 = vmatpush.msra.mxu3 %v5427_v38 }
 0x819   :  { %v5203_v0 = vmax.f32 %v5199_v10, 0.0 }
 0x81a   :  { %v5314_v1 = vsel %vm5313_vm11, %v6376_v61, %v5310_v29  ;;  %v5202_v11 = vmax.f32 %v5198_v43, 0.0 }
 0x81b   :  { %v5315_v4 = vmul.f32 %v5314_v1, %v9550_v37  ;;  %5282 = vmatmul.f32.gmra.mxu1 %v5203_v0 }
 0x81c   :  { %5259 = vmatmul.f32.gmra.mxu0 %v5202_v11 }
 0x81d   :  { %v5350_v18 = vmul.f32 %v6289_v19, %v5315_v4 }
 0x81f   :  { %v5356_v28 = vadd.f32 %v6290_v24, %v5350_v18  ;;  %v5449_v18 = vpop.f32.mrf.mxu3 }
 0x821   :  { %v5358_v55 = vmax.f32 %v5356_v28, 0.0 }
 0x823   :  { %5396 = vmatmul.f32.vlgmr.msrb.gmra.mxu2 %v5358_v55  ;;  %v9607_v55 = vld [vmem:[#allocation40] ss:$0 sm:$0xff] }
 0x827   :  { %v9605_v28 = vpop.f32.mrf.mxu3 }
 0x881   :  { %v5412_v0 = vpop.permute.xlu1 %5411 }
 0x898   :  { %v5283_v35 = vpop.f32.mrf.mxu1 }
 0x899   :  { %v5260_v63 = vpop.f32.mrf.mxu0 }
 0x89a   :  { %v5261_v56 = vadd.f32 %v9527_v59, %v5260_v63 }
 0x89c   :  { %v5284_v51 = vadd.f32 %v5283_v35, %v5261_v56 }
 0x89e   :  { %v5316_v53 = vmul.f32 %v5284_v51, %v9984_v14 }
 0x8a0   :  { %v5317_v40 = vrot.slane %v5316_v53, 4 }
 0x8a2   :  { %v5318_v30 = vadd.f32 %v5317_v40, %v5316_v53 }
 0x8a4   :  { %v5319_v31 = vrot.slane %v5318_v30, 2 }
 0x8a6   :  { %v5320_v20 = vadd.f32 %v5319_v31, %v5318_v30  ;;  %v5397_v37 = vpop.f32.mrf.mxu2  ;;  %v5595_v30 = vld [vmem:[#allocation44 + $0xf0] sm:$0xff] }
 0x8a7   :  { %v9583_v57 = vadd.f32 %v6291_v26, %v5397_v37  ;;  %5603 = vmatpush.msra.mxu0 %v5595_v30  ;;  %v5594_v37 = vld [vmem:[#allocation44 + $0xe8] sm:$0xff] }
 0x8a8   :  { %v5321_v8 = vrot.slane %v5320_v20, 1 }
 0x8a9   :  { %v5403_v23 = vmul.f32 1.442695, %v9583_v57 }
 0x8aa   :  { %v5322_v54 = vadd.f32 %v5321_v8, %v5320_v20  ;;  %v5593_v20 = vld [vmem:[#allocation44 + $0xe0] sm:$0xff] }
 0x8ab   :  { %6377 = vpow2.f32 %v5403_v23  ;;  %5604 = vmatpush.msra.mxu0 %v5593_v20  ;;  %v5591_v23 = vld [vmem:[#allocation44 + $0xd0] sm:$0xff]  ;;  %v9618_v20 = vld [vmem:[#allocation41] ss:$0 sm:$0xff] }
 0x8ac   :  { %v5323_v59 = vmul.f32 %v5322_v54, %v9997_v44  ;;  %v5592_v54 = vld [vmem:[#allocation44 + $0xd8] sm:$0xff] }
 0x8ad   :  { %5605 = vmatpush.msra.mxu0 %v5591_v23  ;;  %v9621_v23 = vld [vmem:[#allocation43] ss:$0 sm:$0xff] }
 0x8ae   :  { %v5324_v62 = vsub.f32 %v5284_v51, %v5323_v59 }
 0x8b0   :  { %v5325_v48 = vmul.f32 %v5324_v62, %v5324_v62 }
 0x8b1   :  { %v6378_v15 = vpop.eup %6377 }
 0x8b2   :  { %v5326_v58 = vmul.f32 %v5325_v48, %v9984_v14  ;;  %v5415_v32 = vmul.f32 %v6378_v15, %v5410_v49  ;;  %v5590_v49 = vld [vmem:[#allocation44 + $0xc8] sm:$0xff]  ;;  %v5587_v15 = vld [vmem:[#allocation44 + $0xb0] sm:$0xff] }
 0x8b4   :  { %v5327_v3 = vrot.slane %v5326_v58, 4  ;;  %5419 = vrot.lane.b32.xlu2 %v5415_v32, %s7405_s13 }
 0x8b6   :  { %v5328_v45 = vadd.f32 %v5327_v3, %v5326_v58  ;;  %v5588_v58 = vld [vmem:[#allocation44 + $0xb8] sm:$0xff]  ;;  %v5585_v3 = vld [vmem:[#allocation44 + $0xa0] sm:$0xff] }
 0x8b8   :  { %v5329_v60 = vrot.slane %v5328_v45, 2 }
 0x8ba   :  { %v5330_v46 = vadd.f32 %v5329_v60, %v5328_v45  ;;  %v5586_v45 = vld [vmem:[#allocation44 + $0xa8] sm:$0xff] }
 0x8bc   :  { %v5331_v12 = vrot.slane %v5330_v46, 1 }
 0x8be   :  { %v5332_v33 = vadd.f32 %v5331_v12, %v5330_v46  ;;  %v5583_v46 = vld [vmem:[#allocation44 + $0x90] sm:$0xff]  ;;  %v5584_v12 = vld [vmem:[#allocation44 + $0x98] sm:$0xff] }
 0x8c0   :  { %v5333_v52 = vmul.f32 %v5332_v33, %v9997_v44 }
 0x8c2   :  { %v5334_v7 = vadd.f32 1e-05, %v5333_v52  ;;  %v5582_v52 = vld [vmem:[#allocation44 + $0x88] sm:$0xff] }
 0x8c4   :  { %6379 = vrsqrt.f32 %v5334_v7  ;;  %vm5341_vm13 = vweird.f32 %v5334_v7 }
 0x8ca   :  { %v6380_v61 = vpop.eup %6379 }
 0x8cb   :  { %v5336_v17 = vmul.f32 %v6380_v61, %v5334_v7  ;;  %vm5342_vm12 = vweird.f32 %v6380_v61 }
 0x8cc   :  { %vm5343_vm14 = vmor %vm5341_vm13, %vm5342_vm12 }
 0x8cd   :  { %v5337_v22 = vmul.f32 %v6380_v61, %v5336_v17  ;;  %v5580_v17 = vld [vmem:[#allocation44 + $0x78] sm:$0xff] }
 0x8cf   :  { %v5338_v9 = vmul.f32 0.5, %v5337_v22 }
 0x8d1   :  { %v5339_v2 = vsub.f32 1.5, %v5338_v9  ;;  %v5577_v9 = vld [vmem:[#allocation44 + $0x60] sm:$0xff] }
 0x8d3   :  { %v5340_v50 = vmul.f32 %v6380_v61, %v5339_v2  ;;  %v5578_v2 = vld [vmem:[#allocation44 + $0x68] sm:$0xff] }
 0x8d5   :  { %v5344_v25 = vsel %vm5343_vm14, %v6380_v61, %v5340_v50  ;;  %v5579_v61 = vld [vmem:[#allocation44 + $0x70] sm:$0xff] }
 0x8d6   :  { %v5345_v21 = vmul.f32 %v5344_v25, %v5324_v62  ;;  %v5589_v62 = vld [vmem:[#allocation44 + $0xc0] sm:$0xff]  ;;  %v5575_v25 = vld [vmem:[#allocation44 + $0x50] sm:$0xff] }
 0x8d7   :  { %5606 = vmatpush.msra.mxu0 %v5589_v62 }
 0x8d8   :  { %v5351_v36 = vmul.f32 %v6289_v19, %v5345_v21  ;;  %v5576_v21 = vld [vmem:[#allocation44 + $0x58] sm:$0xff] }
 0x8d9   :  { %5607 = vmatpush.msra.mxu0 %v5587_v15  ;;  %v9630_v15 = vld [vmem:[#allocation46] sm:$0x3] }
 0x8da   :  { %v5357_v42 = vadd.f32 %v6290_v24, %v5351_v36 }
 0x8db   :  { %5608 = vmatpush.msra.mxu0 %v5585_v3 }
 0x8dc   :  { %v5359_v47 = vmax.f32 %v5357_v42, 0.0  ;;  %v5573_v42 = vld [vmem:[#allocation44 + $0x40] sm:$0xff] }
 0x8dd   :  { %5609 = vmatpush.msra.mxu0 %v5583_v46 }
 0x8de   :  { %5399 = vmatmul.f32.gmra.mxu2 %v5359_v47  ;;  %v5574_v47 = vld [vmem:[#allocation44 + $0x48] sm:$0xff] }
 0x8df   :  { %5610 = vmatpush.msra.mxu0 %v5581_v5 }
 0x8e1   :  { %5611 = vmatpush.msra.mxu0 %v5579_v61 }
 0x8e3   :  { %5612 = vmatpush.msra.mxu0 %v5577_v9 }
 0x8e5   :  { %5613 = vmatpush.msra.mxu0 %v5575_v25  ;;  %v5823_v25 = vld [vmem:[%s10026_s6 + $0xf0] sm:$0xff] }
 0x8e7   :  { %5614 = vmatpush.msra.mxu0 %v5573_v42  ;;  %v5806_v42 = vld [vmem:[%s10026_s6 + $0x68] sm:$0xff] }
 0x90e   :  { %v5420_v39 = vpop.permute.xlu2 %5419 }
 0x90f   :  { %v9593_v16 = vadd.f32 %v5420_v39, %v9583_v57  ;;  %v5571_v39 = vld [vmem:[#allocation44 + $0x30] sm:$0xff] }
 0x910   :  { %5615 = vmatpush.msra.mxu0 %v5571_v39 }
 0x911   :  { %6186 = vmatmul.msk.f32.vlgmr.msra.gmra.mxu3 %vm5455_vm15, %v9593_v16 }
 0x961   :  { %v5400_v10 = vpop.f32.mrf.mxu2 }
 0x962   :  { %v9597_v29 = vadd.f32 %v6291_v26, %v5400_v10  ;;  %v5596_v26 = vld [vmem:[#allocation44 + $0xf8] sm:$0xff] }
 0x963   :  { %5626 = vmatpush.msra.mxu1 %v5596_v26  ;;  %v5572_v10 = vld [vmem:[#allocation44 + $0x38] sm:$0xff] }
 0x964   :  { %v5405_v43 = vmul.f32 1.442695, %v9597_v29  ;;  %v5969_v19 = vsub.f32 0.0, %v9597_v29 }
 0x965   :  { %5627 = vmatpush.msra.mxu1 %v5594_v37 }
 0x966   :  { %6381 = vpow2.f32 %v5405_v43  ;;  %v5972_v11 = vmul.f32 1.442695, %v5969_v19 }
 0x967   :  { %5628 = vmatpush.msra.mxu1 %v5592_v54 }
 0x968   :  { %6383 = vpow2.f32 %v5972_v11  ;;  %v5567_v11 = vld [vmem:[#allocation44 + $0x10] sm:$0xff] }
 0x969   :  { %5629 = vmatpush.msra.mxu1 %v5590_v49 }
 0x96b   :  { %5630 = vmatpush.msra.mxu1 %v5588_v58  ;;  %v5599_v58 = vperm.slane %v9630_v15, 0 }
 0x96c   :  { %v6382_v1 = vpop.eup %6381 }
 0x96d   :  { %v5416_v4 = vmul.f32 %v6382_v1, %v5412_v0  ;;  %5631 = vmatpush.msra.mxu1 %v5586_v45  ;;  %v5569_v0 = vld [vmem:[#allocation44 + $0x20] sm:$0xff]  ;;  %v5570_v1 = vld [vmem:[#allocation44 + $0x28] sm:$0xff] }
 0x96e   :  { %v6384_v24 = vpop.eup %6383  ;;  %5616 = vmatpush.msra.mxu0 %v5569_v0 }
 0x96f   :  { %5421 = vrot.lane.b32.xlu0 %v5416_v4, %s7405_s13  ;;  %5632 = vmatpush.msra.mxu1 %v5584_v12  ;;  %v5568_v4 = vld [vmem:[#allocation44 + $0x18] sm:$0xff] }
 0x970   :  { %5617 = vmatpush.msra.mxu0 %v5567_v11  ;;  %v5804_v11 = vld [vmem:[%s10026_s6 + $0x58] sm:$0xff] }
 0x971   :  { %5633 = vmatpush.msra.mxu1 %v5582_v52 }
 0x973   :  { %5634 = vmatpush.msra.mxu1 %v5580_v17  ;;  %v5808_v17 = vld [vmem:[%s10026_s6 + $0x78] sm:$0xff] }
 0x974   :  { %5829 = vmatpush.msra.mxu2 %v5808_v17 }
 0x975   :  { %5635 = vmatpush.msra.mxu1 %v5578_v2 }
 0x977   :  { %5978 = vrot.lane.b32.xlu0 %v6384_v24, %s7405_s13  ;;  %5636 = vmatpush.msra.mxu1 %v5576_v21 }
 0x979   :  { %5637 = vmatpush.msra.mxu1 %v5574_v47  ;;  %v5822_v47 = vld [vmem:[%s10026_s6 + $0xe8] sm:$0xff] }
 0x97b   :  { %5638 = vmatpush.msra.mxu1 %v5572_v10  ;;  %v5805_v10 = vld [vmem:[%s10026_s6 + $0x60] sm:$0xff] }
 0x97d   :  { %5639 = vmatpush.msra.mxu1 %v5570_v1 }
 0x97f   :  { %5640 = vmatpush.msra.mxu1 %v5568_v4  ;;  %v5820_v4 = vld [vmem:[%s10026_s6 + $0xd8] sm:$0xff] }
 0x994   :  { %v5479_v63 = vpop.f32.mrf.mxu3 }
 0x995   :  { %v5480_v56 = vadd.f32 %v5479_v63, %v5449_v18  ;;  %v5565_v18 = vld [vmem:[#allocation44] sm:$0xff]  ;;  %v5566_v63 = vld [vmem:[#allocation44 + $0x8] sm:$0xff] }
 0x996   :  { %5618 = vmatpush.msra.mxu0 %v5565_v18  ;;  %5641 = vmatpush.msra.mxu1 %v5566_v63 }
 0x997   :  { %v5489_v35 = vadd.f32 %v9607_v55, %v5480_v56 }
 0x999   :  { %v5491_v51 = vmul.f32 %v5489_v35, %v7779_v41 }
 0x99b   :  { %v5492_v53 = vrot.slane %v5491_v51, 4 }
 0x99d   :  { %v5493_v40 = vadd.f32 %v5492_v53, %v5491_v51 }
 0x99f   :  { %v5494_v31 = vrot.slane %v5493_v40, 2 }
 0x9a1   :  { %v5495_v8 = vadd.f32 %v5494_v31, %v5493_v40 }
 0x9a3   :  { %v5496_v59 = vrot.slane %v5495_v8, 1 }
 0x9a5   :  { %v5497_v48 = vadd.f32 %v5496_v59, %v5495_v8 }
 0x9a7   :  { %v5498_v32 = vmul.f32 %v5497_v48, %v9990_v34 }
 0x9a9   :  { %v9612_v60 = vsub.f32 %v5489_v35, %v5498_v32  ;;  %v5600_v32 = vperm.slane %v9630_v15, 1 }
 0x9ab   :  { %v5500_v33 = vmul.f32 %v9612_v60, %v9612_v60 }
 0x9ad   :  { %v5501_v7 = vmul.f32 %v5500_v33, %v7779_v41 }
 0x9af   :  { %v5502_v22 = vrot.slane %v5501_v7, 4 }
 0x9b1   :  { %v5503_v50 = vadd.f32 %v5502_v22, %v5501_v7  ;;  %v5824_v22 = vld [vmem:[%s10026_s6 + $0xf8] sm:$0xff] }
 0x9b2   :  { %5852 = vmatpush.msrb.mxu3 %v5824_v22 }
 0x9b3   :  { %v5504_v36 = vrot.slane %v5503_v50, 2 }
 0x9b4   :  { %5853 = vmatpush.msrb.mxu3 %v5823_v25 }
 0x9b5   :  { %v5505_v38 = vadd.f32 %v5504_v36, %v5503_v50  ;;  %v5807_v50 = vld [vmem:[%s10026_s6 + $0x70] sm:$0xff] }
 0x9b6   :  { %5830 = vmatpush.msra.mxu2 %v5807_v50  ;;  %5854 = vmatpush.msrb.mxu3 %v5822_v47  ;;  %v5813_v50 = vld [vmem:[%s10026_s6 + $0xa0] sm:$0xff]  ;;  %v5812_v47 = vld [vmem:[%s10026_s6 + $0x98] sm:$0xff] }
 0x9b7   :  { %v5506_v43 = vrot.slane %v5505_v38, 1 }
 0x9b8   :  { %5831 = vmatpush.msra.mxu2 %v5806_v42  ;;  %v5796_v42 = vld [vmem:[%s10026_s6 + $0x18] sm:$0xff] }
 0x9b9   :  { %v5507_v24 = vadd.f32 %v5506_v43, %v5505_v38  ;;  %v5821_v43 = vld [vmem:[%s10026_s6 + $0xe0] sm:$0xff] }
 0x9ba   :  { %5832 = vmatpush.msra.mxu2 %v5805_v10  ;;  %5855 = vmatpush.msrb.mxu3 %v5821_v43  ;;  %v5795_v43 = vld [vmem:[%s10026_s6 + $0x10] sm:$0xff] }
 0x9bb   :  { %v5508_v56 = vmul.f32 %v5507_v24, %v9990_v34 }
 0x9bc   :  { %5833 = vmatpush.msra.mxu2 %v5804_v11  ;;  %5856 = vmatpush.msrb.mxu3 %v5820_v4 }
 0x9bd   :  { %v5509_v35 = vadd.f32 1e-05, %v5508_v56  ;;  %v5803_v56 = vld [vmem:[%s10026_s6 + $0x50] sm:$0xff] }
 0x9be   :  { %5834 = vmatpush.msra.mxu2 %v5803_v56 }
 0x9bf   :  { %6385 = vrsqrt.f32 %v5509_v35  ;;  %vm5516_vm4 = vweird.f32 %v5509_v35 }
 0x9c5   :  { %v6386_v51 = vpop.eup %6385 }
 0x9c6   :  { %v5511_v53 = vmul.f32 %v6386_v51, %v5509_v35  ;;  %vm5517_vm2 = vweird.f32 %v6386_v51  ;;  %v5819_v35 = vld [vmem:[%s10026_s6 + $0xd0] sm:$0xff] }
 0x9c7   :  { %vm5518_vm5 = vmor %vm5516_vm4, %vm5517_vm2  ;;  %5857 = vmatpush.msrb.mxu3 %v5819_v35 }
 0x9c8   :  { %v5512_v40 = vmul.f32 %v6386_v51, %v5511_v53 }
 0x9ca   :  { %v5513_v30 = vmul.f32 0.5, %v5512_v40 }
 0x9cc   :  { %v5514_v26 = vsub.f32 1.5, %v5513_v30  ;;  %v5802_v30 = vld [vmem:[%s10026_s6 + $0x48] sm:$0xff] }
 0x9cd   :  { %5835 = vmatpush.msra.mxu2 %v5802_v30  ;;  %v5809_v30 = vld [vmem:[%s10026_s6 + $0x80] sm:$0xff] }
 0x9ce   :  { %v5515_v31 = vmul.f32 %v6386_v51, %v5514_v26  ;;  %v5818_v26 = vld [vmem:[%s10026_s6 + $0xc8] sm:$0xff] }
 0x9cf   :  { %5858 = vmatpush.msrb.mxu3 %v5818_v26 }
 0x9d0   :  { %v5519_v37 = vsel %vm5518_vm5, %v6386_v51, %v5515_v31 }
 0x9d1   :  { %v5520_v8 = vmul.f32 %v5519_v37, %v9612_v60 }
 0x9d3   :  { %v5555_v54 = vmul.f32 %v9618_v20, %v5520_v8  ;;  %v5801_v8 = vld [vmem:[%s10026_s6 + $0x40] sm:$0xff] }
 0x9d4   :  { %5836 = vmatpush.msra.mxu2 %v5801_v8 }
 0x9d5   :  { %v5561_v59 = vadd.f32 %v9621_v23, %v5555_v54  ;;  %v5817_v54 = vld [vmem:[%s10026_s6 + $0xc0] sm:$0xff] }
 0x9d6   :  { %5859 = vmatpush.msrb.mxu3 %v5817_v54 }
 0x9d7   :  { %v5563_v62 = vmax.f32 %v5561_v59, 0.0 }
 0x9d9   :  { %5619 = vmatmul.f32.vlgmr.msra.gmra.mxu0 %v5563_v62  ;;  %5642 = vmatmul.f32.vlgmr.msra.gmra.mxu1 %v5563_v62 }
 0x9e1   :  { %v5422_v49 = vpop.permute.xlu0 %5421 }
 0x9e2   :  { %v9626_v48 = vadd.f32 %v5422_v49, %v9597_v29  ;;  %v5800_v49 = vld [vmem:[%s10026_s6 + $0x38] sm:$0xff] }
 0x9e3   :  { %5837 = vmatpush.msra.mxu2 %v5800_v49 }
 0x9e4   :  { %6187 = vmatmul.msk.f32.gmra.mxu3 %vm5455_vm15, %v9626_v48 }
 0xa56   :  { %v5620_v3 = vpop.f32.mrf.mxu0  ;;  %v5643_v45 = vpop.f32.mrf.mxu1 }
 0xa57   :  { %v5621_v60 = vadd.f32 %v5620_v3, %v5599_v58  ;;  %v5644_v46 = vadd.f32 %v5643_v45, %v5600_v32  ;;  %v5816_v3 = vld [vmem:[%s10026_s6 + $0xb8] sm:$0xff] }
 0xa58   :  { %5860 = vmatpush.msrb.mxu3 %v5816_v3 }
 0xa59   :  { %v5649_v12 = vmul.f32 %v5621_v60, %v7779_v41  ;;  %v5650_v33 = vmul.f32 %v5644_v46, %v7779_v41 }
 0xa5b   :  { %v5651_v5 = vrot.slane %v5649_v12, 4  ;;  %v5657_v52 = vrot.slane %v5650_v33, 4 }
 0xa5d   :  { %v5652_v7 = vadd.f32 %v5651_v5, %v5649_v12  ;;  %v5658_v61 = vadd.f32 %v5657_v52, %v5650_v33  ;;  %v5799_v12 = vld [vmem:[%s10026_s6 + $0x30] sm:$0xff] }
 0xa5e   :  { %v5815_v33 = vld [vmem:[%s10026_s6 + $0xb0] sm:$0xff]  ;;  %5838 = vmatpush.msra.mxu2 %v5799_v12 }
 0xa5f   :  { %v5653_v9 = vrot.slane %v5652_v7, 2  ;;  %v5659_v2 = vrot.slane %v5658_v61, 2  ;;  %5861 = vmatpush.msrb.mxu3 %v5815_v33 }
 0xa61   :  { %v5654_v21 = vadd.f32 %v5653_v9, %v5652_v7  ;;  %v5660_v36 = vadd.f32 %v5659_v2, %v5658_v61  ;;  %v5814_v61 = vld [vmem:[%s10026_s6 + $0xa8] sm:$0xff]  ;;  %v5797_v2 = vld [vmem:[%s10026_s6 + $0x20] sm:$0xff] }
 0xa62   :  { %5862 = vmatpush.msrb.mxu3 %v5814_v61 }
 0xa63   :  { %v5655_v38 = vrot.slane %v5654_v21, 1  ;;  %v5661_v39 = vrot.slane %v5660_v36, 1 }
 0xa64   :  { %5863 = vmatpush.msrb.mxu3 %v5813_v50 }
 0xa65   :  { %v5656_v0 = vadd.f32 %v5655_v38, %v5654_v21  ;;  %v5662_v1 = vadd.f32 %v5661_v39, %v5660_v36 }
 0xa66   :  { %5864 = vmatpush.msrb.mxu3 %v5812_v47 }
 0xa67   :  { %v5663_v24 = vmul.f32 %v5656_v0, %v9990_v34  ;;  %v5664_v18 = vmul.f32 %v5662_v1, %v9990_v34  ;;  %v5482_v63 = vpop.f32.mrf.mxu3  ;;  %v5811_v0 = vld [vmem:[%s10026_s6 + $0x90] sm:$0xff] }
 0xa68   :  { %v5483_v51 = vadd.f32 %v5482_v63, %v9605_v28  ;;  %5865 = vmatpush.msrb.mxu3 %v5811_v0 }
 0xa69   :  { %v9655_v53 = vsub.f32 %v5621_v60, %v5663_v24  ;;  %v9657_v40 = vsub.f32 %v5644_v46, %v5664_v18  ;;  %v5794_v24 = vld [vmem:[%s10026_s6 + $0x8] sm:$0xff] }
 0xa6a   :  { %v9662_v31 = vadd.f32 %v9607_v55, %v5483_v51  ;;  %v5810_v18 = vld [vmem:[%s10026_s6 + $0x88] sm:$0xff]  ;;  %v5793_v51 = vld [vmem:[%s10026_s6] sm:$0xff] }
 0xa6b   :  { %v5667_v37 = vmul.f32 %v9655_v53, %v9655_v53  ;;  %v5668_v28 = vmul.f32 %v9657_v40, %v9657_v40  ;;  %5866 = vmatpush.msrb.mxu3 %v5810_v18 }
 0xa6c   :  { %v5521_v59 = vmul.f32 %v9662_v31, %v9984_v14 }
 0xa6d   :  { %v5669_v55 = vmul.f32 %v5667_v37, %v7779_v41  ;;  %v5670_v62 = vmul.f32 %v5668_v28, %v7779_v41  ;;  %v5798_v41 = vld [vmem:[%s10026_s6 + $0x28] sm:$0xff]  ;;  %5867 = vmatpush.msrb.mxu3 %v5809_v30 }
 0xa6e   :  { %v5522_v45 = vrot.slane %v5521_v59, 4  ;;  %5839 = vmatpush.msra.mxu2 %v5798_v41 }
 0xa6f   :  { %v5671_v60 = vrot.slane %v5669_v55, 4  ;;  %v5677_v46 = vrot.slane %v5670_v62, 4 }
 0xa70   :  { %v5523_v5 = vadd.f32 %v5522_v45, %v5521_v59  ;;  %5840 = vmatpush.msra.mxu2 %v5797_v2 }
 0xa71   :  { %v5672_v52 = vadd.f32 %v5671_v60, %v5669_v55  ;;  %v5678_v7 = vadd.f32 %v5677_v46, %v5670_v62 }
 0xa72   :  { %v5524_v17 = vrot.slane %v5523_v5, 2  ;;  %5841 = vmatpush.msra.mxu2 %v5796_v42 }
 0xa73   :  { %v5673_v22 = vrot.slane %v5672_v52, 2  ;;  %v5679_v9 = vrot.slane %v5678_v7, 2 }
 0xa74   :  { %v5525_v25 = vadd.f32 %v5524_v17, %v5523_v5  ;;  %5842 = vmatpush.msra.mxu2 %v5795_v43 }
 0xa75   :  { %v5674_v21 = vadd.f32 %v5673_v22, %v5672_v52  ;;  %v5680_v36 = vadd.f32 %v5679_v9, %v5678_v7  ;;  %v9699_v7 = vld [vmem:[#allocation47] sm:$0x3]  ;;  %v9701_v22 = vld [vmem:[#allocation49] sm:$0x3] }
 0xa76   :  { %v5526_v38 = vrot.slane %v5525_v25, 1  ;;  %5843 = vmatpush.msra.mxu2 %v5794_v24  ;;  %v5771_v2 = vperm.slane %v9699_v7, 0  ;;  %v5781_v47 = vperm.slane %v9701_v22, 0 }
 0xa77   :  { %v5675_v39 = vrot.slane %v5674_v21, 1  ;;  %v5681_v10 = vrot.slane %v5680_v36, 1 }
 0xa78   :  { %v5527_v1 = vadd.f32 %v5526_v38, %v5525_v25  ;;  %5844 = vmatpush.msra.mxu2 %v5793_v51 }
 0xa79   :  { %v5676_v11 = vadd.f32 %v5675_v39, %v5674_v21  ;;  %v5682_v4 = vadd.f32 %v5681_v10, %v5680_v36  ;;  %v5772_v21 = vperm.slane %v9699_v7, 1  ;;  %v5782_v10 = vperm.slane %v9701_v22, 1 }
 0xa7a   :  { %v5528_v63 = vmul.f32 %v5527_v1, %v9997_v44 }
 0xa7b   :  { %v5683_v56 = vmul.f32 %v5676_v11, %v9990_v34  ;;  %v5684_v35 = vmul.f32 %v5682_v4, %v9990_v34 }
 0xa7c   :  { %v9694_v26 = vsub.f32 %v9662_v31, %v5528_v63 }
 0xa7d   :  { %v5685_v37 = vadd.f32 1e-05, %v5683_v56  ;;  %v5686_v28 = vadd.f32 1e-05, %v5684_v35 }
 0xa7e   :  { %v5530_v8 = vmul.f32 %v9694_v26, %v9694_v26 }
 0xa7f   :  { %6387 = vrsqrt.f32 %v5685_v37  ;;  %vm5693_vm8 = vweird.f32 %v5685_v37  ;;  %vm5703_vm10 = vweird.f32 %v5686_v28 }
 0xa80   :  { %6389 = vrsqrt.f32 %v5686_v28  ;;  %v5531_v54 = vmul.f32 %v5530_v8, %v9984_v14 }
 0xa82   :  { %v5532_v59 = vrot.slane %v5531_v54, 4 }
 0xa84   :  { %v5533_v55 = vadd.f32 %v5532_v59, %v5531_v54  ;;  %v9721_v54 = vld [vmem:[#allocation50] ss:$0 sm:$0xff] }
 0xa85   :  { %v6388_v62 = vpop.eup %6387 }
 0xa86   :  { %v6390_v34 = vpop.eup %6389  ;;  %v5688_v49 = vmul.f32 %v6388_v62, %v5685_v37  ;;  %v5534_v3 = vrot.slane %v5533_v55, 2  ;;  %vm5694_vm6 = vweird.f32 %v6388_v62 }
 0xa87   :  { %v5698_v45 = vmul.f32 %v6390_v34, %v5686_v28  ;;  %vm5704_vm7 = vweird.f32 %v6390_v34  ;;  %vm5695_vm9 = vmor %vm5693_vm8, %vm5694_vm6 }
 0xa88   :  { %v5689_v31 = vmul.f32 %v6388_v62, %v5688_v49  ;;  %v5535_v60 = vadd.f32 %v5534_v3, %v5533_v55  ;;  %vm5705_vm11 = vmor %vm5703_vm10, %vm5704_vm7 }
 0xa89   :  { %v5699_v46 = vmul.f32 %v6390_v34, %v5698_v45 }
 0xa8a   :  { %v5690_v12 = vmul.f32 0.5, %v5689_v31  ;;  %v5536_v33 = vrot.slane %v5535_v60, 1 }
 0xa8b   :  { %v5700_v5 = vmul.f32 0.5, %v5699_v46 }
 0xa8c   :  { %v5691_v52 = vsub.f32 1.5, %v5690_v12  ;;  %v5537_v41 = vadd.f32 %v5536_v33, %v5535_v60 }
 0xa8d   :  { %v5701_v61 = vsub.f32 1.5, %v5700_v5 }
 0xa8e   :  { %v5692_v17 = vmul.f32 %v6388_v62, %v5691_v52  ;;  %v5538_v9 = vmul.f32 %v5537_v41, %v9997_v44  ;;  %v5979_v41 = vpop.permute.xlu0 %5978 }
 0xa8f   :  { %v5702_v50 = vmul.f32 %v6390_v34, %v5701_v61  ;;  %v5967_v61 = vsub.f32 %v9626_v48, %v9597_v29 }
 0xa90   :  { %v5696_v25 = vsel %vm5695_vm9, %v6388_v62, %v5692_v17  ;;  %v5539_v36 = vadd.f32 1e-05, %v5538_v9  ;;  %vm4899_vm9 = vcmask 0  }
 0xa91   :  { %v5707_v42 = vmul.f32 %v5696_v25, %v9655_v53  ;;  %v5706_v38 = vsel %vm5705_vm11, %v6390_v34, %v5702_v50  ;;  %v5983_v9 = vmul.f32 %v5979_v41, %v5967_v61 }
 0xa92   :  { %v5708_v39 = vmul.f32 %v5706_v38, %v9657_v40  ;;  %6391 = vrsqrt.f32 %v5539_v36  ;;  %vm5546_vm13 = vweird.f32 %v5539_v36 }
 0xa93   :  { %v5775_v43 = vmul.f32 %v5771_v2, %v5707_v42  ;;  %v5987_v42 = vmul.f32 0.5, %v5983_v9 }
 0xa94   :  { %v5776_v0 = vmul.f32 %v5772_v21, %v5708_v39 }
 0xa95   :  { %v5785_v1 = vadd.f32 %v5781_v47, %v5775_v43 }
 0xa96   :  { %v5786_v53 = vadd.f32 %v5782_v10, %v5776_v0 }
 0xa97   :  { %v5789_v11 = vmax.f32 %v5785_v1, 0.0 }
 0xa98   :  { %v6392_v4 = vpop.eup %6391  ;;  %v5790_v24 = vmax.f32 %v5786_v53, 0.0 }
 0xa99   :  { %v5541_v18 = vmul.f32 %v6392_v4, %v5539_v36  ;;  %5845 = vmatmul.f32.vlgmr.msra.gmra.mxu2 %v5789_v11  ;;  %vm5547_vm12 = vweird.f32 %v6392_v4  ;;  %v5989_v11 = vmul.f32 %v5987_v42, %v5983_v9 }
 0xa9a   :  { %5868 = vmatmul.f32.vlgmr.msrb.gmra.mxu3 %v5790_v24  ;;  %vm5548_vm14 = vmor %vm5546_vm13, %vm5547_vm12 }
 0xa9b   :  { %v5542_v40 = vmul.f32 %v6392_v4, %v5541_v18 }
 0xa9d   :  { %v5543_v63 = vmul.f32 0.5, %v5542_v40 }
 0xa9f   :  { %v5544_v56 = vsub.f32 1.5, %v5543_v63 }
 0xaa1   :  { %v5545_v35 = vmul.f32 %v6392_v4, %v5544_v56 }
 0xaa3   :  { %v5549_v51 = vsel %vm5548_vm14, %v6392_v4, %v5545_v35 }
 0xaa4   :  { %v5550_v30 = vmul.f32 %v5549_v51, %v9694_v26 }
 0xaa6   :  { %v5556_v37 = vmul.f32 %v9618_v20, %v5550_v30  ;;  %v4867_v20 = vsub.f32 0.0, %v9466_v6 }
 0xaa8   :  { %v5562_v28 = vadd.f32 %v9621_v23, %v5556_v37  ;;  %v4868_v23 = vmul.f32 1.442695, %v4867_v20 }
 0xaaa   :  { %v5564_v8 = vmax.f32 %v5562_v28, 0.0 }
 0xaac   :  { %5622 = vmatmul.f32.gmra.mxu0 %v5564_v8  ;;  %5645 = vmatmul.f32.gmra.mxu1 %v5564_v8 }
 0xb1c   :  { %v5846_v59 = vpop.f32.mrf.mxu2 }
 0xb1d   :  { %v5847_v55 = vadd.f32 %v9721_v54, %v5846_v59  ;;  %v5869_v62 = vpop.f32.mrf.mxu3 }
 0xb1f   :  { %v9724_v34 = vadd.f32 %v5869_v62, %v5847_v55 }
 0xb21   :  { %v5877_v49 = vsub.f32 0.0, %v9724_v34 }
 0xb23   :  { %v5879_v26 = vmul.f32 1.442695, %v5877_v49 }
 0xb25   :  { %6393 = vpow2.f32 %v5879_v26 }
 0xb26   :  { %6395 = vpow2.f32 %v4868_v23 }
 0xb29   :  { %v5623_v3 = vpop.f32.mrf.mxu0  ;;  %v5646_v45 = vpop.f32.mrf.mxu1 }
 0xb2a   :  { %v5624_v31 = vadd.f32 %v5623_v3, %v5599_v58  ;;  %v5647_v60 = vadd.f32 %v5646_v45, %v5600_v32 }
 0xb2b   :  { %v6394_v46 = vpop.eup %6393 }
 0xb2c   :  { %v5709_v12 = vmul.f32 %v5624_v31, %v9984_v14  ;;  %v5710_v33 = vmul.f32 %v5647_v60, %v9984_v14  ;;  %5885 = vrot.lane.b32.xlu2 %v6394_v46, %s7406_s3  ;;  %v6396_v50 = vpop.eup %6395 }
 0xb2e   :  { %v5711_v5 = vrot.slane %v5709_v12, 4  ;;  %v5717_v52 = vrot.slane %v5710_v33, 4 }
 0xb30   :  { %v5712_v17 = vadd.f32 %v5711_v5, %v5709_v12  ;;  %v5718_v58 = vadd.f32 %v5717_v52, %v5710_v33 }
 0xb32   :  { %v5713_v15 = vrot.slane %v5712_v17, 2  ;;  %v5719_v32 = vrot.slane %v5718_v58, 2 }
 0xb34   :  { %v5714_v25 = vadd.f32 %v5713_v15, %v5712_v17  ;;  %v5720_v36 = vadd.f32 %v5719_v32, %v5718_v58  ;;  %4871 = vrot.lane.b32.xlu2 %v6396_v50, %s7404_s19 }
 0xb36   :  { %v5715_v38 = vrot.slane %v5714_v25, 1  ;;  %v5721_v39 = vrot.slane %v5720_v36, 1 }
 0xb38   :  { %v5716_v43 = vadd.f32 %v5715_v38, %v5714_v25  ;;  %v5722_v0 = vadd.f32 %v5721_v39, %v5720_v36 }
 0xb3a   :  { %v5723_v1 = vmul.f32 %v5716_v43, %v9997_v44  ;;  %v5724_v53 = vmul.f32 %v5722_v0, %v9997_v44 }
 0xb3c   :  { %v5725_v4 = vsub.f32 %v5624_v31, %v5723_v1  ;;  %v5726_v24 = vsub.f32 %v5647_v60, %v5724_v53  ;;  %5994 = vrot.lane.b32.xlu2 %v5989_v11, %s7376_s11 }
 0xb3e   :  { %v5727_v18 = vmul.f32 %v5725_v4, %v5725_v4  ;;  %v5728_v40 = vmul.f32 %v5726_v24, %v5726_v24 }
 0xb40   :  { %v5729_v63 = vmul.f32 %v5727_v18, %v9984_v14  ;;  %v5730_v56 = vmul.f32 %v5728_v40, %v9984_v14 }
 0xb42   :  { %v5731_v35 = vrot.slane %v5729_v63, 4  ;;  %v5737_v51 = vrot.slane %v5730_v56, 4 }
 0xb44   :  { %v5732_v30 = vadd.f32 %v5731_v35, %v5729_v63  ;;  %v5738_v37 = vadd.f32 %v5737_v51, %v5730_v56  ;;  %v4865_v56 = vld [vmem:[%s10021_s24] sm:$0xff] }
 0xb46   :  { %v5733_v28 = vrot.slane %v5732_v30, 2  ;;  %v5739_v8 = vrot.slane %v5738_v37, 2 }
 0xb48   :  { %v5734_v59 = vadd.f32 %v5733_v28, %v5732_v30  ;;  %v5740_v55 = vadd.f32 %v5739_v8, %v5738_v37  ;;  %v4866_v30 = vsub.f32 %v4865_v56, %v9466_v6 }
 0xb4a   :  { %v5735_v62 = vrot.slane %v5734_v59, 1  ;;  %v5741_v26 = vrot.slane %v5740_v55, 1 }
 0xb4c   :  { %v5736_v23 = vadd.f32 %v5735_v62, %v5734_v59  ;;  %v5742_v3 = vadd.f32 %v5741_v26, %v5740_v55  ;;  %v6192_v62 = vadd.f32 -0.9189385, %v5969_v19 }
 0xb4e   :  { %v5743_v45 = vmul.f32 %v5736_v23, %v9997_v44  ;;  %v5744_v31 = vmul.f32 %v5742_v3, %v9997_v44  ;;  %v4914_v23 = vadd.f32 1.4189385, %v9469_v13 }
 0xb50   :  { %v5745_v60 = vadd.f32 1e-05, %v5743_v45  ;;  %v5746_v46 = vadd.f32 1e-05, %v5744_v31 }
 0xb52   :  { %6397 = vrsqrt.f32 %v5745_v60  ;;  %vm5753_vm5 = vweird.f32 %v5745_v60  ;;  %vm5763_vm7 = vweird.f32 %v5746_v46 }
 0xb53   :  { %6399 = vrsqrt.f32 %v5746_v46 }
 0xb58   :  { %v6398_v14 = vpop.eup %6397 }
 0xb59   :  { %v6400_v12 = vpop.eup %6399  ;;  %v5748_v33 = vmul.f32 %v6398_v14, %v5745_v60  ;;  %vm5754_vm2 = vweird.f32 %v6398_v14 }
 0xb5a   :  { %v5758_v5 = vmul.f32 %v6400_v12, %v5746_v46  ;;  %vm5764_vm4 = vweird.f32 %v6400_v12  ;;  %vm5755_vm6 = vmor %vm5753_vm5, %vm5754_vm2 }
 0xb5b   :  { %v5749_v52 = vmul.f32 %v6398_v14, %v5748_v33  ;;  %vm5765_vm8 = vmor %vm5763_vm7, %vm5764_vm4 }
 0xb5c   :  { %v5759_v41 = vmul.f32 %v6400_v12, %v5758_v5  ;;  %v6188_v5 = vadd.f32 -0.9189385, %v5877_v49 }
 0xb5d   :  { %v5750_v61 = vmul.f32 0.5, %v5749_v52 }
 0xb5e   :  { %v5760_v17 = vmul.f32 0.5, %v5759_v41 }
 0xb5f   :  { %v5751_v58 = vsub.f32 1.5, %v5750_v61  ;;  %v6172_v61 = vadd.f32 -0.9189385, %v4867_v20 }
 0xb60   :  { %v5761_v9 = vsub.f32 1.5, %v5760_v17 }
 0xb61   :  { %v5752_v15 = vmul.f32 %v6398_v14, %v5751_v58  ;;  %v5924_v58 = vld [vmem:[#allocation7] sm:$0x1] }
 0xb62   :  { %v5762_v44 = vmul.f32 %v6400_v12, %v5761_v9  ;;  %v5930_v9 = vsub.f32 0.0, %v5924_v58 }
 0xb63   :  { %v5756_v32 = vsel %vm5755_vm6, %v6398_v14, %v5752_v15  ;;  %v5966_v14 = vsub.f32 %v9593_v16, %v9583_v57 }
 0xb64   :  { %v5767_v50 = vmul.f32 %v5756_v32, %v5725_v4  ;;  %v5766_v25 = vsel %vm5765_vm8, %v6400_v12, %v5762_v44  ;;  %v5931_v15 = vmul.f32 1.442695, %v5930_v9  ;;  %v6296_v44 = vld [vmem:[#allocation5] ss:$0 sm:$0xff] }
 0xb65   :  { %v5768_v36 = vmul.f32 %v5766_v25, %v5726_v24  ;;  %v5929_v56 = vsub.f32 %v9509_v27, %v6296_v44 }
 0xb66   :  { %v5777_v42 = vmul.f32 %v5771_v2, %v5767_v50  ;;  %v6413_v50 = vld [vmem:[%s10021_s24] sm:$0xff] }
 0xb67   :  { %v5778_v38 = vmul.f32 %v5772_v21, %v5768_v36  ;;  %v5968_v21 = vsub.f32 0.0, %v9583_v57  ;;  %v5928_v25 = vsub.f32 %v6413_v50, %v6296_v44 }
 0xb68   :  { %v5787_v39 = vadd.f32 %v5781_v47, %v5777_v42 }
 0xb69   :  { %v5788_v43 = vadd.f32 %v5782_v10, %v5778_v38  ;;  %v5970_v22 = vmul.f32 1.442695, %v5968_v21  ;;  %v6190_v38 = vadd.f32 -0.9189385, %v5930_v9 }
 0xb6a   :  { %v5791_v0 = vmax.f32 %v5787_v39, 0.0 }
 0xb6b   :  { %v5792_v1 = vmax.f32 %v5788_v43, 0.0  ;;  %v5944_v20 = vperm.slane %v6190_v38, 0 }
 0xb6c   :  { %5848 = vmatmul.f32.gmra.mxu2 %v5791_v0 }
 0xb6d   :  { %5871 = vmatmul.f32.gmra.mxu3 %v5792_v1 }
 0xb86   :  { %v5886_v10 = vpop.permute.xlu2 %5885 }
 0xb8e   :  { %v4872_v51 = vpop.permute.xlu2 %4871 }
 0xb8f   :  { %v4874_v28 = vmul.f32 %v4872_v51, %v4866_v30 }
 0xb91   :  { %v4876_v8 = vmul.f32 0.5, %v4874_v28 }
 0xb93   :  { %v4877_v59 = vmul.f32 %v4876_v8, %v4874_v28  ;;  %v6414_v8 = vld [vmem:[%s9941_s30] sm:$0xff] }
 0xb96   :  { %v5995_v55 = vpop.permute.xlu2 %5994 }
 0xb97   :  { %v5999_v26 = vsub.f32 %v6192_v62, %v5995_v55 }
 0xbef   :  { %v5849_v53 = vpop.f32.mrf.mxu2 }
 0xbf0   :  { %v5850_v11 = vadd.f32 %v9721_v54, %v5849_v53  ;;  %v5872_v4 = vpop.f32.mrf.mxu3  ;;  %v6412_v54 = vld [vmem:[#allocation2] sm:$0xff] }
 0xbf1   :  { %v5875_v18 = vsub.f32 %v6412_v54, %v9724_v34 }
 0xbf2   :  { %v9758_v24 = vadd.f32 %v5872_v4, %v5850_v11  ;;  %v6191_v4 = vadd.f32 -0.9189385, %v5968_v21 }
 0xbf3   :  { %v5891_v40 = vmul.f32 %v5886_v10, %v5875_v18 }
 0xbf4   :  { %v5878_v7 = vsub.f32 0.0, %v9758_v24  ;;  %v5876_v3 = vsub.f32 %v6412_v54, %v9758_v24 }
 0xbf5   :  { %v5895_v35 = vmul.f32 0.5, %v5891_v40 }
 0xbf6   :  { %v5881_v2 = vmul.f32 1.442695, %v5878_v7  ;;  %v6189_v10 = vadd.f32 -0.9189385, %v5878_v7 }
 0xbf7   :  { %v5897_v37 = vmul.f32 %v5895_v35, %v5891_v40 }
 0xbf8   :  { %6401 = vpow2.f32 %v5881_v2 }
 0xbf9   :  { %6403 = vpow2.f32 %v5970_v22 }
 0xbfa   :  { %6405 = vpow2.f32 %v5931_v15 }
 0xbfe   :  { %v6402_v47 = vpop.eup %6401 }
 0xbff   :  { %5887 = vrot.lane.b32.xlu1 %v6402_v47, %s7406_s3  ;;  %v6404_v63 = vpop.eup %6403  ;;  %v5955_v47 = vmul.f32 0.5, %v9626_v48 }
 0xc00   :  { %v6406_v32 = vpop.eup %6405 }
 0xc01   :  { %v5934_v49 = vperm.slane %v6406_v32, 0 }
 0xc03   :  { %v5936_v36 = vmul.f32 %v5934_v49, %v5928_v25  ;;  %v5937_v35 = vmul.f32 %v5934_v49, %v5929_v56 }
 0xc05   :  { %v5939_v42 = vmul.f32 0.5, %v5936_v36  ;;  %v5940_v51 = vmul.f32 0.5, %v5937_v35 }
 0xc07   :  { %5976 = vrot.lane.b32.xlu1 %v6404_v63, %s7405_s13  ;;  %v5941_v43 = vmul.f32 %v5939_v42, %v5936_v36  ;;  %v5957_v63 = vmul.f32 %v5955_v47, %v9626_v48  ;;  %v5942_v30 = vmul.f32 %v5940_v51, %v5937_v35 }
 0xc09   :  { %v5946_v0 = vsub.f32 %v5944_v20, %v5941_v43  ;;  %v5959_v57 = vsub.f32 -0.9189385, %v5957_v63 }
 0xc0b   :  { %v5948_v1 = vsel %vm4887_vm3, %v5946_v0, 0.0  ;;  %v5963_v21 = vsel %vm5455_vm15, %v5959_v57, 0.0 }
 0xc0f   :  { %5901 = vrot.lane.b32.xlu1 %v5897_v37, %s7407_s9  ;;  %v5947_v37 = vsub.f32 %v5944_v20, %v5942_v30 }
 0xc11   :  { %v5951_v48 = vsel %vm4887_vm3, %v5947_v37, 0.0 }
 0xc17   :  { %4879 = vrot.lane.b32.xlu1 %v4877_v59, %s7403_s28 }
 0xc1f   :  { %6004 = vrot.lane.b32.xlu1 %v5999_v26, %s7405_s13 }
 0xc27   :  { %4916 = vrot.lane.b32.xlu1 %v4914_v23, %s7404_s19 }
 0xc71   :  { %v5888_v45 = vpop.permute.xlu1 %5887 }
 0xc72   :  { %v5892_v31 = vmul.f32 %v5888_v45, %v5876_v3 }
 0xc74   :  { %v5896_v60 = vmul.f32 0.5, %v5892_v31 }
 0xc76   :  { %v5898_v46 = vmul.f32 %v5896_v60, %v5892_v31 }
 0xc78   :  { %5903 = vrot.lane.b32.xlu0 %v5898_v46, %s7407_s9  ;;  %v5954_v46 = vmul.f32 0.5, %v9593_v16 }
 0xc79   :  { %v5977_v12 = vpop.permute.xlu1 %5976 }
 0xc7a   :  { %v5982_v29 = vmul.f32 %v5977_v12, %v5966_v14 }
 0xc7c   :  { %v5986_v19 = vmul.f32 0.5, %v5982_v29 }
 0xc7e   :  { %v5988_v33 = vmul.f32 %v5986_v19, %v5982_v29  ;;  %v5956_v29 = vmul.f32 %v5954_v46, %v9593_v16 }
 0xc80   :  { %5992 = vrot.lane.b32.xlu0 %v5988_v33, %s7376_s11  ;;  %v5958_v19 = vsub.f32 -0.9189385, %v5956_v29  ;;  %s7408_s11 = smov [#allocation56]  }
 0xc81   :  { %v5902_v13 = vpop.permute.xlu1 %5901  ;;  %s6078_s26 = sshll.u32 %s7408_s11, 4  ;;  %s6079_s26 = int_to_ptr.vmem [resolvable:$true] %s6078_s26 }
 0xc82   :  { %v5907_v52 = vsub.f32 %v6188_v5, %v5902_v13  ;;  %v5960_v33 = vsel %vm5455_vm15, %v5958_v19, 0.0  ;;  %v6415_v5 = vld [vmem:[%s9940_s18] sm:$0xff] }
 0xc88   :  { %5911 = vrot.lane.b32.xlu0 %v5907_v52, %s7406_s3 }
 0xc89   :  { %v4880_v41 = vpop.permute.xlu1 %4879 }
 0xc8a   :  { %v4882_v17 = vsub.f32 %v6172_v61, %v4880_v41 }
 0xc90   :  { %4884 = vrot.lane.b32.xlu0 %v4882_v17, %s7404_s19 }
 0xc91   :  { %v6005_v34 = vpop.permute.xlu1 %6004 }
 0xc92   :  { %v6011_v53 = vsel %vm5455_vm15, %v6005_v34, 0.0 }
 0xc99   :  { %v4917_v39 = vpop.permute.xlu1 %4916 }
 0xc9a   :  { %v4919_v6 = vsel %vm4887_vm3, %v4917_v39, 0.0 }
 0xcba   :  { %4920 = vadd.xlane.f32.xlu0 %v4919_v6 }
 0xcc2   :  { %5949 = vadd.xlane.f32.xlu0 %v5948_v1 }
 0xcca   :  { %6012 = vadd.xlane.f32.xlu0 %v6011_v53 }
 0xcea   :  { %v5904_v11 = vpop.permute.xlu0 %5903 }
 0xceb   :  { %v5908_v18 = vsub.f32 %v6189_v10, %v5904_v11 }
 0xcf2   :  { %v5993_v2 = vpop.permute.xlu0 %5992 }
 0xcf3   :  { %v5998_v22 = vsub.f32 %v6191_v4, %v5993_v2 }
 0xcf5   :  { %6002 = vrot.lane.b32.xlu2 %v5998_v22, %s7405_s13 }
 0xcfa   :  { %v5912_v54 = vpop.permute.xlu0 %5911 }
 0xcfb   :  { %v5917_v40 = vsel %vm723_vm0, %v5912_v54, 0.0 }
 0xcfc   :  { %5918 = vadd.xlane.f32.xlu1 %v5917_v40 }
 0xcfd   :  { %5913 = vrot.lane.b32.xlu2 %v5908_v18, %s7406_s3 }
 0xd02   :  { %v4885_v24 = vpop.permute.xlu0 %4884 }
 0xd03   :  { %v4888_v7 = vsel %vm4887_vm3, %v4885_v24, 0.0 }
 0xd04   :  { %5964 = vadd.xlane.f32.xlu1 %v5963_v21 }
 0xd26   :  { %4889 = vadd.xlane.f32.xlu2 %v4888_v7 }
 0xd2d   :  { %v4921_v28 = vpop.xlane.xlu0 %4920 }
 0xd2e   :  { %v4922_v59 = vmul.f32 %v6414_v8, %v4921_v28  ;;  %5952 = vadd.xlane.f32.xlu2 %v5951_v48 }
 0xd30   :  { %v4923_v55 = vsel %vm625_vm1, %v4922_v59, 0.0 }
 0xd31   :  { %v4924_v62 = vrot.slane %v4923_v55, 4 }
 0xd33   :  { %v4925_v26 = vadd.f32 %v4924_v62, %v4923_v55 }
 0xd35   :  { %v4926_v23 = vrot.slane %v4925_v26, 2 }
 0xd37   :  { %v4927_v27 = vadd.f32 %v4926_v23, %v4925_v26 }
 0xd39   :  { %v4928_v3 = vrot.slane %v4927_v27, 1 }
 0xd3b   :  { %v4929_v45 = vadd.f32 %v4928_v3, %v4927_v27 }
 0xd3d   :  { %4930 = vst.msk [vmem:[#allocation55] sm:$0x1] %vm4899_vm9, %v4929_v45 }
 0xd4f   :  { %v6003_v31 = vpop.permute.xlu2 %6002 }
 0xd50   :  { %v6008_v60 = vsel %vm5455_vm15, %v6003_v31, 0.0 }
 0xd51   :  { %6009 = vadd.xlane.f32.xlu1 %v6008_v60 }
 0xd57   :  { %v5914_v14 = vpop.permute.xlu2 %5913 }
 0xd58   :  { %v5920_v12 = vsel %vm723_vm0, %v5914_v14, 0.0 }
 0xd59   :  { %5921 = vadd.xlane.f32.xlu2 %v5920_v12 }
 0xd61   :  { %5961 = vadd.xlane.f32.xlu2 %v5960_v33 }
 0xd99   :  { %v4890_v13 = vpop.xlane.xlu2 %4889 }
 0xd9a   :  { %v4891_v52 = vmul.f32 %v6415_v5, %v4890_v13 }
 0xd9c   :  { %v4892_v41 = vsel %vm625_vm1, %v4891_v52, 0.0 }
 0xd9d   :  { %v4893_v61 = vrot.slane %v4892_v41, 4 }
 0xd9f   :  { %v4894_v17 = vadd.f32 %v4893_v61, %v4892_v41 }
 0xda1   :  { %v4895_v58 = vrot.slane %v4894_v17, 2 }
 0xda3   :  { %v4896_v9 = vadd.f32 %v4895_v58, %v4894_v17 }
 0xda5   :  { %v4897_v16 = vrot.slane %v4896_v9, 1 }
 0xda7   :  { %v4898_v15 = vadd.f32 %v4897_v16, %v4896_v9 }
 0xda9   :  { %4900 = vst.msk [vmem:[#allocation56] sm:$0x1] %vm4899_vm9, %v4898_v15 }
 0xdaa   :  { %7207 = shalt.err (!%p7204_p10)
}
 0xdab   :  { %6083 = dma.vmem_to_hbm [thread:$0]  %s6079_s26, 16, %s6081_s14, [#allocation57]   ;;  %v5919_v44 = vpop.xlane.xlu1 %5918  ;;  %v5953_v32 = vpop.xlane.xlu2 %5952 }
 0xdac   :  { %v5950_v50 = vpop.xlane.xlu0 %5949  ;;  %s7409_s27 = smov [#allocation53]   ;;  %s6058_s2 = sshll.u32 %s7630_s12, 4  ;;  %s6059_s2 = int_to_ptr.hbm [resolvable:$true] %s6058_s2 }
 0xdad   :  { %v6014_v39 = vadd.f32 %v5950_v50, %v5919_v44  ;;  %s9820_s21 = sshll.u32 %s7409_s27, 4  ;;  %s7410_s29 = smov [#allocation55]   ;;  %s6057_s21 = int_to_ptr.vmem [resolvable:$true] %s9820_s21 }
 0xdae   :  { %s9823_s20 = sshll.u32 %s7410_s29, 4  ;;  %s6069_s15 = sshll.u32 %s7635_s5, 4  ;;  %s6068_s20 = int_to_ptr.vmem [resolvable:$true] %s9823_s20  ;;  %s6070_s15 = int_to_ptr.hbm [resolvable:$true] %s6069_s15 }
 0xdaf   :  { %s7411_s16 = smov [#allocation52]   ;;  %s6047_s18 = sshll.u32 %s7625_s8, 4  ;;  %s6048_s18 = int_to_ptr.hbm [resolvable:$true] %s6047_s18 }
 0xdb0   :  { %s9829_s25 = sshll.u32 %s7411_s16, 4  ;;  %s7220_s30 = sshra.s32 %s6059_s2, 4  ;;  %s7221_s30 = int_to_ptr.hbm [resolvable:$true] %s7220_s30  ;;  %s6046_s25 = int_to_ptr.vmem [resolvable:$true] %s9829_s25 }
 0xdb1   :  { %s7222_s23 = scalar_lea.hbm %s7221_s30, 1  ;;  %s7224_s24 = scalar_lea.hbm %s7630_s12, 1 }
 0xdb2   :  { %p7223_p11 = scmp.ne.s32.totalorder %s7221_s30, %s7222_s23  ;;  %p7225_p12 = scmp.lt.s32.totalorder %s7221_s30, %s7630_s12 }
 0xdb3   :  { %v5965_v49 = vpop.xlane.xlu1 %5964  ;;  %p7226_p13 = scmp.lt.s32.totalorder %s7224_s24, %s7222_s23 }
 0xdb4   :  { %v6013_v42 = vpop.xlane.xlu0 %6012 }
 0xdb5   :  { %p7227_p0 = por %p7226_p13, %p7225_p12 }
 0xdb7   :  { %p7228_p1 = pnand %p7227_p0, %p7223_p11 }
 0xdc4   :  { %v6010_v1 = vpop.xlane.xlu1 %6009 }
 0xdcc   :  { %v5922_v25 = vpop.xlane.xlu2 %5921 }
 0xdcd   :  { %v6015_v34 = vadd.f32 %v5953_v32, %v5922_v25 }
 0xdcf   :  { %v6017_v36 = vadd.f32 %v6015_v34, %v5965_v49 }
 0xdd1   :  { %v6019_v38 = vsub.f32 %v6017_v36, %v6013_v42 }
 0xdd3   :  { %v6021_v43 = vsub.f32 0.0, %v6019_v38 }
 0xdd4   :  { %v5962_v6 = vpop.xlane.xlu2 %5961 }
 0xdd5   :  { %v6031_v20 = vmul.f32 %v6414_v8, %v6021_v43  ;;  %v6016_v0 = vadd.f32 %v6014_v39, %v5962_v6 }
 0xdd7   :  { %v6032_v53 = vsel %vm625_vm1, %v6031_v20, 0.0  ;;  %v6018_v11 = vsub.f32 %v6016_v0, %v6010_v1 }
 0xdd8   :  { %v6033_v4 = vrot.slane %v6032_v53, 4 }
 0xdd9   :  { %v6020_v2 = vsub.f32 0.0, %v6018_v11 }
 0xdda   :  { %v6034_v22 = vadd.f32 %v6033_v4, %v6032_v53 }
 0xddb   :  { %v6022_v47 = vmul.f32 %v6415_v5, %v6020_v2 }
 0xddc   :  { %v6035_v10 = vrot.slane %v6034_v22, 2 }
 0xddd   :  { %v6023_v54 = vsel %vm625_vm1, %v6022_v47, 0.0 }
 0xdde   :  { %v6024_v18 = vrot.slane %v6023_v54, 4  ;;  %v6036_v40 = vadd.f32 %v6035_v10, %v6034_v22 }
 0xde0   :  { %v6025_v63 = vadd.f32 %v6024_v18, %v6023_v54  ;;  %v6037_v57 = vrot.slane %v6036_v40, 1 }
 0xde2   :  { %v6026_v21 = vrot.slane %v6025_v63, 2  ;;  %v6038_v56 = vadd.f32 %v6037_v57, %v6036_v40 }
 0xde4   :  { %6039 = vst.msk [vmem:[#allocation53] sm:$0x1] %vm4899_vm9, %v6038_v56  ;;  %v6027_v35 = vadd.f32 %v6026_v21, %v6025_v63 }
 0xde5   :  { %7231 = shalt.err (!%p7228_p1)
}
 0xde6   :  { %6061 = dma.vmem_to_hbm [thread:$0]  %s6057_s21, 16, %s6059_s2, [#allocation54]   ;;  %v6028_v51 = vrot.slane %v6027_v35, 1 }
 0xde7   :  { %s7244_s0 = sshra.s32 %s6070_s15, 4  ;;  %s7248_s19 = scalar_lea.hbm %s7635_s5, 1  ;;  %s7245_s0 = int_to_ptr.hbm [resolvable:$true] %s7244_s0 }
 0xde8   :  { %s7246_s28 = scalar_lea.hbm %s7245_s0, 1  ;;  %p7249_p3 = scmp.lt.s32.totalorder %s7245_s0, %s7635_s5 }
 0xde9   :  { %p7247_p2 = scmp.ne.s32.totalorder %s7245_s0, %s7246_s28  ;;  %p7250_p4 = scmp.lt.s32.totalorder %s7248_s19, %s7246_s28 }
 0xdeb   :  { %p7251_p5 = por %p7250_p4, %p7249_p3 }
 0xded   :  { %p7252_p6 = pnand %p7251_p5, %p7247_p2 }
 0xdef   :  { %7255 = shalt.err (!%p7252_p6)
}
 0xdf0   :  { %6072 = dma.vmem_to_hbm [thread:$0]  %s6068_s20, 16, %s6070_s15, [#allocation54]   ;;  %v6029_v24 = vadd.f32 %v6028_v51, %v6027_v35 }
 0xdf1   :  { %s7268_s12 = sshra.s32 %s6048_s18, 4  ;;  %s7272_s5 = scalar_lea.hbm %s7625_s8, 1  ;;  %s7269_s12 = int_to_ptr.hbm [resolvable:$true] %s7268_s12 }
 0xdf2   :  { %6030 = vst.msk [vmem:[#allocation52] sm:$0x1] %vm4899_vm9, %v6029_v24  ;;  %s7270_s17 = scalar_lea.hbm %s7269_s12, 1  ;;  %p7273_p8 = scmp.lt.s32.totalorder %s7269_s12, %s7625_s8 }
 0xdf3   :  { %p7271_p7 = scmp.ne.s32.totalorder %s7269_s12, %s7270_s17  ;;  %p7274_p9 = scmp.lt.s32.totalorder %s7272_s5, %s7270_s17 }
 0xdf5   :  { %p7275_p10 = por %p7274_p9, %p7273_p8 }
 0xdf7   :  { %p7276_p11 = pnand %p7275_p10, %p7271_p7 }
 0xdf9   :  { %7279 = shalt.err (!%p7276_p11)
}
 0xdfa   :  { %6050 = dma.vmem_to_hbm [thread:$0]  %s6046_s25, 16, %s6048_s18, [#allocation4]  }
 0xdfb   :  { %7314 = dma.done.wait [#allocation4], 16  }
 0xdfc   :  { %7315 = vsyncadd [#allocation4], 4294967280 }
 0xdfd   :  { %7316 = dma.done.wait [#allocation54], 32  }
 0xdfe   :  { %7317 = vsyncadd [#allocation54], 4294967264 }
 0xdff   :  { %7318 = dma.done.wait [#allocation57], 16  }
 0xe00   :  { %7319 = vsyncadd [#allocation57], 4294967280 }
 0xe01   :  { %6100 = vsyncpa [#allocation3], 1 }
 0xe02   :  { %6101 = vsyncpa [#allocation6], 1 }
 0xe03   :  { %6102 = vsyncpa [#allocation9], 1 }
 0xe04   :  { %6103 = vsyncpa [#allocation12], 1 }
 0xe05   :  { %6104 = vsyncpa [#allocation15], 1 }
 0xe06   :  { %6105 = vsyncpa [#allocation18], 1 }
 0xe07   :  { %6106 = vsyncpa [#allocation21], 1 }
 0xe08   :  { %6107 = vsyncpa [#allocation24], 1 }
 0xe09   :  { %6108 = vsyncpa [#allocation27], 1 }
 0xe0a   :  { %6109 = vsyncpa [#allocation30], 1 }
 0xe0b   :  { %6110 = vsyncpa [#allocation33], 1 }
 0xe0c   :  { %6111 = vsyncpa [#allocation36], 1 }
 0xe0d   :  { %6112 = vsyncpa [#allocation39], 1 }
 0xe0e   :  { %6113 = vsyncpa [#allocation42], 1 }
 0xe0f   :  { %6114 = vsyncpa [#allocation45], 1 }
 0xe10   :  { %6115 = vsyncpa [#allocation48], 1 }
 0xe11   :  { %6116 = vsyncpa [#allocation51], 1 }
 0xe12   :  { %6117 = vsyncpa [#allocation4], 1 }
 0xe13   :  { %6118 = vsyncpa [#allocation54], 1 }
 0xe14   :  { %6119 = vsyncpa [#allocation57], 1 }

</bundles_post_ra>
